<compile_context>
chip_gen: v7x
topology: tpu7x:2x2x1
jax: 0.10.0
libtpu: 0.0.40
codegen_flags: <defaults>
</compile_context>

<pallas_src>
import numpy as np
import jax
import jax.numpy as jnp
from jax.experimental import pallas as pl
from jax.experimental.pallas import tpu as pltpu

# ---- static sizes implied by the module --------------------------------------
K = 9              # Conv1d kernel size
C = 20             # conv channels (and LSTM1 input size)
C_PAD = 24         # C padded to a multiple of 8 sublanes
POOL = 4           # MaxPool1d kernel size
L_IN = 256         # input length
L1 = L_IN - (K - 1)        # 248 after conv1
P1 = L1 // POOL            # 62  after pool1
L2 = P1 - (K - 1)          # 54  after conv2
T = L2 // POOL             # 13  after pool2 (== LSTM sequence length)
H1, H2 = 64, 128           # LSTM hidden sizes
SLAB = 128                 # lane-aligned width of one fused-gate slab

_VMEM = pl.BlockSpec(memory_space=pltpu.MemorySpace.VMEM)


def _sigmoid(x):
    # == 1/(1+exp(-x)); single tanh on the EUP, no divide on the VPU.
    return 0.5 * jnp.tanh(0.5 * x) + 0.5


# ------------------------------ fused kernel ----------------------------------
def _fused_forward_kernel(x_ref, w1_ref, b1_ref, selA_ref, w2f_ref, b2_ref,
                          selBX_ref, m2mask_ref, mw_ref, pc_ref,
                          wih1_ref, bl1_ref, whh1_ref, w2cat_ref, bl2_ref,
                          wf_ref, bf_ref, o_ref):
    f32 = jnp.float32
    bf16 = jnp.bfloat16
    B = x_ref.shape[0]
    CP = C_PAD
    BCP = B * CP
    W1m = L1 - (POOL - 1)            # 245
    Wm2 = B * L2 - (POOL - 1)        # 105
    CT = C * T                       # 260
    R = B * T                        # 26

    # ----------------- Conv1d(1->20, k=9), VPU tap loop -----------------------
    # x broadcast to (B*24, 256) once (channel rows 20..23 per sample are pads
    # that stay exactly 0 because w1b/b1b are zero there).
    xv = x_ref[...]                                                    # (B, 256)
    x_rows = jnp.concatenate(
        [jnp.broadcast_to(xv[b:b + 1, :], (CP, L_IN)) for b in range(B)], axis=0)
    z1 = jnp.zeros((BCP, L1), f32)
    for k in range(K):
        z1 = z1 + x_rows[:, k:k + L1] * w1_ref[k]                      # (48, 248)
    z1 = z1 + b1_ref[...]

    # MaxPool1d(4): sliding max (VPU) + one-hot stride-4 select (MXU), both
    # samples at once; relu commutes past max/select so it is applied after.
    m1 = jnp.maximum(jnp.maximum(z1[:, 0:W1m], z1[:, 1:1 + W1m]),
                     jnp.maximum(z1[:, 2:2 + W1m], z1[:, 3:3 + W1m]))   # (48, 245)
    p1 = jnp.maximum(jnp.dot(m1, selA_ref[...], preferred_element_type=f32), 0.0)  # (48, 62)

    # ----------------- Conv1d(20->20, k=9) as one im2col matmul ---------------
    blocks = []
    for k in range(K):                      # per-tap (24, B*54) blocks, 8-aligned
        blocks.append(jnp.concatenate(
            [p1[b * CP:(b + 1) * CP, k:k + L2] for b in range(B)], axis=1))
    A = jnp.concatenate(blocks, axis=0).astype(bf16)                   # (216, 108)
    z2 = jnp.dot(w2f_ref[...], A, preferred_element_type=f32) + b2_ref[...]  # (20, 108)

    # ----------------- pool2 + torch-view flatten ------------------------------
    m2 = jnp.maximum(jnp.maximum(z2[:, 0:Wm2], z2[:, 1:1 + Wm2]),
                     jnp.maximum(z2[:, 2:2 + Wm2], z2[:, 3:3 + Wm2]))   # (20, 105)
    # expand: [c, b*260+m] = pooled(pre-relu) value of (sample b, chan c, time m%13)
    expand = jnp.dot(m2, selBX_ref[...], preferred_element_type=f32)    # (20, B*260)
    # mask keeps only the channel m//13 per lane, then reduce rows -> flat .view
    flat = jnp.maximum(
        jnp.sum(expand * m2mask_ref[...], axis=0, keepdims=True), 0.0)  # (1, B*260)

    # scramble -> time-major (t, b) sequence rows via one one-hot compaction
    big = jnp.broadcast_to(flat, (R, B * CT)) * mw_ref[...]             # (26, B*260)
    seqtm = jnp.dot(big, pc_ref[...], preferred_element_type=f32)       # (26, 20)

    # batched layer-1 input projection (hoisted out of the recurrence)
    xp = (jnp.dot(seqtm.astype(bf16), wih1_ref[...], preferred_element_type=f32)
          + bl1_ref[...])                                               # (26, 512)

    # --------------------- LSTM(20->64) -> LSTM(64->128) ----------------------
    whh1 = whh1_ref[...]                                                # (128, 512) bf16
    w2cat = w2cat_ref[...]                                              # (256, 512) bf16
    bl2 = bl2_ref[...]                                                  # (1, 512)
    # layer-1 state is kept 128-wide; lanes 64..127 stay exactly 0 through the
    # recurrence (zero-padded weight columns/rows), keeping everything aligned.
    h1 = jnp.zeros((B, SLAB), f32)
    c1 = jnp.zeros((B, SLAB), f32)
    h2 = jnp.zeros((B, H2), f32)
    c2 = jnp.zeros((B, H2), f32)
    for t in range(T):                                                  # static unroll, T=13
        xt = xp[B * t:B * (t + 1), :]                                   # (B, 512) contiguous rows
        # layer 1: one fused-gate matmul; slabs (i, f, o, g)
        g1 = xt + jnp.dot(h1.astype(bf16), whh1, preferred_element_type=f32)
        s1 = _sigmoid(g1[:, :3 * SLAB])
        i1 = s1[:, 0:SLAB]
        f1 = s1[:, SLAB:2 * SLAB]
        o1 = s1[:, 2 * SLAB:3 * SLAB]
        gg1 = jnp.tanh(g1[:, 3 * SLAB:4 * SLAB])
        c1 = f1 * c1 + i1 * gg1
        h1 = o1 * jnp.tanh(c1)
        # layer 2: single matmul on [h1 | h2] against stacked [wih2; whh2]
        hcat = jnp.concatenate([h1, h2], axis=1)                        # (B, 256)
        g2 = (jnp.dot(hcat.astype(bf16), w2cat, preferred_element_type=f32) + bl2)
        s2 = _sigmoid(g2[:, :3 * SLAB])
        i2 = s2[:, 0:SLAB]
        f2 = s2[:, SLAB:2 * SLAB]
        o2 = s2[:, 2 * SLAB:3 * SLAB]
        gg2 = jnp.tanh(g2[:, 3 * SLAB:4 * SLAB])
        c2 = f2 * c2 + i2 * gg2
        h2 = o2 * jnp.tanh(c2)

    # final Linear(128, 1): VPU multiply + lane reduce (no MXU push)
    y = jnp.sum(h2 * wf_ref[...], axis=1, keepdims=True) + bf_ref[...]
    o_ref[...] = y


# --------------------- host-side one-hot selectors / masks ---------------------
def _make_selectors(B):
    CT = C * T
    Wcols = B * CT
    R = B * T
    W1m = L1 - (POOL - 1)
    Wm2 = B * L2 - (POOL - 1)
    selA = np.zeros((W1m, P1), np.float32)
    selA[POOL * np.arange(P1), np.arange(P1)] = 1.0
    selBX = np.zeros((Wm2, Wcols), np.float32)
    m2mask = np.zeros((C, Wcols), np.float32)
    pc = np.zeros((Wcols, C), np.float32)
    mw = np.zeros((R, Wcols), np.float32)
    for col in range(Wcols):
        b, m = divmod(col, CT)
        selBX[b * L2 + POOL * (m % T), col] = 1.0     # pooled window start
        m2mask[m // T, col] = 1.0                     # channel owning flat idx m
        pc[col, m % C] = 1.0                          # lane compaction (mod 20)
    for r in range(R):
        t, b = divmod(r, B)                           # time-major interleaved rows
        mw[r, b * CT + C * t: b * CT + C * (t + 1)] = 1.0
    return selA, selBX, m2mask, mw, pc


def _fuse_gates(per_gate, slab=SLAB):
    """(4, In, H) per-gate (i, f, g, o) -> (In, 4*slab), slab order (i, f, o, g).

    Each gate occupies a 128-lane-aligned slab (zero padded when H < 128)."""
    _, inner, h = per_gate.shape
    out = jnp.zeros((inner, 4 * slab), per_gate.dtype)
    for s, g in enumerate((0, 1, 3, 2)):          # i, f, o, g
        out = out.at[:, s * slab:s * slab + h].set(per_gate[g])
    return out


# ------------------------------ wrapper ---------------------------------------
def forward(x, params):
    (w1, b1, w2, b2, wih1, whh1, bl1, wih2, whh2, bl2, wf, bf) = params
    B = x.shape[0]
    CP = C_PAD
    bf16 = jnp.bfloat16
    x2d = x[:, 0, :]                                                   # (B, 256)

    # one-hot selectors / masks (exact, numpy, built at trace time)
    selA, selBX, m2mask, mw, pc = _make_selectors(B)

    # conv1 weights: channel-pad to 24 rows per sample, replicate per sample
    w1b = jnp.zeros((K, B * CP, 1), jnp.float32)
    b1b = jnp.zeros((B * CP, 1), jnp.float32)
    for b in range(B):
        w1b = w1b.at[:, b * CP:b * CP + C, :].set(w1)
        b1b = b1b.at[b * CP:b * CP + C, :].set(b1)

    # conv2 weights: im2col layout (C_out, K*24), pad rows per tap are zero
    w2f = jnp.zeros((C, K * CP), jnp.float32)
    for k in range(K):
        w2f = w2f.at[:, k * CP:k * CP + C].set(w2[k])
    w2f = w2f.astype(bf16)

    # LSTM fused-gate weights (slab order i, f, o, g)
    wih1f = _fuse_gates(wih1).astype(bf16)                             # (20, 512)
    whh1f = (jnp.zeros((SLAB, 4 * SLAB), jnp.float32)
             .at[:H1, :].set(_fuse_gates(whh1))).astype(bf16)          # (128, 512)
    bl1f = _fuse_gates(bl1)                                            # (1, 512) f32
    w2cat = jnp.zeros((2 * SLAB, 4 * SLAB), jnp.float32)
    w2cat = w2cat.at[:H1, :].set(_fuse_gates(wih2))                    # h1 rows
    w2cat = w2cat.at[SLAB:SLAB + H2, :].set(_fuse_gates(whh2))         # h2 rows
    w2cat = w2cat.astype(bf16)                                         # (256, 512)
    bl2f = _fuse_gates(bl2)                                            # (1, 512) f32
    wfrow = wf.reshape(1, H2)                                          # (1, 128)

    return pl.pallas_call(
        _fused_forward_kernel,
        out_shape=jax.ShapeDtypeStruct((B, 1), jnp.float32),
        in_specs=[_VMEM] * 17,
        out_specs=_VMEM,
    )(x2d, w1b, b1b, selA, w2f, b2, selBX, m2mask, mw, pc,
      wih1f, bl1f, whh1f, w2cat, bl2f, wfrow, bf)


# ------------------------- deterministic parameters ---------------------------
def init_params(key):
    ks = jax.random.split(key, 12)
    s = 0.1
    w1 = s * jax.random.normal(ks[0], (K, C, 1), jnp.float32)        # Conv1d(1,20,9) per-tap
    b1 = s * jax.random.normal(ks[1], (C, 1), jnp.float32)
    w2 = s * jax.random.normal(ks[2], (K, C, C), jnp.float32)        # Conv1d(20,20,9) [k, c_out, c_in]
    b2 = s * jax.random.normal(ks[3], (C, 1), jnp.float32)
    wih1 = s * jax.random.normal(ks[4], (4, C, H1), jnp.float32)     # per-gate (i, f, g, o)
    whh1 = s * jax.random.normal(ks[5], (4, H1, H1), jnp.float32)
    bl1 = s * jax.random.normal(ks[6], (4, 1, H1), jnp.float32)      # b_ih + b_hh combined
    wih2 = s * jax.random.normal(ks[7], (4, H1, H2), jnp.float32)
    whh2 = s * jax.random.normal(ks[8], (4, H2, H2), jnp.float32)
    bl2 = s * jax.random.normal(ks[9], (4, 1, H2), jnp.float32)
    wf = s * jax.random.normal(ks[10], (H2, 1), jnp.float32)         # Linear(128, 1) weight^T
    bf = s * jax.random.normal(ks[11], (1, 1), jnp.float32)
    return (w1, b1, w2, b2, wih1, whh1, bl1, wih2, whh2, bl2, wf, bf)


# --------------------------- plain-JAX reference -------------------------------
def reference_forward(x, params):
    (w1, b1, w2, b2, wih1, whh1, bl1, wih2, whh2, bl2, wf, bf) = params
    B = x.shape[0]
    patches = jnp.stack([x[:, 0, k:k + L1] for k in range(K)], axis=-1)      # (B, L1, K)
    y1 = jax.nn.relu(jnp.einsum('blk,kc->bcl', patches, w1[:, :, 0]) + b1[None])
    p1 = jnp.max(y1.reshape(B, C, P1, POOL), axis=-1)
    patches2 = jnp.stack([p1[:, :, k:k + L2] for k in range(K)], axis=-1)    # (B, C, L2, K)
    y2 = jax.nn.relu(jnp.einsum('bilk,koi->bol', patches2, w2) + b2[None])
    p2 = jnp.max(y2[:, :, :T * POOL].reshape(B, C, T, POOL), axis=-1)
    seq = p2.reshape(-1, T, C)                                    # torch .view(-1, 13, 20)

    h1 = jnp.zeros((B, H1)); c1 = jnp.zeros((B, H1))
    h2 = jnp.zeros((B, H2)); c2 = jnp.zeros((B, H2))
    for t in range(T):
        xt = seq[:, t, :]
        i1 = _sigmoid(xt @ wih1[0] + h1 @ whh1[0] + bl1[0])
        f1 = _sigmoid(xt @ wih1[1] + h1 @ whh1[1] + bl1[1])
        g1 = jnp.tanh(xt @ wih1[2] + h1 @ whh1[2] + bl1[2])
        o1 = _sigmoid(xt @ wih1[3] + h1 @ whh1[3] + bl1[3])
        c1 = f1 * c1 + i1 * g1
        h1 = o1 * jnp.tanh(c1)
        i2 = _sigmoid(h1 @ wih2[0] + h2 @ whh2[0] + bl2[0])
        f2 = _sigmoid(h1 @ wih2[1] + h2 @ whh2[1] + bl2[1])
        g2 = jnp.tanh(h1 @ wih2[2] + h2 @ whh2[2] + bl2[2])
        o2 = _sigmoid(h1 @ wih2[3] + h2 @ whh2[3] + bl2[3])
        c2 = f2 * c2 + i2 * g2
        h2 = o2 * jnp.tanh(c2)
    return h2 @ wf + bf


# ----------------------------------- main --------------------------------------
if __name__ == "__main__":
    key = jax.random.PRNGKey(0)
    kx, kp = jax.random.split(key)
    x = jax.random.normal(kx, (2, 1, L_IN), jnp.float32)   # (batch=2, channels=1, length=256)
    params = init_params(kp)

    y = jax.jit(forward)(x, params)
    y = jax.block_until_ready(y)
    assert y.shape == (2, 1), y.shape

    y_ref = reference_forward(x, params)
    np.testing.assert_allclose(np.asarray(y), np.asarray(y_ref), rtol=2e-2, atol=2e-2)

    print("KERNEL_OK")
</pallas_src>

<mosaic_0001>
module attributes {stable_mosaic.version = 11 : i64} {
  func.func @_fused_forward_kernel(%arg0: memref<2x256xf32, #tpu.memory_space<vmem>>, %arg1: memref<9x48x1xf32, #tpu.memory_space<vmem>>, %arg2: memref<48x1xf32, #tpu.memory_space<vmem>>, %arg3: memref<245x62xf32, #tpu.memory_space<vmem>>, %arg4: memref<20x216xbf16, #tpu.memory_space<vmem>>, %arg5: memref<20x1xf32, #tpu.memory_space<vmem>>, %arg6: memref<105x520xf32, #tpu.memory_space<vmem>>, %arg7: memref<20x520xf32, #tpu.memory_space<vmem>>, %arg8: memref<26x520xf32, #tpu.memory_space<vmem>>, %arg9: memref<520x20xf32, #tpu.memory_space<vmem>>, %arg10: memref<20x512xbf16, #tpu.memory_space<vmem>>, %arg11: memref<1x512xf32, #tpu.memory_space<vmem>>, %arg12: memref<128x512xbf16, #tpu.memory_space<vmem>>, %arg13: memref<256x512xbf16, #tpu.memory_space<vmem>>, %arg14: memref<1x512xf32, #tpu.memory_space<vmem>>, %arg15: memref<1x128xf32, #tpu.memory_space<vmem>>, %arg16: memref<1x1xf32, #tpu.memory_space<vmem>>, %arg17: memref<2x1xf32, #tpu.memory_space<vmem>>) attributes {dimension_semantics = [], scalar_prefetch = 0 : i64, scratch_operands = 0 : i64, tpu.core_type = #tpu.core_type<tc>} {
    %c0 = arith.constant 0 : index
    %c0_0 = arith.constant 0 : index
    %0 = vector.load %arg0[%c0, %c0_0] : memref<2x256xf32, #tpu.memory_space<vmem>>, vector<2x256xf32>
    %1 = vector.extract_strided_slice %0 {offsets = [0, 0], sizes = [1, 256], strides = [1, 1]} : vector<2x256xf32> to vector<1x256xf32>
    %2 = vector.shape_cast %1 : vector<1x256xf32> to vector<1x256xf32>
    %3 = vector.broadcast %2 : vector<1x256xf32> to vector<24x256xf32>
    %4 = vector.extract_strided_slice %0 {offsets = [1, 0], sizes = [1, 256], strides = [1, 1]} : vector<2x256xf32> to vector<1x256xf32>
    %5 = vector.shape_cast %4 : vector<1x256xf32> to vector<1x256xf32>
    %6 = vector.broadcast %5 : vector<1x256xf32> to vector<24x256xf32>
    %7 = tpu.concatenate %3, %6 in 0 : vector<24x256xf32>, vector<24x256xf32> -> vector<48x256xf32>
    %cst = arith.constant 0.000000e+00 : f32
    %8 = vector.broadcast %cst : f32 to vector<48x248xf32>
    %9 = vector.extract_strided_slice %7 {offsets = [0, 0], sizes = [48, 248], strides = [1, 1]} : vector<48x256xf32> to vector<48x248xf32>
    %c0_1 = arith.constant 0 : index
    %c0_2 = arith.constant 0 : index
    %c0_3 = arith.constant 0 : index
    %10 = vector.load %arg1[%c0_1, %c0_2, %c0_3] : memref<9x48x1xf32, #tpu.memory_space<vmem>>, vector<1x48x1xf32>
    %11 = vector.shape_cast %10 : vector<1x48x1xf32> to vector<48x1xf32>
    %12 = vector.broadcast %11 : vector<48x1xf32> to vector<48x248xf32>
    %13 = arith.mulf %9, %12 : vector<48x248xf32>
    %14 = arith.addf %8, %13 : vector<48x248xf32>
    %15 = vector.extract_strided_slice %7 {offsets = [0, 1], sizes = [48, 248], strides = [1, 1]} : vector<48x256xf32> to vector<48x248xf32>
    %c1 = arith.constant 1 : index
    %c0_4 = arith.constant 0 : index
    %c0_5 = arith.constant 0 : index
    %16 = vector.load %arg1[%c1, %c0_4, %c0_5] : memref<9x48x1xf32, #tpu.memory_space<vmem>>, vector<1x48x1xf32>
    %17 = vector.shape_cast %16 : vector<1x48x1xf32> to vector<48x1xf32>
    %18 = vector.broadcast %17 : vector<48x1xf32> to vector<48x248xf32>
    %19 = arith.mulf %15, %18 : vector<48x248xf32>
    %20 = arith.addf %14, %19 : vector<48x248xf32>
    %21 = vector.extract_strided_slice %7 {offsets = [0, 2], sizes = [48, 248], strides = [1, 1]} : vector<48x256xf32> to vector<48x248xf32>
    %c2 = arith.constant 2 : index
    %c0_6 = arith.constant 0 : index
    %c0_7 = arith.constant 0 : index
    %22 = vector.load %arg1[%c2, %c0_6, %c0_7] : memref<9x48x1xf32, #tpu.memory_space<vmem>>, vector<1x48x1xf32>
    %23 = vector.shape_cast %22 : vector<1x48x1xf32> to vector<48x1xf32>
    %24 = vector.broadcast %23 : vector<48x1xf32> to vector<48x248xf32>
    %25 = arith.mulf %21, %24 : vector<48x248xf32>
    %26 = arith.addf %20, %25 : vector<48x248xf32>
    %27 = vector.extract_strided_slice %7 {offsets = [0, 3], sizes = [48, 248], strides = [1, 1]} : vector<48x256xf32> to vector<48x248xf32>
    %c3 = arith.constant 3 : index
    %c0_8 = arith.constant 0 : index
    %c0_9 = arith.constant 0 : index
    %28 = vector.load %arg1[%c3, %c0_8, %c0_9] : memref<9x48x1xf32, #tpu.memory_space<vmem>>, vector<1x48x1xf32>
    %29 = vector.shape_cast %28 : vector<1x48x1xf32> to vector<48x1xf32>
    %30 = vector.broadcast %29 : vector<48x1xf32> to vector<48x248xf32>
    %31 = arith.mulf %27, %30 : vector<48x248xf32>
    %32 = arith.addf %26, %31 : vector<48x248xf32>
    %33 = vector.extract_strided_slice %7 {offsets = [0, 4], sizes = [48, 248], strides = [1, 1]} : vector<48x256xf32> to vector<48x248xf32>
    %c4 = arith.constant 4 : index
    %c0_10 = arith.constant 0 : index
    %c0_11 = arith.constant 0 : index
    %34 = vector.load %arg1[%c4, %c0_10, %c0_11] : memref<9x48x1xf32, #tpu.memory_space<vmem>>, vector<1x48x1xf32>
    %35 = vector.shape_cast %34 : vector<1x48x1xf32> to vector<48x1xf32>
    %36 = vector.broadcast %35 : vector<48x1xf32> to vector<48x248xf32>
    %37 = arith.mulf %33, %36 : vector<48x248xf32>
    %38 = arith.addf %32, %37 : vector<48x248xf32>
    %39 = vector.extract_strided_slice %7 {offsets = [0, 5], sizes = [48, 248], strides = [1, 1]} : vector<48x256xf32> to vector<48x248xf32>
    %c5 = arith.constant 5 : index
    %c0_12 = arith.constant 0 : index
    %c0_13 = arith.constant 0 : index
    %40 = vector.load %arg1[%c5, %c0_12, %c0_13] : memref<9x48x1xf32, #tpu.memory_space<vmem>>, vector<1x48x1xf32>
    %41 = vector.shape_cast %40 : vector<1x48x1xf32> to vector<48x1xf32>
    %42 = vector.broadcast %41 : vector<48x1xf32> to vector<48x248xf32>
    %43 = arith.mulf %39, %42 : vector<48x248xf32>
    %44 = arith.addf %38, %43 : vector<48x248xf32>
    %45 = vector.extract_strided_slice %7 {offsets = [0, 6], sizes = [48, 248], strides = [1, 1]} : vector<48x256xf32> to vector<48x248xf32>
    %c6 = arith.constant 6 : index
    %c0_14 = arith.constant 0 : index
    %c0_15 = arith.constant 0 : index
    %46 = vector.load %arg1[%c6, %c0_14, %c0_15] : memref<9x48x1xf32, #tpu.memory_space<vmem>>, vector<1x48x1xf32>
    %47 = vector.shape_cast %46 : vector<1x48x1xf32> to vector<48x1xf32>
    %48 = vector.broadcast %47 : vector<48x1xf32> to vector<48x248xf32>
    %49 = arith.mulf %45, %48 : vector<48x248xf32>
    %50 = arith.addf %44, %49 : vector<48x248xf32>
    %51 = vector.extract_strided_slice %7 {offsets = [0, 7], sizes = [48, 248], strides = [1, 1]} : vector<48x256xf32> to vector<48x248xf32>
    %c7 = arith.constant 7 : index
    %c0_16 = arith.constant 0 : index
    %c0_17 = arith.constant 0 : index
    %52 = vector.load %arg1[%c7, %c0_16, %c0_17] : memref<9x48x1xf32, #tpu.memory_space<vmem>>, vector<1x48x1xf32>
    %53 = vector.shape_cast %52 : vector<1x48x1xf32> to vector<48x1xf32>
    %54 = vector.broadcast %53 : vector<48x1xf32> to vector<48x248xf32>
    %55 = arith.mulf %51, %54 : vector<48x248xf32>
    %56 = arith.addf %50, %55 : vector<48x248xf32>
    %57 = vector.extract_strided_slice %7 {offsets = [0, 8], sizes = [48, 248], strides = [1, 1]} : vector<48x256xf32> to vector<48x248xf32>
    %c8 = arith.constant 8 : index
    %c0_18 = arith.constant 0 : index
    %c0_19 = arith.constant 0 : index
    %58 = vector.load %arg1[%c8, %c0_18, %c0_19] : memref<9x48x1xf32, #tpu.memory_space<vmem>>, vector<1x48x1xf32>
    %59 = vector.shape_cast %58 : vector<1x48x1xf32> to vector<48x1xf32>
    %60 = vector.broadcast %59 : vector<48x1xf32> to vector<48x248xf32>
    %61 = arith.mulf %57, %60 : vector<48x248xf32>
    %62 = arith.addf %56, %61 : vector<48x248xf32>
    %c0_20 = arith.constant 0 : index
    %c0_21 = arith.constant 0 : index
    %63 = vector.load %arg2[%c0_20, %c0_21] : memref<48x1xf32, #tpu.memory_space<vmem>>, vector<48x1xf32>
    %64 = vector.broadcast %63 : vector<48x1xf32> to vector<48x248xf32>
    %65 = arith.addf %62, %64 : vector<48x248xf32>
    %66 = vector.extract_strided_slice %65 {offsets = [0, 0], sizes = [48, 245], strides = [1, 1]} : vector<48x248xf32> to vector<48x245xf32>
    %67 = vector.extract_strided_slice %65 {offsets = [0, 1], sizes = [48, 245], strides = [1, 1]} : vector<48x248xf32> to vector<48x245xf32>
    %68 = arith.maximumf %66, %67 : vector<48x245xf32>
    %69 = vector.extract_strided_slice %65 {offsets = [0, 2], sizes = [48, 245], strides = [1, 1]} : vector<48x248xf32> to vector<48x245xf32>
    %70 = vector.extract_strided_slice %65 {offsets = [0, 3], sizes = [48, 245], strides = [1, 1]} : vector<48x248xf32> to vector<48x245xf32>
    %71 = arith.maximumf %69, %70 : vector<48x245xf32>
    %72 = arith.maximumf %68, %71 : vector<48x245xf32>
    %c0_22 = arith.constant 0 : index
    %c0_23 = arith.constant 0 : index
    %73 = vector.load %arg3[%c0_22, %c0_23] : memref<245x62xf32, #tpu.memory_space<vmem>>, vector<245x62xf32>
    %cst_24 = arith.constant dense<0.000000e+00> : vector<48x62xf32>
    %74 = tpu.matmul %72, %73, %cst_24 {dimension_numbers = #tpu.dot_dimension_numbers<[1], [0], [0], [1], [0, 0, 1, 1], [], []>} : vector<48x245xf32>, vector<245x62xf32>, vector<48x62xf32> -> vector<48x62xf32>
    %cst_25 = arith.constant 0.000000e+00 : f32
    %75 = vector.broadcast %cst_25 : f32 to vector<48x62xf32>
    %76 = arith.maximumf %74, %75 : vector<48x62xf32>
    %77 = vector.extract_strided_slice %76 {offsets = [0, 0], sizes = [24, 54], strides = [1, 1]} : vector<48x62xf32> to vector<24x54xf32>
    %78 = vector.extract_strided_slice %76 {offsets = [24, 0], sizes = [24, 54], strides = [1, 1]} : vector<48x62xf32> to vector<24x54xf32>
    %79 = tpu.concatenate %77, %78 in 1 : vector<24x54xf32>, vector<24x54xf32> -> vector<24x108xf32>
    %80 = vector.extract_strided_slice %76 {offsets = [0, 1], sizes = [24, 54], strides = [1, 1]} : vector<48x62xf32> to vector<24x54xf32>
    %81 = vector.extract_strided_slice %76 {offsets = [24, 1], sizes = [24, 54], strides = [1, 1]} : vector<48x62xf32> to vector<24x54xf32>
    %82 = tpu.concatenate %80, %81 in 1 : vector<24x54xf32>, vector<24x54xf32> -> vector<24x108xf32>
    %83 = vector.extract_strided_slice %76 {offsets = [0, 2], sizes = [24, 54], strides = [1, 1]} : vector<48x62xf32> to vector<24x54xf32>
    %84 = vector.extract_strided_slice %76 {offsets = [24, 2], sizes = [24, 54], strides = [1, 1]} : vector<48x62xf32> to vector<24x54xf32>
    %85 = tpu.concatenate %83, %84 in 1 : vector<24x54xf32>, vector<24x54xf32> -> vector<24x108xf32>
    %86 = vector.extract_strided_slice %76 {offsets = [0, 3], sizes = [24, 54], strides = [1, 1]} : vector<48x62xf32> to vector<24x54xf32>
    %87 = vector.extract_strided_slice %76 {offsets = [24, 3], sizes = [24, 54], strides = [1, 1]} : vector<48x62xf32> to vector<24x54xf32>
    %88 = tpu.concatenate %86, %87 in 1 : vector<24x54xf32>, vector<24x54xf32> -> vector<24x108xf32>
    %89 = vector.extract_strided_slice %76 {offsets = [0, 4], sizes = [24, 54], strides = [1, 1]} : vector<48x62xf32> to vector<24x54xf32>
    %90 = vector.extract_strided_slice %76 {offsets = [24, 4], sizes = [24, 54], strides = [1, 1]} : vector<48x62xf32> to vector<24x54xf32>
    %91 = tpu.concatenate %89, %90 in 1 : vector<24x54xf32>, vector<24x54xf32> -> vector<24x108xf32>
    %92 = vector.extract_strided_slice %76 {offsets = [0, 5], sizes = [24, 54], strides = [1, 1]} : vector<48x62xf32> to vector<24x54xf32>
    %93 = vector.extract_strided_slice %76 {offsets = [24, 5], sizes = [24, 54], strides = [1, 1]} : vector<48x62xf32> to vector<24x54xf32>
    %94 = tpu.concatenate %92, %93 in 1 : vector<24x54xf32>, vector<24x54xf32> -> vector<24x108xf32>
    %95 = vector.extract_strided_slice %76 {offsets = [0, 6], sizes = [24, 54], strides = [1, 1]} : vector<48x62xf32> to vector<24x54xf32>
    %96 = vector.extract_strided_slice %76 {offsets = [24, 6], sizes = [24, 54], strides = [1, 1]} : vector<48x62xf32> to vector<24x54xf32>
    %97 = tpu.concatenate %95, %96 in 1 : vector<24x54xf32>, vector<24x54xf32> -> vector<24x108xf32>
    %98 = vector.extract_strided_slice %76 {offsets = [0, 7], sizes = [24, 54], strides = [1, 1]} : vector<48x62xf32> to vector<24x54xf32>
    %99 = vector.extract_strided_slice %76 {offsets = [24, 7], sizes = [24, 54], strides = [1, 1]} : vector<48x62xf32> to vector<24x54xf32>
    %100 = tpu.concatenate %98, %99 in 1 : vector<24x54xf32>, vector<24x54xf32> -> vector<24x108xf32>
    %101 = vector.extract_strided_slice %76 {offsets = [0, 8], sizes = [24, 54], strides = [1, 1]} : vector<48x62xf32> to vector<24x54xf32>
    %102 = vector.extract_strided_slice %76 {offsets = [24, 8], sizes = [24, 54], strides = [1, 1]} : vector<48x62xf32> to vector<24x54xf32>
    %103 = tpu.concatenate %101, %102 in 1 : vector<24x54xf32>, vector<24x54xf32> -> vector<24x108xf32>
    %104 = tpu.concatenate %79, %82, %85, %88, %91, %94, %97, %100, %103 in 0 : vector<24x108xf32>, vector<24x108xf32>, vector<24x108xf32>, vector<24x108xf32>, vector<24x108xf32>, vector<24x108xf32>, vector<24x108xf32>, vector<24x108xf32>, vector<24x108xf32> -> vector<216x108xf32>
    %105 = arith.truncf %104 : vector<216x108xf32> to vector<216x108xbf16>
    %c0_26 = arith.constant 0 : index
    %c0_27 = arith.constant 0 : index
    %106 = vector.load %arg4[%c0_26, %c0_27] : memref<20x216xbf16, #tpu.memory_space<vmem>>, vector<20x216xbf16>
    %cst_28 = arith.constant dense<0.000000e+00> : vector<20x108xf32>
    %107 = tpu.matmul %106, %105, %cst_28 {dimension_numbers = #tpu.dot_dimension_numbers<[1], [0], [0], [1], [0, 0, 1, 1], [], []>} : vector<20x216xbf16>, vector<216x108xbf16>, vector<20x108xf32> -> vector<20x108xf32>
    %c0_29 = arith.constant 0 : index
    %c0_30 = arith.constant 0 : index
    %108 = vector.load %arg5[%c0_29, %c0_30] : memref<20x1xf32, #tpu.memory_space<vmem>>, vector<20x1xf32>
    %109 = vector.broadcast %108 : vector<20x1xf32> to vector<20x108xf32>
    %110 = arith.addf %107, %109 : vector<20x108xf32>
    %111 = vector.extract_strided_slice %110 {offsets = [0, 0], sizes = [20, 105], strides = [1, 1]} : vector<20x108xf32> to vector<20x105xf32>
    %112 = vector.extract_strided_slice %110 {offsets = [0, 1], sizes = [20, 105], strides = [1, 1]} : vector<20x108xf32> to vector<20x105xf32>
    %113 = arith.maximumf %111, %112 : vector<20x105xf32>
    %114 = vector.extract_strided_slice %110 {offsets = [0, 2], sizes = [20, 105], strides = [1, 1]} : vector<20x108xf32> to vector<20x105xf32>
    %115 = vector.extract_strided_slice %110 {offsets = [0, 3], sizes = [20, 105], strides = [1, 1]} : vector<20x108xf32> to vector<20x105xf32>
    %116 = arith.maximumf %114, %115 : vector<20x105xf32>
    %117 = arith.maximumf %113, %116 : vector<20x105xf32>
    %c0_31 = arith.constant 0 : index
    %c0_32 = arith.constant 0 : index
    %118 = vector.load %arg6[%c0_31, %c0_32] : memref<105x520xf32, #tpu.memory_space<vmem>>, vector<105x520xf32>
    %cst_33 = arith.constant dense<0.000000e+00> : vector<20x520xf32>
    %119 = tpu.matmul %117, %118, %cst_33 {dimension_numbers = #tpu.dot_dimension_numbers<[1], [0], [0], [1], [0, 0, 1, 1], [], []>} : vector<20x105xf32>, vector<105x520xf32>, vector<20x520xf32> -> vector<20x520xf32>
    %c0_34 = arith.constant 0 : index
    %c0_35 = arith.constant 0 : index
    %120 = vector.load %arg7[%c0_34, %c0_35] : memref<20x520xf32, #tpu.memory_space<vmem>>, vector<20x520xf32>
    %121 = arith.mulf %119, %120 : vector<20x520xf32>
    %cst_36 = arith.constant dense<0.000000e+00> : vector<520xf32>
    %122 = vector.multi_reduction <add>, %121, %cst_36 [0] : vector<20x520xf32> to vector<520xf32>
    %123 = vector.shape_cast %122 : vector<520xf32> to vector<1x520xf32>
    %cst_37 = arith.constant 0.000000e+00 : f32
    %124 = vector.broadcast %cst_37 : f32 to vector<1x520xf32>
    %125 = arith.maximumf %123, %124 : vector<1x520xf32>
    %126 = vector.shape_cast %125 : vector<1x520xf32> to vector<1x520xf32>
    %127 = vector.broadcast %126 : vector<1x520xf32> to vector<26x520xf32>
    %c0_38 = arith.constant 0 : index
    %c0_39 = arith.constant 0 : index
    %128 = vector.load %arg8[%c0_38, %c0_39] : memref<26x520xf32, #tpu.memory_space<vmem>>, vector<26x520xf32>
    %129 = arith.mulf %127, %128 : vector<26x520xf32>
    %c0_40 = arith.constant 0 : index
    %c0_41 = arith.constant 0 : index
    %130 = vector.load %arg9[%c0_40, %c0_41] : memref<520x20xf32, #tpu.memory_space<vmem>>, vector<520x20xf32>
    %cst_42 = arith.constant dense<0.000000e+00> : vector<26x20xf32>
    %131 = tpu.matmul %129, %130, %cst_42 {dimension_numbers = #tpu.dot_dimension_numbers<[1], [0], [0], [1], [0, 0, 1, 1], [], []>} : vector<26x520xf32>, vector<520x20xf32>, vector<26x20xf32> -> vector<26x20xf32>
    %132 = arith.truncf %131 : vector<26x20xf32> to vector<26x20xbf16>
    %c0_43 = arith.constant 0 : index
    %c0_44 = arith.constant 0 : index
    %133 = vector.load %arg10[%c0_43, %c0_44] : memref<20x512xbf16, #tpu.memory_space<vmem>>, vector<20x512xbf16>
    %cst_45 = arith.constant dense<0.000000e+00> : vector<26x512xf32>
    %134 = tpu.matmul %132, %133, %cst_45 {dimension_numbers = #tpu.dot_dimension_numbers<[1], [0], [0], [1], [0, 0, 1, 1], [], []>} : vector<26x20xbf16>, vector<20x512xbf16>, vector<26x512xf32> -> vector<26x512xf32>
    %c0_46 = arith.constant 0 : index
    %c0_47 = arith.constant 0 : index
    %135 = vector.load %arg11[%c0_46, %c0_47] : memref<1x512xf32, #tpu.memory_space<vmem>>, vector<1x512xf32>
    %136 = vector.broadcast %135 : vector<1x512xf32> to vector<26x512xf32>
    %137 = arith.addf %134, %136 : vector<26x512xf32>
    %c0_48 = arith.constant 0 : index
    %c0_49 = arith.constant 0 : index
    %138 = vector.load %arg12[%c0_48, %c0_49] : memref<128x512xbf16, #tpu.memory_space<vmem>>, vector<128x512xbf16>
    %c0_50 = arith.constant 0 : index
    %c0_51 = arith.constant 0 : index
    %139 = vector.load %arg13[%c0_50, %c0_51] : memref<256x512xbf16, #tpu.memory_space<vmem>>, vector<256x512xbf16>
    %c0_52 = arith.constant 0 : index
    %c0_53 = arith.constant 0 : index
    %140 = vector.load %arg14[%c0_52, %c0_53] : memref<1x512xf32, #tpu.memory_space<vmem>>, vector<1x512xf32>
    %cst_54 = arith.constant 0.000000e+00 : f32
    %141 = vector.broadcast %cst_54 : f32 to vector<2x128xf32>
    %cst_55 = arith.constant 0.000000e+00 : f32
    %142 = vector.broadcast %cst_55 : f32 to vector<2x128xf32>
    %cst_56 = arith.constant 0.000000e+00 : f32
    %143 = vector.broadcast %cst_56 : f32 to vector<2x128xf32>
    %cst_57 = arith.constant 0.000000e+00 : f32
    %144 = vector.broadcast %cst_57 : f32 to vector<2x128xf32>
    %145 = vector.extract_strided_slice %137 {offsets = [0, 0], sizes = [2, 512], strides = [1, 1]} : vector<26x512xf32> to vector<2x512xf32>
    %146 = arith.truncf %141 : vector<2x128xf32> to vector<2x128xbf16>
    %cst_58 = arith.constant dense<0.000000e+00> : vector<2x512xf32>
    %147 = tpu.matmul %146, %138, %cst_58 {dimension_numbers = #tpu.dot_dimension_numbers<[1], [0], [0], [1], [0, 0, 1, 1], [], []>} : vector<2x128xbf16>, vector<128x512xbf16>, vector<2x512xf32> -> vector<2x512xf32>
    %148 = arith.addf %145, %147 : vector<2x512xf32>
    %149 = vector.extract_strided_slice %148 {offsets = [0, 0], sizes = [2, 384], strides = [1, 1]} : vector<2x512xf32> to vector<2x384xf32>
    %cst_59 = arith.constant 5.000000e-01 : f32
    %150 = vector.broadcast %cst_59 : f32 to vector<2x384xf32>
    %151 = arith.mulf %150, %149 : vector<2x384xf32>
    %152 = math.tanh %151 : vector<2x384xf32>
    %cst_60 = arith.constant 5.000000e-01 : f32
    %153 = vector.broadcast %cst_60 : f32 to vector<2x384xf32>
    %154 = arith.mulf %153, %152 : vector<2x384xf32>
    %cst_61 = arith.constant 5.000000e-01 : f32
    %155 = vector.broadcast %cst_61 : f32 to vector<2x384xf32>
    %156 = arith.addf %154, %155 : vector<2x384xf32>
    %157 = vector.extract_strided_slice %156 {offsets = [0, 0], sizes = [2, 128], strides = [1, 1]} : vector<2x384xf32> to vector<2x128xf32>
    %158 = vector.extract_strided_slice %156 {offsets = [0, 128], sizes = [2, 128], strides = [1, 1]} : vector<2x384xf32> to vector<2x128xf32>
    %159 = vector.extract_strided_slice %156 {offsets = [0, 256], sizes = [2, 128], strides = [1, 1]} : vector<2x384xf32> to vector<2x128xf32>
    %160 = vector.extract_strided_slice %148 {offsets = [0, 384], sizes = [2, 128], strides = [1, 1]} : vector<2x512xf32> to vector<2x128xf32>
    %161 = math.tanh %160 : vector<2x128xf32>
    %162 = arith.mulf %158, %142 : vector<2x128xf32>
    %163 = arith.mulf %157, %161 : vector<2x128xf32>
    %164 = arith.addf %162, %163 : vector<2x128xf32>
    %165 = math.tanh %164 : vector<2x128xf32>
    %166 = arith.mulf %159, %165 : vector<2x128xf32>
    %167 = tpu.concatenate %166, %143 in 1 : vector<2x128xf32>, vector<2x128xf32> -> vector<2x256xf32>
    %168 = arith.truncf %167 : vector<2x256xf32> to vector<2x256xbf16>
    %cst_62 = arith.constant dense<0.000000e+00> : vector<2x512xf32>
    %169 = tpu.matmul %168, %139, %cst_62 {dimension_numbers = #tpu.dot_dimension_numbers<[1], [0], [0], [1], [0, 0, 1, 1], [], []>} : vector<2x256xbf16>, vector<256x512xbf16>, vector<2x512xf32> -> vector<2x512xf32>
    %170 = vector.broadcast %140 : vector<1x512xf32> to vector<2x512xf32>
    %171 = arith.addf %169, %170 : vector<2x512xf32>
    %172 = vector.extract_strided_slice %171 {offsets = [0, 0], sizes = [2, 384], strides = [1, 1]} : vector<2x512xf32> to vector<2x384xf32>
    %cst_63 = arith.constant 5.000000e-01 : f32
    %173 = vector.broadcast %cst_63 : f32 to vector<2x384xf32>
    %174 = arith.mulf %173, %172 : vector<2x384xf32>
    %175 = math.tanh %174 : vector<2x384xf32>
    %cst_64 = arith.constant 5.000000e-01 : f32
    %176 = vector.broadcast %cst_64 : f32 to vector<2x384xf32>
    %177 = arith.mulf %176, %175 : vector<2x384xf32>
    %cst_65 = arith.constant 5.000000e-01 : f32
    %178 = vector.broadcast %cst_65 : f32 to vector<2x384xf32>
    %179 = arith.addf %177, %178 : vector<2x384xf32>
    %180 = vector.extract_strided_slice %179 {offsets = [0, 0], sizes = [2, 128], strides = [1, 1]} : vector<2x384xf32> to vector<2x128xf32>
    %181 = vector.extract_strided_slice %179 {offsets = [0, 128], sizes = [2, 128], strides = [1, 1]} : vector<2x384xf32> to vector<2x128xf32>
    %182 = vector.extract_strided_slice %179 {offsets = [0, 256], sizes = [2, 128], strides = [1, 1]} : vector<2x384xf32> to vector<2x128xf32>
    %183 = vector.extract_strided_slice %171 {offsets = [0, 384], sizes = [2, 128], strides = [1, 1]} : vector<2x512xf32> to vector<2x128xf32>
    %184 = math.tanh %183 : vector<2x128xf32>
    %185 = arith.mulf %181, %144 : vector<2x128xf32>
    %186 = arith.mulf %180, %184 : vector<2x128xf32>
    %187 = arith.addf %185, %186 : vector<2x128xf32>
    %188 = math.tanh %187 : vector<2x128xf32>
    %189 = arith.mulf %182, %188 : vector<2x128xf32>
    %190 = vector.extract_strided_slice %137 {offsets = [2, 0], sizes = [2, 512], strides = [1, 1]} : vector<26x512xf32> to vector<2x512xf32>
    %191 = arith.truncf %166 : vector<2x128xf32> to vector<2x128xbf16>
    %cst_66 = arith.constant dense<0.000000e+00> : vector<2x512xf32>
    %192 = tpu.matmul %191, %138, %cst_66 {dimension_numbers = #tpu.dot_dimension_numbers<[1], [0], [0], [1], [0, 0, 1, 1], [], []>} : vector<2x128xbf16>, vector<128x512xbf16>, vector<2x512xf32> -> vector<2x512xf32>
    %193 = arith.addf %190, %192 : vector<2x512xf32>
    %194 = vector.extract_strided_slice %193 {offsets = [0, 0], sizes = [2, 384], strides = [1, 1]} : vector<2x512xf32> to vector<2x384xf32>
    %cst_67 = arith.constant 5.000000e-01 : f32
    %195 = vector.broadcast %cst_67 : f32 to vector<2x384xf32>
    %196 = arith.mulf %195, %194 : vector<2x384xf32>
    %197 = math.tanh %196 : vector<2x384xf32>
    %cst_68 = arith.constant 5.000000e-01 : f32
    %198 = vector.broadcast %cst_68 : f32 to vector<2x384xf32>
    %199 = arith.mulf %198, %197 : vector<2x384xf32>
    %cst_69 = arith.constant 5.000000e-01 : f32
    %200 = vector.broadcast %cst_69 : f32 to vector<2x384xf32>
    %201 = arith.addf %199, %200 : vector<2x384xf32>
    %202 = vector.extract_strided_slice %201 {offsets = [0, 0], sizes = [2, 128], strides = [1, 1]} : vector<2x384xf32> to vector<2x128xf32>
    %203 = vector.extract_strided_slice %201 {offsets = [0, 128], sizes = [2, 128], strides = [1, 1]} : vector<2x384xf32> to vector<2x128xf32>
    %204 = vector.extract_strided_slice %201 {offsets = [0, 256], sizes = [2, 128], strides = [1, 1]} : vector<2x384xf32> to vector<2x128xf32>
    %205 = vector.extract_strided_slice %193 {offsets = [0, 384], sizes = [2, 128], strides = [1, 1]} : vector<2x512xf32> to vector<2x128xf32>
    %206 = math.tanh %205 : vector<2x128xf32>
    %207 = arith.mulf %203, %164 : vector<2x128xf32>
    %208 = arith.mulf %202, %206 : vector<2x128xf32>
    %209 = arith.addf %207, %208 : vector<2x128xf32>
    %210 = math.tanh %209 : vector<2x128xf32>
    %211 = arith.mulf %204, %210 : vector<2x128xf32>
    %212 = tpu.concatenate %211, %189 in 1 : vector<2x128xf32>, vector<2x128xf32> -> vector<2x256xf32>
    %213 = arith.truncf %212 : vector<2x256xf32> to vector<2x256xbf16>
    %cst_70 = arith.constant dense<0.000000e+00> : vector<2x512xf32>
    %214 = tpu.matmul %213, %139, %cst_70 {dimension_numbers = #tpu.dot_dimension_numbers<[1], [0], [0], [1], [0, 0, 1, 1], [], []>} : vector<2x256xbf16>, vector<256x512xbf16>, vector<2x512xf32> -> vector<2x512xf32>
    %215 = vector.broadcast %140 : vector<1x512xf32> to vector<2x512xf32>
    %216 = arith.addf %214, %215 : vector<2x512xf32>
    %217 = vector.extract_strided_slice %216 {offsets = [0, 0], sizes = [2, 384], strides = [1, 1]} : vector<2x512xf32> to vector<2x384xf32>
    %cst_71 = arith.constant 5.000000e-01 : f32
    %218 = vector.broadcast %cst_71 : f32 to vector<2x384xf32>
    %219 = arith.mulf %218, %217 : vector<2x384xf32>
    %220 = math.tanh %219 : vector<2x384xf32>
    %cst_72 = arith.constant 5.000000e-01 : f32
    %221 = vector.broadcast %cst_72 : f32 to vector<2x384xf32>
    %222 = arith.mulf %221, %220 : vector<2x384xf32>
    %cst_73 = arith.constant 5.000000e-01 : f32
    %223 = vector.broadcast %cst_73 : f32 to vector<2x384xf32>
    %224 = arith.addf %222, %223 : vector<2x384xf32>
    %225 = vector.extract_strided_slice %224 {offsets = [0, 0], sizes = [2, 128], strides = [1, 1]} : vector<2x384xf32> to vector<2x128xf32>
    %226 = vector.extract_strided_slice %224 {offsets = [0, 128], sizes = [2, 128], strides = [1, 1]} : vector<2x384xf32> to vector<2x128xf32>
    %227 = vector.extract_strided_slice %224 {offsets = [0, 256], sizes = [2, 128], strides = [1, 1]} : vector<2x384xf32> to vector<2x128xf32>
    %228 = vector.extract_strided_slice %216 {offsets = [0, 384], sizes = [2, 128], strides = [1, 1]} : vector<2x512xf32> to vector<2x128xf32>
    %229 = math.tanh %228 : vector<2x128xf32>
    %230 = arith.mulf %226, %187 : vector<2x128xf32>
    %231 = arith.mulf %225, %229 : vector<2x128xf32>
    %232 = arith.addf %230, %231 : vector<2x128xf32>
    %233 = math.tanh %232 : vector<2x128xf32>
    %234 = arith.mulf %227, %233 : vector<2x128xf32>
    %235 = vector.extract_strided_slice %137 {offsets = [4, 0], sizes = [2, 512], strides = [1, 1]} : vector<26x512xf32> to vector<2x512xf32>
    %236 = arith.truncf %211 : vector<2x128xf32> to vector<2x128xbf16>
    %cst_74 = arith.constant dense<0.000000e+00> : vector<2x512xf32>
    %237 = tpu.matmul %236, %138, %cst_74 {dimension_numbers = #tpu.dot_dimension_numbers<[1], [0], [0], [1], [0, 0, 1, 1], [], []>} : vector<2x128xbf16>, vector<128x512xbf16>, vector<2x512xf32> -> vector<2x512xf32>
    %238 = arith.addf %235, %237 : vector<2x512xf32>
    %239 = vector.extract_strided_slice %238 {offsets = [0, 0], sizes = [2, 384], strides = [1, 1]} : vector<2x512xf32> to vector<2x384xf32>
    %cst_75 = arith.constant 5.000000e-01 : f32
    %240 = vector.broadcast %cst_75 : f32 to vector<2x384xf32>
    %241 = arith.mulf %240, %239 : vector<2x384xf32>
    %242 = math.tanh %241 : vector<2x384xf32>
    %cst_76 = arith.constant 5.000000e-01 : f32
    %243 = vector.broadcast %cst_76 : f32 to vector<2x384xf32>
    %244 = arith.mulf %243, %242 : vector<2x384xf32>
    %cst_77 = arith.constant 5.000000e-01 : f32
    %245 = vector.broadcast %cst_77 : f32 to vector<2x384xf32>
    %246 = arith.addf %244, %245 : vector<2x384xf32>
    %247 = vector.extract_strided_slice %246 {offsets = [0, 0], sizes = [2, 128], strides = [1, 1]} : vector<2x384xf32> to vector<2x128xf32>
    %248 = vector.extract_strided_slice %246 {offsets = [0, 128], sizes = [2, 128], strides = [1, 1]} : vector<2x384xf32> to vector<2x128xf32>
    %249 = vector.extract_strided_slice %246 {offsets = [0, 256], sizes = [2, 128], strides = [1, 1]} : vector<2x384xf32> to vector<2x128xf32>
    %250 = vector.extract_strided_slice %238 {offsets = [0, 384], sizes = [2, 128], strides = [1, 1]} : vector<2x512xf32> to vector<2x128xf32>
    %251 = math.tanh %250 : vector<2x128xf32>
    %252 = arith.mulf %248, %209 : vector<2x128xf32>
    %253 = arith.mulf %247, %251 : vector<2x128xf32>
    %254 = arith.addf %252, %253 : vector<2x128xf32>
    %255 = math.tanh %254 : vector<2x128xf32>
    %256 = arith.mulf %249, %255 : vector<2x128xf32>
    %257 = tpu.concatenate %256, %234 in 1 : vector<2x128xf32>, vector<2x128xf32> -> vector<2x256xf32>
    %258 = arith.truncf %257 : vector<2x256xf32> to vector<2x256xbf16>
    %cst_78 = arith.constant dense<0.000000e+00> : vector<2x512xf32>
    %259 = tpu.matmul %258, %139, %cst_78 {dimension_numbers = #tpu.dot_dimension_numbers<[1], [0], [0], [1], [0, 0, 1, 1], [], []>} : vector<2x256xbf16>, vector<256x512xbf16>, vector<2x512xf32> -> vector<2x512xf32>
    %260 = vector.broadcast %140 : vector<1x512xf32> to vector<2x512xf32>
    %261 = arith.addf %259, %260 : vector<2x512xf32>
    %262 = vector.extract_strided_slice %261 {offsets = [0, 0], sizes = [2, 384], strides = [1, 1]} : vector<2x512xf32> to vector<2x384xf32>
    %cst_79 = arith.constant 5.000000e-01 : f32
    %263 = vector.broadcast %cst_79 : f32 to vector<2x384xf32>
    %264 = arith.mulf %263, %262 : vector<2x384xf32>
    %265 = math.tanh %264 : vector<2x384xf32>
    %cst_80 = arith.constant 5.000000e-01 : f32
    %266 = vector.broadcast %cst_80 : f32 to vector<2x384xf32>
    %267 = arith.mulf %266, %265 : vector<2x384xf32>
    %cst_81 = arith.constant 5.000000e-01 : f32
    %268 = vector.broadcast %cst_81 : f32 to vector<2x384xf32>
    %269 = arith.addf %267, %268 : vector<2x384xf32>
    %270 = vector.extract_strided_slice %269 {offsets = [0, 0], sizes = [2, 128], strides = [1, 1]} : vector<2x384xf32> to vector<2x128xf32>
    %271 = vector.extract_strided_slice %269 {offsets = [0, 128], sizes = [2, 128], strides = [1, 1]} : vector<2x384xf32> to vector<2x128xf32>
    %272 = vector.extract_strided_slice %269 {offsets = [0, 256], sizes = [2, 128], strides = [1, 1]} : vector<2x384xf32> to vector<2x128xf32>
    %273 = vector.extract_strided_slice %261 {offsets = [0, 384], sizes = [2, 128], strides = [1, 1]} : vector<2x512xf32> to vector<2x128xf32>
    %274 = math.tanh %273 : vector<2x128xf32>
    %275 = arith.mulf %271, %232 : vector<2x128xf32>
    %276 = arith.mulf %270, %274 : vector<2x128xf32>
    %277 = arith.addf %275, %276 : vector<2x128xf32>
    %278 = math.tanh %277 : vector<2x128xf32>
    %279 = arith.mulf %272, %278 : vector<2x128xf32>
    %280 = vector.extract_strided_slice %137 {offsets = [6, 0], sizes = [2, 512], strides = [1, 1]} : vector<26x512xf32> to vector<2x512xf32>
    %281 = arith.truncf %256 : vector<2x128xf32> to vector<2x128xbf16>
    %cst_82 = arith.constant dense<0.000000e+00> : vector<2x512xf32>
    %282 = tpu.matmul %281, %138, %cst_82 {dimension_numbers = #tpu.dot_dimension_numbers<[1], [0], [0], [1], [0, 0, 1, 1], [], []>} : vector<2x128xbf16>, vector<128x512xbf16>, vector<2x512xf32> -> vector<2x512xf32>
    %283 = arith.addf %280, %282 : vector<2x512xf32>
    %284 = vector.extract_strided_slice %283 {offsets = [0, 0], sizes = [2, 384], strides = [1, 1]} : vector<2x512xf32> to vector<2x384xf32>
    %cst_83 = arith.constant 5.000000e-01 : f32
    %285 = vector.broadcast %cst_83 : f32 to vector<2x384xf32>
    %286 = arith.mulf %285, %284 : vector<2x384xf32>
    %287 = math.tanh %286 : vector<2x384xf32>
    %cst_84 = arith.constant 5.000000e-01 : f32
    %288 = vector.broadcast %cst_84 : f32 to vector<2x384xf32>
    %289 = arith.mulf %288, %287 : vector<2x384xf32>
    %cst_85 = arith.constant 5.000000e-01 : f32
    %290 = vector.broadcast %cst_85 : f32 to vector<2x384xf32>
    %291 = arith.addf %289, %290 : vector<2x384xf32>
    %292 = vector.extract_strided_slice %291 {offsets = [0, 0], sizes = [2, 128], strides = [1, 1]} : vector<2x384xf32> to vector<2x128xf32>
    %293 = vector.extract_strided_slice %291 {offsets = [0, 128], sizes = [2, 128], strides = [1, 1]} : vector<2x384xf32> to vector<2x128xf32>
    %294 = vector.extract_strided_slice %291 {offsets = [0, 256], sizes = [2, 128], strides = [1, 1]} : vector<2x384xf32> to vector<2x128xf32>
    %295 = vector.extract_strided_slice %283 {offsets = [0, 384], sizes = [2, 128], strides = [1, 1]} : vector<2x512xf32> to vector<2x128xf32>
    %296 = math.tanh %295 : vector<2x128xf32>
    %297 = arith.mulf %293, %254 : vector<2x128xf32>
    %298 = arith.mulf %292, %296 : vector<2x128xf32>
    %299 = arith.addf %297, %298 : vector<2x128xf32>
    %300 = math.tanh %299 : vector<2x128xf32>
    %301 = arith.mulf %294, %300 : vector<2x128xf32>
    %302 = tpu.concatenate %301, %279 in 1 : vector<2x128xf32>, vector<2x128xf32> -> vector<2x256xf32>
    %303 = arith.truncf %302 : vector<2x256xf32> to vector<2x256xbf16>
    %cst_86 = arith.constant dense<0.000000e+00> : vector<2x512xf32>
    %304 = tpu.matmul %303, %139, %cst_86 {dimension_numbers = #tpu.dot_dimension_numbers<[1], [0], [0], [1], [0, 0, 1, 1], [], []>} : vector<2x256xbf16>, vector<256x512xbf16>, vector<2x512xf32> -> vector<2x512xf32>
    %305 = vector.broadcast %140 : vector<1x512xf32> to vector<2x512xf32>
    %306 = arith.addf %304, %305 : vector<2x512xf32>
    %307 = vector.extract_strided_slice %306 {offsets = [0, 0], sizes = [2, 384], strides = [1, 1]} : vector<2x512xf32> to vector<2x384xf32>
    %cst_87 = arith.constant 5.000000e-01 : f32
    %308 = vector.broadcast %cst_87 : f32 to vector<2x384xf32>
    %309 = arith.mulf %308, %307 : vector<2x384xf32>
    %310 = math.tanh %309 : vector<2x384xf32>
    %cst_88 = arith.constant 5.000000e-01 : f32
    %311 = vector.broadcast %cst_88 : f32 to vector<2x384xf32>
    %312 = arith.mulf %311, %310 : vector<2x384xf32>
    %cst_89 = arith.constant 5.000000e-01 : f32
    %313 = vector.broadcast %cst_89 : f32 to vector<2x384xf32>
    %314 = arith.addf %312, %313 : vector<2x384xf32>
    %315 = vector.extract_strided_slice %314 {offsets = [0, 0], sizes = [2, 128], strides = [1, 1]} : vector<2x384xf32> to vector<2x128xf32>
    %316 = vector.extract_strided_slice %314 {offsets = [0, 128], sizes = [2, 128], strides = [1, 1]} : vector<2x384xf32> to vector<2x128xf32>
    %317 = vector.extract_strided_slice %314 {offsets = [0, 256], sizes = [2, 128], strides = [1, 1]} : vector<2x384xf32> to vector<2x128xf32>
    %318 = vector.extract_strided_slice %306 {offsets = [0, 384], sizes = [2, 128], strides = [1, 1]} : vector<2x512xf32> to vector<2x128xf32>
    %319 = math.tanh %318 : vector<2x128xf32>
    %320 = arith.mulf %316, %277 : vector<2x128xf32>
    %321 = arith.mulf %315, %319 : vector<2x128xf32>
    %322 = arith.addf %320, %321 : vector<2x128xf32>
    %323 = math.tanh %322 : vector<2x128xf32>
    %324 = arith.mulf %317, %323 : vector<2x128xf32>
    %325 = vector.extract_strided_slice %137 {offsets = [8, 0], sizes = [2, 512], strides = [1, 1]} : vector<26x512xf32> to vector<2x512xf32>
    %326 = arith.truncf %301 : vector<2x128xf32> to vector<2x128xbf16>
    %cst_90 = arith.constant dense<0.000000e+00> : vector<2x512xf32>
    %327 = tpu.matmul %326, %138, %cst_90 {dimension_numbers = #tpu.dot_dimension_numbers<[1], [0], [0], [1], [0, 0, 1, 1], [], []>} : vector<2x128xbf16>, vector<128x512xbf16>, vector<2x512xf32> -> vector<2x512xf32>
    %328 = arith.addf %325, %327 : vector<2x512xf32>
    %329 = vector.extract_strided_slice %328 {offsets = [0, 0], sizes = [2, 384], strides = [1, 1]} : vector<2x512xf32> to vector<2x384xf32>
    %cst_91 = arith.constant 5.000000e-01 : f32
    %330 = vector.broadcast %cst_91 : f32 to vector<2x384xf32>
    %331 = arith.mulf %330, %329 : vector<2x384xf32>
    %332 = math.tanh %331 : vector<2x384xf32>
    %cst_92 = arith.constant 5.000000e-01 : f32
    %333 = vector.broadcast %cst_92 : f32 to vector<2x384xf32>
    %334 = arith.mulf %333, %332 : vector<2x384xf32>
    %cst_93 = arith.constant 5.000000e-01 : f32
    %335 = vector.broadcast %cst_93 : f32 to vector<2x384xf32>
    %336 = arith.addf %334, %335 : vector<2x384xf32>
    %337 = vector.extract_strided_slice %336 {offsets = [0, 0], sizes = [2, 128], strides = [1, 1]} : vector<2x384xf32> to vector<2x128xf32>
    %338 = vector.extract_strided_slice %336 {offsets = [0, 128], sizes = [2, 128], strides = [1, 1]} : vector<2x384xf32> to vector<2x128xf32>
    %339 = vector.extract_strided_slice %336 {offsets = [0, 256], sizes = [2, 128], strides = [1, 1]} : vector<2x384xf32> to vector<2x128xf32>
    %340 = vector.extract_strided_slice %328 {offsets = [0, 384], sizes = [2, 128], strides = [1, 1]} : vector<2x512xf32> to vector<2x128xf32>
    %341 = math.tanh %340 : vector<2x128xf32>
    %342 = arith.mulf %338, %299 : vector<2x128xf32>
    %343 = arith.mulf %337, %341 : vector<2x128xf32>
    %344 = arith.addf %342, %343 : vector<2x128xf32>
    %345 = math.tanh %344 : vector<2x128xf32>
    %346 = arith.mulf %339, %345 : vector<2x128xf32>
    %347 = tpu.concatenate %346, %324 in 1 : vector<2x128xf32>, vector<2x128xf32> -> vector<2x256xf32>
    %348 = arith.truncf %347 : vector<2x256xf32> to vector<2x256xbf16>
    %cst_94 = arith.constant dense<0.000000e+00> : vector<2x512xf32>
    %349 = tpu.matmul %348, %139, %cst_94 {dimension_numbers = #tpu.dot_dimension_numbers<[1], [0], [0], [1], [0, 0, 1, 1], [], []>} : vector<2x256xbf16>, vector<256x512xbf16>, vector<2x512xf32> -> vector<2x512xf32>
    %350 = vector.broadcast %140 : vector<1x512xf32> to vector<2x512xf32>
    %351 = arith.addf %349, %350 : vector<2x512xf32>
    %352 = vector.extract_strided_slice %351 {offsets = [0, 0], sizes = [2, 384], strides = [1, 1]} : vector<2x512xf32> to vector<2x384xf32>
    %cst_95 = arith.constant 5.000000e-01 : f32
    %353 = vector.broadcast %cst_95 : f32 to vector<2x384xf32>
    %354 = arith.mulf %353, %352 : vector<2x384xf32>
    %355 = math.tanh %354 : vector<2x384xf32>
    %cst_96 = arith.constant 5.000000e-01 : f32
    %356 = vector.broadcast %cst_96 : f32 to vector<2x384xf32>
    %357 = arith.mulf %356, %355 : vector<2x384xf32>
    %cst_97 = arith.constant 5.000000e-01 : f32
    %358 = vector.broadcast %cst_97 : f32 to vector<2x384xf32>
    %359 = arith.addf %357, %358 : vector<2x384xf32>
    %360 = vector.extract_strided_slice %359 {offsets = [0, 0], sizes = [2, 128], strides = [1, 1]} : vector<2x384xf32> to vector<2x128xf32>
    %361 = vector.extract_strided_slice %359 {offsets = [0, 128], sizes = [2, 128], strides = [1, 1]} : vector<2x384xf32> to vector<2x128xf32>
    %362 = vector.extract_strided_slice %359 {offsets = [0, 256], sizes = [2, 128], strides = [1, 1]} : vector<2x384xf32> to vector<2x128xf32>
    %363 = vector.extract_strided_slice %351 {offsets = [0, 384], sizes = [2, 128], strides = [1, 1]} : vector<2x512xf32> to vector<2x128xf32>
    %364 = math.tanh %363 : vector<2x128xf32>
    %365 = arith.mulf %361, %322 : vector<2x128xf32>
    %366 = arith.mulf %360, %364 : vector<2x128xf32>
    %367 = arith.addf %365, %366 : vector<2x128xf32>
    %368 = math.tanh %367 : vector<2x128xf32>
    %369 = arith.mulf %362, %368 : vector<2x128xf32>
    %370 = vector.extract_strided_slice %137 {offsets = [10, 0], sizes = [2, 512], strides = [1, 1]} : vector<26x512xf32> to vector<2x512xf32>
    %371 = arith.truncf %346 : vector<2x128xf32> to vector<2x128xbf16>
    %cst_98 = arith.constant dense<0.000000e+00> : vector<2x512xf32>
    %372 = tpu.matmul %371, %138, %cst_98 {dimension_numbers = #tpu.dot_dimension_numbers<[1], [0], [0], [1], [0, 0, 1, 1], [], []>} : vector<2x128xbf16>, vector<128x512xbf16>, vector<2x512xf32> -> vector<2x512xf32>
    %373 = arith.addf %370, %372 : vector<2x512xf32>
    %374 = vector.extract_strided_slice %373 {offsets = [0, 0], sizes = [2, 384], strides = [1, 1]} : vector<2x512xf32> to vector<2x384xf32>
    %cst_99 = arith.constant 5.000000e-01 : f32
    %375 = vector.broadcast %cst_99 : f32 to vector<2x384xf32>
    %376 = arith.mulf %375, %374 : vector<2x384xf32>
    %377 = math.tanh %376 : vector<2x384xf32>
    %cst_100 = arith.constant 5.000000e-01 : f32
    %378 = vector.broadcast %cst_100 : f32 to vector<2x384xf32>
    %379 = arith.mulf %378, %377 : vector<2x384xf32>
    %cst_101 = arith.constant 5.000000e-01 : f32
    %380 = vector.broadcast %cst_101 : f32 to vector<2x384xf32>
    %381 = arith.addf %379, %380 : vector<2x384xf32>
    %382 = vector.extract_strided_slice %381 {offsets = [0, 0], sizes = [2, 128], strides = [1, 1]} : vector<2x384xf32> to vector<2x128xf32>
    %383 = vector.extract_strided_slice %381 {offsets = [0, 128], sizes = [2, 128], strides = [1, 1]} : vector<2x384xf32> to vector<2x128xf32>
    %384 = vector.extract_strided_slice %381 {offsets = [0, 256], sizes = [2, 128], strides = [1, 1]} : vector<2x384xf32> to vector<2x128xf32>
    %385 = vector.extract_strided_slice %373 {offsets = [0, 384], sizes = [2, 128], strides = [1, 1]} : vector<2x512xf32> to vector<2x128xf32>
    %386 = math.tanh %385 : vector<2x128xf32>
    %387 = arith.mulf %383, %344 : vector<2x128xf32>
    %388 = arith.mulf %382, %386 : vector<2x128xf32>
    %389 = arith.addf %387, %388 : vector<2x128xf32>
    %390 = math.tanh %389 : vector<2x128xf32>
    %391 = arith.mulf %384, %390 : vector<2x128xf32>
    %392 = tpu.concatenate %391, %369 in 1 : vector<2x128xf32>, vector<2x128xf32> -> vector<2x256xf32>
    %393 = arith.truncf %392 : vector<2x256xf32> to vector<2x256xbf16>
    %cst_102 = arith.constant dense<0.000000e+00> : vector<2x512xf32>
    %394 = tpu.matmul %393, %139, %cst_102 {dimension_numbers = #tpu.dot_dimension_numbers<[1], [0], [0], [1], [0, 0, 1, 1], [], []>} : vector<2x256xbf16>, vector<256x512xbf16>, vector<2x512xf32> -> vector<2x512xf32>
    %395 = vector.broadcast %140 : vector<1x512xf32> to vector<2x512xf32>
    %396 = arith.addf %394, %395 : vector<2x512xf32>
    %397 = vector.extract_strided_slice %396 {offsets = [0, 0], sizes = [2, 384], strides = [1, 1]} : vector<2x512xf32> to vector<2x384xf32>
    %cst_103 = arith.constant 5.000000e-01 : f32
    %398 = vector.broadcast %cst_103 : f32 to vector<2x384xf32>
    %399 = arith.mulf %398, %397 : vector<2x384xf32>
    %400 = math.tanh %399 : vector<2x384xf32>
    %cst_104 = arith.constant 5.000000e-01 : f32
    %401 = vector.broadcast %cst_104 : f32 to vector<2x384xf32>
    %402 = arith.mulf %401, %400 : vector<2x384xf32>
    %cst_105 = arith.constant 5.000000e-01 : f32
    %403 = vector.broadcast %cst_105 : f32 to vector<2x384xf32>
    %404 = arith.addf %402, %403 : vector<2x384xf32>
    %405 = vector.extract_strided_slice %404 {offsets = [0, 0], sizes = [2, 128], strides = [1, 1]} : vector<2x384xf32> to vector<2x128xf32>
    %406 = vector.extract_strided_slice %404 {offsets = [0, 128], sizes = [2, 128], strides = [1, 1]} : vector<2x384xf32> to vector<2x128xf32>
    %407 = vector.extract_strided_slice %404 {offsets = [0, 256], sizes = [2, 128], strides = [1, 1]} : vector<2x384xf32> to vector<2x128xf32>
    %408 = vector.extract_strided_slice %396 {offsets = [0, 384], sizes = [2, 128], strides = [1, 1]} : vector<2x512xf32> to vector<2x128xf32>
    %409 = math.tanh %408 : vector<2x128xf32>
    %410 = arith.mulf %406, %367 : vector<2x128xf32>
    %411 = arith.mulf %405, %409 : vector<2x128xf32>
    %412 = arith.addf %410, %411 : vector<2x128xf32>
    %413 = math.tanh %412 : vector<2x128xf32>
    %414 = arith.mulf %407, %413 : vector<2x128xf32>
    %415 = vector.extract_strided_slice %137 {offsets = [12, 0], sizes = [2, 512], strides = [1, 1]} : vector<26x512xf32> to vector<2x512xf32>
    %416 = arith.truncf %391 : vector<2x128xf32> to vector<2x128xbf16>
    %cst_106 = arith.constant dense<0.000000e+00> : vector<2x512xf32>
    %417 = tpu.matmul %416, %138, %cst_106 {dimension_numbers = #tpu.dot_dimension_numbers<[1], [0], [0], [1], [0, 0, 1, 1], [], []>} : vector<2x128xbf16>, vector<128x512xbf16>, vector<2x512xf32> -> vector<2x512xf32>
    %418 = arith.addf %415, %417 : vector<2x512xf32>
    %419 = vector.extract_strided_slice %418 {offsets = [0, 0], sizes = [2, 384], strides = [1, 1]} : vector<2x512xf32> to vector<2x384xf32>
    %cst_107 = arith.constant 5.000000e-01 : f32
    %420 = vector.broadcast %cst_107 : f32 to vector<2x384xf32>
    %421 = arith.mulf %420, %419 : vector<2x384xf32>
    %422 = math.tanh %421 : vector<2x384xf32>
    %cst_108 = arith.constant 5.000000e-01 : f32
    %423 = vector.broadcast %cst_108 : f32 to vector<2x384xf32>
    %424 = arith.mulf %423, %422 : vector<2x384xf32>
    %cst_109 = arith.constant 5.000000e-01 : f32
    %425 = vector.broadcast %cst_109 : f32 to vector<2x384xf32>
    %426 = arith.addf %424, %425 : vector<2x384xf32>
    %427 = vector.extract_strided_slice %426 {offsets = [0, 0], sizes = [2, 128], strides = [1, 1]} : vector<2x384xf32> to vector<2x128xf32>
    %428 = vector.extract_strided_slice %426 {offsets = [0, 128], sizes = [2, 128], strides = [1, 1]} : vector<2x384xf32> to vector<2x128xf32>
    %429 = vector.extract_strided_slice %426 {offsets = [0, 256], sizes = [2, 128], strides = [1, 1]} : vector<2x384xf32> to vector<2x128xf32>
    %430 = vector.extract_strided_slice %418 {offsets = [0, 384], sizes = [2, 128], strides = [1, 1]} : vector<2x512xf32> to vector<2x128xf32>
    %431 = math.tanh %430 : vector<2x128xf32>
    %432 = arith.mulf %428, %389 : vector<2x128xf32>
    %433 = arith.mulf %427, %431 : vector<2x128xf32>
    %434 = arith.addf %432, %433 : vector<2x128xf32>
    %435 = math.tanh %434 : vector<2x128xf32>
    %436 = arith.mulf %429, %435 : vector<2x128xf32>
    %437 = tpu.concatenate %436, %414 in 1 : vector<2x128xf32>, vector<2x128xf32> -> vector<2x256xf32>
    %438 = arith.truncf %437 : vector<2x256xf32> to vector<2x256xbf16>
    %cst_110 = arith.constant dense<0.000000e+00> : vector<2x512xf32>
    %439 = tpu.matmul %438, %139, %cst_110 {dimension_numbers = #tpu.dot_dimension_numbers<[1], [0], [0], [1], [0, 0, 1, 1], [], []>} : vector<2x256xbf16>, vector<256x512xbf16>, vector<2x512xf32> -> vector<2x512xf32>
    %440 = vector.broadcast %140 : vector<1x512xf32> to vector<2x512xf32>
    %441 = arith.addf %439, %440 : vector<2x512xf32>
    %442 = vector.extract_strided_slice %441 {offsets = [0, 0], sizes = [2, 384], strides = [1, 1]} : vector<2x512xf32> to vector<2x384xf32>
    %cst_111 = arith.constant 5.000000e-01 : f32
    %443 = vector.broadcast %cst_111 : f32 to vector<2x384xf32>
    %444 = arith.mulf %443, %442 : vector<2x384xf32>
    %445 = math.tanh %444 : vector<2x384xf32>
    %cst_112 = arith.constant 5.000000e-01 : f32
    %446 = vector.broadcast %cst_112 : f32 to vector<2x384xf32>
    %447 = arith.mulf %446, %445 : vector<2x384xf32>
    %cst_113 = arith.constant 5.000000e-01 : f32
    %448 = vector.broadcast %cst_113 : f32 to vector<2x384xf32>
    %449 = arith.addf %447, %448 : vector<2x384xf32>
    %450 = vector.extract_strided_slice %449 {offsets = [0, 0], sizes = [2, 128], strides = [1, 1]} : vector<2x384xf32> to vector<2x128xf32>
    %451 = vector.extract_strided_slice %449 {offsets = [0, 128], sizes = [2, 128], strides = [1, 1]} : vector<2x384xf32> to vector<2x128xf32>
    %452 = vector.extract_strided_slice %449 {offsets = [0, 256], sizes = [2, 128], strides = [1, 1]} : vector<2x384xf32> to vector<2x128xf32>
    %453 = vector.extract_strided_slice %441 {offsets = [0, 384], sizes = [2, 128], strides = [1, 1]} : vector<2x512xf32> to vector<2x128xf32>
    %454 = math.tanh %453 : vector<2x128xf32>
    %455 = arith.mulf %451, %412 : vector<2x128xf32>
    %456 = arith.mulf %450, %454 : vector<2x128xf32>
    %457 = arith.addf %455, %456 : vector<2x128xf32>
    %458 = math.tanh %457 : vector<2x128xf32>
    %459 = arith.mulf %452, %458 : vector<2x128xf32>
    %460 = vector.extract_strided_slice %137 {offsets = [14, 0], sizes = [2, 512], strides = [1, 1]} : vector<26x512xf32> to vector<2x512xf32>
    %461 = arith.truncf %436 : vector<2x128xf32> to vector<2x128xbf16>
    %cst_114 = arith.constant dense<0.000000e+00> : vector<2x512xf32>
    %462 = tpu.matmul %461, %138, %cst_114 {dimension_numbers = #tpu.dot_dimension_numbers<[1], [0], [0], [1], [0, 0, 1, 1], [], []>} : vector<2x128xbf16>, vector<128x512xbf16>, vector<2x512xf32> -> vector<2x512xf32>
    %463 = arith.addf %460, %462 : vector<2x512xf32>
    %464 = vector.extract_strided_slice %463 {offsets = [0, 0], sizes = [2, 384], strides = [1, 1]} : vector<2x512xf32> to vector<2x384xf32>
    %cst_115 = arith.constant 5.000000e-01 : f32
    %465 = vector.broadcast %cst_115 : f32 to vector<2x384xf32>
    %466 = arith.mulf %465, %464 : vector<2x384xf32>
    %467 = math.tanh %466 : vector<2x384xf32>
    %cst_116 = arith.constant 5.000000e-01 : f32
    %468 = vector.broadcast %cst_116 : f32 to vector<2x384xf32>
    %469 = arith.mulf %468, %467 : vector<2x384xf32>
    %cst_117 = arith.constant 5.000000e-01 : f32
    %470 = vector.broadcast %cst_117 : f32 to vector<2x384xf32>
    %471 = arith.addf %469, %470 : vector<2x384xf32>
    %472 = vector.extract_strided_slice %471 {offsets = [0, 0], sizes = [2, 128], strides = [1, 1]} : vector<2x384xf32> to vector<2x128xf32>
    %473 = vector.extract_strided_slice %471 {offsets = [0, 128], sizes = [2, 128], strides = [1, 1]} : vector<2x384xf32> to vector<2x128xf32>
    %474 = vector.extract_strided_slice %471 {offsets = [0, 256], sizes = [2, 128], strides = [1, 1]} : vector<2x384xf32> to vector<2x128xf32>
    %475 = vector.extract_strided_slice %463 {offsets = [0, 384], sizes = [2, 128], strides = [1, 1]} : vector<2x512xf32> to vector<2x128xf32>
    %476 = math.tanh %475 : vector<2x128xf32>
    %477 = arith.mulf %473, %434 : vector<2x128xf32>
    %478 = arith.mulf %472, %476 : vector<2x128xf32>
    %479 = arith.addf %477, %478 : vector<2x128xf32>
    %480 = math.tanh %479 : vector<2x128xf32>
    %481 = arith.mulf %474, %480 : vector<2x128xf32>
    %482 = tpu.concatenate %481, %459 in 1 : vector<2x128xf32>, vector<2x128xf32> -> vector<2x256xf32>
    %483 = arith.truncf %482 : vector<2x256xf32> to vector<2x256xbf16>
    %cst_118 = arith.constant dense<0.000000e+00> : vector<2x512xf32>
    %484 = tpu.matmul %483, %139, %cst_118 {dimension_numbers = #tpu.dot_dimension_numbers<[1], [0], [0], [1], [0, 0, 1, 1], [], []>} : vector<2x256xbf16>, vector<256x512xbf16>, vector<2x512xf32> -> vector<2x512xf32>
    %485 = vector.broadcast %140 : vector<1x512xf32> to vector<2x512xf32>
    %486 = arith.addf %484, %485 : vector<2x512xf32>
    %487 = vector.extract_strided_slice %486 {offsets = [0, 0], sizes = [2, 384], strides = [1, 1]} : vector<2x512xf32> to vector<2x384xf32>
    %cst_119 = arith.constant 5.000000e-01 : f32
    %488 = vector.broadcast %cst_119 : f32 to vector<2x384xf32>
    %489 = arith.mulf %488, %487 : vector<2x384xf32>
    %490 = math.tanh %489 : vector<2x384xf32>
    %cst_120 = arith.constant 5.000000e-01 : f32
    %491 = vector.broadcast %cst_120 : f32 to vector<2x384xf32>
    %492 = arith.mulf %491, %490 : vector<2x384xf32>
    %cst_121 = arith.constant 5.000000e-01 : f32
    %493 = vector.broadcast %cst_121 : f32 to vector<2x384xf32>
    %494 = arith.addf %492, %493 : vector<2x384xf32>
    %495 = vector.extract_strided_slice %494 {offsets = [0, 0], sizes = [2, 128], strides = [1, 1]} : vector<2x384xf32> to vector<2x128xf32>
    %496 = vector.extract_strided_slice %494 {offsets = [0, 128], sizes = [2, 128], strides = [1, 1]} : vector<2x384xf32> to vector<2x128xf32>
    %497 = vector.extract_strided_slice %494 {offsets = [0, 256], sizes = [2, 128], strides = [1, 1]} : vector<2x384xf32> to vector<2x128xf32>
    %498 = vector.extract_strided_slice %486 {offsets = [0, 384], sizes = [2, 128], strides = [1, 1]} : vector<2x512xf32> to vector<2x128xf32>
    %499 = math.tanh %498 : vector<2x128xf32>
    %500 = arith.mulf %496, %457 : vector<2x128xf32>
    %501 = arith.mulf %495, %499 : vector<2x128xf32>
    %502 = arith.addf %500, %501 : vector<2x128xf32>
    %503 = math.tanh %502 : vector<2x128xf32>
    %504 = arith.mulf %497, %503 : vector<2x128xf32>
    %505 = vector.extract_strided_slice %137 {offsets = [16, 0], sizes = [2, 512], strides = [1, 1]} : vector<26x512xf32> to vector<2x512xf32>
    %506 = arith.truncf %481 : vector<2x128xf32> to vector<2x128xbf16>
    %cst_122 = arith.constant dense<0.000000e+00> : vector<2x512xf32>
    %507 = tpu.matmul %506, %138, %cst_122 {dimension_numbers = #tpu.dot_dimension_numbers<[1], [0], [0], [1], [0, 0, 1, 1], [], []>} : vector<2x128xbf16>, vector<128x512xbf16>, vector<2x512xf32> -> vector<2x512xf32>
    %508 = arith.addf %505, %507 : vector<2x512xf32>
    %509 = vector.extract_strided_slice %508 {offsets = [0, 0], sizes = [2, 384], strides = [1, 1]} : vector<2x512xf32> to vector<2x384xf32>
    %cst_123 = arith.constant 5.000000e-01 : f32
    %510 = vector.broadcast %cst_123 : f32 to vector<2x384xf32>
    %511 = arith.mulf %510, %509 : vector<2x384xf32>
    %512 = math.tanh %511 : vector<2x384xf32>
    %cst_124 = arith.constant 5.000000e-01 : f32
    %513 = vector.broadcast %cst_124 : f32 to vector<2x384xf32>
    %514 = arith.mulf %513, %512 : vector<2x384xf32>
    %cst_125 = arith.constant 5.000000e-01 : f32
    %515 = vector.broadcast %cst_125 : f32 to vector<2x384xf32>
    %516 = arith.addf %514, %515 : vector<2x384xf32>
    %517 = vector.extract_strided_slice %516 {offsets = [0, 0], sizes = [2, 128], strides = [1, 1]} : vector<2x384xf32> to vector<2x128xf32>
    %518 = vector.extract_strided_slice %516 {offsets = [0, 128], sizes = [2, 128], strides = [1, 1]} : vector<2x384xf32> to vector<2x128xf32>
    %519 = vector.extract_strided_slice %516 {offsets = [0, 256], sizes = [2, 128], strides = [1, 1]} : vector<2x384xf32> to vector<2x128xf32>
    %520 = vector.extract_strided_slice %508 {offsets = [0, 384], sizes = [2, 128], strides = [1, 1]} : vector<2x512xf32> to vector<2x128xf32>
    %521 = math.tanh %520 : vector<2x128xf32>
    %522 = arith.mulf %518, %479 : vector<2x128xf32>
    %523 = arith.mulf %517, %521 : vector<2x128xf32>
    %524 = arith.addf %522, %523 : vector<2x128xf32>
    %525 = math.tanh %524 : vector<2x128xf32>
    %526 = arith.mulf %519, %525 : vector<2x128xf32>
    %527 = tpu.concatenate %526, %504 in 1 : vector<2x128xf32>, vector<2x128xf32> -> vector<2x256xf32>
    %528 = arith.truncf %527 : vector<2x256xf32> to vector<2x256xbf16>
    %cst_126 = arith.constant dense<0.000000e+00> : vector<2x512xf32>
    %529 = tpu.matmul %528, %139, %cst_126 {dimension_numbers = #tpu.dot_dimension_numbers<[1], [0], [0], [1], [0, 0, 1, 1], [], []>} : vector<2x256xbf16>, vector<256x512xbf16>, vector<2x512xf32> -> vector<2x512xf32>
    %530 = vector.broadcast %140 : vector<1x512xf32> to vector<2x512xf32>
    %531 = arith.addf %529, %530 : vector<2x512xf32>
    %532 = vector.extract_strided_slice %531 {offsets = [0, 0], sizes = [2, 384], strides = [1, 1]} : vector<2x512xf32> to vector<2x384xf32>
    %cst_127 = arith.constant 5.000000e-01 : f32
    %533 = vector.broadcast %cst_127 : f32 to vector<2x384xf32>
    %534 = arith.mulf %533, %532 : vector<2x384xf32>
    %535 = math.tanh %534 : vector<2x384xf32>
    %cst_128 = arith.constant 5.000000e-01 : f32
    %536 = vector.broadcast %cst_128 : f32 to vector<2x384xf32>
    %537 = arith.mulf %536, %535 : vector<2x384xf32>
    %cst_129 = arith.constant 5.000000e-01 : f32
    %538 = vector.broadcast %cst_129 : f32 to vector<2x384xf32>
    %539 = arith.addf %537, %538 : vector<2x384xf32>
    %540 = vector.extract_strided_slice %539 {offsets = [0, 0], sizes = [2, 128], strides = [1, 1]} : vector<2x384xf32> to vector<2x128xf32>
    %541 = vector.extract_strided_slice %539 {offsets = [0, 128], sizes = [2, 128], strides = [1, 1]} : vector<2x384xf32> to vector<2x128xf32>
    %542 = vector.extract_strided_slice %539 {offsets = [0, 256], sizes = [2, 128], strides = [1, 1]} : vector<2x384xf32> to vector<2x128xf32>
    %543 = vector.extract_strided_slice %531 {offsets = [0, 384], sizes = [2, 128], strides = [1, 1]} : vector<2x512xf32> to vector<2x128xf32>
    %544 = math.tanh %543 : vector<2x128xf32>
    %545 = arith.mulf %541, %502 : vector<2x128xf32>
    %546 = arith.mulf %540, %544 : vector<2x128xf32>
    %547 = arith.addf %545, %546 : vector<2x128xf32>
    %548 = math.tanh %547 : vector<2x128xf32>
    %549 = arith.mulf %542, %548 : vector<2x128xf32>
    %550 = vector.extract_strided_slice %137 {offsets = [18, 0], sizes = [2, 512], strides = [1, 1]} : vector<26x512xf32> to vector<2x512xf32>
    %551 = arith.truncf %526 : vector<2x128xf32> to vector<2x128xbf16>
    %cst_130 = arith.constant dense<0.000000e+00> : vector<2x512xf32>
    %552 = tpu.matmul %551, %138, %cst_130 {dimension_numbers = #tpu.dot_dimension_numbers<[1], [0], [0], [1], [0, 0, 1, 1], [], []>} : vector<2x128xbf16>, vector<128x512xbf16>, vector<2x512xf32> -> vector<2x512xf32>
    %553 = arith.addf %550, %552 : vector<2x512xf32>
    %554 = vector.extract_strided_slice %553 {offsets = [0, 0], sizes = [2, 384], strides = [1, 1]} : vector<2x512xf32> to vector<2x384xf32>
    %cst_131 = arith.constant 5.000000e-01 : f32
    %555 = vector.broadcast %cst_131 : f32 to vector<2x384xf32>
    %556 = arith.mulf %555, %554 : vector<2x384xf32>
    %557 = math.tanh %556 : vector<2x384xf32>
    %cst_132 = arith.constant 5.000000e-01 : f32
    %558 = vector.broadcast %cst_132 : f32 to vector<2x384xf32>
    %559 = arith.mulf %558, %557 : vector<2x384xf32>
    %cst_133 = arith.constant 5.000000e-01 : f32
    %560 = vector.broadcast %cst_133 : f32 to vector<2x384xf32>
    %561 = arith.addf %559, %560 : vector<2x384xf32>
    %562 = vector.extract_strided_slice %561 {offsets = [0, 0], sizes = [2, 128], strides = [1, 1]} : vector<2x384xf32> to vector<2x128xf32>
    %563 = vector.extract_strided_slice %561 {offsets = [0, 128], sizes = [2, 128], strides = [1, 1]} : vector<2x384xf32> to vector<2x128xf32>
    %564 = vector.extract_strided_slice %561 {offsets = [0, 256], sizes = [2, 128], strides = [1, 1]} : vector<2x384xf32> to vector<2x128xf32>
    %565 = vector.extract_strided_slice %553 {offsets = [0, 384], sizes = [2, 128], strides = [1, 1]} : vector<2x512xf32> to vector<2x128xf32>
    %566 = math.tanh %565 : vector<2x128xf32>
    %567 = arith.mulf %563, %524 : vector<2x128xf32>
    %568 = arith.mulf %562, %566 : vector<2x128xf32>
    %569 = arith.addf %567, %568 : vector<2x128xf32>
    %570 = math.tanh %569 : vector<2x128xf32>
    %571 = arith.mulf %564, %570 : vector<2x128xf32>
    %572 = tpu.concatenate %571, %549 in 1 : vector<2x128xf32>, vector<2x128xf32> -> vector<2x256xf32>
    %573 = arith.truncf %572 : vector<2x256xf32> to vector<2x256xbf16>
    %cst_134 = arith.constant dense<0.000000e+00> : vector<2x512xf32>
    %574 = tpu.matmul %573, %139, %cst_134 {dimension_numbers = #tpu.dot_dimension_numbers<[1], [0], [0], [1], [0, 0, 1, 1], [], []>} : vector<2x256xbf16>, vector<256x512xbf16>, vector<2x512xf32> -> vector<2x512xf32>
    %575 = vector.broadcast %140 : vector<1x512xf32> to vector<2x512xf32>
    %576 = arith.addf %574, %575 : vector<2x512xf32>
    %577 = vector.extract_strided_slice %576 {offsets = [0, 0], sizes = [2, 384], strides = [1, 1]} : vector<2x512xf32> to vector<2x384xf32>
    %cst_135 = arith.constant 5.000000e-01 : f32
    %578 = vector.broadcast %cst_135 : f32 to vector<2x384xf32>
    %579 = arith.mulf %578, %577 : vector<2x384xf32>
    %580 = math.tanh %579 : vector<2x384xf32>
    %cst_136 = arith.constant 5.000000e-01 : f32
    %581 = vector.broadcast %cst_136 : f32 to vector<2x384xf32>
    %582 = arith.mulf %581, %580 : vector<2x384xf32>
    %cst_137 = arith.constant 5.000000e-01 : f32
    %583 = vector.broadcast %cst_137 : f32 to vector<2x384xf32>
    %584 = arith.addf %582, %583 : vector<2x384xf32>
    %585 = vector.extract_strided_slice %584 {offsets = [0, 0], sizes = [2, 128], strides = [1, 1]} : vector<2x384xf32> to vector<2x128xf32>
    %586 = vector.extract_strided_slice %584 {offsets = [0, 128], sizes = [2, 128], strides = [1, 1]} : vector<2x384xf32> to vector<2x128xf32>
    %587 = vector.extract_strided_slice %584 {offsets = [0, 256], sizes = [2, 128], strides = [1, 1]} : vector<2x384xf32> to vector<2x128xf32>
    %588 = vector.extract_strided_slice %576 {offsets = [0, 384], sizes = [2, 128], strides = [1, 1]} : vector<2x512xf32> to vector<2x128xf32>
    %589 = math.tanh %588 : vector<2x128xf32>
    %590 = arith.mulf %586, %547 : vector<2x128xf32>
    %591 = arith.mulf %585, %589 : vector<2x128xf32>
    %592 = arith.addf %590, %591 : vector<2x128xf32>
    %593 = math.tanh %592 : vector<2x128xf32>
    %594 = arith.mulf %587, %593 : vector<2x128xf32>
    %595 = vector.extract_strided_slice %137 {offsets = [20, 0], sizes = [2, 512], strides = [1, 1]} : vector<26x512xf32> to vector<2x512xf32>
    %596 = arith.truncf %571 : vector<2x128xf32> to vector<2x128xbf16>
    %cst_138 = arith.constant dense<0.000000e+00> : vector<2x512xf32>
    %597 = tpu.matmul %596, %138, %cst_138 {dimension_numbers = #tpu.dot_dimension_numbers<[1], [0], [0], [1], [0, 0, 1, 1], [], []>} : vector<2x128xbf16>, vector<128x512xbf16>, vector<2x512xf32> -> vector<2x512xf32>
    %598 = arith.addf %595, %597 : vector<2x512xf32>
    %599 = vector.extract_strided_slice %598 {offsets = [0, 0], sizes = [2, 384], strides = [1, 1]} : vector<2x512xf32> to vector<2x384xf32>
    %cst_139 = arith.constant 5.000000e-01 : f32
    %600 = vector.broadcast %cst_139 : f32 to vector<2x384xf32>
    %601 = arith.mulf %600, %599 : vector<2x384xf32>
    %602 = math.tanh %601 : vector<2x384xf32>
    %cst_140 = arith.constant 5.000000e-01 : f32
    %603 = vector.broadcast %cst_140 : f32 to vector<2x384xf32>
    %604 = arith.mulf %603, %602 : vector<2x384xf32>
    %cst_141 = arith.constant 5.000000e-01 : f32
    %605 = vector.broadcast %cst_141 : f32 to vector<2x384xf32>
    %606 = arith.addf %604, %605 : vector<2x384xf32>
    %607 = vector.extract_strided_slice %606 {offsets = [0, 0], sizes = [2, 128], strides = [1, 1]} : vector<2x384xf32> to vector<2x128xf32>
    %608 = vector.extract_strided_slice %606 {offsets = [0, 128], sizes = [2, 128], strides = [1, 1]} : vector<2x384xf32> to vector<2x128xf32>
    %609 = vector.extract_strided_slice %606 {offsets = [0, 256], sizes = [2, 128], strides = [1, 1]} : vector<2x384xf32> to vector<2x128xf32>
    %610 = vector.extract_strided_slice %598 {offsets = [0, 384], sizes = [2, 128], strides = [1, 1]} : vector<2x512xf32> to vector<2x128xf32>
    %611 = math.tanh %610 : vector<2x128xf32>
    %612 = arith.mulf %608, %569 : vector<2x128xf32>
    %613 = arith.mulf %607, %611 : vector<2x128xf32>
    %614 = arith.addf %612, %613 : vector<2x128xf32>
    %615 = math.tanh %614 : vector<2x128xf32>
    %616 = arith.mulf %609, %615 : vector<2x128xf32>
    %617 = tpu.concatenate %616, %594 in 1 : vector<2x128xf32>, vector<2x128xf32> -> vector<2x256xf32>
    %618 = arith.truncf %617 : vector<2x256xf32> to vector<2x256xbf16>
    %cst_142 = arith.constant dense<0.000000e+00> : vector<2x512xf32>
    %619 = tpu.matmul %618, %139, %cst_142 {dimension_numbers = #tpu.dot_dimension_numbers<[1], [0], [0], [1], [0, 0, 1, 1], [], []>} : vector<2x256xbf16>, vector<256x512xbf16>, vector<2x512xf32> -> vector<2x512xf32>
    %620 = vector.broadcast %140 : vector<1x512xf32> to vector<2x512xf32>
    %621 = arith.addf %619, %620 : vector<2x512xf32>
    %622 = vector.extract_strided_slice %621 {offsets = [0, 0], sizes = [2, 384], strides = [1, 1]} : vector<2x512xf32> to vector<2x384xf32>
    %cst_143 = arith.constant 5.000000e-01 : f32
    %623 = vector.broadcast %cst_143 : f32 to vector<2x384xf32>
    %624 = arith.mulf %623, %622 : vector<2x384xf32>
    %625 = math.tanh %624 : vector<2x384xf32>
    %cst_144 = arith.constant 5.000000e-01 : f32
    %626 = vector.broadcast %cst_144 : f32 to vector<2x384xf32>
    %627 = arith.mulf %626, %625 : vector<2x384xf32>
    %cst_145 = arith.constant 5.000000e-01 : f32
    %628 = vector.broadcast %cst_145 : f32 to vector<2x384xf32>
    %629 = arith.addf %627, %628 : vector<2x384xf32>
    %630 = vector.extract_strided_slice %629 {offsets = [0, 0], sizes = [2, 128], strides = [1, 1]} : vector<2x384xf32> to vector<2x128xf32>
    %631 = vector.extract_strided_slice %629 {offsets = [0, 128], sizes = [2, 128], strides = [1, 1]} : vector<2x384xf32> to vector<2x128xf32>
    %632 = vector.extract_strided_slice %629 {offsets = [0, 256], sizes = [2, 128], strides = [1, 1]} : vector<2x384xf32> to vector<2x128xf32>
    %633 = vector.extract_strided_slice %621 {offsets = [0, 384], sizes = [2, 128], strides = [1, 1]} : vector<2x512xf32> to vector<2x128xf32>
    %634 = math.tanh %633 : vector<2x128xf32>
    %635 = arith.mulf %631, %592 : vector<2x128xf32>
    %636 = arith.mulf %630, %634 : vector<2x128xf32>
    %637 = arith.addf %635, %636 : vector<2x128xf32>
    %638 = math.tanh %637 : vector<2x128xf32>
    %639 = arith.mulf %632, %638 : vector<2x128xf32>
    %640 = vector.extract_strided_slice %137 {offsets = [22, 0], sizes = [2, 512], strides = [1, 1]} : vector<26x512xf32> to vector<2x512xf32>
    %641 = arith.truncf %616 : vector<2x128xf32> to vector<2x128xbf16>
    %cst_146 = arith.constant dense<0.000000e+00> : vector<2x512xf32>
    %642 = tpu.matmul %641, %138, %cst_146 {dimension_numbers = #tpu.dot_dimension_numbers<[1], [0], [0], [1], [0, 0, 1, 1], [], []>} : vector<2x128xbf16>, vector<128x512xbf16>, vector<2x512xf32> -> vector<2x512xf32>
    %643 = arith.addf %640, %642 : vector<2x512xf32>
    %644 = vector.extract_strided_slice %643 {offsets = [0, 0], sizes = [2, 384], strides = [1, 1]} : vector<2x512xf32> to vector<2x384xf32>
    %cst_147 = arith.constant 5.000000e-01 : f32
    %645 = vector.broadcast %cst_147 : f32 to vector<2x384xf32>
    %646 = arith.mulf %645, %644 : vector<2x384xf32>
    %647 = math.tanh %646 : vector<2x384xf32>
    %cst_148 = arith.constant 5.000000e-01 : f32
    %648 = vector.broadcast %cst_148 : f32 to vector<2x384xf32>
    %649 = arith.mulf %648, %647 : vector<2x384xf32>
    %cst_149 = arith.constant 5.000000e-01 : f32
    %650 = vector.broadcast %cst_149 : f32 to vector<2x384xf32>
    %651 = arith.addf %649, %650 : vector<2x384xf32>
    %652 = vector.extract_strided_slice %651 {offsets = [0, 0], sizes = [2, 128], strides = [1, 1]} : vector<2x384xf32> to vector<2x128xf32>
    %653 = vector.extract_strided_slice %651 {offsets = [0, 128], sizes = [2, 128], strides = [1, 1]} : vector<2x384xf32> to vector<2x128xf32>
    %654 = vector.extract_strided_slice %651 {offsets = [0, 256], sizes = [2, 128], strides = [1, 1]} : vector<2x384xf32> to vector<2x128xf32>
    %655 = vector.extract_strided_slice %643 {offsets = [0, 384], sizes = [2, 128], strides = [1, 1]} : vector<2x512xf32> to vector<2x128xf32>
    %656 = math.tanh %655 : vector<2x128xf32>
    %657 = arith.mulf %653, %614 : vector<2x128xf32>
    %658 = arith.mulf %652, %656 : vector<2x128xf32>
    %659 = arith.addf %657, %658 : vector<2x128xf32>
    %660 = math.tanh %659 : vector<2x128xf32>
    %661 = arith.mulf %654, %660 : vector<2x128xf32>
    %662 = tpu.concatenate %661, %639 in 1 : vector<2x128xf32>, vector<2x128xf32> -> vector<2x256xf32>
    %663 = arith.truncf %662 : vector<2x256xf32> to vector<2x256xbf16>
    %cst_150 = arith.constant dense<0.000000e+00> : vector<2x512xf32>
    %664 = tpu.matmul %663, %139, %cst_150 {dimension_numbers = #tpu.dot_dimension_numbers<[1], [0], [0], [1], [0, 0, 1, 1], [], []>} : vector<2x256xbf16>, vector<256x512xbf16>, vector<2x512xf32> -> vector<2x512xf32>
    %665 = vector.broadcast %140 : vector<1x512xf32> to vector<2x512xf32>
    %666 = arith.addf %664, %665 : vector<2x512xf32>
    %667 = vector.extract_strided_slice %666 {offsets = [0, 0], sizes = [2, 384], strides = [1, 1]} : vector<2x512xf32> to vector<2x384xf32>
    %cst_151 = arith.constant 5.000000e-01 : f32
    %668 = vector.broadcast %cst_151 : f32 to vector<2x384xf32>
    %669 = arith.mulf %668, %667 : vector<2x384xf32>
    %670 = math.tanh %669 : vector<2x384xf32>
    %cst_152 = arith.constant 5.000000e-01 : f32
    %671 = vector.broadcast %cst_152 : f32 to vector<2x384xf32>
    %672 = arith.mulf %671, %670 : vector<2x384xf32>
    %cst_153 = arith.constant 5.000000e-01 : f32
    %673 = vector.broadcast %cst_153 : f32 to vector<2x384xf32>
    %674 = arith.addf %672, %673 : vector<2x384xf32>
    %675 = vector.extract_strided_slice %674 {offsets = [0, 0], sizes = [2, 128], strides = [1, 1]} : vector<2x384xf32> to vector<2x128xf32>
    %676 = vector.extract_strided_slice %674 {offsets = [0, 128], sizes = [2, 128], strides = [1, 1]} : vector<2x384xf32> to vector<2x128xf32>
    %677 = vector.extract_strided_slice %674 {offsets = [0, 256], sizes = [2, 128], strides = [1, 1]} : vector<2x384xf32> to vector<2x128xf32>
    %678 = vector.extract_strided_slice %666 {offsets = [0, 384], sizes = [2, 128], strides = [1, 1]} : vector<2x512xf32> to vector<2x128xf32>
    %679 = math.tanh %678 : vector<2x128xf32>
    %680 = arith.mulf %676, %637 : vector<2x128xf32>
    %681 = arith.mulf %675, %679 : vector<2x128xf32>
    %682 = arith.addf %680, %681 : vector<2x128xf32>
    %683 = math.tanh %682 : vector<2x128xf32>
    %684 = arith.mulf %677, %683 : vector<2x128xf32>
    %685 = vector.extract_strided_slice %137 {offsets = [24, 0], sizes = [2, 512], strides = [1, 1]} : vector<26x512xf32> to vector<2x512xf32>
    %686 = arith.truncf %661 : vector<2x128xf32> to vector<2x128xbf16>
    %cst_154 = arith.constant dense<0.000000e+00> : vector<2x512xf32>
    %687 = tpu.matmul %686, %138, %cst_154 {dimension_numbers = #tpu.dot_dimension_numbers<[1], [0], [0], [1], [0, 0, 1, 1], [], []>} : vector<2x128xbf16>, vector<128x512xbf16>, vector<2x512xf32> -> vector<2x512xf32>
    %688 = arith.addf %685, %687 : vector<2x512xf32>
    %689 = vector.extract_strided_slice %688 {offsets = [0, 0], sizes = [2, 384], strides = [1, 1]} : vector<2x512xf32> to vector<2x384xf32>
    %cst_155 = arith.constant 5.000000e-01 : f32
    %690 = vector.broadcast %cst_155 : f32 to vector<2x384xf32>
    %691 = arith.mulf %690, %689 : vector<2x384xf32>
    %692 = math.tanh %691 : vector<2x384xf32>
    %cst_156 = arith.constant 5.000000e-01 : f32
    %693 = vector.broadcast %cst_156 : f32 to vector<2x384xf32>
    %694 = arith.mulf %693, %692 : vector<2x384xf32>
    %cst_157 = arith.constant 5.000000e-01 : f32
    %695 = vector.broadcast %cst_157 : f32 to vector<2x384xf32>
    %696 = arith.addf %694, %695 : vector<2x384xf32>
    %697 = vector.extract_strided_slice %696 {offsets = [0, 0], sizes = [2, 128], strides = [1, 1]} : vector<2x384xf32> to vector<2x128xf32>
    %698 = vector.extract_strided_slice %696 {offsets = [0, 128], sizes = [2, 128], strides = [1, 1]} : vector<2x384xf32> to vector<2x128xf32>
    %699 = vector.extract_strided_slice %696 {offsets = [0, 256], sizes = [2, 128], strides = [1, 1]} : vector<2x384xf32> to vector<2x128xf32>
    %700 = vector.extract_strided_slice %688 {offsets = [0, 384], sizes = [2, 128], strides = [1, 1]} : vector<2x512xf32> to vector<2x128xf32>
    %701 = math.tanh %700 : vector<2x128xf32>
    %702 = arith.mulf %698, %659 : vector<2x128xf32>
    %703 = arith.mulf %697, %701 : vector<2x128xf32>
    %704 = arith.addf %702, %703 : vector<2x128xf32>
    %705 = math.tanh %704 : vector<2x128xf32>
    %706 = arith.mulf %699, %705 : vector<2x128xf32>
    %707 = tpu.concatenate %706, %684 in 1 : vector<2x128xf32>, vector<2x128xf32> -> vector<2x256xf32>
    %708 = arith.truncf %707 : vector<2x256xf32> to vector<2x256xbf16>
    %cst_158 = arith.constant dense<0.000000e+00> : vector<2x512xf32>
    %709 = tpu.matmul %708, %139, %cst_158 {dimension_numbers = #tpu.dot_dimension_numbers<[1], [0], [0], [1], [0, 0, 1, 1], [], []>} : vector<2x256xbf16>, vector<256x512xbf16>, vector<2x512xf32> -> vector<2x512xf32>
    %710 = vector.broadcast %140 : vector<1x512xf32> to vector<2x512xf32>
    %711 = arith.addf %709, %710 : vector<2x512xf32>
    %712 = vector.extract_strided_slice %711 {offsets = [0, 0], sizes = [2, 384], strides = [1, 1]} : vector<2x512xf32> to vector<2x384xf32>
    %cst_159 = arith.constant 5.000000e-01 : f32
    %713 = vector.broadcast %cst_159 : f32 to vector<2x384xf32>
    %714 = arith.mulf %713, %712 : vector<2x384xf32>
    %715 = math.tanh %714 : vector<2x384xf32>
    %cst_160 = arith.constant 5.000000e-01 : f32
    %716 = vector.broadcast %cst_160 : f32 to vector<2x384xf32>
    %717 = arith.mulf %716, %715 : vector<2x384xf32>
    %cst_161 = arith.constant 5.000000e-01 : f32
    %718 = vector.broadcast %cst_161 : f32 to vector<2x384xf32>
    %719 = arith.addf %717, %718 : vector<2x384xf32>
    %720 = vector.extract_strided_slice %719 {offsets = [0, 0], sizes = [2, 128], strides = [1, 1]} : vector<2x384xf32> to vector<2x128xf32>
    %721 = vector.extract_strided_slice %719 {offsets = [0, 128], sizes = [2, 128], strides = [1, 1]} : vector<2x384xf32> to vector<2x128xf32>
    %722 = vector.extract_strided_slice %719 {offsets = [0, 256], sizes = [2, 128], strides = [1, 1]} : vector<2x384xf32> to vector<2x128xf32>
    %723 = vector.extract_strided_slice %711 {offsets = [0, 384], sizes = [2, 128], strides = [1, 1]} : vector<2x512xf32> to vector<2x128xf32>
    %724 = math.tanh %723 : vector<2x128xf32>
    %725 = arith.mulf %721, %682 : vector<2x128xf32>
    %726 = arith.mulf %720, %724 : vector<2x128xf32>
    %727 = arith.addf %725, %726 : vector<2x128xf32>
    %728 = math.tanh %727 : vector<2x128xf32>
    %729 = arith.mulf %722, %728 : vector<2x128xf32>
    %c0_162 = arith.constant 0 : index
    %c0_163 = arith.constant 0 : index
    %730 = vector.load %arg15[%c0_162, %c0_163] : memref<1x128xf32, #tpu.memory_space<vmem>>, vector<1x128xf32>
    %731 = vector.broadcast %730 : vector<1x128xf32> to vector<2x128xf32>
    %732 = arith.mulf %729, %731 : vector<2x128xf32>
    %cst_164 = arith.constant dense<0.000000e+00> : vector<2xf32>
    %733 = vector.multi_reduction <add>, %732, %cst_164 [1] : vector<2x128xf32> to vector<2xf32>
    %734 = vector.shape_cast %733 : vector<2xf32> to vector<2x1xf32>
    %c0_165 = arith.constant 0 : index
    %c0_166 = arith.constant 0 : index
    %735 = vector.load %arg16[%c0_165, %c0_166] : memref<1x1xf32, #tpu.memory_space<vmem>>, vector<1x1xf32>
    %736 = vector.broadcast %735 : vector<1x1xf32> to vector<2x1xf32>
    %737 = arith.addf %734, %736 : vector<2x1xf32>
    %c0_167 = arith.constant 0 : index
    %c0_168 = arith.constant 0 : index
    %738 = vector.load %arg17[%c0_167, %c0_168] : memref<2x1xf32, #tpu.memory_space<vmem>>, vector<2x1xf32>
    tpu.vector_store %arg17[%c0_167, %c0_168], %737 {strides = array<i32>} : memref<2x1xf32, #tpu.memory_space<vmem>>, vector<2x1xf32>,
    return
  }
}

</mosaic_0001>

<bundles_post_ra>
// kernel: forward.1
= control target key start
LH: loop header
LB: loop body
LE: loop exit
PB: predicated region body
PF: predicated region fallthrough
CT: control target
= control target key end

     0   :  { %v13346_v0 = vmov 0   ;;  %v61_v54 = vlaneseq  ;;  %s7706_s21 = smov 127   ;;  %s7707_s22 = smov 126   ;;  %vm242_vm0 = vcmask 1039360   ;;  %vm358_vm1 = vcmask 1031168   ;;  %s13327_s1 = inlined_call_operand.vmem [shape: f32[9,48,1], index: 1, kind: input, shape index: {}]   ;;  %s13328_s0 = inlined_call_operand.vmem [shape: f32[2,256], index: 0, kind: input, shape index: {}]   ;;  %s13329_s2 = inlined_call_operand.vmem [shape: f32[48,1], index: 2, kind: input, shape index: {}]   ;;  %s13330_s3 = inlined_call_operand.vmem [shape: f32[245,62], index: 3, kind: input, shape index: {}]   ;;  %s13331_s5 = inlined_call_operand.vmem [shape: f32[20,1], index: 5, kind: input, shape index: {}]   ;;  %s13332_s4 = inlined_call_operand.vmem [shape: bf16[20,216], index: 4, kind: input, shape index: {}]   ;;  %s13333_s6 = inlined_call_operand.vmem [shape: f32[105,520], index: 6, kind: input, shape index: {}]   ;;  %s13334_s9 = inlined_call_operand.vmem [shape: f32[520,20], index: 9, kind: input, shape index: {}]   ;;  %s13335_s7 = inlined_call_operand.vmem [shape: f32[20,520], index: 7, kind: input, shape index: {}]   ;;  %s13336_s8 = inlined_call_operand.vmem [shape: f32[26,520], index: 8, kind: input, shape index: {}]   ;;  %s13337_s10 = inlined_call_operand.vmem [shape: bf16[20,512], index: 10, kind: input, shape index: {}]   ;;  %s13338_s12 = inlined_call_operand.vmem [shape: bf16[128,512], index: 12, kind: input, shape index: {}]   ;;  %s13339_s13 = inlined_call_operand.vmem [shape: bf16[256,512], index: 13, kind: input, shape index: {}]   ;;  %s13340_s11 = inlined_call_operand.vmem [shape: f32[1,512], index: 11, kind: input, shape index: {}]   ;;  %s13341_s14 = inlined_call_operand.vmem [shape: f32[1,512], index: 14, kind: input, shape index: {}]   ;;  %s13342_s16 = inlined_call_operand.<no memory space> [shape: f32[1,1], index: 16, kind: input, shape index: {}]   ;;  %s13343_s15 = inlined_call_operand.vmem [shape: f32[1,128], index: 15, kind: input, shape index: {}]   ;;  %s13344_s17 = inlined_call_operand.vmem [shape: f32[2,1], index: 17, kind: output, shape index: {}]  }
   0x1   :  { %13857 = sst [smem:[#allocation78_spill]] %s13327_s1  ;;  %6816 = vset.pattern.permute.xlu1 %v13346_v0  ;;  %6815 = vset.pattern.permute.xlu0 %v13346_v0  ;;  %s7708_s23 = smov 125   ;;  %vm474_vm2 = vcmask 1022976   ;;  %vm590_vm3 = vcmask 1014784   ;;  %vm706_vm4 = vcmask 1006592   ;;  %vm822_vm5 = vcmask 998400  }
   0x2   :  { %13858 = sst [smem:[#allocation79_spill]] %s13328_s0  ;;  %s13859_s26 = sld [smem:[#allocation78_spill]]  ;;  %1668 = vmatprep.subr.bf16.mxu1 %v13346_v0  ;;  %v7979_v55 = vshrl.u32 %v61_v54, 7  ;;  %vm938_vm6 = vcmask 990208   ;;  %vm1054_vm7 = vcmask 982016   ;;  %vm1315_vm8 = vcmask 1044480  }
   0x3   :  { %s13862_s20 = sld [smem:[#allocation79_spill]]  ;;  %s7709_s24 = smov 124   ;;  %vm1296_vm9 = vcmask 957440   ;;  %vm1657_vm10 = vcmask 719872   ;;  %vm1432_vm11 = vcmask 441344   ;;  %vm1664_vm12 = vcmask 1043456  }
   0x4   :  { %v7982_v56 = vsub.s32 0, %v7979_v55  ;;  %v7985_v57 = vsub.s32 2, %v7979_v55  ;;  %s7710_s25 = smov 123   ;;  %s7711_s27 = smov 122   ;;  %vm1826_vm13 = vcmask 1040384   ;;  %vm7725_vm14 = vmmov 1  }
   0x5   :  { %s7713_s18 = smov 120   ;;  %s7717_s0 = smov 54   ;;  %vm9163_vm15 = vmpackc.low %vm1826_vm13, %vm7725_vm14 }
   0x6   :  { %13860 = vst [vmem:[#allocation3_spill] sm:$0xff] %v7982_v56  ;;  %13861 = vst [vmem:[#allocation4_spill] sm:$0xff] %v7985_v57  ;;  %s7720_s28 = smov 50   ;;  %s7721_s29 = smov 49  }
   0x8   :  { %v6257_v1 = vld [vmem:[%s13859_s26 + $0x38] sm:$0xff]  ;;  %v6256_v2 = vld [vmem:[%s13859_s26 + $0x30] sm:$0xff]  ;;  %v6262_v4 = vld [vmem:[%s13859_s26 + $0x60] sm:$0xff] }
   0x9   :  { %171 = vperm.xlu1 %6816, %v6257_v1   ;;  %166 = vperm.xlu0 %6815, %v6256_v2   ;;  %v6268_v3 = vld [vmem:[%s13859_s26 + $0x90] sm:$0xff]  ;;  %v6274_v5 = vld [vmem:[%s13859_s26 + $0xc0] sm:$0xff]  ;;  %v6263_v6 = vld [vmem:[%s13859_s26 + $0x68] sm:$0xff] }
   0xa   :  { %v6269_v7 = vld [vmem:[%s13859_s26 + $0x98] sm:$0xff]  ;;  %v6258_v8 = vld [vmem:[%s13859_s26 + $0x40] sm:$0xff]  ;;  %v6264_v9 = vld [vmem:[%s13859_s26 + $0x70] sm:$0xff] }
   0xb   :  { %v6280_v10 = vld [vmem:[%s13859_s26 + $0xf0] sm:$0xff]  ;;  %v6286_v11 = vld [vmem:[%s13859_s26 + $0x120] sm:$0xff]  ;;  %v6275_v12 = vld [vmem:[%s13859_s26 + $0xc8] sm:$0xff] }
   0xc   :  { %v6270_v13 = vld [vmem:[%s13859_s26 + $0xa0] sm:$0xff]  ;;  %v6259_v14 = vld [vmem:[%s13859_s26 + $0x48] sm:$0xff]  ;;  %v6292_v15 = vld [vmem:[%s13859_s26 + $0x150] sm:$0xff] }
   0xd   :  { %398 = vperm.xlu1 %6816, %v6268_v3   ;;  %282 = vperm.xlu0 %6815, %v6262_v4   ;;  %v6281_v16 = vld [vmem:[%s13859_s26 + $0xf8] sm:$0xff]  ;;  %v6276_v17 = vld [vmem:[%s13859_s26 + $0xd0] sm:$0xff]  ;;  %v6298_v19 = vld [vmem:[%s13859_s26 + $0x180] sm:$0xff] }
   0xe   :  { %v6265_v18 = vld [vmem:[%s13859_s26 + $0x78] sm:$0xff]  ;;  %v6287_v20 = vld [vmem:[%s13859_s26 + $0x128] sm:$0xff]  ;;  %v6260_v22 = vld [vmem:[%s13859_s26 + $0x50] sm:$0xff] }
   0xf   :  { %v6271_v21 = vld [vmem:[%s13859_s26 + $0xa8] sm:$0xff]  ;;  %v6293_v23 = vld [vmem:[%s13859_s26 + $0x158] sm:$0xff]  ;;  %v6282_v24 = vld [vmem:[%s13859_s26 + $0x100] sm:$0xff] }
  0x10   :  { %v6277_v25 = vld [vmem:[%s13859_s26 + $0xd8] sm:$0xff]  ;;  %v6266_v26 = vld [vmem:[%s13859_s26 + $0x80] sm:$0xff]  ;;  %v6299_v27 = vld [vmem:[%s13859_s26 + $0x188] sm:$0xff] }
  0x11   :  { %514 = vperm.xlu1 %6816, %v6274_v5   ;;  %287 = vperm.xlu0 %6815, %v6263_v6   ;;  %v6288_v28 = vld [vmem:[%s13859_s26 + $0x130] sm:$0xff]  ;;  %v6261_v30 = vld [vmem:[%s13859_s26 + $0x58] sm:$0xff]  ;;  %v6294_v31 = vld [vmem:[%s13859_s26 + $0x160] sm:$0xff] }
  0x12   :  { %v6272_v29 = vld [vmem:[%s13859_s26 + $0xb0] sm:$0xff]  ;;  %v6283_v32 = vld [vmem:[%s13859_s26 + $0x108] sm:$0xff]  ;;  %v6278_v33 = vld [vmem:[%s13859_s26 + $0xe0] sm:$0xff] }
  0x13   :  { %v6267_v34 = vld [vmem:[%s13859_s26 + $0x88] sm:$0xff]  ;;  %v6300_v35 = vld [vmem:[%s13859_s26 + $0x190] sm:$0xff]  ;;  %v6289_v36 = vld [vmem:[%s13859_s26 + $0x138] sm:$0xff] }
  0x14   :  { %v6284_v37 = vld [vmem:[%s13859_s26 + $0x110] sm:$0xff]  ;;  %v6273_v38 = vld [vmem:[%s13859_s26 + $0xb8] sm:$0xff]  ;;  %v6279_v39 = vld [vmem:[%s13859_s26 + $0xe8] sm:$0xff] }
  0x15   :  { %403 = vperm.xlu1 %6816, %v6269_v7   ;;  %176 = vperm.xlu0 %6815, %v6258_v8   ;;  %v6295_v40 = vld [vmem:[%s13859_s26 + $0x168] sm:$0xff]  ;;  %v6301_v41 = vld [vmem:[%s13859_s26 + $0x198] sm:$0xff]  ;;  %v6290_v42 = vld [vmem:[%s13859_s26 + $0x140] sm:$0xff] }
  0x16   :  { %v6296_v43 = vld [vmem:[%s13859_s26 + $0x170] sm:$0xff]  ;;  %v6285_v44 = vld [vmem:[%s13859_s26 + $0x118] sm:$0xff]  ;;  %v6302_v45 = vld [vmem:[%s13859_s26 + $0x1a0] sm:$0xff] }
  0x17   :  { %v6291_v46 = vld [vmem:[%s13859_s26 + $0x148] sm:$0xff]  ;;  %v6297_v48 = vld [vmem:[%s13859_s26 + $0x178] sm:$0xff]  ;;  %v97_v50 = vld [vmem:[%s13859_s26] sm:$0xff] }
  0x18   :  { %v6303_v47 = vld [vmem:[%s13859_s26 + $0x1a8] sm:$0xff]  ;;  %v100_v51 = vld [vmem:[%s13859_s26 + $0x18] sm:$0xff]  ;;  %v99_v52 = vld [vmem:[%s13859_s26 + $0x10] sm:$0xff] }
  0x19   :  { %292 = vperm.xlu1 %6816, %v6264_v9   ;;  %630 = vperm.xlu0 %6815, %v6280_v10   ;;  %v98_v49 = vld [vmem:[%s13859_s26 + $0x8] sm:$0xff]  ;;  %v101_v53 = vld [vmem:[%s13859_s26 + $0x20] sm:$0xff] }
  0x1a   :  { %v7990_v58 = vld [vmem:[%s13862_s20] sm:$0xf]  ;;  %v102_v54 = vld [vmem:[%s13859_s26 + $0x28] sm:$0xff]  ;;  %s7712_s26 = smov 121   ;;  %s7718_s20 = smov 52  }
  0x1b   :  { %v64_v59 = vrot.slane %v7990_v58, %v7982_v56  ;;  %v68_v60 = vrot.slane %v7990_v58, %v7985_v57 }
  0x1d   :  { %746 = vperm.xlu1 %6816, %v6286_v11   ;;  %519 = vperm.xlu0 %6815, %v6275_v12   ;;  %v7997_v61 = vrot.slane %v64_v59, %v7982_v56  ;;  %v8000_v62 = vrot.slane %v68_v60, %v7982_v56 }
  0x21   :  { %408 = vperm.xlu1 %6816, %v6270_v13   ;;  %181 = vperm.xlu0 %6815, %v6259_v14  }
  0x25   :  { %862 = vperm.xlu1 %6816, %v6292_v15   ;;  %635 = vperm.xlu0 %6815, %v6281_v16  }
  0x29   :  { %524 = vperm.xlu1 %6816, %v6276_v17   ;;  %297 = vperm.xlu0 %6815, %v6265_v18  }
  0x2d   :  { %978 = vperm.xlu1 %6816, %v6298_v19   ;;  %751 = vperm.xlu0 %6815, %v6287_v20  }
  0x31   :  { %413 = vperm.xlu1 %6816, %v6271_v21   ;;  %186 = vperm.xlu0 %6815, %v6260_v22  }
  0x35   :  { %867 = vperm.xlu1 %6816, %v6293_v23   ;;  %640 = vperm.xlu0 %6815, %v6282_v24  }
  0x39   :  { %529 = vperm.xlu1 %6816, %v6277_v25   ;;  %302 = vperm.xlu0 %6815, %v6266_v26  }
  0x3d   :  { %983 = vperm.xlu1 %6816, %v6299_v27   ;;  %756 = vperm.xlu0 %6815, %v6288_v28  }
  0x41   :  { %418 = vperm.xlu1 %6816, %v6272_v29   ;;  %191 = vperm.xlu0 %6815, %v6261_v30  }
  0x45   :  { %872 = vperm.xlu1 %6816, %v6294_v31   ;;  %645 = vperm.xlu0 %6815, %v6283_v32  }
  0x49   :  { %534 = vperm.xlu1 %6816, %v6278_v33   ;;  %307 = vperm.xlu0 %6815, %v6267_v34  }
  0x4d   :  { %988 = vperm.xlu1 %6816, %v6300_v35   ;;  %761 = vperm.xlu0 %6815, %v6289_v36  }
  0x51   :  { %650 = vperm.xlu1 %6816, %v6284_v37   ;;  %423 = vperm.xlu0 %6815, %v6273_v38  }
  0x55   :  { %539 = vperm.xlu1 %6816, %v6279_v39   ;;  %877 = vperm.xlu0 %6815, %v6295_v40  }
  0x59   :  { %993 = vperm.xlu1 %6816, %v6301_v41   ;;  %766 = vperm.xlu0 %6815, %v6290_v42  }
  0x5d   :  { %882 = vperm.xlu1 %6816, %v6296_v43   ;;  %655 = vperm.xlu0 %6815, %v6285_v44   ;;  %v8059_v44 = vsub.s32 1, %v7979_v55 }
  0x5f   :  { %13863 = vst [vmem:[#allocation5_spill] sm:$0xff] %v8059_v44 }
  0x61   :  { %998 = vperm.xlu1 %6816, %v6302_v45   ;;  %771 = vperm.xlu0 %6815, %v6291_v46   ;;  %v8062_v45 = vsub.s32 3, %v7979_v55  ;;  %v1085_v55 = vld [vmem:[%s13329_s2] sm:$0xff] }
  0x63   :  { %13864 = vst [vmem:[#allocation6_spill] sm:$0xff] %v8062_v45 }
  0x65   :  { %1003 = vperm.xlu1 %6816, %v6303_v47   ;;  %887 = vperm.xlu0 %6815, %v6297_v48  }
  0x69   :  { %110 = vperm.xlu1 %6816, %v98_v49   ;;  %105 = vperm.xlu0 %6815, %v97_v50   ;;  %v82_v50 = vrot.slane %v7990_v58, %v8059_v44 }
  0x6b   :  { %v8089_v59 = vrot.slane %v82_v50, %v8059_v44 }
  0x6d   :  { %120 = vperm.xlu1 %6816, %v100_v51   ;;  %115 = vperm.xlu0 %6815, %v99_v52   ;;  %v86_v51 = vrot.slane %v7990_v58, %v8062_v45 }
  0x6f   :  { %v8092_v58 = vrot.slane %v86_v51, %v8059_v44 }
  0x71   :  { %125 = vperm.xlu0 %6815, %v101_v53  }
  0x88   :  { %v172_v63 = vpop.permute.xlu1 %171  ;;  %v167_v1 = vpop.permute.xlu0 %166 }
  0x89   :  { %v194_v2 = vmul.f32 %v167_v1, %v7997_v61  ;;  %v195_v3 = vmul.f32 %v167_v1, %v8000_v62  ;;  %v196_v8 = vmul.f32 %v172_v63, %v7997_v61  ;;  %v197_v9 = vmul.f32 %v172_v63, %v8000_v62 }
  0x8b   :  { %220 = vrot.lane.b32.xlu0 %v195_v3, %s7706_s21  ;;  %218 = vrot.lane.b32.xlu1 %v194_v2, %s7706_s21 }
  0x8c   :  { %v399_v4 = vpop.permute.xlu1 %398  ;;  %v283_v5 = vpop.permute.xlu0 %282 }
  0x8d   :  { %v310_v6 = vmul.f32 %v283_v5, %v7997_v61  ;;  %v311_v7 = vmul.f32 %v283_v5, %v8000_v62  ;;  %v426_v14 = vmul.f32 %v399_v4, %v7997_v61  ;;  %v427_v15 = vmul.f32 %v399_v4, %v8000_v62 }
  0x8f   :  { %336 = vrot.lane.b32.xlu0 %v311_v7, %s7707_s22  ;;  %334 = vrot.lane.b32.xlu1 %v310_v6, %s7707_s22 }
  0x90   :  { %v515_v10 = vpop.permute.xlu1 %514  ;;  %v288_v11 = vpop.permute.xlu0 %287 }
  0x91   :  { %v312_v18 = vmul.f32 %v288_v11, %v7997_v61  ;;  %v313_v19 = vmul.f32 %v288_v11, %v8000_v62  ;;  %v542_v22 = vmul.f32 %v515_v10, %v7997_v61  ;;  %v543_v23 = vmul.f32 %v515_v10, %v8000_v62 }
  0x93   :  { %222 = vrot.lane.b32.xlu0 %v196_v8, %s7706_s21  ;;  %224 = vrot.lane.b32.xlu1 %v197_v9, %s7706_s21 }
  0x94   :  { %v404_v12 = vpop.permute.xlu1 %403  ;;  %v177_v13 = vpop.permute.xlu0 %176 }
  0x95   :  { %v198_v26 = vmul.f32 %v177_v13, %v7997_v61  ;;  %v199_v27 = vmul.f32 %v177_v13, %v8000_v62  ;;  %v428_v30 = vmul.f32 %v404_v12, %v7997_v61  ;;  %v429_v31 = vmul.f32 %v404_v12, %v8000_v62 }
  0x97   :  { %450 = vrot.lane.b32.xlu0 %v426_v14, %s7708_s23  ;;  %452 = vrot.lane.b32.xlu1 %v427_v15, %s7708_s23 }
  0x98   :  { %v293_v16 = vpop.permute.xlu1 %292  ;;  %v631_v17 = vpop.permute.xlu0 %630 }
  0x99   :  { %v658_v34 = vmul.f32 %v631_v17, %v7997_v61  ;;  %v659_v35 = vmul.f32 %v631_v17, %v8000_v62  ;;  %v314_v38 = vmul.f32 %v293_v16, %v7997_v61  ;;  %v315_v39 = vmul.f32 %v293_v16, %v8000_v62 }
  0x9b   :  { %338 = vrot.lane.b32.xlu0 %v312_v18, %s7707_s22  ;;  %340 = vrot.lane.b32.xlu1 %v313_v19, %s7707_s22 }
  0x9c   :  { %v747_v20 = vpop.permute.xlu1 %746  ;;  %v520_v21 = vpop.permute.xlu0 %519 }
  0x9d   :  { %v544_v42 = vmul.f32 %v520_v21, %v7997_v61  ;;  %v545_v43 = vmul.f32 %v520_v21, %v8000_v62  ;;  %v774_v48 = vmul.f32 %v747_v20, %v7997_v61  ;;  %v775_v49 = vmul.f32 %v747_v20, %v8000_v62 }
  0x9f   :  { %566 = vrot.lane.b32.xlu0 %v542_v22, %s7709_s24  ;;  %568 = vrot.lane.b32.xlu1 %v543_v23, %s7709_s24 }
  0xa0   :  { %v409_v24 = vpop.permute.xlu1 %408  ;;  %v182_v25 = vpop.permute.xlu0 %181 }
  0xa1   :  { %v200_v1 = vmul.f32 %v182_v25, %v8089_v59  ;;  %v201_v2 = vmul.f32 %v182_v25, %v8092_v58  ;;  %v430_v5 = vmul.f32 %v409_v24, %v7997_v61  ;;  %v431_v6 = vmul.f32 %v409_v24, %v8000_v62 }
  0xa3   :  { %228 = vrot.lane.b32.xlu0 %v199_v27, %s7706_s21  ;;  %226 = vrot.lane.b32.xlu1 %v198_v26, %s7706_s21 }
  0xa4   :  { %v8030_v28 = vpop.permute.xlu1 %862  ;;  %v636_v29 = vpop.permute.xlu0 %635 }
  0xa5   :  { %v660_v9 = vmul.f32 %v636_v29, %v7997_v61  ;;  %v661_v10 = vmul.f32 %v636_v29, %v8000_v62  ;;  %v890_v13 = vmul.f32 %v8030_v28, %v7997_v61  ;;  %v891_v14 = vmul.f32 %v8030_v28, %v8000_v62 }
  0xa7   :  { %456 = vrot.lane.b32.xlu0 %v429_v31, %s7708_s23  ;;  %454 = vrot.lane.b32.xlu1 %v428_v30, %s7708_s23 }
  0xa8   :  { %v8036_v32 = vpop.permute.xlu1 %524  ;;  %v8038_v33 = vpop.permute.xlu0 %297 }
  0xa9   :  { %v316_v17 = vmul.f32 %v8038_v33, %v8089_v59  ;;  %v317_v18 = vmul.f32 %v8038_v33, %v8092_v58  ;;  %v546_v21 = vmul.f32 %v8036_v32, %v7997_v61  ;;  %v547_v22 = vmul.f32 %v8036_v32, %v8000_v62  ;;  %v1086_v32 = vld [vmem:[%s13329_s2 + $0x8] sm:$0xff] }
  0xab   :  { %684 = vrot.lane.b32.xlu0 %v659_v35, %s7710_s25  ;;  %682 = vrot.lane.b32.xlu1 %v658_v34, %s7710_s25 }
  0xac   :  { %v8044_v36 = vpop.permute.xlu1 %978  ;;  %v8046_v37 = vpop.permute.xlu0 %751 }
  0xad   :  { %v776_v24 = vmul.f32 %v8046_v37, %v7997_v61  ;;  %v777_v25 = vmul.f32 %v8046_v37, %v8000_v62  ;;  %v1006_v28 = vmul.f32 %v8044_v36, %v7997_v61  ;;  %v1007_v29 = vmul.f32 %v8044_v36, %v8000_v62 }
  0xaf   :  { %344 = vrot.lane.b32.xlu0 %v315_v39, %s7707_s22  ;;  %342 = vrot.lane.b32.xlu1 %v314_v38, %s7707_s22 }
  0xb0   :  { %v8052_v40 = vpop.permute.xlu1 %413  ;;  %v8054_v41 = vpop.permute.xlu0 %186 }
  0xb1   :  { %v202_v33 = vmul.f32 %v8054_v41, %v8089_v59  ;;  %v432_v34 = vmul.f32 %v8052_v40, %v8089_v59  ;;  %v203_v35 = vmul.f32 %v8054_v41, %v8092_v58  ;;  %v433_v38 = vmul.f32 %v8052_v40, %v8092_v58 }
  0xb3   :  { %572 = vrot.lane.b32.xlu0 %v545_v43, %s7709_s24  ;;  %570 = vrot.lane.b32.xlu1 %v544_v42, %s7709_s24 }
  0xb4   :  { %v8066_v46 = vpop.permute.xlu1 %867  ;;  %v8068_v47 = vpop.permute.xlu0 %640 }
  0xb5   :  { %v662_v39 = vmul.f32 %v8068_v47, %v7997_v61  ;;  %v892_v41 = vmul.f32 %v8066_v46, %v7997_v61  ;;  %v893_v40 = vmul.f32 %v8066_v46, %v8000_v62 }
  0xb7   :  { %800 = vrot.lane.b32.xlu0 %v775_v49, %s7711_s27  ;;  %798 = vrot.lane.b32.xlu1 %v774_v48, %s7711_s27  ;;  %v663_v48 = vmul.f32 %v8068_v47, %v8000_v62 }
  0xb8   :  { %v8078_v52 = vpop.permute.xlu1 %529  ;;  %v8080_v53 = vpop.permute.xlu0 %302 }
  0xb9   :  { %v318_v49 = vmul.f32 %v8080_v53, %v8089_v59  ;;  %v548_v47 = vmul.f32 %v8078_v52, %v8089_v59 }
  0xbb   :  { %130 = vperm.xlu0 %6815, %v102_v54   ;;  %1093 = vperm.xlu1 %6816, %v1085_v55   ;;  %v319_v54 = vmul.f32 %v8080_v53, %v8092_v58 }
  0xbc   :  { %v8094_v60 = vpop.permute.xlu1 %983  ;;  %v8096_v63 = vpop.permute.xlu0 %756 }
  0xbd   :  { %v1008_v53 = vmul.f32 %v8094_v60, %v7997_v61 }
  0xbf   :  { %232 = vrot.lane.b32.xlu0 %v201_v2, %s7706_s21  ;;  %230 = vrot.lane.b32.xlu1 %v200_v1, %s7706_s21  ;;  %v549_v1 = vmul.f32 %v8078_v52, %v8092_v58  ;;  %v778_v2 = vmul.f32 %v8096_v63, %v7997_v61  ;;  %v1087_v52 = vld [vmem:[%s13329_s2 + $0x10] sm:$0xff] }
  0xc0   :  { %v8102_v3 = vpop.permute.xlu1 %418  ;;  %v8104_v4 = vpop.permute.xlu0 %191 }
  0xc3   :  { %460 = vrot.lane.b32.xlu0 %v431_v6, %s7708_s23  ;;  %458 = vrot.lane.b32.xlu1 %v430_v5, %s7708_s23  ;;  %v779_v5 = vmul.f32 %v8096_v63, %v8000_v62  ;;  %v204_v63 = vmul.f32 %v8104_v4, %v8089_v59 }
  0xc4   :  { %v8110_v7 = vpop.permute.xlu1 %872  ;;  %v8112_v8 = vpop.permute.xlu0 %645 }
  0xc7   :  { %688 = vrot.lane.b32.xlu0 %v661_v10, %s7710_s25  ;;  %686 = vrot.lane.b32.xlu1 %v660_v9, %s7710_s25  ;;  %v1009_v10 = vmul.f32 %v8094_v60, %v8000_v62  ;;  %v434_v60 = vmul.f32 %v8102_v3, %v8089_v59 }
  0xc8   :  { %v8118_v11 = vpop.permute.xlu1 %534  ;;  %v8120_v12 = vpop.permute.xlu0 %307 }
  0xcb   :  { %916 = vrot.lane.b32.xlu0 %v891_v14, %s7712_s26  ;;  %914 = vrot.lane.b32.xlu1 %v890_v13, %s7712_s26 }
  0xcc   :  { %v8128_v15 = vpop.permute.xlu1 %988  ;;  %v8130_v16 = vpop.permute.xlu0 %761 }
  0xcf   :  { %348 = vrot.lane.b32.xlu0 %v317_v18, %s7707_s22  ;;  %346 = vrot.lane.b32.xlu1 %v316_v17, %s7707_s22  ;;  %v205_v17 = vmul.f32 %v8104_v4, %v8092_v58  ;;  %v664_v4 = vmul.f32 %v8112_v8, %v8089_v59 }
  0xd0   :  { %v8138_v19 = vpop.permute.xlu1 %650  ;;  %v8140_v20 = vpop.permute.xlu0 %423 }
  0xd3   :  { %576 = vrot.lane.b32.xlu0 %v547_v22, %s7709_s24  ;;  %574 = vrot.lane.b32.xlu1 %v546_v21, %s7709_s24  ;;  %v435_v22 = vmul.f32 %v8102_v3, %v8092_v58  ;;  %v894_v3 = vmul.f32 %v8110_v7, %v7997_v61 }
  0xd4   :  { %v8148_v23 = vpop.permute.xlu0 %877  ;;  %v8154_v26 = vpop.permute.xlu1 %539 }
  0xd7   :  { %804 = vrot.lane.b32.xlu0 %v777_v25, %s7711_s27  ;;  %802 = vrot.lane.b32.xlu1 %v776_v24, %s7711_s27 }
  0xd8   :  { %v8158_v27 = vpop.permute.xlu0 %766  ;;  %v8164_v30 = vpop.permute.xlu1 %993 }
  0xdb   :  { %1032 = vrot.lane.b32.xlu0 %v1007_v29, %s7713_s18  ;;  %1030 = vrot.lane.b32.xlu1 %v1006_v28, %s7713_s18  ;;  %v665_v28 = vmul.f32 %v8112_v8, %v8092_v58  ;;  %v320_v8 = vmul.f32 %v8120_v12, %v8089_v59 }
  0xdc   :  { %v8168_v31 = vpop.permute.xlu0 %655  ;;  %v8180_v36 = vpop.permute.xlu1 %882 }
  0xdf   :  { %234 = vrot.lane.b32.xlu0 %v202_v33, %s7706_s21  ;;  %1098 = vperm.xlu1 %6816, %v1086_v32   ;;  %v895_v33 = vmul.f32 %v8110_v7, %v8000_v62  ;;  %v550_v7 = vmul.f32 %v8118_v11, %v8089_v59 }
  0xe0   :  { %v8182_v37 = vpop.permute.xlu0 %771  ;;  %v8190_v42 = vpop.permute.xlu1 %998 }
  0xe3   :  { %462 = vrot.lane.b32.xlu0 %v432_v34, %s7708_s23  ;;  %236 = vrot.lane.b32.xlu1 %v203_v35, %s7706_s21 }
  0xe4   :  { %v8192_v43 = vpop.permute.xlu0 %887  ;;  %v8206_v50 = vpop.permute.xlu1 %1003 }
  0xe7   :  { %690 = vrot.lane.b32.xlu0 %v662_v39, %s7710_s25  ;;  %464 = vrot.lane.b32.xlu1 %v433_v38, %s7708_s23  ;;  %v321_v38 = vmul.f32 %v8120_v12, %v8092_v58 }
  0xe8   :  { %v8208_v51 = vpop.permute.xlu0 %105  ;;  %v8216_v55 = vpop.permute.xlu1 %110 }
  0xeb   :  { %918 = vrot.lane.b32.xlu0 %v892_v41, %s7712_s26  ;;  %692 = vrot.lane.b32.xlu1 %v663_v48, %s7710_s25  ;;  %v551_v48 = vmul.f32 %v8118_v11, %v8092_v58  ;;  %v1010_v11 = vmul.f32 %v8128_v15, %v7997_v61 }
  0xec   :  { %v8218_v46 = vpop.permute.xlu0 %115  ;;  %v8232_v6 = vpop.permute.xlu1 %120 }
  0xef   :  { %350 = vrot.lane.b32.xlu0 %v318_v49, %s7707_s22  ;;  %920 = vrot.lane.b32.xlu1 %v893_v40, %s7712_s26  ;;  %v780_v49 = vmul.f32 %v8130_v16, %v8089_v59 }
  0xf0   :  { %v8234_v9 = vpop.permute.xlu0 %125 }
  0xf3   :  { %578 = vrot.lane.b32.xlu0 %v548_v47, %s7709_s24  ;;  %352 = vrot.lane.b32.xlu1 %v319_v54, %s7707_s22  ;;  %v781_v47 = vmul.f32 %v8130_v16, %v8092_v58  ;;  %v1011_v54 = vmul.f32 %v8128_v15, %v8000_v62  ;;  %v1088_v16 = vld [vmem:[%s13329_s2 + $0x18] sm:$0xff] }
  0xf7   :  { %806 = vrot.lane.b32.xlu0 %v778_v2, %s7711_s27  ;;  %580 = vrot.lane.b32.xlu1 %v549_v1, %s7709_s24 }
  0xfb   :  { %1034 = vrot.lane.b32.xlu0 %v1008_v53, %s7713_s18  ;;  %808 = vrot.lane.b32.xlu1 %v779_v5, %s7711_s27  ;;  %v436_v53 = vmul.f32 %v8140_v20, %v8089_v59 }
  0xfd   :  { %v8243_v13 = vpop.permute.xlu0 %220  ;;  %v8245_v14 = vpop.permute.xlu1 %218 }
  0xff   :  { %1103 = vperm.xlu0 %6815, %v1087_v52   ;;  %1036 = vrot.lane.b32.xlu1 %v1009_v10, %s7713_s18  ;;  %v666_v52 = vmul.f32 %v8138_v19, %v8089_v59  ;;  %v437_v10 = vmul.f32 %v8140_v20, %v8092_v58  ;;  %v552_v20 = vmul.f32 %v8154_v26, %v8089_v59 }
 0x101   :  { %v8252_v18 = vpop.permute.xlu0 %336  ;;  %v8254_v21 = vpop.permute.xlu1 %334 }
 0x103   :  { %240 = vrot.lane.b32.xlu0 %v205_v17, %s7706_s21  ;;  %238 = vrot.lane.b32.xlu1 %v204_v63, %s7706_s21  ;;  %v667_v63 = vmul.f32 %v8138_v19, %v8092_v58  ;;  %v896_v17 = vmul.f32 %v8148_v23, %v8089_v59 }
 0x105   :  { %v8262_v24 = vpop.permute.xlu0 %222  ;;  %v8264_v25 = vpop.permute.xlu1 %224 }
 0x107   :  { %468 = vrot.lane.b32.xlu0 %v435_v22, %s7708_s23  ;;  %466 = vrot.lane.b32.xlu1 %v434_v60, %s7708_s23 }
 0x109   :  { %v8272_v29 = vpop.permute.xlu0 %450  ;;  %v8274_v32 = vpop.permute.xlu1 %452 }
 0x10b   :  { %696 = vrot.lane.b32.xlu0 %v665_v28, %s7710_s25  ;;  %694 = vrot.lane.b32.xlu1 %v664_v4, %s7710_s25  ;;  %v897_v4 = vmul.f32 %v8148_v23, %v8092_v58  ;;  %v1012_v23 = vmul.f32 %v8164_v30, %v8089_v59 }
 0x10d   :  { %v8282_v34 = vpop.permute.xlu0 %338  ;;  %v8284_v35 = vpop.permute.xlu1 %340 }
 0x10f   :  { %924 = vrot.lane.b32.xlu0 %v895_v33, %s7712_s26  ;;  %922 = vrot.lane.b32.xlu1 %v894_v3, %s7712_s26  ;;  %v553_v3 = vmul.f32 %v8154_v26, %v8092_v58  ;;  %v782_v33 = vmul.f32 %v8158_v27, %v8089_v59  ;;  %v1089_v26 = vld [vmem:[%s13329_s2 + $0x20] sm:$0xff] }
 0x111   :  { %v8292_v39 = vpop.permute.xlu0 %566  ;;  %v8294_v41 = vpop.permute.xlu1 %568 }
 0x113   :  { %356 = vrot.lane.b32.xlu0 %v321_v38, %s7707_s22  ;;  %354 = vrot.lane.b32.xlu1 %v320_v8, %s7707_s22  ;;  %v783_v8 = vmul.f32 %v8158_v27, %v8092_v58  ;;  %v668_v27 = vmul.f32 %v8168_v31, %v8089_v59 }
 0x115   :  { %v8304_v40 = vpop.permute.xlu0 %228  ;;  %v8306_v12 = vpop.permute.xlu1 %226 }
 0x117   :  { %584 = vrot.lane.b32.xlu0 %v551_v48, %s7709_s24  ;;  %582 = vrot.lane.b32.xlu1 %v550_v7, %s7709_s24  ;;  %v1013_v48 = vmul.f32 %v8164_v30, %v8092_v58  ;;  %v898_v30 = vmul.f32 %v8180_v36, %v8089_v59 }
 0x119   :  { %v8318_v1 = vpop.permute.xlu0 %456  ;;  %v8320_v2 = vpop.permute.xlu1 %454 }
 0x11b   :  { %812 = vrot.lane.b32.xlu0 %v781_v47, %s7711_s27  ;;  %810 = vrot.lane.b32.xlu1 %v780_v49, %s7711_s27 }
 0x11d   :  { %v8330_v5 = vpop.permute.xlu0 %684  ;;  %v8332_v15 = vpop.permute.xlu1 %682 }
 0x11f   :  { %1040 = vrot.lane.b32.xlu0 %v1011_v54, %s7713_s18  ;;  %1038 = vrot.lane.b32.xlu1 %v1010_v11, %s7713_s18  ;;  %v669_v11 = vmul.f32 %v8168_v31, %v8092_v58  ;;  %v784_v31 = vmul.f32 %v8182_v37, %v8089_v59 }
 0x121   :  { %v8344_v60 = vpop.permute.xlu0 %344  ;;  %v8346_v22 = vpop.permute.xlu1 %342 }
 0x123   :  { %470 = vrot.lane.b32.xlu0 %v436_v53, %s7708_s23  ;;  %1108 = vperm.xlu1 %6816, %v1088_v16   ;;  %v899_v53 = vmul.f32 %v8180_v36, %v8092_v58  ;;  %v1014_v36 = vmul.f32 %v8190_v42, %v8089_v59 }
 0x125   :  { %v8356_v19 = vpop.permute.xlu0 %572  ;;  %v8358_v28 = vpop.permute.xlu1 %570 }
 0x127   :  { %698 = vrot.lane.b32.xlu0 %v666_v52, %s7710_s25  ;;  %472 = vrot.lane.b32.xlu1 %v437_v10, %s7708_s23 }
 0x129   :  { %v8370_v38 = vpop.permute.xlu0 %800  ;;  %v8372_v7 = vpop.permute.xlu1 %798 }
 0x12b   :  { %926 = vrot.lane.b32.xlu0 %v896_v17, %s7712_s26  ;;  %700 = vrot.lane.b32.xlu1 %v667_v63, %s7710_s25  ;;  %v785_v63 = vmul.f32 %v8182_v37, %v8092_v58  ;;  %v134_v37 = vmul.f32 %v8208_v51, %v8000_v62 }
 0x12f   :  { %586 = vrot.lane.b32.xlu0 %v552_v20, %s7709_s24  ;;  %928 = vrot.lane.b32.xlu1 %v897_v4, %s7712_s26  ;;  %v1015_v4 = vmul.f32 %v8190_v42, %v8092_v58  ;;  %v1090_v42 = vld [vmem:[%s13329_s2 + $0x28] sm:$0xff]  ;;  %s7719_s2 = smov 51  }
 0x133   :  { %814 = vrot.lane.b32.xlu0 %v782_v33, %s7711_s27  ;;  %588 = vrot.lane.b32.xlu1 %v553_v3, %s7709_s24 }
 0x137   :  { %1042 = vrot.lane.b32.xlu0 %v1012_v23, %s7713_s18  ;;  %816 = vrot.lane.b32.xlu1 %v783_v8, %s7711_s27  ;;  %v243_v23 = vsel %vm242_vm0, %v8245_v14, %v8243_v13  ;;  %v133_v8 = vmul.f32 %v8208_v51, %v7997_v61  ;;  %v359_v14 = vsel %vm358_vm1, %v8254_v21, %v8252_v18 }
 0x138   :  { %v1016_v21 = vmul.f32 %v8206_v50, %v8089_v59 }
 0x13a   :  { %v8381_v49 = vpop.permute.xlu0 %130  ;;  %v8383_v47 = vpop.permute.xlu1 %1093 }
 0x13b   :  { %1113 = vperm.xlu0 %6815, %v1089_v26   ;;  %1044 = vrot.lane.b32.xlu1 %v1013_v48, %s7713_s18  ;;  %v900_v26 = vmul.f32 %v8192_v43, %v8089_v59  ;;  %v262_v48 = vadd.f32 %v8243_v13, %v134_v37 }
 0x13d   :  { %v378_v51 = vadd.f32 %v8252_v18, %v262_v48  ;;  %v591_v18 = vsel %vm590_vm3, %v8292_v39, %v8294_v41 }
 0x13e   :  { %v8390_v54 = vpop.permute.xlu0 %232  ;;  %v8392_v16 = vpop.permute.xlu1 %230 }
 0x13f   :  { %704 = vrot.lane.b32.xlu0 %v669_v11, %s7710_s25  ;;  %702 = vrot.lane.b32.xlu1 %v668_v27, %s7710_s25  ;;  %v261_v27 = vadd.f32 %v243_v23, %v133_v8  ;;  %v707_v23 = vsel %vm706_vm4, %v8332_v15, %v8330_v5  ;;  %v823_v8 = vsel %vm822_vm5, %v8372_v7, %v8370_v38 }
 0x141   :  { %v377_v13 = vadd.f32 %v359_v14, %v261_v27 }
 0x142   :  { %v8400_v52 = vpop.permute.xlu0 %460  ;;  %v8402_v10 = vpop.permute.xlu1 %458 }
 0x143   :  { %932 = vrot.lane.b32.xlu0 %v899_v53, %s7712_s26  ;;  %930 = vrot.lane.b32.xlu1 %v898_v30, %s7712_s26  ;;  %v475_v53 = vsel %vm474_vm2, %v8272_v29, %v8274_v32 }
 0x146   :  { %v8410_v17 = vpop.permute.xlu0 %688  ;;  %v8412_v20 = vpop.permute.xlu1 %686 }
 0x147   :  { %820 = vrot.lane.b32.xlu0 %v785_v63, %s7711_s27  ;;  %818 = vrot.lane.b32.xlu1 %v784_v31, %s7711_s27  ;;  %v901_v31 = vmul.f32 %v8192_v43, %v8092_v58  ;;  %v494_v63 = vadd.f32 %v8274_v32, %v378_v51  ;;  %v1017_v32 = vmul.f32 %v8206_v50, %v8092_v58 }
 0x149   :  { %v610_v37 = vadd.f32 %v8294_v41, %v494_v63 }
 0x14a   :  { %v917_v3 = vpop.permute.xlu0 %916  ;;  %v915_v33 = vpop.permute.xlu1 %914 }
 0x14b   :  { %1048 = vrot.lane.b32.xlu0 %v1015_v4, %s7713_s18  ;;  %1046 = vrot.lane.b32.xlu1 %v1014_v36, %s7713_s18  ;;  %v493_v36 = vadd.f32 %v475_v53, %v377_v13  ;;  %v726_v39 = vadd.f32 %v8330_v5, %v610_v37  ;;  %v939_v48 = vsel %vm938_vm6, %v915_v33, %v917_v3 }
 0x14d   :  { %v609_v43 = vadd.f32 %v591_v18, %v493_v36  ;;  %v842_v15 = vadd.f32 %v8370_v38, %v726_v39  ;;  %v244_v39 = vsel %vm242_vm0, %v8262_v24, %v8264_v25  ;;  %v476_v24 = vsel %vm474_vm2, %v8320_v2, %v8318_v1 }
 0x14e   :  { %v8438_v11 = vpop.permute.xlu0 %348  ;;  %v8440_v30 = vpop.permute.xlu1 %346 }
 0x14f   :  { %934 = vrot.lane.b32.xlu0 %v900_v26, %s7712_s26  ;;  %1118 = vperm.xlu1 %6816, %v1090_v42   ;;  %v725_v41 = vadd.f32 %v707_v23, %v609_v43  ;;  %v958_v27 = vadd.f32 %v917_v3, %v842_v15  ;;  %v360_v15 = vsel %vm358_vm1, %v8282_v34, %v8284_v35 }
 0x151   :  { %v841_v14 = vadd.f32 %v823_v8, %v725_v41  ;;  %v135_v8 = vmul.f32 %v8216_v55, %v7997_v61 }
 0x152   :  { %v8455_v29 = vpop.permute.xlu0 %576  ;;  %v8457_v4 = vpop.permute.xlu1 %574 }
 0x153   :  { %1050 = vrot.lane.b32.xlu0 %v1016_v21, %s7713_s18  ;;  %936 = vrot.lane.b32.xlu1 %v901_v31, %s7712_s26  ;;  %v957_v51 = vadd.f32 %v939_v48, %v841_v14  ;;  %v263_v48 = vadd.f32 %v244_v39, %v135_v8 }
 0x156   :  { %v805_v42 = vpop.permute.xlu0 %804  ;;  %v803_v26 = vpop.permute.xlu1 %802 }
 0x157   :  { %1052 = vrot.lane.b32.xlu1 %v1017_v32, %s7713_s18  ;;  %v136_v32 = vmul.f32 %v8216_v55, %v8000_v62 }
 0x159   :  { %v264_v41 = vadd.f32 %v8264_v25, %v136_v32  ;;  %v592_v25 = vsel %vm590_vm3, %v8358_v28, %v8356_v19  ;;  %v824_v32 = vsel %vm822_vm5, %v803_v26, %v805_v42 }
 0x15a   :  { %v1033_v50 = vpop.permute.xlu0 %1032  ;;  %v1031_v53 = vpop.permute.xlu1 %1030 }
 0x15b   :  { %v1074_v5 = vadd.f32 %v1033_v50, %v958_v27  ;;  %v1055_v13 = vsel %vm1054_vm7, %v1031_v53, %v1033_v50  ;;  %v379_v50 = vadd.f32 %v360_v15, %v263_v48 }
 0x15c   :  { %v1073_v21 = vadd.f32 %v1055_v13, %v957_v51  ;;  %v380_v51 = vadd.f32 %v8284_v35, %v264_v41  ;;  %v708_v35 = vsel %vm706_vm4, %v8412_v20, %v8410_v17 }
 0x15d   :  { %v8476_v7 = vadd.f32 %v8383_v47, %v1074_v5  ;;  %v495_v53 = vadd.f32 %v476_v24, %v379_v50 }
 0x15e   :  { %v8479_v31 = vadd.f32 %v8383_v47, %v1073_v21  ;;  %v8481_v38 = vpop.permute.xlu0 %234  ;;  %v1099_v33 = vpop.permute.xlu1 %1098  ;;  %v496_v55 = vadd.f32 %v8318_v1, %v380_v51 }
 0x15f   :  { %1147 = vrot.lane.b32.xlu1 %v8476_v7, %s7706_s21  ;;  %v611_v21 = vadd.f32 %v592_v25, %v495_v53 }
 0x160   :  { %1145 = vrot.lane.b32.xlu0 %v8479_v31, %s7706_s21  ;;  %v612_v13 = vadd.f32 %v8356_v19, %v496_v55 }
 0x161   :  { %v727_v1 = vadd.f32 %v708_v35, %v611_v21  ;;  %v138_v21 = vmul.f32 %v8218_v46, %v8000_v62 }
 0x162   :  { %v8487_v3 = vpop.permute.xlu0 %462  ;;  %v8489_v63 = vpop.permute.xlu1 %236  ;;  %v728_v2 = vadd.f32 %v8410_v17, %v612_v13 }
 0x163   :  { %v843_v15 = vadd.f32 %v824_v32, %v727_v1  ;;  %v137_v32 = vmul.f32 %v8218_v46, %v7997_v61  ;;  %v266_v1 = vadd.f32 %v8304_v40, %v138_v21  ;;  %v593_v46 = vsel %vm590_vm3, %v8457_v4, %v8455_v29 }
 0x164   :  { %v844_v41 = vadd.f32 %v805_v42, %v728_v2  ;;  %v245_v2 = vsel %vm242_vm0, %v8306_v12, %v8304_v40  ;;  %v477_v12 = vsel %vm474_vm2, %v8402_v10, %v8400_v52  ;;  %v1266_v10 = vld [vmem:[%s13330_s3 + $0x8] sm:$0xff] }
 0x165   :  { %v382_v62 = vadd.f32 %v8344_v60, %v266_v1 }
 0x166   :  { %v8491_v18 = vpop.permute.xlu0 %690  ;;  %v8493_v36 = vpop.permute.xlu1 %464 }
 0x167   :  { %v498_v61 = vadd.f32 %v8400_v52, %v382_v62  ;;  %v1270_v62 = vld [vmem:[%s13330_s3 + $0x28] sm:$0xff] }
 0x16a   :  { %v919_v37 = vpop.permute.xlu0 %918  ;;  %v8495_v47 = vpop.permute.xlu1 %692 }
 0x16b   :  { %v709_v52 = vsel %vm706_vm4, %v8491_v18, %v8495_v47  ;;  %v1268_v18 = vld [vmem:[%s13330_s3 + $0x18] sm:$0xff] }
 0x16e   :  { %v8497_v23 = vpop.permute.xlu0 %350  ;;  %v921_v43 = vpop.permute.xlu1 %920 }
 0x16f   :  { %v940_v28 = vsel %vm938_vm6, %v919_v37, %v921_v43  ;;  %v960_v48 = vadd.f32 %v921_v43, %v844_v41  ;;  %v265_v41 = vadd.f32 %v245_v2, %v137_v32 }
 0x170   :  { %v959_v51 = vadd.f32 %v940_v28, %v843_v15 }
 0x172   :  { %v8510_v14 = vpop.permute.xlu0 %578  ;;  %v8512_v27 = vpop.permute.xlu1 %352 }
 0x176   :  { %v807_v34 = vpop.permute.xlu0 %806  ;;  %v8522_v5 = vpop.permute.xlu1 %580 }
 0x17a   :  { %v1035_v39 = vpop.permute.xlu0 %1034  ;;  %v809_v8 = vpop.permute.xlu1 %808 }
 0x17b   :  { %v825_v21 = vsel %vm822_vm5, %v807_v34, %v809_v8 }
 0x17e   :  { %v8531_v24 = vpop.permute.xlu0 %1103  ;;  %v1037_v19 = vpop.permute.xlu1 %1036 }
 0x17f   :  { %v1056_v50 = vsel %vm1054_vm7, %v1035_v39, %v1037_v19  ;;  %v1076_v20 = vadd.f32 %v1037_v19, %v960_v48  ;;  %v361_v39 = vsel %vm358_vm1, %v8346_v22, %v8344_v60  ;;  %v1265_v60 = vld [vmem:[%s13330_s3] sm:$0xff]  ;;  %v614_v19 = vadd.f32 %v8455_v29, %v498_v61  ;;  %v1267_v29 = vld [vmem:[%s13330_s3 + $0x10] sm:$0xff] }
 0x180   :  { %v1075_v55 = vadd.f32 %v1056_v50, %v959_v51  ;;  %v381_v48 = vadd.f32 %v361_v39, %v265_v41  ;;  %v6603_v4 = vpack.c.bf16 %v1266_v10, %v1265_v60  ;;  %v6606_v41 = vpack.c.bf16 %v1268_v18, %v1267_v29  ;;  %v1274_v29 = vld [vmem:[%s13330_s3 + $0x48] sm:$0xff] }
 0x181   :  { %v8534_v25 = vadd.f32 %v1099_v33, %v1076_v20  ;;  %v7714_v20 = vmov 0.0|0.0  }
 0x182   :  { %v8536_v17 = vadd.f32 %v1099_v33, %v1075_v55  ;;  %v8538_v26 = vpop.permute.xlu0 %240  ;;  %v8540_v53 = vpop.permute.xlu1 %238  ;;  %v497_v40 = vadd.f32 %v477_v12, %v381_v48  ;;  %6602 = vmatprep.subr.bf16.mxu0 %v7714_v20  ;;  %v730_v55 = vadd.f32 %v8495_v47, %v614_v19  ;;  %v1269_v47 = vld [vmem:[%s13330_s3 + $0x20] sm:$0xff] }
 0x183   :  { %1151 = vrot.lane.b32.xlu1 %v8534_v25, %s7706_s21  ;;  %6604 = vmatpush1.bf16.msra.mxu0 %v6603_v4  ;;  %v6609_v61 = vpack.c.bf16 %v1270_v62, %v1269_v47 }
 0x184   :  { %1149 = vrot.lane.b32.xlu0 %v8536_v17, %s7706_s21  ;;  %v613_v50 = vadd.f32 %v593_v46, %v497_v40  ;;  %6605 = vmatprep.subr.bf16.mxu0 %v7714_v20  ;;  %v846_v34 = vadd.f32 %v809_v8, %v730_v55  ;;  %v1271_v8 = vld [vmem:[%s13330_s3 + $0x30] sm:$0xff] }
 0x186   :  { %v8546_v42 = vpop.permute.xlu0 %468  ;;  %v8548_v37 = vpop.permute.xlu1 %466  ;;  %v729_v2 = vadd.f32 %v709_v52, %v613_v50 }
 0x187   :  { %6607 = vmatpush1.bf16.msra.mxu0 %v6606_v41 }
 0x188   :  { %v845_v12 = vadd.f32 %v825_v21, %v729_v2  ;;  %6608 = vmatprep.subr.bf16.mxu0 %v7714_v20  ;;  %v1273_v2 = vld [vmem:[%s13330_s3 + $0x40] sm:$0xff] }
 0x18a   :  { %v8550_v43 = vpop.permute.xlu0 %696  ;;  %v8552_v13 = vpop.permute.xlu1 %694 }
 0x18b   :  { %6610 = vmatpush1.bf16.msra.mxu0 %v6609_v61  ;;  %v1278_v61 = vld [vmem:[%s13330_s3 + $0x68] sm:$0xff] }
 0x18c   :  { %6611 = vmatprep.subr.bf16.mxu0 %v7714_v20 }
 0x18e   :  { %v925_v33 = vpop.permute.xlu0 %924  ;;  %v923_v35 = vpop.permute.xlu1 %922 }
 0x18f   :  { %v941_v39 = vsel %vm938_vm6, %v923_v35, %v925_v33  ;;  %v962_v48 = vadd.f32 %v925_v33, %v846_v34  ;;  %v1272_v35 = vld [vmem:[%s13330_s3 + $0x38] sm:$0xff]  ;;  %v1275_v34 = vld [vmem:[%s13330_s3 + $0x50] sm:$0xff] }
 0x190   :  { %v961_v46 = vadd.f32 %v941_v39, %v845_v12  ;;  %v6612_v4 = vpack.c.bf16 %v1272_v35, %v1271_v8  ;;  %v1276_v39 = vld [vmem:[%s13330_s3 + $0x58] sm:$0xff]  ;;  %v362_v35 = vsel %vm358_vm1, %v8440_v30, %v8438_v11  ;;  %v594_v30 = vsel %vm590_vm3, %v8510_v14, %v8522_v5 }
 0x191   :  { %v6618_v41 = vpack.c.bf16 %v1276_v39, %v1275_v34  ;;  %v710_v14 = vsel %vm706_vm4, %v8552_v13, %v8550_v43  ;;  %v1282_v13 = vld [vmem:[%s13330_s3 + $0x88] sm:$0xff] }
 0x192   :  { %v8565_v28 = vpop.permute.xlu0 %356  ;;  %v8567_v15 = vpop.permute.xlu1 %354  ;;  %6613 = vmatpush1.bf16.msra.mxu0 %v6612_v4 }
 0x193   :  { %6614 = vmatprep.subr.bf16.mxu0 %v7714_v20 }
 0x196   :  { %v8577_v22 = vpop.permute.xlu0 %584  ;;  %v8579_v51 = vpop.permute.xlu1 %582 }
 0x19a   :  { %v8594_v32 = vpop.permute.xlu0 %812  ;;  %v8596_v1 = vpop.permute.xlu1 %810 }
 0x19e   :  { %v1041_v40 = vpop.permute.xlu0 %1040  ;;  %v1039_v60 = vpop.permute.xlu1 %1038 }
 0x19f   :  { %v1078_v10 = vadd.f32 %v1041_v40, %v962_v48  ;;  %v1057_v19 = vsel %vm1054_vm7, %v1039_v60, %v1041_v40  ;;  %v1277_v48 = vld [vmem:[%s13330_s3 + $0x60] sm:$0xff]  ;;  %v246_v40 = vsel %vm242_vm0, %v8392_v16, %v8390_v54  ;;  %v139_v60 = vmul.f32 %v8232_v6, %v8089_v59 }
 0x1a0   :  { %v1077_v52 = vadd.f32 %v1057_v19, %v961_v46  ;;  %v140_v46 = vmul.f32 %v8232_v6, %v8092_v58  ;;  %v478_v6 = vsel %vm474_vm2, %v8487_v3, %v8493_v36  ;;  %v1280_v3 = vld [vmem:[%s13330_s3 + $0x78] sm:$0xff] }
 0x1a1   :  { %v8621_v33 = vadd.f32 %v8531_v24, %v1078_v10  ;;  %v6621_v10 = vpack.c.bf16 %v1278_v61, %v1277_v48  ;;  %v267_v19 = vadd.f32 %v246_v40, %v139_v60  ;;  %v826_v61 = vsel %vm822_vm5, %v8596_v1, %v8594_v32 }
 0x1a2   :  { %v8624_v50 = vadd.f32 %v8531_v24, %v1077_v52  ;;  %v8626_v55 = vpop.permute.xlu0 %470  ;;  %v8628_v21 = vpop.permute.xlu1 %1108  ;;  %v6615_v24 = vpack.c.bf16 %v1274_v29, %v1273_v2  ;;  %v268_v8 = vadd.f32 %v8390_v54, %v140_v46 }
 0x1a3   :  { %1155 = vrot.lane.b32.xlu1 %v8621_v33, %s7706_s21  ;;  %v383_v16 = vadd.f32 %v362_v35, %v267_v19 }
 0x1a4   :  { %1153 = vrot.lane.b32.xlu0 %v8624_v50, %s7706_s21  ;;  %6616 = vmatpush1.bf16.msra.mxu0 %v6615_v24  ;;  %v384_v2 = vadd.f32 %v8438_v11, %v268_v8  ;;  %v1279_v11 = vld [vmem:[%s13330_s3 + $0x70] sm:$0xff] }
 0x1a5   :  { %6617 = vmatprep.subr.bf16.mxu0 %v7714_v20  ;;  %v499_v29 = vadd.f32 %v478_v6, %v383_v16  ;;  %v6624_v39 = vpack.c.bf16 %v1280_v3, %v1279_v11 }
 0x1a6   :  { %v8641_v18 = vpop.permute.xlu0 %698  ;;  %v8643_v47 = vpop.permute.xlu1 %472  ;;  %v500_v54 = vadd.f32 %v8493_v36, %v384_v2 }
 0x1a8   :  { %6619 = vmatpush1.bf16.msra.mxu0 %v6618_v41  ;;  %v616_v36 = vadd.f32 %v8522_v5, %v500_v54  ;;  %v615_v41 = vadd.f32 %v594_v30, %v499_v29  ;;  %v1281_v5 = vld [vmem:[%s13330_s3 + $0x80] sm:$0xff]  ;;  %v142_v29 = vmul.f32 %v8234_v9, %v8092_v58 }
 0x1a9   :  { %6620 = vmatprep.subr.bf16.mxu0 %v7714_v20  ;;  %v6627_v35 = vpack.c.bf16 %v1282_v13, %v1281_v5  ;;  %v595_v13 = vsel %vm590_vm3, %v8579_v51, %v8577_v22 }
 0x1aa   :  { %v927_v62 = vpop.permute.xlu0 %926  ;;  %v8652_v12 = vpop.permute.xlu1 %700  ;;  %v732_v48 = vadd.f32 %v8550_v43, %v616_v36  ;;  %v731_v46 = vadd.f32 %v710_v14, %v615_v41  ;;  %v1283_v43 = vld [vmem:[%s13330_s3 + $0x90] sm:$0xff]  ;;  %v141_v36 = vmul.f32 %v8234_v9, %v8089_v59  ;;  %v363_v41 = vsel %vm358_vm1, %v8497_v23, %v8512_v27 }
 0x1ab   :  { %v711_v51 = vsel %vm706_vm4, %v8641_v18, %v8652_v12  ;;  %v1290_v18 = vld [vmem:[%s13330_s3 + $0xc8] sm:$0xff] }
 0x1ac   :  { %6622 = vmatpush1.bf16.msra.mxu0 %v6621_v10  ;;  %v848_v1 = vadd.f32 %v8594_v32, %v732_v48  ;;  %v1284_v10 = vld [vmem:[%s13330_s3 + $0x98] sm:$0xff]  ;;  %v847_v19 = vadd.f32 %v826_v61, %v731_v46  ;;  %v1285_v32 = vld [vmem:[%s13330_s3 + $0xa0] sm:$0xff] }
 0x1ad   :  { %6623 = vmatprep.subr.bf16.mxu0 %v7714_v20  ;;  %v6630_v6 = vpack.c.bf16 %v1284_v10, %v1283_v43 }
 0x1ae   :  { %v8672_v52 = vpop.permute.xlu0 %586  ;;  %v929_v4 = vpop.permute.xlu1 %928 }
 0x1af   :  { %v942_v8 = vsel %vm938_vm6, %v927_v62, %v929_v4  ;;  %v964_v2 = vadd.f32 %v929_v4, %v848_v1  ;;  %v1286_v62 = vld [vmem:[%s13330_s3 + $0xa8] sm:$0xff]  ;;  %v247_v4 = vsel %vm242_vm0, %v8481_v38, %v8489_v63 }
 0x1b0   :  { %6625 = vmatpush1.bf16.msra.mxu0 %v6624_v39  ;;  %v963_v16 = vadd.f32 %v942_v8, %v847_v19  ;;  %v270_v39 = vadd.f32 %v8489_v63, %v142_v29  ;;  %v6633_v61 = vpack.c.bf16 %v1286_v62, %v1285_v32  ;;  %v269_v46 = vadd.f32 %v247_v4, %v141_v36  ;;  %v1288_v8 = vld [vmem:[%s13330_s3 + $0xb8] sm:$0xff] }
 0x1b1   :  { %6626 = vmatprep.subr.bf16.mxu0 %v7714_v20  ;;  %v479_v63 = vsel %vm474_vm2, %v8548_v37, %v8546_v42  ;;  %v1287_v37 = vld [vmem:[%s13330_s3 + $0xb0] sm:$0xff]  ;;  %v1292_v4 = vld [vmem:[%s13330_s3 + $0xd8] sm:$0xff] }
 0x1b2   :  { %v8683_v24 = vpop.permute.xlu0 %814  ;;  %v8685_v34 = vpop.permute.xlu1 %588  ;;  %v386_v9 = vadd.f32 %v8512_v27, %v270_v39  ;;  %v385_v23 = vadd.f32 %v363_v41, %v269_v46 }
 0x1b4   :  { %6628 = vmatpush1.bf16.msra.mxu0 %v6627_v35  ;;  %v501_v43 = vadd.f32 %v479_v63, %v385_v23  ;;  %v6636_v35 = vpack.c.bf16 %v1288_v8, %v1287_v37 }
 0x1b5   :  { %6629 = vmatprep.subr.bf16.mxu0 %v7714_v20 }
 0x1b6   :  { %v1043_v40 = vpop.permute.xlu0 %1042  ;;  %v8702_v60 = vpop.permute.xlu1 %816  ;;  %v617_v10 = vadd.f32 %v595_v13, %v501_v43 }
 0x1b8   :  { %6631 = vmatpush1.bf16.msra.mxu0 %v6630_v6  ;;  %v144_v6 = vmul.f32 %v8381_v49, %v8092_v58  ;;  %v248_v58 = vsel %vm242_vm0, %v8540_v53, %v8538_v26 }
 0x1b9   :  { %6632 = vmatprep.subr.bf16.mxu0 %v7714_v20 }
 0x1ba   :  { %v8719_v54 = vpop.permute.xlu0 %1113  ;;  %v1045_v30 = vpop.permute.xlu1 %1044  ;;  %v272_v36 = vadd.f32 %v8538_v26, %v144_v6  ;;  %v7715_v6 = vmov 0.0  }
 0x1bb   :  { %v1058_v11 = vsel %vm1054_vm7, %v1043_v40, %v1045_v30  ;;  %v1080_v3 = vadd.f32 %v1045_v30, %v964_v2  ;;  %v827_v2 = vsel %vm822_vm5, %v8683_v24, %v8702_v60 }
 0x1bc   :  { %v1079_v14 = vadd.f32 %v1058_v11, %v963_v16  ;;  %6634 = vmatpush1.bf16.msra.mxu0 %v6633_v61  ;;  %v733_v16 = vadd.f32 %v711_v51, %v617_v10  ;;  %v143_v11 = vmul.f32 %v8381_v49, %v8089_v59  ;;  %v480_v59 = vsel %vm474_vm2, %v8626_v55, %v8643_v47 }
 0x1bd   :  { %v8741_v48 = vadd.f32 %v8628_v21, %v1080_v3  ;;  %6635 = vmatprep.subr.bf16.mxu0 %v7714_v20  ;;  %vm2154_vm2 = vcmask 64512  }
 0x1be   :  { %v8744_v38 = vadd.f32 %v8628_v21, %v1079_v14  ;;  %v8746_v40 = vpop.permute.xlu0 %704  ;;  %v8748_v5 = vpop.permute.xlu1 %702  ;;  %v502_v21 = vadd.f32 %v8546_v42, %v386_v9  ;;  %v849_v3 = vadd.f32 %v827_v2, %v733_v16  ;;  %v364_v14 = vsel %vm358_vm1, %v8567_v15, %v8565_v28  ;;  %v1295_v16 = vld [vmem:[%s13330_s3 + $0xf0] sm:$0x1f] }
 0x1bf   :  { %1159 = vrot.lane.b32.xlu1 %v8741_v48, %s7706_s21  ;;  %v271_v39 = vadd.f32 %v248_v58, %v143_v11  ;;  %v388_v9 = vadd.f32 %v8565_v28, %v272_v36  ;;  %v712_v37 = vsel %vm706_vm4, %v8748_v5, %v8746_v40  ;;  %vm2611_vm4 = vcmask 1041408  }
 0x1c0   :  { %1157 = vrot.lane.b32.xlu0 %v8744_v38, %s7706_s21  ;;  %v618_v42 = vadd.f32 %v8577_v22, %v502_v21  ;;  %6637 = vmatpush1.bf16.msra.mxu0 %v6636_v35  ;;  %v1289_v22 = vld [vmem:[%s13330_s3 + $0xc0] sm:$0xff]  ;;  %v596_v21 = vsel %vm590_vm3, %v8672_v52, %v8685_v34  ;;  %v1294_v52 = vld [vmem:[%s13330_s3 + $0xe8] sm:$0xff]  ;;  %vm2158_vm3 = vcmask 60416  }
 0x1c1   :  { %6638 = vmatprep.subr.bf16.mxu0 %v7714_v20  ;;  %v6639_v29 = vpack.c.bf16 %v1290_v18, %v1289_v22  ;;  %v387_v63 = vadd.f32 %v364_v14, %v271_v39  ;;  %v504_v23 = vadd.f32 %v8643_v47, %v388_v9  ;;  %v1293_v47 = vld [vmem:[%s13330_s3 + $0xe0] sm:$0xff] }
 0x1c2   :  { %v933_v27 = vpop.permute.xlu0 %932  ;;  %v931_v1 = vpop.permute.xlu1 %930  ;;  %v734_v19 = vadd.f32 %v8652_v12, %v618_v42  ;;  %v1291_v12 = vld [vmem:[%s13330_s3 + $0xd0] sm:$0xff]  ;;  %s7716_s3 = smov 53  }
 0x1c3   :  { %v943_v62 = vsel %vm938_vm6, %v931_v1, %v933_v27  ;;  %v503_v28 = vadd.f32 %v480_v59, %v387_v63  ;;  %v620_v1 = vadd.f32 %v8685_v34, %v504_v23 }
 0x1c4   :  { %v850_v24 = vadd.f32 %v8702_v60, %v734_v19  ;;  %6640 = vmatpush1.bf16.msra.mxu0 %v6639_v29  ;;  %v6642_v60 = vpack.c.bf16 %v1292_v4, %v1291_v12  ;;  %v965_v41 = vadd.f32 %v943_v62, %v849_v3 }
 0x1c5   :  { %6641 = vmatprep.subr.bf16.mxu0 %v7714_v20  ;;  %v619_v8 = vadd.f32 %v596_v21, %v503_v28  ;;  %v736_v42 = vadd.f32 %v8746_v40, %v620_v1 }
 0x1c6   :  { %v821_v30 = vpop.permute.xlu0 %820  ;;  %v819_v32 = vpop.permute.xlu1 %818  ;;  %v966_v53 = vadd.f32 %v933_v27, %v850_v24 }
 0x1c7   :  { %v828_v51 = vsel %vm822_vm5, %v819_v32, %v821_v30  ;;  %v735_v35 = vadd.f32 %v712_v37, %v619_v8  ;;  %v852_v34 = vadd.f32 %v821_v30, %v736_v42  ;;  %vm2604_vm5 = vcmask 162816  }
 0x1c8   :  { %6643 = vmatpush1.bf16.msra.mxu0 %v6642_v60 }
 0x1c9   :  { %6644 = vmatprep.subr.bf16.mxu0 %v7714_v20  ;;  %v851_v2 = vadd.f32 %v828_v51, %v735_v35 }
 0x1ca   :  { %v1049_v61 = vpop.permute.xlu0 %1048  ;;  %v1047_v46 = vpop.permute.xlu1 %1046 }
 0x1cb   :  { %v1082_v49 = vadd.f32 %v1049_v61, %v966_v53  ;;  %v1059_v26 = vsel %vm1054_vm7, %v1047_v46, %v1049_v61 }
 0x1cc   :  { %v1081_v15 = vadd.f32 %v1059_v26, %v965_v41 }
 0x1cd   :  { %v8815_v13 = vadd.f32 %v8719_v54, %v1082_v49 }
 0x1ce   :  { %v8818_v43 = vadd.f32 %v8719_v54, %v1081_v15  ;;  %v935_v55 = vpop.permute.xlu0 %934  ;;  %v1119_v27 = vpop.permute.xlu1 %1118  ;;  %v6645_v54 = vpack.c.bf16 %v1294_v52, %v1293_v47 }
 0x1cf   :  { %1163 = vrot.lane.b32.xlu1 %v8815_v13, %s7706_s21 }
 0x1d0   :  { %1161 = vrot.lane.b32.xlu0 %v8818_v43, %s7706_s21  ;;  %6646 = vmatpush1.bf16.msra.mxu0 %v6645_v54 }
 0x1d1   :  { %1379 = vmatprep.subr.mxu0 %v7715_v6 }
 0x1d2   :  { %v937_v10 = vpop.permute.xlu1 %936  ;;  %v1051_v5 = vpop.permute.xlu0 %1050 }
 0x1d3   :  { %v944_v19 = vsel %vm938_vm6, %v935_v55, %v937_v10  ;;  %v968_v22 = vadd.f32 %v937_v10, %v852_v34  ;;  %vm6250_vm6 = vcmask 1024  }
 0x1d4   :  { %6304 = vmatpush1.msk.msra.mxu0 %vm1315_vm8, %v1295_v16  ;;  %v967_v40 = vadd.f32 %v944_v19, %v851_v2 }
 0x1d6   :  { %v1053_v32 = vpop.permute.xlu1 %1052  ;;  %v1146_v62 = vpop.permute.xlu0 %1145 }
 0x1d7   :  { %v1060_v18 = vsel %vm1054_vm7, %v1051_v5, %v1053_v32  ;;  %v1084_v12 = vadd.f32 %v1053_v32, %v968_v22 }
 0x1d8   :  { %v1083_v30 = vadd.f32 %v1060_v18, %v967_v40 }
 0x1d9   :  { %v1132_v58 = vadd.f32 %v1119_v27, %v1084_v12 }
 0x1da   :  { %v1131_v24 = vadd.f32 %v1119_v27, %v1083_v30  ;;  %v1148_v29 = vpop.permute.xlu1 %1147 }
 0x1db   :  { %v1169_v4 = vsel %vm242_vm0, %v1146_v62, %v1148_v29  ;;  %1167 = vrot.lane.b32.xlu1 %v1132_v58, %s7706_s21  ;;  %v1188_v11 = vmax.f32 %v8476_v7, %v1148_v29 }
 0x1dc   :  { %1165 = vrot.lane.b32.xlu0 %v1131_v24, %s7706_s21  ;;  %v1187_v3 = vmax.f32 %v8479_v31, %v1169_v4 }
 0x1df   :  { %1213 = vrot.lane.b32.xlu1 %v1188_v11, %s7707_s22 }
 0x1e0   :  { %1211 = vrot.lane.b32.xlu0 %v1187_v3, %s7707_s22 }
 0x1f5   :  { %v1152_v36 = vpop.permute.xlu1 %1151 }
 0x1f6   :  { %v1190_v14 = vmax.f32 %v8534_v25, %v1152_v36  ;;  %v1150_v53 = vpop.permute.xlu0 %1149 }
 0x1f7   :  { %v1170_v60 = vsel %vm242_vm0, %v1150_v53, %v1152_v36 }
 0x1f8   :  { %v1189_v39 = vmax.f32 %v8536_v17, %v1170_v60  ;;  %1217 = vrot.lane.b32.xlu1 %v1190_v14, %s7707_s22 }
 0x1fa   :  { %1215 = vrot.lane.b32.xlu0 %v1189_v39, %s7707_s22 }
 0x215   :  { %v1156_v41 = vpop.permute.xlu1 %1155 }
 0x216   :  { %v1192_v7 = vmax.f32 %v8621_v33, %v1156_v41  ;;  %v1154_v31 = vpop.permute.xlu0 %1153 }
 0x217   :  { %v1171_v61 = vsel %vm242_vm0, %v1154_v31, %v1156_v41 }
 0x218   :  { %v1191_v46 = vmax.f32 %v8624_v50, %v1171_v61  ;;  %1221 = vrot.lane.b32.xlu1 %v1192_v7, %s7707_s22 }
 0x21a   :  { %1219 = vrot.lane.b32.xlu0 %v1191_v46, %s7707_s22 }
 0x231   :  { %v1160_v25 = vpop.permute.xlu1 %1159 }
 0x232   :  { %v1194_v9 = vmax.f32 %v8741_v48, %v1160_v25  ;;  %v1158_v17 = vpop.permute.xlu0 %1157 }
 0x233   :  { %v1172_v59 = vsel %vm242_vm0, %v1158_v17, %v1160_v25 }
 0x234   :  { %v1193_v49 = vmax.f32 %v8744_v38, %v1172_v59  ;;  %1225 = vrot.lane.b32.xlu1 %v1194_v9, %s7707_s22 }
 0x236   :  { %1223 = vrot.lane.b32.xlu0 %v1193_v49, %s7707_s22 }
 0x241   :  { %v1164_v33 = vpop.permute.xlu1 %1163 }
 0x242   :  { %v1196_v26 = vmax.f32 %v8815_v13, %v1164_v33  ;;  %v1162_v50 = vpop.permute.xlu0 %1161 }
 0x243   :  { %v1173_v63 = vsel %vm242_vm0, %v1162_v50, %v1164_v33 }
 0x244   :  { %v1195_v15 = vmax.f32 %v8818_v43, %v1173_v63  ;;  %1229 = vrot.lane.b32.xlu1 %v1196_v26, %s7707_s22  ;;  %v1624_v63 = vld [vmem:[%s13331_s5] sm:$0xff] }
 0x246   :  { %1227 = vrot.lane.b32.xlu0 %v1195_v15, %s7707_s22 }
 0x24d   :  { %v1168_v48 = vpop.permute.xlu1 %1167 }
 0x24e   :  { %v1198_v23 = vmax.f32 %v1132_v58, %v1168_v48  ;;  %v1166_v21 = vpop.permute.xlu0 %1165 }
 0x24f   :  { %v1174_v38 = vsel %vm242_vm0, %v1166_v21, %v1168_v48  ;;  %v6904_v48 = vld [vmem:[%s13332_s4 + $0x4] ss:$8 sps:$4 sm:$0xff]   ;;  %vm1816_vm0 = vcmask 859136  }
 0x250   :  { %v1197_v28 = vmax.f32 %v1131_v24, %v1174_v38  ;;  %1233 = vrot.lane.b32.xlu1 %v1198_v23, %s7707_s22  ;;  %6315 = vmatprep.mubr.msk.bf16.mxu1 %vm1657_vm10, %v6904_v48 }
 0x251   :  { %v1214_v55 = vpop.permute.xlu1 %1213 }
 0x252   :  { %1231 = vrot.lane.b32.xlu0 %v1197_v28, %s7707_s22  ;;  %v1212_v13 = vpop.permute.xlu0 %1211  ;;  %v1254_v27 = vmax.f32 %v1188_v11, %v1214_v55 }
 0x253   :  { %v1235_v43 = vsel %vm358_vm1, %v1212_v13, %v1214_v55 }
 0x254   :  { %v1253_v47 = vmax.f32 %v1187_v3, %v1235_v43  ;;  %6305 = vmatprep.mubr.msk.f32.mxu0 %vm1296_vm9, %v1254_v27 }
 0x256   :  { %1384 = vmatmul.mubr.f32.vlgmr.msra.gmra.mrb[0].mxu0 %v1253_v47 }
 0x26a   :  { %v1218_v52 = vpop.permute.xlu1 %1217 }
 0x26b   :  { %v1256_v1 = vmax.f32 %v1190_v14, %v1218_v52 }
 0x26c   :  { %v1216_v37 = vpop.permute.xlu0 %1215 }
 0x26d   :  { %v1236_v54 = vsel %vm358_vm1, %v1216_v37, %v1218_v52  ;;  %6306 = vmatprep.mubr.msk.f32.mxu0 %vm1296_vm9, %v1256_v1 }
 0x26e   :  { %v1255_v8 = vmax.f32 %v1189_v39, %v1236_v54 }
 0x270   :  { %1389 = vmatmul.mubr.f32.gmra.mrb[2].mxu0 %v1255_v8 }
 0x28a   :  { %v1222_v42 = vpop.permute.xlu1 %1221 }
 0x28b   :  { %v1258_v51 = vmax.f32 %v1192_v7, %v1222_v42 }
 0x28c   :  { %v1220_v35 = vpop.permute.xlu0 %1219 }
 0x28d   :  { %v1237_v10 = vsel %vm358_vm1, %v1220_v35, %v1222_v42  ;;  %6307 = vmatprep.mubr.msk.f32.mxu0 %vm1296_vm9, %v1258_v51 }
 0x28e   :  { %v1257_v34 = vmax.f32 %v1191_v46, %v1237_v10 }
 0x290   :  { %1394 = vmatmul.mubr.f32.gmra.mrb[4].mxu0 %v1257_v34 }
 0x2a6   :  { %v1226_v19 = vpop.permute.xlu1 %1225 }
 0x2a7   :  { %v1260_v2 = vmax.f32 %v1194_v9, %v1226_v19 }
 0x2a8   :  { %v1224_v5 = vpop.permute.xlu0 %1223 }
 0x2a9   :  { %v1238_v16 = vsel %vm358_vm1, %v1224_v5, %v1226_v19  ;;  %6308 = vmatprep.mubr.msk.f32.mxu0 %vm1296_vm9, %v1260_v2 }
 0x2aa   :  { %v1259_v22 = vmax.f32 %v1193_v49, %v1238_v16 }
 0x2ac   :  { %1399 = vmatmul.mubr.f32.gmra.mrb[6].mxu0 %v1259_v22 }
 0x2b6   :  { %v1230_v40 = vpop.permute.xlu1 %1229 }
 0x2b7   :  { %v1262_v32 = vmax.f32 %v1196_v26, %v1230_v40 }
 0x2b8   :  { %v1228_v18 = vpop.permute.xlu0 %1227 }
 0x2b9   :  { %v1239_v12 = vsel %vm358_vm1, %v1228_v18, %v1230_v40  ;;  %6309 = vmatprep.mubr.msk.f32.mxu0 %vm1296_vm9, %v1262_v32 }
 0x2ba   :  { %v1261_v30 = vmax.f32 %v1195_v15, %v1239_v12  ;;  %v1626_v15 = vld [vmem:[%s13331_s5 + $0x10] sm:$0xf] }
 0x2bc   :  { %1404 = vmatmul.mubr.f32.gmra.mrb[8].mxu0 %v1261_v30 }
 0x2c2   :  { %v1234_v58 = vpop.permute.xlu1 %1233 }
 0x2c3   :  { %v1264_v24 = vmax.f32 %v1198_v23, %v1234_v58  ;;  %v1625_v23 = vld [vmem:[%s13331_s5 + $0x8] sm:$0xff] }
 0x2c4   :  { %v1232_v62 = vpop.permute.xlu0 %1231 }
 0x2c5   :  { %v1240_v29 = vsel %vm358_vm1, %v1232_v62, %v1234_v58  ;;  %6310 = vmatprep.mubr.msk.f32.mxu0 %vm1296_vm9, %v1264_v24  ;;  %vm7726_vm1 = vmmov 0  }
 0x2c6   :  { %v1263_v4 = vmax.f32 %v1197_v28, %v1240_v29 }
 0x2c8   :  { %1409 = vmatmul.mubr.f32.gmra.mrb[10].mxu0 %v1263_v4 }
 0x2c9   :  { %1989 = vmatprep.mubr.f32.mxu0 %v7715_v6 }
 0x329   :  { %v8886_v11 = vpop.f32.mrb[0].mxu0 }
 0x32a   :  { %v1387_v3 = vpop.f32.mrb[1].mxu0  ;;  %v1414_v14 = vmax.f32 %v8886_v11, 0.0 }
 0x343   :  { %v8888_v36 = vpop.f32.mrb[2].mxu0 }
 0x344   :  { %v1415_v53 = vmax.f32 %v8888_v36, 0.0  ;;  %v1392_v60 = vpop.f32.mrb[3].mxu0 }
 0x346   :  { %v6817_v39 = vpack.i.bf16 %v1415_v53, %v1414_v14 }
 0x348   :  { %6818 = vrot.lane.b32.xlu0 %v6817_v39, %s7706_s21 }
 0x34c   :  { %6823 = vrot.lane.b32.xlu0 %v6817_v39, %s7707_s22 }
 0x363   :  { %v1395_v41 = vpop.f32.mrb[4].mxu0 }
 0x364   :  { %v8898_v7 = vmax.f32 %v1395_v41, 0.0  ;;  %v1397_v31 = vpop.f32.mrb[5].mxu0 }
 0x366   :  { %1443 = vrot.lane.b32.xlu0 %v8898_v7, %s7706_s21 }
 0x37f   :  { %v1400_v61 = vpop.f32.mrb[6].mxu0 }
 0x380   :  { %v1402_v46 = vpop.f32.mrb[7].mxu0  ;;  %v1417_v9 = vmax.f32 %v1400_v61, 0.0 }
 0x38f   :  { %v1405_v25 = vpop.f32.mrb[8].mxu0 }
 0x390   :  { %v1418_v17 = vmax.f32 %v1405_v25, 0.0  ;;  %v1407_v59 = vpop.f32.mrb[9].mxu0 }
 0x392   :  { %v6847_v49 = vpack.i.bf16 %v1418_v17, %v1417_v9 }
 0x394   :  { %6848 = vrot.lane.b32.xlu1 %v6847_v49, %s7716_s3  ;;  %6828 = vrot.lane.b32.xlu0 %v6847_v49, %s7717_s0 }
 0x398   :  { %6853 = vrot.lane.b32.xlu1 %v6847_v49, %s7718_s20  ;;  %1464 = vrot.lane.b32.xlu0 %v8898_v7, %s7707_s22 }
 0x39b   :  { %v1410_v33 = vpop.f32.mrb[10].mxu0 }
 0x39c   :  { %6858 = vrot.lane.b32.xlu1 %v6847_v49, %s7719_s2  ;;  %6833 = vrot.lane.b32.xlu0 %v6817_v39, %s7708_s23  ;;  %v1412_v26 = vpop.f32.mrb[11].mxu0  ;;  %v1419_v50 = vmax.f32 %v1410_v33, 0.0 }
 0x3a0   :  { %6863 = vrot.lane.b32.xlu1 %v6847_v49, %s7720_s28  ;;  %1485 = vrot.lane.b32.xlu0 %v8898_v7, %s7708_s23  ;;  %s7722_s23 = smov 48  }
 0x3a4   :  { %6838 = vrot.lane.b32.xlu0 %v6817_v39, %s7709_s24  ;;  %1427 = vrot.lane.b32.xlu1 %v1419_v50, %s7717_s0 }
 0x3a8   :  { %1506 = vrot.lane.b32.xlu0 %v8898_v7, %s7709_s24  ;;  %1452 = vrot.lane.b32.xlu1 %v1419_v50, %s7716_s3  ;;  %s7723_s24 = smov 47   ;;  %s7724_s3 = smov 46  }
 0x3ac   :  { %6843 = vrot.lane.b32.xlu0 %v6817_v39, %s7710_s25  ;;  %6868 = vrot.lane.b32.xlu1 %v6847_v49, %s7721_s29 }
 0x3b0   :  { %1527 = vrot.lane.b32.xlu0 %v8898_v7, %s7710_s25  ;;  %1473 = vrot.lane.b32.xlu1 %v1419_v50, %s7718_s20 }
 0x3b4   :  { %6873 = vrot.lane.b32.xlu0 %v6817_v39, %s7711_s27  ;;  %1494 = vrot.lane.b32.xlu1 %v1419_v50, %s7719_s2 }
 0x3b8   :  { %1548 = vrot.lane.b32.xlu0 %v8898_v7, %s7711_s27  ;;  %6878 = vrot.lane.b32.xlu1 %v6847_v49, %s7722_s23 }
 0x3ba   :  { %v6819_v21 = vpop.permute.xlu0 %6818 }
 0x3bb   :  { %v6820_v34 = vunpack.i.l.bf16 %v6819_v21  ;;  %v6821_v32 = vunpack.i.h.bf16 %v6819_v21 }
 0x3bc   :  { %6883 = vrot.lane.b32.xlu0 %v6817_v39, %s7712_s26  ;;  %1515 = vrot.lane.b32.xlu1 %v1419_v50, %s7720_s28 }
 0x3be   :  { %v6824_v38 = vpop.permute.xlu0 %6823 }
 0x3bf   :  { %v6826_v24 = vunpack.i.h.bf16 %v6824_v38  ;;  %v6825_v62 = vunpack.i.l.bf16 %v6824_v38 }
 0x3c0   :  { %1569 = vrot.lane.b32.xlu0 %v8898_v7, %s7712_s26  ;;  %1536 = vrot.lane.b32.xlu1 %v1419_v50, %s7721_s29 }
 0x3c4   :  { %6893 = vrot.lane.b32.xlu0 %v6817_v39, %s7713_s18  ;;  %6888 = vrot.lane.b32.xlu1 %v6847_v49, %s7723_s24 }
 0x3c8   :  { %1590 = vrot.lane.b32.xlu0 %v8898_v7, %s7713_s18  ;;  %1557 = vrot.lane.b32.xlu1 %v1419_v50, %s7722_s23 }
 0x3cc   :  { %1629 = vperm.xlu0 %6815, %v1624_v63   ;;  %1578 = vrot.lane.b32.xlu1 %v1419_v50, %s7723_s24 }
 0x3d0   :  { %1639 = vperm.xlu0 %6815, %v1626_v15   ;;  %6898 = vrot.lane.b32.xlu1 %v6847_v49, %s7724_s3 }
 0x3d4   :  { %1599 = vrot.lane.b32.xlu1 %v1419_v50, %s7724_s3 }
 0x3d8   :  { %1634 = vperm.xlu1 %6816, %v1625_v23   ;;  %v1444_v28 = vpop.permute.xlu0 %1443 }
 0x406   :  { %v6849_v55 = vpop.permute.xlu1 %6848  ;;  %v6829_v13 = vpop.permute.xlu0 %6828 }
 0x407   :  { %v6831_v27 = vunpack.i.h.bf16 %v6829_v13  ;;  %v6830_v43 = vunpack.i.l.bf16 %v6829_v13  ;;  %v6850_v10 = vunpack.i.l.bf16 %v6849_v55  ;;  %v6851_v5 = vunpack.i.h.bf16 %v6849_v55 }
 0x409   :  { %v1433_v47 = vsel %vm1432_vm11, %v1414_v14, %v6830_v43  ;;  %v1434_v52 = vsel %vm1432_vm11, %v1415_v53, %v6831_v27  ;;  %v1457_v22 = vsel %vm1432_vm11, %v6820_v34, %v6850_v10  ;;  %v1458_v29 = vsel %vm1432_vm11, %v6821_v32, %v6851_v5 }
 0x40a   :  { %v6854_v1 = vpop.permute.xlu1 %6853  ;;  %v1465_v37 = vpop.permute.xlu0 %1464  ;;  %v1607_v54 = vpack.c.bf16 %v1434_v52, %v1433_v47 }
 0x40b   :  { %v6856_v18 = vunpack.i.h.bf16 %v6854_v1  ;;  %v6855_v12 = vunpack.i.l.bf16 %v6854_v1 }
 0x40c   :  { %1669 = vmatpush1.bf16.msra.mxu1 %v1607_v54 }
 0x40d   :  { %1670 = vmatprep.subr.bf16.mxu1 %v13346_v0  ;;  %v1478_v3 = vsel %vm1432_vm11, %v6825_v62, %v6855_v12  ;;  %v1479_v36 = vsel %vm1432_vm11, %v6826_v24, %v6856_v18 }
 0x40e   :  { %v6859_v8 = vpop.permute.xlu1 %6858  ;;  %v6834_v42 = vpop.permute.xlu0 %6833  ;;  %v1610_v41 = vpack.c.bf16 %v1479_v36, %v1478_v3 }
 0x40f   :  { %v6860_v60 = vunpack.i.l.bf16 %v6859_v8  ;;  %v6835_v39 = vunpack.i.l.bf16 %v6834_v42  ;;  %v6861_v61 = vunpack.i.h.bf16 %v6859_v8  ;;  %v6836_v46 = vunpack.i.h.bf16 %v6834_v42 }
 0x411   :  { %v1499_v9 = vsel %vm1432_vm11, %v6835_v39, %v6860_v60  ;;  %v1500_v63 = vsel %vm1432_vm11, %v6836_v46, %v6861_v61 }
 0x412   :  { %v6864_v51 = vpop.permute.xlu1 %6863  ;;  %v1486_v35 = vpop.permute.xlu0 %1485 }
 0x413   :  { %v6866_v26 = vunpack.i.h.bf16 %v6864_v51  ;;  %v6865_v50 = vunpack.i.l.bf16 %v6864_v51 }
 0x416   :  { %v1428_v19 = vpop.permute.xlu1 %1427  ;;  %v6839_v2 = vpop.permute.xlu0 %6838 }
 0x417   :  { %v1435_v16 = vsel %vm1432_vm11, %v8898_v7, %v1428_v19  ;;  %v6841_v59 = vunpack.i.h.bf16 %v6839_v2  ;;  %v6840_v49 = vunpack.i.l.bf16 %v6839_v2 }
 0x418   :  { %v1608_v40 = vpack.c.bf16 %v1457_v22, %v1435_v16 }
 0x419   :  { %v1520_v21 = vsel %vm1432_vm11, %v6840_v49, %v6865_v50  ;;  %v1521_v38 = vsel %vm1432_vm11, %v6841_v59, %v6866_v26  ;;  %v1623_v50 = vld [vmem:[%s13332_s4 + $0x10] sm:$0x33] }
 0x41a   :  { %v1453_v30 = vpop.permute.xlu1 %1452  ;;  %v1507_v58 = vpop.permute.xlu0 %1506  ;;  %1671 = vmatpush1.bf16.msra.mxu1 %v1608_v40  ;;  %v1613_v27 = vpack.c.bf16 %v1521_v38, %v1520_v21 }
 0x41b   :  { %v1459_v4 = vsel %vm1432_vm11, %v1444_v28, %v1453_v30  ;;  %1672 = vmatprep.subr.bf16.mxu1 %v13346_v0 }
 0x41c   :  { %v1609_v11 = vpack.c.bf16 %v1459_v4, %v1458_v29 }
 0x41e   :  { %v6869_v14 = vpop.permute.xlu1 %6868  ;;  %v6844_v53 = vpop.permute.xlu0 %6843  ;;  %1673 = vmatpush1.bf16.msra.mxu1 %v1609_v11 }
 0x41f   :  { %1674 = vmatprep.subr.bf16.mxu1 %v13346_v0  ;;  %v6870_v55 = vunpack.i.l.bf16 %v6869_v14  ;;  %v6845_v13 = vunpack.i.l.bf16 %v6844_v53  ;;  %v6871_v52 = vunpack.i.h.bf16 %v6869_v14  ;;  %v6846_v1 = vunpack.i.h.bf16 %v6844_v53 }
 0x421   :  { %v1541_v54 = vsel %vm1432_vm11, %v6845_v13, %v6870_v55  ;;  %v1542_v19 = vsel %vm1432_vm11, %v6846_v1, %v6871_v52  ;;  %v1747_v13 = vld [vmem:[%s13333_s6 + $0x8] sm:$0xff] }
 0x422   :  { %v1474_v7 = vpop.permute.xlu1 %1473  ;;  %v1528_v31 = vpop.permute.xlu0 %1527  ;;  %1675 = vmatpush1.bf16.msra.mxu1 %v1610_v41 }
 0x423   :  { %v1480_v25 = vsel %vm1432_vm11, %v1465_v37, %v1474_v7  ;;  %1676 = vmatprep.subr.bf16.mxu1 %v13346_v0 }
 0x424   :  { %v1611_v17 = vpack.c.bf16 %v1499_v9, %v1480_v25 }
 0x426   :  { %v1495_v33 = vpop.permute.xlu1 %1494  ;;  %1677 = vmatpush1.bf16.msra.mxu1 %v1611_v17  ;;  %v6874_v23 = vpop.permute.xlu0 %6873 }
 0x427   :  { %v1501_v15 = vsel %vm1432_vm11, %v1486_v35, %v1495_v33  ;;  %1678 = vmatprep.subr.bf16.mxu1 %v13346_v0  ;;  %v6876_v10 = vunpack.i.h.bf16 %v6874_v23  ;;  %v6875_v34 = vunpack.i.l.bf16 %v6874_v23  ;;  %v6313_v23 = vcombine.low %v1623_v50, %v1623_v50 }
 0x428   :  { %v1612_v48 = vpack.c.bf16 %v1501_v15, %v1500_v63  ;;  %v6902_v15 = vld [vmem:[%s13332_s4] ss:$8 sps:$4 sm:$0xff]  }
 0x42a   :  { %v6879_v28 = vpop.permute.xlu1 %6878  ;;  %1679 = vmatpush1.bf16.msra.mxu1 %v1612_v48  ;;  %v1549_v43 = vpop.permute.xlu0 %1548  ;;  %v6314_v48 = vcombine.high %v1623_v50, %v1623_v50  ;;  %v1781_v50 = vld [vmem:[%s13333_s6 + $0x118] sm:$0xff] }
 0x42b   :  { %1680 = vmatprep.subr.bf16.mxu1 %v13346_v0  ;;  %v6881_v42 = vunpack.i.h.bf16 %v6879_v28  ;;  %v6880_v51 = vunpack.i.l.bf16 %v6879_v28 }
 0x42d   :  { %v1562_v22 = vsel %vm1432_vm11, %v6875_v34, %v6880_v51  ;;  %v1563_v40 = vsel %vm1432_vm11, %v6876_v10, %v6881_v42  ;;  %v1748_v34 = vld [vmem:[%s13333_s6 + $0x10] sm:$0xff] }
 0x42e   :  { %v1516_v47 = vpop.permute.xlu1 %1515  ;;  %1681 = vmatpush1.bf16.msra.mxu1 %v1613_v27  ;;  %v6884_v5 = vpop.permute.xlu0 %6883  ;;  %v1616_v12 = vpack.c.bf16 %v1563_v40, %v1562_v22  ;;  %v1752_v27 = vld [vmem:[%s13333_s6 + $0x30] sm:$0xff]  ;;  %v1761_v40 = vld [vmem:[%s13333_s6 + $0x78] sm:$0xff] }
 0x42f   :  { %v1522_v37 = vsel %vm1432_vm11, %v1507_v58, %v1516_v47  ;;  %1682 = vmatprep.subr.bf16.mxu1 %v13346_v0  ;;  %v6885_v30 = vunpack.i.l.bf16 %v6884_v5  ;;  %v6886_v3 = vunpack.i.h.bf16 %v6884_v5  ;;  %v6647_v1 = vpack.c.bf16 %v1752_v27, %v1747_v13  ;;  %v1756_v22 = vld [vmem:[%s13333_s6 + $0x50] sm:$0xff]  ;;  %v1783_v13 = vld [vmem:[%s13333_s6 + $0x128] sm:$0xff] }
 0x430   :  { %v1614_v8 = vpack.c.bf16 %v1541_v54, %v1522_v37  ;;  %v1751_v37 = vld [vmem:[%s13333_s6 + $0x28] sm:$0xff]  ;;  %v1749_v54 = vld [vmem:[%s13333_s6 + $0x18] sm:$0xff]  ;;  %v1792_v27 = vld [vmem:[%s13333_s6 + $0x170] sm:$0xff] }
 0x432   :  { %v1537_v35 = vpop.permute.xlu1 %1536  ;;  %1683 = vmatpush1.bf16.msra.mxu1 %v1614_v8  ;;  %v1570_v58 = vpop.permute.xlu0 %1569  ;;  %v1754_v8 = vld [vmem:[%s13333_s6 + $0x40] sm:$0xff] }
 0x433   :  { %v1543_v2 = vsel %vm1432_vm11, %v1528_v31, %v1537_v35  ;;  %1684 = vmatprep.subr.bf16.mxu1 %v13346_v0  ;;  %v6677_v10 = vpack.c.bf16 %v1754_v8, %v1749_v54  ;;  %v1791_v54 = vld [vmem:[%s13333_s6 + $0x168] sm:$0xff] }
 0x434   :  { %v1615_v16 = vpack.c.bf16 %v1543_v2, %v1542_v19  ;;  %v1753_v19 = vld [vmem:[%s13333_s6 + $0x38] sm:$0xff] }
 0x435   :  { %v1757_v2 = vld [vmem:[%s13333_s6 + $0x58] sm:$0xff]  ;;  %v6679_v5 = vpack.c.bf16 %v1753_v19, %v1748_v34  ;;  %6678 = vmatprep.subr.bf16.mxu0 %v6677_v10  ;;  %v1788_v34 = vld [vmem:[%s13333_s6 + $0x150] sm:$0xff] }
 0x436   :  { %v6889_v32 = vpop.permute.xlu1 %6888  ;;  %1685 = vmatpush1.bf16.msra.mxu1 %v1615_v16  ;;  %v6894_v60 = vpop.permute.xlu0 %6893  ;;  %v1762_v16 = vld [vmem:[%s13333_s6 + $0x80] sm:$0xff]  ;;  %v1793_v19 = vld [vmem:[%s13333_s6 + $0x178] sm:$0xff] }
 0x437   :  { %v6890_v18 = vunpack.i.l.bf16 %v6889_v32  ;;  %1686 = vmatprep.subr.bf16.mxu1 %v13346_v0  ;;  %v6891_v62 = vunpack.i.h.bf16 %v6889_v32  ;;  %v6896_v7 = vunpack.i.h.bf16 %v6894_v60  ;;  %v6895_v31 = vunpack.i.l.bf16 %v6894_v60  ;;  %6680 = vmatpush1.bf16.msra.mxu0 %v6679_v5  ;;  %v1799_v5 = vld [vmem:[%s13333_s6 + $0x1a8] sm:$0xff] }
 0x438   :  { %v6651_v32 = vpack.c.bf16 %v1762_v16, %v1757_v2  ;;  %v1804_v16 = vld [vmem:[%s13333_s6 + $0x1d0] sm:$0xff] }
 0x439   :  { %v1583_v4 = vsel %vm1432_vm11, %v6885_v30, %v6890_v18  ;;  %v1584_v14 = vsel %vm1432_vm11, %v6886_v3, %v6891_v62  ;;  %v6653_v18 = vpack.c.bf16 %v1761_v40, %v1756_v22  ;;  %v1764_v30 = vld [vmem:[%s13333_s6 + $0x90] sm:$0xff]  ;;  %v1763_v62 = vld [vmem:[%s13333_s6 + $0x88] sm:$0xff] }
 0x43a   :  { %v1558_v24 = vpop.permute.xlu1 %1557  ;;  %1687 = vmatpush1.bf16.msra.mxu1 %v1616_v12  ;;  %v1591_v17 = vpop.permute.xlu0 %1590  ;;  %v1759_v12 = vld [vmem:[%s13333_s6 + $0x68] sm:$0xff]  ;;  %v1796_v40 = vld [vmem:[%s13333_s6 + $0x190] sm:$0xff] }
 0x43b   :  { %v1564_v29 = vsel %vm1432_vm11, %v1549_v43, %v1558_v24  ;;  %1688 = vmatprep.subr.bf16.mxu1 %v13346_v0  ;;  %v1746_v43 = vld [vmem:[%s13333_s6] sm:$0xff]  ;;  %v6681_v24 = vpack.c.bf16 %v1764_v30, %v1759_v12  ;;  %v1807_v12 = vld [vmem:[%s13333_s6 + $0x1e8] sm:$0xff]  ;;  %v1812_v30 = vld [vmem:[%s13333_s6 + $0x210] sm:$0x1] }
 0x43c   :  { %v1617_v11 = vpack.c.bf16 %v1583_v4, %v1564_v29  ;;  %v6649_v35 = vpack.c.bf16 %v1751_v37, %v1746_v43  ;;  %v1767_v29 = vld [vmem:[%s13333_s6 + $0xa8] sm:$0xff]  ;;  %v1772_v4 = vld [vmem:[%s13333_s6 + $0xd0] sm:$0xff]  ;;  %v1786_v37 = vld [vmem:[%s13333_s6 + $0x140] sm:$0xff] }
 0x43d   :  { %v6655_v3 = vpack.c.bf16 %v1772_v4, %v1767_v29  ;;  %6682 = vmatprep.subr.bf16.mxu0 %v6681_v24  ;;  %v6665_v2 = vpack.c.bf16 %v1791_v54, %v1786_v37  ;;  %v1798_v24 = vld [vmem:[%s13333_s6 + $0x1a0] sm:$0xff]  ;;  %v1809_v4 = vld [vmem:[%s13333_s6 + $0x1f8] sm:$0xff]  ;;  %v1795_v54 = vld [vmem:[%s13333_s6 + $0x188] sm:$0xff] }
 0x43e   :  { %v1579_v36 = vpop.permute.xlu1 %1578  ;;  %1689 = vmatpush1.bf16.msra.mxu1 %v1617_v11  ;;  %v1790_v37 = vld [vmem:[%s13333_s6 + $0x160] sm:$0xff] }
 0x43f   :  { %v1585_v53 = vsel %vm1432_vm11, %v1570_v58, %v1579_v36  ;;  %1690 = vmatprep.subr.bf16.mxu1 %v13346_v0  ;;  %v1758_v58 = vld [vmem:[%s13333_s6 + $0x60] sm:$0xff] }
 0x440   :  { %v1618_v39 = vpack.c.bf16 %v1585_v53, %v1584_v14  ;;  %v6683_v11 = vpack.c.bf16 %v1763_v62, %v1758_v58  ;;  %v1766_v36 = vld [vmem:[%s13333_s6 + $0xa0] sm:$0xff]  ;;  %v1771_v14 = vld [vmem:[%s13333_s6 + $0xc8] sm:$0xff]  ;;  %v1769_v53 = vld [vmem:[%s13333_s6 + $0xb8] sm:$0xff]  ;;  %v6697_v58 = vpack.c.bf16 %v1804_v16, %v1799_v5 }
 0x441   :  { %v1803_v62 = vld [vmem:[%s13333_s6 + $0x1c8] sm:$0xff]  ;;  %v2228_v5 = vld [vmem:[%s13334_s9 + $0x80] sm:$0xff] }
 0x442   :  { %v6899_v41 = vpop.permute.xlu1 %6898  ;;  %1691 = vmatpush1.bf16.msra.mxu1 %v1618_v39  ;;  %6684 = vmatpush1.bf16.msra.mxu0 %v6683_v11  ;;  %v1814_v11 = vld [vmem:[%s13333_s6 + $0x220] sm:$0x1]  ;;  %v2229_v16 = vld [vmem:[%s13334_s9 + $0x88] sm:$0xff] }
 0x443   :  { %v6901_v61 = vunpack.i.h.bf16 %v6899_v41  ;;  %v6900_v46 = vunpack.i.l.bf16 %v6899_v41  ;;  %1692 = vmatprep.subr.bf16.mxu1 %v13346_v0  ;;  %v1774_v41 = vld [vmem:[%s13333_s6 + $0xe0] sm:$0xff] }
 0x445   :  { %v1604_v25 = vsel %vm1432_vm11, %v6895_v31, %v6900_v46  ;;  %v1605_v9 = vsel %vm1432_vm11, %v6896_v7, %v6901_v61  ;;  %v1768_v7 = vld [vmem:[%s13333_s6 + $0xb0] sm:$0xff]  ;;  %v1773_v31 = vld [vmem:[%s13333_s6 + $0xd8] sm:$0xff] }
 0x446   :  { %v1600_v59 = vpop.permute.xlu1 %1599  ;;  %v1619_v49 = vpack.c.bf16 %v1605_v9, %v1604_v25  ;;  %v6657_v25 = vpack.c.bf16 %v1771_v14, %v1766_v36  ;;  %v6685_v9 = vpack.c.bf16 %v1774_v41, %v1769_v53  ;;  %v1806_v36 = vld [vmem:[%s13333_s6 + $0x1e0] sm:$0xff]  ;;  %v1811_v14 = vld [vmem:[%s13333_s6 + $0x208] sm:$0x1]  ;;  %v6699_v53 = vpack.c.bf16 %v1803_v62, %v1798_v24  ;;  %v1808_v41 = vld [vmem:[%s13333_s6 + $0x1f0] sm:$0xff] }
 0x447   :  { %v1606_v33 = vsel %vm1432_vm11, %v1591_v17, %v1600_v59  ;;  %v1777_v17 = vld [vmem:[%s13333_s6 + $0xf8] sm:$0xff]  ;;  %v1782_v59 = vld [vmem:[%s13333_s6 + $0x120] sm:$0xff]  ;;  %v2245_v24 = vld [vmem:[%s13334_s9 + $0x108] sm:$0xff] }
 0x448   :  { %v1620_v26 = vpack.c.bf16 %v1606_v33, %v1606_v33  ;;  %1693 = vmatpush1.bf16.msra.mxu1 %v1619_v49  ;;  %v1776_v49 = vld [vmem:[%s13333_s6 + $0xf0] sm:$0xff]  ;;  %6686 = vmatprep.subr.bf16.mxu0 %v6685_v9 }
 0x449   :  { %1694 = vmatprep.subr.bf16.mxu1 %v13346_v0  ;;  %v6661_v43 = vpack.c.bf16 %v1781_v50, %v1776_v49 }
 0x44a   :  { %v1666_v63 = vsel %vm1664_vm12, %v1620_v26, 0  ;;  %v6659_v26 = vpack.c.bf16 %v1782_v59, %v1777_v17 }
 0x44b   :  { %v1630_v21 = vpop.permute.xlu0 %1629 }
 0x44c   :  { %1695 = vmatpush1.bf16.msra.mxu1 %v1666_v63  ;;  %v1779_v63 = vld [vmem:[%s13333_s6 + $0x108] sm:$0xff] }
 0x44d   :  { %6648 = vmatprep.subr.bf16.mxu1 %v6647_v1 }
 0x44f   :  { %1701 = vmatmul.mubr.bf16.vlgmr.msra.gmra.mrb[0].mxu1 %v6902_v15  ;;  %v1640_v60 = vpop.permute.xlu0 %1639  ;;  %v1784_v15 = vld [vmem:[%s13333_s6 + $0x130] sm:$0xff] }
 0x450   :  { %6316 = vmatprep.mubr.msk.bf16.mxu1 %vm1657_vm10, %v6314_v48  ;;  %6650 = vmatpush1.bf16.msra.mxu1 %v6649_v35  ;;  %v1802_v35 = vld [vmem:[%s13333_s6 + $0x1c0] sm:$0xff] }
 0x451   :  { %6652 = vmatprep.subr.bf16.mxu1 %v6651_v32  ;;  %v1801_v32 = vld [vmem:[%s13333_s6 + $0x1b8] sm:$0xff] }
 0x452   :  { %v6669_v29 = vpack.c.bf16 %v1801_v32, %v1796_v40  ;;  %v6729_v40 = vpack.c.bf16 %v2229_v16, %v2228_v5  ;;  %v2261_v32 = vld [vmem:[%s13334_s9 + $0x188] sm:$0xff] }
 0x453   :  { %v2253_v5 = vld [vmem:[%s13334_s9 + $0x148] sm:$0xff] }
 0x454   :  { %6654 = vmatpush1.bf16.msra.mxu1 %v6653_v18  ;;  %v6695_v18 = vpack.c.bf16 %v1793_v19, %v1788_v34  ;;  %v1810_v34 = vld [vmem:[%s13333_s6 + $0x200] sm:$0xff]  ;;  %v1815_v19 = vld [vmem:[%s13333_s6 + $0x228] sm:$0x1] }
 0x455   :  { %6656 = vmatprep.subr.bf16.mxu1 %v6655_v3  ;;  %v6671_v3 = vpack.c.bf16 %v1812_v30, %v1807_v12  ;;  %v2213_v12 = vld [vmem:[%s13334_s9 + $0x8] sm:$0xff] }
 0x457   :  { %1709 = vmatmul.mubr.bf16.gmra.mrb[4].mxu1 %v6313_v23  ;;  %v1635_v47 = vpop.permute.xlu1 %1634  ;;  %v6687_v23 = vpack.c.bf16 %v1773_v31, %v1768_v7  ;;  %v1813_v7 = vld [vmem:[%s13333_s6 + $0x218] sm:$0x1]  ;;  %v6674_v31 = vpack.c.bf16 %v1811_v14, %v1806_v36  ;;  %v2214_v14 = vld [vmem:[%s13334_s9 + $0x10] sm:$0xff] }
 0x458   :  { %1906 = vmatprep.mubr.f32.mxu1 %v7715_v6  ;;  %6658 = vmatpush1.bf16.msra.mxu1 %v6657_v25  ;;  %v2263_v36 = vld [vmem:[%s13334_s9 + $0x198] sm:$0xff] }
 0x459   :  { %6660 = vmatprep.subr.bf16.mxu1 %v6659_v26  ;;  %6688 = vmatpush1.bf16.msra.mxu0 %v6687_v23  ;;  %v1750_v26 = vld [vmem:[%s13333_s6 + $0x20] sm:$0xff] }
 0x45c   :  { %6662 = vmatpush1.bf16.msra.mxu1 %v6661_v43 }
 0x522   :  { %v1702_v38 = vpop.f32.mrb[0].mxu1 }
 0x523   :  { %v8989_v28 = vadd.f32 %v1702_v38, %v1630_v21  ;;  %v1704_v55 = vpop.f32.mrb[1].mxu1  ;;  %v1787_v21 = vld [vmem:[%s13333_s6 + $0x148] sm:$0xff]  ;;  %v6689_v38 = vpack.c.bf16 %v1784_v15, %v1779_v63  ;;  %v1760_v15 = vld [vmem:[%s13333_s6 + $0x70] sm:$0xff] }
 0x524   :  { %v1705_v52 = vpop.f32.mrb[2].mxu1  ;;  %v1778_v55 = vld [vmem:[%s13333_s6 + $0x100] sm:$0xff]  ;;  %v6663_v1 = vpack.c.bf16 %v1792_v27, %v1787_v21 }
 0x525   :  { %v9009_v42 = vadd.f32 %v1705_v52, %v1635_v47  ;;  %v1707_v51 = vpop.f32.mrb[3].mxu1  ;;  %1719 = vrot.lane.b32.xlu1 %v8989_v28, %s7706_s21  ;;  %v1789_v47 = vld [vmem:[%s13333_s6 + $0x158] sm:$0xff]  ;;  %v1794_v52 = vld [vmem:[%s13333_s6 + $0x180] sm:$0xff]  ;;  %v6691_v8 = vpack.c.bf16 %v1783_v13, %v1778_v55  ;;  %6690 = vmatprep.subr.bf16.mxu0 %v6689_v38  ;;  %v1775_v55 = vld [vmem:[%s13333_s6 + $0xe8] sm:$0xff] }
 0x526   :  { %v1797_v51 = vld [vmem:[%s13333_s6 + $0x198] sm:$0xff]  ;;  %v6693_v10 = vpack.c.bf16 %v1794_v52, %v1789_v47  ;;  %6664 = vmatprep.subr.bf16.mxu1 %v6663_v1  ;;  %v1770_v38 = vld [vmem:[%s13333_s6 + $0xc0] sm:$0xff]  ;;  %v1780_v47 = vld [vmem:[%s13333_s6 + $0x110] sm:$0xff] }
 0x527   :  { %1721 = vrot.lane.b32.xlu0 %v9009_v42, %s7706_s21  ;;  %v6667_v22 = vpack.c.bf16 %v1802_v35, %v1797_v51  ;;  %6692 = vmatpush1.bf16.msra.mxu0 %v6691_v8  ;;  %v6714_v27 = vpack.c.bf16 %v1775_v55, %v1770_v38  ;;  %v1785_v52 = vld [vmem:[%s13333_s6 + $0x138] sm:$0xff]  ;;  %v6720_v8 = vpack.c.bf16 %v1795_v54, %v1790_v37  ;;  %v1800_v51 = vld [vmem:[%s13333_s6 + $0x1b0] sm:$0xff]  ;;  %v2237_v37 = vld [vmem:[%s13334_s9 + $0xc8] sm:$0xff] }
 0x528   :  { %6694 = vmatprep.subr.bf16.mxu0 %v6693_v10  ;;  %6666 = vmatpush1.bf16.msra.mxu1 %v6665_v2  ;;  %v6717_v1 = vpack.c.bf16 %v1785_v52, %v1780_v47  ;;  %v1805_v35 = vld [vmem:[%s13333_s6 + $0x1d8] sm:$0xff]  ;;  %v6726_v2 = vpack.c.bf16 %v1815_v19, %v1810_v34  ;;  %v2218_v55 = vld [vmem:[%s13334_s9 + $0x30] sm:$0xff]  ;;  %v2268_v54 = vld [vmem:[%s13334_s9 + $0x1c0] sm:$0xff] }
 0x529   :  { %6668 = vmatprep.subr.bf16.mxu1 %v6667_v22  ;;  %v6723_v10 = vpack.c.bf16 %v1805_v35, %v1800_v51  ;;  %v2260_v22 = vld [vmem:[%s13334_s9 + $0x180] sm:$0xff]  ;;  %v2251_v47 = vld [vmem:[%s13334_s9 + $0x138] sm:$0xff]  ;;  %v2269_v51 = vld [vmem:[%s13334_s9 + $0x1c8] sm:$0xff] }
 0x52a   :  { %v1710_v39 = vpop.f32.mrb[4].mxu1  ;;  %v2220_v35 = vld [vmem:[%s13334_s9 + $0x40] sm:$0xff]  ;;  %v6777_v34 = vpack.c.bf16 %v2269_v51, %v2268_v54 }
 0x52b   :  { %v9069_v61 = vadd.f32 %v1710_v39, %v1640_v60  ;;  %v1712_v46 = vpop.f32.mrb[5].mxu1  ;;  %6696 = vmatpush1.bf16.msra.mxu0 %v6695_v18  ;;  %v6701_v39 = vpack.c.bf16 %v1814_v11, %v1809_v4  ;;  %v6761_v18 = vpack.c.bf16 %v2261_v32, %v2260_v22  ;;  %v2231_v4 = vld [vmem:[%s13334_s9 + $0x98] sm:$0xff]  ;;  %v2262_v11 = vld [vmem:[%s13334_s9 + $0x190] sm:$0xff]  ;;  %v2096_v54 = vld [vmem:[%s13335_s7 + $0x40] sm:$0xff] }
 0x52c   :  { %v1713_v33 = vpop.f32.mrb[6].mxu1  ;;  %6698 = vmatprep.subr.bf16.mxu0 %v6697_v58  ;;  %6670 = vmatpush1.bf16.msra.mxu1 %v6669_v29  ;;  %v6704_v46 = vpack.c.bf16 %v1813_v7, %v1808_v41  ;;  %v2244_v58 = vld [vmem:[%s13334_s9 + $0x100] sm:$0xff]  ;;  %v2230_v29 = vld [vmem:[%s13334_s9 + $0x90] sm:$0xff]  ;;  %v2215_v60 = vld [vmem:[%s13334_s9 + $0x18] sm:$0xff] }
 0x52d   :  { %1723 = vrot.lane.b32.xlu1 %v9069_v61, %s7706_s21  ;;  %v1714_v48 = vpop.f32.mrb[7].mxu1  ;;  %6673 = vmatprep.subr.msk.bf16.mxu1 %vm9163_vm15, %v6671_v3  ;;  %v6763_v62 = vpack.c.bf16 %v2245_v24, %v2244_v58  ;;  %v6733_v3 = vpack.c.bf16 %v2231_v4, %v2230_v29  ;;  %v2247_v41 = vld [vmem:[%s13334_s9 + $0x118] sm:$0xff]  ;;  %v6735_v7 = vpack.c.bf16 %v2215_v60, %v2214_v14  ;;  %v2238_v22 = vld [vmem:[%s13334_s9 + $0xd0] sm:$0xff]  ;;  %v2224_v60 = vld [vmem:[%s13334_s9 + $0x60] sm:$0xff] }
 0x52e   :  { %v2270_v32 = vld [vmem:[%s13334_s9 + $0x1d0] sm:$0xff]  ;;  %v2255_v29 = vld [vmem:[%s13334_s9 + $0x158] sm:$0xff] }
 0x52f   :  { %6700 = vmatpush1.bf16.msra.mxu0 %v6699_v53  ;;  %v6765_v53 = vpack.c.bf16 %v2263_v36, %v2262_v11  ;;  %v2240_v11 = vld [vmem:[%s13334_s9 + $0xe0] sm:$0xff] }
 0x530   :  { %6703 = vmatprep.subr.msk.bf16.mxu0 %vm9163_vm15, %v6701_v39  ;;  %6676 = vmatpush1.bf16.msk.msra.mxu1 %vm9163_vm15, %v6674_v31  ;;  %v2246_v39 = vld [vmem:[%s13334_s9 + $0x110] sm:$0xff]  ;;  %v2272_v36 = vld [vmem:[%s13334_s9 + $0x1e0] sm:$0xff] }
 0x531   :  { %6707 = vmatprep.subr.bf16.mxu1 %v7714_v20  ;;  %v6767_v31 = vpack.c.bf16 %v2247_v41, %v2246_v39  ;;  %v2225_v39 = vld [vmem:[%s13334_s9 + $0x68] sm:$0xff] }
 0x533   :  { %6706 = vmatpush1.bf16.msk.msra.mxu0 %vm9163_vm15, %v6704_v46  ;;  %v2232_v46 = vld [vmem:[%s13334_s9 + $0xa0] sm:$0xff] }
 0x534   :  { %6730 = vmatprep.subr.bf16.mxu0 %v6729_v40  ;;  %v2239_v40 = vld [vmem:[%s13334_s9 + $0xd8] sm:$0xff] }
 0x597   :  { %v1720_v25 = vpop.permute.xlu1 %1719 }
 0x598   :  { %v1728_v9 = vmax.f32 %v8989_v28, %v1720_v25  ;;  %v1755_v28 = vld [vmem:[%s13333_s6 + $0x48] sm:$0xff] }
 0x599   :  { %v1722_v17 = vpop.permute.xlu0 %1721  ;;  %v2233_v25 = vld [vmem:[%s13334_s9 + $0xa8] sm:$0xff] }
 0x59a   :  { %v1729_v59 = vmax.f32 %v9009_v42, %v1722_v17  ;;  %1734 = vrot.lane.b32.xlu0 %v1728_v9, %s7707_s22  ;;  %v6708_v42 = vpack.c.bf16 %v1755_v28, %v1750_v26  ;;  %v6737_v17 = vpack.c.bf16 %v2233_v25, %v2232_v46  ;;  %v2257_v46 = vld [vmem:[%s13334_s9 + $0x168] sm:$0xff] }
 0x59c   :  { %1736 = vrot.lane.b32.xlu1 %v1729_v59, %s7707_s22 }
 0x59f   :  { %v1724_v49 = vpop.permute.xlu1 %1723 }
 0x5a0   :  { %v1730_v33 = vmax.f32 %v9069_v61, %v1724_v49  ;;  %v1765_v61 = vld [vmem:[%s13333_s6 + $0x98] sm:$0xff]  ;;  %v2216_v49 = vld [vmem:[%s13334_s9 + $0x20] sm:$0xff] }
 0x5a1   :  { %v6711_v23 = vpack.c.bf16 %v1765_v61, %v1760_v15  ;;  %v2234_v15 = vld [vmem:[%s13334_s9 + $0xb0] sm:$0xff]  ;;  %v2235_v61 = vld [vmem:[%s13334_s9 + $0xb8] sm:$0xff] }
 0x5a2   :  { %1738 = vrot.lane.b32.xlu0 %v1730_v33, %s7707_s22 }
 0x60c   :  { %v1735_v50 = vpop.permute.xlu0 %1734 }
 0x60d   :  { %v1743_v63 = vmax.f32 %v1728_v9, %v1735_v50  ;;  %v2264_v9 = vld [vmem:[%s13334_s9 + $0x1a0] sm:$0xff] }
 0x60e   :  { %v1737_v48 = vpop.permute.xlu1 %1736  ;;  %v2248_v50 = vld [vmem:[%s13334_s9 + $0x120] sm:$0xff] }
 0x60f   :  { %6319 = vmatmul.mubr.msk.f32.vlgmr.msra.gmra.mrb[8].mxu1 %vm1816_vm0, %v1743_v63  ;;  %6324 = vmatmul.mubr.msk.f32.vlgmr.msra.gmra.mrb[12].mxu0 %vm1816_vm0, %v1743_v63  ;;  %v1744_v21 = vmax.f32 %v1729_v59, %v1737_v48  ;;  %v2265_v59 = vld [vmem:[%s13334_s9 + $0x1a8] sm:$0xff]  ;;  %v2266_v48 = vld [vmem:[%s13334_s9 + $0x1b0] sm:$0xff] }
 0x610   :  { %6709 = vmatpush3.bf16.msra.mxu1 %v6708_v42  ;;  %1912 = vmatprep.mubr.f32.mxu1 %v7715_v6  ;;  %v6769_v26 = vpack.c.bf16 %v2265_v59, %v2264_v9  ;;  %v2249_v42 = vld [vmem:[%s13334_s9 + $0x128] sm:$0xff]  ;;  %v2242_v9 = vld [vmem:[%s13334_s9 + $0xf0] sm:$0xff] }
 0x611   :  { %1995 = vmatprep.mubr.f32.mxu0 %v7715_v6  ;;  %6710 = vmatprep.subr.bf16.mxu1 %v7714_v20  ;;  %v2274_v59 = vld [vmem:[%s13334_s9 + $0x1f0] sm:$0xff] }
 0x613   :  { %6320 = vmatmul.mubr.msk.f32.gmra.mrb[10].mxu1 %vm1816_vm0, %v1744_v21  ;;  %6325 = vmatmul.mubr.msk.f32.gmra.mrb[14].mxu0 %vm1816_vm0, %v1744_v21 }
 0x614   :  { %6712 = vmatpush3.bf16.msra.mxu1 %v6711_v23  ;;  %v1739_v13 = vpop.permute.xlu0 %1738  ;;  %1918 = vmatprep.mubr.f32.mxu1 %v7715_v6  ;;  %v2267_v23 = vld [vmem:[%s13334_s9 + $0x1b8] sm:$0xff] }
 0x615   :  { %v1745_v43 = vmax.f32 %v1730_v33, %v1739_v13  ;;  %2001 = vmatprep.mubr.f32.mxu0 %v7715_v6  ;;  %6713 = vmatprep.subr.bf16.mxu1 %v7714_v20  ;;  %v2217_v33 = vld [vmem:[%s13334_s9 + $0x28] sm:$0xff]  ;;  %v6773_v38 = vpack.c.bf16 %v2267_v23, %v2266_v48  ;;  %v2219_v13 = vld [vmem:[%s13334_s9 + $0x38] sm:$0xff]  ;;  %v9452_v48 = vld [vmem:[%s13334_s9 + $0x200] sm:$0xff] }
 0x616   :  { %v6739_v28 = vpack.c.bf16 %v2217_v33, %v2216_v49  ;;  %v2275_v33 = vld [vmem:[%s13334_s9 + $0x1f8] sm:$0xff] }
 0x617   :  { %6321 = vmatmul.mubr.msk.f32.gmra.mrb[12].mxu1 %vm1816_vm0, %v1745_v43  ;;  %6326 = vmatmul.mubr.msk.f32.gmra.mrb[16].mxu0 %vm1816_vm0, %v1745_v43 }
 0x618   :  { %6715 = vmatpush3.bf16.msra.mxu1 %v6714_v27  ;;  %6585 = vmatprep.mubr.msk.f32.mxu1 %vm7726_vm1, %v7715_v6  ;;  %v2250_v27 = vld [vmem:[%s13334_s9 + $0x130] sm:$0xff] }
 0x619   :  { %6716 = vmatprep.subr.bf16.mxu1 %v7714_v20  ;;  %v6775_v52 = vpack.c.bf16 %v2251_v47, %v2250_v27  ;;  %v2093_v47 = vld [vmem:[%s13335_s7 + $0x28] sm:$0xff] }
 0x61c   :  { %6718 = vmatpush3.bf16.msra.mxu1 %v6717_v1  ;;  %v2236_v1 = vld [vmem:[%s13334_s9 + $0xc0] sm:$0xff] }
 0x61d   :  { %6719 = vmatprep.subr.bf16.mxu1 %v7714_v20 }
 0x620   :  { %6721 = vmatpush3.bf16.msra.mxu1 %v6720_v8  ;;  %v6745_v8 = vpack.c.bf16 %v2237_v37, %v2236_v1  ;;  %v2091_v1 = vld [vmem:[%s13335_s7 + $0x18] sm:$0xff]  ;;  %v2094_v37 = vld [vmem:[%s13335_s7 + $0x30] sm:$0xff] }
 0x621   :  { %6722 = vmatprep.subr.bf16.mxu1 %v7714_v20 }
 0x624   :  { %6724 = vmatpush3.bf16.msra.mxu1 %v6723_v10  ;;  %v2221_v10 = vld [vmem:[%s13334_s9 + $0x48] sm:$0xff] }
 0x625   :  { %6725 = vmatprep.subr.bf16.mxu1 %v7714_v20  ;;  %v6747_v19 = vpack.c.bf16 %v2221_v10, %v2220_v35 }
 0x628   :  { %6728 = vmatpush3.bf16.msk.msra.mxu1 %vm9163_vm15, %v6726_v2  ;;  %v2252_v2 = vld [vmem:[%s13334_s9 + $0x140] sm:$0xff] }
 0x629   :  { %6762 = vmatprep.subr.bf16.mxu1 %v6761_v18  ;;  %v6779_v16 = vpack.c.bf16 %v2253_v5, %v2252_v2  ;;  %v2271_v18 = vld [vmem:[%s13334_s9 + $0x1d8] sm:$0xff] }
 0x62a   :  { %v6781_v58 = vpack.c.bf16 %v2271_v18, %v2270_v32  ;;  %v2100_v18 = vld [vmem:[%s13335_s7 + $0x60] sm:$0xf] }
 0x62b   :  { %6586 = vmatmul.mubr.msk.f32.vlgmr.msra.gmra.mrb[14].mxu1 %vm1816_vm0, %v1743_v63  ;;  %v6771_v63 = vpack.c.bf16 %v2249_v42, %v2248_v50  ;;  %v2227_v50 = vld [vmem:[%s13334_s9 + $0x78] sm:$0xff]  ;;  %v2258_v42 = vld [vmem:[%s13334_s9 + $0x170] sm:$0xff] }
 0x62c   :  { %6588 = vmatprep.mubr.msk.f32.mxu1 %vm7726_vm1, %v7715_v6  ;;  %6764 = vmatpush3.bf16.msra.mxu1 %v6763_v62  ;;  %v2254_v62 = vld [vmem:[%s13334_s9 + $0x150] sm:$0xff] }
 0x62d   :  { %6766 = vmatprep.subr.bf16.mxu1 %v6765_v53  ;;  %v6783_v4 = vpack.c.bf16 %v2255_v29, %v2254_v62  ;;  %v2273_v53 = vld [vmem:[%s13334_s9 + $0x1e8] sm:$0xff] }
 0x62e   :  { %v6785_v41 = vpack.c.bf16 %v2273_v53, %v2272_v36 }
 0x62f   :  { %6589 = vmatmul.mubr.msk.f32.gmra.mrb[16].mxu1 %vm1816_vm0, %v1744_v21  ;;  %v6741_v21 = vpack.c.bf16 %v2235_v61, %v2234_v15 }
 0x630   :  { %6591 = vmatprep.mubr.msk.f32.mxu1 %vm7726_vm1, %v7715_v6  ;;  %v2212_v6 = vld [vmem:[%s13334_s9] sm:$0xff]  ;;  %6768 = vmatpush3.bf16.msra.mxu1 %v6767_v31 }
 0x631   :  { %v6731_v30 = vpack.c.bf16 %v2213_v12, %v2212_v6  ;;  %6770 = vmatprep.subr.bf16.mxu1 %v6769_v26  ;;  %v6749_v6 = vpack.c.bf16 %v2239_v40, %v2238_v22  ;;  %v2222_v12 = vld [vmem:[%s13334_s9 + $0x50] sm:$0xff]  ;;  %v2256_v31 = vld [vmem:[%s13334_s9 + $0x160] sm:$0xff] }
 0x632   :  { %v6787_v25 = vpack.c.bf16 %v2257_v46, %v2256_v31  ;;  %v2226_v26 = vld [vmem:[%s13334_s9 + $0x70] sm:$0xff] }
 0x633   :  { %6592 = vmatmul.mubr.msk.f32.gmra.mrb[18].mxu1 %vm1816_vm0, %v1745_v43  ;;  %6732 = vmatpush3.bf16.msra.mxu0 %v6731_v30  ;;  %v6743_v43 = vpack.c.bf16 %v2219_v13, %v2218_v55  ;;  %v2223_v30 = vld [vmem:[%s13334_s9 + $0x58] sm:$0xff]  ;;  %v6759_v15 = vpack.c.bf16 %v2227_v50, %v2226_v26  ;;  %v2090_v55 = vld [vmem:[%s13335_s7 + $0x10] sm:$0xff] }
 0x634   :  { %6734 = vmatprep.subr.bf16.mxu0 %v6733_v3  ;;  %6772 = vmatpush3.bf16.msra.mxu1 %v6771_v63  ;;  %v6751_v24 = vpack.c.bf16 %v2223_v30, %v2222_v12  ;;  %v2241_v3 = vld [vmem:[%s13334_s9 + $0xe8] sm:$0xff]  ;;  %v2259_v63 = vld [vmem:[%s13334_s9 + $0x178] sm:$0xff] }
 0x635   :  { %6774 = vmatprep.subr.bf16.mxu1 %v6773_v38  ;;  %v6753_v14 = vpack.c.bf16 %v2241_v3, %v2240_v11  ;;  %v6791_v61 = vpack.c.bf16 %v2259_v63, %v2258_v42  ;;  %v2088_v38 = vld [vmem:[%s13335_s7] sm:$0xff] }
 0x637   :  { %6736 = vmatpush3.bf16.msra.mxu0 %v6735_v7  ;;  %v6755_v7 = vpack.c.bf16 %v2225_v39, %v2224_v60 }
 0x638   :  { %6738 = vmatprep.subr.bf16.mxu0 %v6737_v17  ;;  %6776 = vmatpush3.bf16.msra.mxu1 %v6775_v52  ;;  %v2243_v17 = vld [vmem:[%s13334_s9 + $0xf8] sm:$0xff] }
 0x639   :  { %6778 = vmatprep.subr.bf16.mxu1 %v6777_v34  ;;  %v6757_v49 = vpack.c.bf16 %v2243_v17, %v2242_v9  ;;  %v2095_v52 = vld [vmem:[%s13335_s7 + $0x38] sm:$0xff] }
 0x63b   :  { %6740 = vmatpush3.bf16.msra.mxu0 %v6739_v28  ;;  %v6789_v28 = vpack.c.bf16 %v2275_v33, %v2274_v59 }
 0x63c   :  { %6742 = vmatprep.subr.bf16.mxu0 %v6741_v21  ;;  %6780 = vmatpush3.bf16.msra.mxu1 %v6779_v16 }
 0x63d   :  { %6782 = vmatprep.subr.bf16.mxu1 %v6781_v58  ;;  %v2099_v58 = vld [vmem:[%s13335_s7 + $0x58] sm:$0xf] }
 0x63f   :  { %6744 = vmatpush3.bf16.msra.mxu0 %v6743_v43  ;;  %v2089_v43 = vld [vmem:[%s13335_s7 + $0x8] sm:$0xff] }
 0x640   :  { %6746 = vmatprep.subr.bf16.mxu0 %v6745_v8  ;;  %6784 = vmatpush3.bf16.msra.mxu1 %v6783_v4 }
 0x641   :  { %6786 = vmatprep.subr.bf16.mxu1 %v6785_v41 }
 0x643   :  { %6748 = vmatpush3.bf16.msra.mxu0 %v6747_v19 }
 0x644   :  { %6750 = vmatprep.subr.bf16.mxu0 %v6749_v6  ;;  %6788 = vmatpush3.bf16.msra.mxu1 %v6787_v25  ;;  %v2098_v6 = vld [vmem:[%s13335_s7 + $0x50] sm:$0xf] }
 0x645   :  { %6790 = vmatprep.subr.bf16.mxu1 %v6789_v28 }
 0x647   :  { %6752 = vmatpush3.bf16.msra.mxu0 %v6751_v24  ;;  %v2101_v24 = vld [vmem:[%s13335_s7 + $0x68] sm:$0xf] }
 0x648   :  { %6754 = vmatprep.subr.bf16.mxu0 %v6753_v14  ;;  %6792 = vmatpush3.bf16.msra.mxu1 %v6791_v61 }
 0x64b   :  { %6756 = vmatpush3.bf16.msra.mxu0 %v6755_v7 }
 0x64c   :  { %6758 = vmatprep.subr.bf16.mxu0 %v6757_v49 }
 0x64f   :  { %6760 = vmatpush3.bf16.msra.mxu0 %v6759_v15 }
 0x650   :  { %6594 = vmatprep.subr.mxu0 %v9452_v48 }
 0x6e2   :  { %v1908_v23 = vpop.f32.mrb[8].mxu1  ;;  %v1991_v21 = vpop.f32.mrb[12].mxu0 }
 0x6e3   :  { %v1910_v13 = vpop.f32.mrb[9].mxu1  ;;  %v1993_v27 = vpop.f32.mrb[13].mxu0  ;;  %v2103_v35 = vmul.f32 %v2088_v38, %v1908_v23  ;;  %v2105_v10 = vmul.f32 %v2090_v55, %v1991_v21 }
 0x6e4   :  { %v2104_v16 = vmul.f32 %v2089_v43, %v1910_v13  ;;  %v2106_v22 = vmul.f32 %v2091_v1, %v1993_v27 }
 0x6e6   :  { %v1914_v8 = vpop.f32.mrb[10].mxu1  ;;  %v1997_v51 = vpop.f32.mrb[14].mxu0 }
 0x6e7   :  { %v2108_v34 = vmul.f32 %v2093_v47, %v1914_v8  ;;  %v2110_v19 = vmul.f32 %v2095_v52, %v1997_v51  ;;  %v1916_v2 = vpop.f32.mrb[11].mxu1  ;;  %v1999_v5 = vpop.f32.mrb[15].mxu0 }
 0x6e8   :  { %v2109_v40 = vmul.f32 %v2094_v37, %v1916_v2  ;;  %v2111_v32 = vmul.f32 %v2096_v54, %v1999_v5  ;;  %v2175_v2 = vld [vmem:[%s13336_s8 + $0x18] sm:$0xff] }
 0x6e9   :  { %v2118_v12 = vadd.f32 %v2108_v34, %v2103_v35  ;;  %v2136_v30 = vadd.f32 %v2110_v19, %v2105_v10  ;;  %v2173_v19 = vld [vmem:[%s13336_s8 + $0x8] sm:$0xff] }
 0x6ea   :  { %v2127_v62 = vadd.f32 %v2109_v40, %v2104_v16  ;;  %v2145_v29 = vadd.f32 %v2111_v32, %v2106_v22  ;;  %v1920_v4 = vpop.f32.mrb[12].mxu1  ;;  %v2003_v11 = vpop.f32.mrb[16].mxu0  ;;  %v2172_v22 = vld [vmem:[%s13336_s8] sm:$0xff]  ;;  %v2174_v40 = vld [vmem:[%s13336_s8 + $0x10] sm:$0xff] }
 0x6eb   :  { %v2113_v3 = vmul.f32 %v2098_v6, %v1920_v4  ;;  %v2115_v36 = vmul.f32 %v2100_v18, %v2003_v11  ;;  %v1922_v14 = vpop.f32.mrb[13].mxu1  ;;  %v2005_v53 = vpop.f32.mrb[17].mxu0  ;;  %v2092_v6 = vld [vmem:[%s13335_s7 + $0x20] sm:$0xff]  ;;  %v2178_v18 = vld [vmem:[%s13336_s8 + $0x30] sm:$0xff] }
 0x6ec   :  { %v2114_v60 = vmul.f32 %v2099_v58, %v1922_v14  ;;  %v2116_v39 = vmul.f32 %v2101_v24, %v2005_v53  ;;  %v2177_v14 = vld [vmem:[%s13336_s8 + $0x28] sm:$0xff]  ;;  %v2179_v53 = vld [vmem:[%s13336_s8 + $0x38] sm:$0xff] }
 0x6ed   :  { %v2119_v41 = vsel %vm1664_vm12, %v2113_v3, 0.0  ;;  %v2137_v7 = vsel %vm1664_vm12, %v2115_v36, 0.0 }
 0x6ee   :  { %v2120_v31 = vadd.f32 %v2119_v41, %v2118_v12  ;;  %v2138_v46 = vadd.f32 %v2137_v7, %v2136_v30  ;;  %v2128_v25 = vsel %vm1664_vm12, %v2114_v60, 0.0  ;;  %v2146_v9 = vsel %vm1664_vm12, %v2116_v39, 0.0  ;;  %v2180_v12 = vld [vmem:[%s13336_s8 + $0x40] sm:$0xff]  ;;  %v2183_v39 = vld [vmem:[%s13336_s8 + $0x58] sm:$0xff]  ;;  %v2185_v41 = vld [vmem:[%s13336_s8 + $0x68] sm:$0xff] }
 0x6ef   :  { %v2129_v17 = vadd.f32 %v2128_v25, %v2127_v62  ;;  %v2147_v59 = vadd.f32 %v2146_v9, %v2145_v29  ;;  %v2097_v62 = vld [vmem:[%s13335_s7 + $0x48] sm:$0xff] }
 0x6f0   :  { %v2121_v49 = vrot.slane %v2120_v31, 4  ;;  %v2139_v33 = vrot.slane %v2138_v46, 4 }
 0x6f1   :  { %v2130_v26 = vrot.slane %v2129_v17, 4  ;;  %v2148_v28 = vrot.slane %v2147_v59, 4 }
 0x6f2   :  { %v2122_v50 = vadd.f32 %v2121_v49, %v2120_v31  ;;  %v2140_v42 = vadd.f32 %v2139_v33, %v2138_v46  ;;  %v2102_v46 = vld [vmem:[%s13335_s7 + $0x70] sm:$0xf] }
 0x6f3   :  { %v2131_v63 = vadd.f32 %v2130_v26, %v2129_v17  ;;  %v2149_v15 = vadd.f32 %v2148_v28, %v2147_v59  ;;  %v2182_v26 = vld [vmem:[%s13336_s8 + $0x50] sm:$0xff]  ;;  %v2184_v28 = vld [vmem:[%s13336_s8 + $0x60] sm:$0xff] }
 0x6f4   :  { %v2123_v61 = vrot.slane %v2122_v50, 2  ;;  %v2141_v23 = vrot.slane %v2140_v42, 2 }
 0x6f5   :  { %v2132_v21 = vrot.slane %v2131_v63, 2  ;;  %v2150_v38 = vrot.slane %v2149_v15, 2 }
 0x6f6   :  { %v2124_v55 = vadd.f32 %v2123_v61, %v2122_v50  ;;  %v2142_v13 = vadd.f32 %v2141_v23, %v2140_v42 }
 0x6f7   :  { %v2133_v27 = vadd.f32 %v2132_v21, %v2131_v63  ;;  %v2151_v43 = vadd.f32 %v2150_v38, %v2149_v15  ;;  %v2190_v63 = vld [vmem:[%s13336_s8 + $0x90] sm:$0x3] }
 0x6f8   :  { %v2125_v47 = vrot.slane %v2124_v55, 1  ;;  %v2143_v52 = vrot.slane %v2142_v13, 1 }
 0x6f9   :  { %v2134_v1 = vrot.slane %v2133_v27, 1  ;;  %v2152_v37 = vrot.slane %v2151_v43, 1 }
 0x6fa   :  { %v2126_v54 = vadd.f32 %v2125_v47, %v2124_v55  ;;  %v2144_v8 = vadd.f32 %v2143_v52, %v2142_v13 }
 0x6fb   :  { %v2135_v51 = vadd.f32 %v2134_v1, %v2133_v27  ;;  %v2153_v35 = vadd.f32 %v2152_v37, %v2151_v43  ;;  %v2187_v27 = vld [vmem:[%s13336_s8 + $0x78] sm:$0x3]  ;;  %v2189_v43 = vld [vmem:[%s13336_s8 + $0x88] sm:$0x3] }
 0x6fc   :  { %v9495_v10 = vmax.f32 %v2126_v54, 0.0  ;;  %v9497_v34 = vmax.f32 %v2144_v8, 0.0 }
 0x6fd   :  { %v2168_v5 = vmax.f32 %v2135_v51, 0.0  ;;  %v2170_v16 = vmax.f32 %v2153_v35, 0.0 }
 0x6fe   :  { %v2074_v32 = vpop.f32.mrb[14].mxu1  ;;  %v2192_v29 = vmul.f32 %v2172_v22, %v9495_v10  ;;  %v2194_v4 = vmul.f32 %v2174_v40, %v9497_v34  ;;  %v2197_v25 = vmul.f32 %v2177_v14, %v9495_v10  ;;  %v2199_v9 = vmul.f32 %v2179_v53, %v9497_v34  ;;  %v9610_v53 = vld [vmem:[%s13338_s12 + $0x4] ss:$16 sps:$4 sm:$0xff]  }
 0x6ff   :  { %v6587_v30 = vpop.f32.mrb[15].mxu1  ;;  %v2193_v58 = vmul.f32 %v2173_v19, %v2168_v5  ;;  %v2195_v24 = vmul.f32 %v2175_v2, %v2170_v16  ;;  %v2107_v11 = vmul.f32 %v2092_v6, %v2074_v32  ;;  %v2198_v3 = vmul.f32 %v2178_v18, %v2168_v5  ;;  %v2176_v2 = vld [vmem:[%s13336_s8 + $0x20] sm:$0xff]  ;;  %v2191_v32 = vld [vmem:[%s13336_s8 + $0x98] sm:$0x3] }
 0x700   :  { %v2200_v36 = vmul.f32 %v2180_v12, %v2170_v16  ;;  %v2203_v49 = vmul.f32 %v2183_v39, %v2168_v5  ;;  %v2205_v33 = vmul.f32 %v2185_v41, %v2170_v16  ;;  %v2202_v23 = vmul.f32 %v2182_v26, %v9495_v10  ;;  %v6907_v18 = vld [vmem:[%s13337_s10 + $0x8] ss:$16 sps:$4 sm:$0xff]   ;;  %v6909_v12 = vld [vmem:[%s13337_s10 + $0xc] ss:$16 sps:$4 sm:$0xff]   ;;  %v6910_v30 = vld [vmem:[%s13337_s10] ss:$16 sps:$4 sm:$0xff]  }
 0x701   :  { %2353 = vmatprep.mubr.f32.mxu0 %v2193_v58  ;;  %2438 = vmatprep.mubr.f32.mxu1 %v2195_v24  ;;  %v2155_v17 = vsel %vm2154_vm2, %v2107_v11, 0.0  ;;  %v2204_v21 = vmul.f32 %v2184_v28, %v9497_v34  ;;  %v2210_v13 = vmul.f32 %v2190_v63, %v2170_v16  ;;  %v2207_v1 = vmul.f32 %v2187_v27, %v9495_v10  ;;  %v6912_v58 = vld [vmem:[%s13337_s10 + $0x4] ss:$16 sps:$4 sm:$0xff]  }
 0x702   :  { %v2079_v60 = vpop.f32.mrb[16].mxu1  ;;  %2354 = vmatmul.mubr.f32.vlgmr.msra.gmra.mrb[18].mxu0 %v2192_v29  ;;  %2439 = vmatmul.mubr.f32.vlgmr.msra.gmra.mrb[20].mxu1 %v2194_v4  ;;  %v2209_v37 = vmul.f32 %v2189_v43, %v9497_v34  ;;  %v2186_v34 = vld [vmem:[%s13336_s8 + $0x70] sm:$0xff]  ;;  %v2550_v24 = vld [vmem:[%s13337_s10 + $0x20] sm:$0x33] }
 0x703   :  { %v2112_v7 = vmul.f32 %v2097_v62, %v2079_v60  ;;  %v6590_v31 = vpop.f32.mrb[17].mxu1  ;;  %2358 = vmatprep.mubr.f32.mxu0 %v2198_v3  ;;  %2443 = vmatprep.mubr.f32.mxu1 %v2200_v36  ;;  %v2551_v62 = vld [vmem:[%s13337_s10 + $0x28] sm:$0x33]  ;;  %v6340_v29 = vcombine.high %v2550_v24, %v2550_v24  ;;  %v6339_v11 = vcombine.low %v2550_v24, %v2550_v24  ;;  %v9684_v24 = vld [vmem:[%s13338_s12 + $0x64] ss:$16 sps:$4 sm:$0xff]  }
 0x704   :  { %6595 = vmatpush3.msra.mxu0 %v9452_v48  ;;  %v2188_v48 = vld [vmem:[%s13336_s8 + $0x80] sm:$0x3]  ;;  %2677 = vmatprep.subr.bf16.mxu1 %v6909_v12  ;;  %v6342_v4 = vcombine.high %v2551_v62, %v2551_v62  ;;  %v6341_v3 = vcombine.low %v2551_v62, %v2551_v62  ;;  %v9615_v60 = vld [vmem:[%s13338_s12 + $0xc] ss:$16 sps:$4 sm:$0xff]  }
 0x705   :  { %v2156_v59 = vsel %vm2154_vm2, %v2112_v7, 0.0  ;;  %v2208_v55 = vmul.f32 %v2188_v48, %v2168_v5  ;;  %v2181_v5 = vld [vmem:[%s13336_s8 + $0x48] sm:$0xff]  ;;  %2678 = vmatpush1.bf16.msra.mxu1 %v6907_v18  ;;  %2624 = vmatprep.subr.bf16.mxu0 %v6912_v58  ;;  %v2613_v36 = vsel %vm2611_vm4, %v6339_v11, 0  ;;  %v9658_v18 = vld [vmem:[%s13338_s12 + $0x44] ss:$16 sps:$4 sm:$0xff]  }
 0x706   :  { %v2157_v50 = vadd.f32 %v2156_v59, %v2155_v17  ;;  %v2084_v42 = vpop.f32.mrb[18].mxu1  ;;  %2359 = vmatmul.mubr.f32.gmra.mrb[20].mxu0 %v2197_v25  ;;  %2444 = vmatmul.mubr.f32.gmra.mrb[22].mxu1 %v2199_v9  ;;  %v2619_v14 = vsel %vm2611_vm4, %v6341_v3, 0  ;;  %v9663_v12 = vld [vmem:[%s13338_s12 + $0x4c] ss:$16 sps:$4 sm:$0xff]   ;;  %v9677_v58 = vld [vmem:[%s13338_s12 + $0x48] ss:$16 sps:$4 sm:$0xff]  }
 0x707   :  { %v2117_v15 = vmul.f32 %v2102_v46, %v2084_v42  ;;  %v6593_v61 = vpop.f32.mrb[19].mxu1  ;;  %2363 = vmatprep.mubr.f32.mxu0 %v2203_v49  ;;  %2448 = vmatprep.mubr.f32.mxu1 %v2205_v33  ;;  %v9689_v62 = vld [vmem:[%s13338_s12 + $0x6c] ss:$16 sps:$4 sm:$0xff]   ;;  %v9710_v11 = vld [vmem:[%s13338_s12 + $0x84] ss:$16 sps:$4 sm:$0xff]  }
 0x708   :  { %6346 = vmatprep.subr.msk.bf16.mxu1 %vm2611_vm4, %v6342_v4  ;;  %v9703_v4 = vld [vmem:[%s13338_s12 + $0x68] ss:$16 sps:$4 sm:$0xff]   ;;  %v9715_v3 = vld [vmem:[%s13338_s12 + $0x8c] ss:$16 sps:$4 sm:$0xff]  }
 0x709   :  { %v2159_v38 = vsel %vm2158_vm3, %v2117_v15, 0.0  ;;  %2680 = vmatpush1.bf16.msra.mxu1 %v2619_v14  ;;  %v9729_v14 = vld [vmem:[%s13338_s12 + $0x88] ss:$16 sps:$4 sm:$0xff]  }
 0x70a   :  { %v2160_v47 = vadd.f32 %v2159_v38, %v2157_v50  ;;  %2364 = vmatmul.mubr.f32.gmra.mrb[22].mxu0 %v2202_v23  ;;  %2449 = vmatmul.mubr.f32.gmra.mrb[24].mxu1 %v2204_v21 }
 0x70b   :  { %2368 = vmatprep.mubr.f32.mxu0 %v2208_v55  ;;  %2453 = vmatprep.mubr.f32.mxu1 %v2210_v13 }
 0x70c   :  { %v2161_v52 = vrot.slane %v2160_v47, 4  ;;  %3028 = vmatprep.subr.bf16.mxu1 %v9615_v60 }
 0x70e   :  { %v2162_v54 = vadd.f32 %v2161_v52, %v2160_v47  ;;  %2369 = vmatmul.mubr.f32.gmra.mrb[24].mxu0 %v2207_v1  ;;  %2454 = vmatmul.mubr.f32.gmra.mrb[26].mxu1 %v2209_v37 }
 0x70f   :  { %2709 = vmatprep.mubr.bf16.mxu1 %v13346_v0 }
 0x710   :  { %v2163_v8 = vrot.slane %v2162_v54, 2 }
 0x712   :  { %v2164_v51 = vadd.f32 %v2163_v8, %v2162_v54 }
 0x714   :  { %v2165_v35 = vrot.slane %v2164_v51, 1 }
 0x716   :  { %v2166_v19 = vadd.f32 %v2165_v35, %v2164_v51  ;;  %v9622_v51 = vld [vmem:[%s13338_s12] ss:$16 sps:$4 sm:$0xff]   ;;  %v9627_v35 = vld [vmem:[%s13338_s12 + $0x8] ss:$16 sps:$4 sm:$0xff]  }
 0x718   :  { %v2171_v10 = vmax.f32 %v2166_v19, 0.0 }
 0x71a   :  { %v2196_v16 = vmul.f32 %v2176_v2, %v2171_v10  ;;  %v2201_v22 = vmul.f32 %v2181_v5, %v2171_v10  ;;  %v2206_v40 = vmul.f32 %v2186_v34, %v2171_v10  ;;  %v2211_v6 = vmul.f32 %v2191_v32, %v2171_v10  ;;  %v9632_v5 = vld [vmem:[%s13338_s12 + $0x24] ss:$16 sps:$4 sm:$0xff]   ;;  %v9637_v10 = vld [vmem:[%s13338_s12 + $0x2c] ss:$16 sps:$4 sm:$0xff]   ;;  %v9651_v32 = vld [vmem:[%s13338_s12 + $0x28] ss:$16 sps:$4 sm:$0xff]  }
 0x71c   :  { %6596 = vmatprep.mubr.msk.f32.mxu0 %vm2154_vm2, %v2196_v16 }
 0x71d   :  { %6597 = vmatmul.mubr.msk.f32.vlgmr.msra.gmra.mrb[26].mxu0 %vm2154_vm2, %v2201_v22 }
 0x71e   :  { %6599 = vmatprep.mubr.msk.f32.mxu0 %vm2154_vm2, %v2206_v40  ;;  %2625 = vmatpush1.bf16.msra.mxu0 %v6910_v30  ;;  %v9646_v40 = vld [vmem:[%s13338_s12 + $0x20] ss:$16 sps:$4 sm:$0xff]  }
 0x71f   :  { %6343 = vmatprep.subr.msk.bf16.mxu0 %vm2611_vm4, %v6340_v29  ;;  %v9672_v30 = vld [vmem:[%s13338_s12 + $0x40] ss:$16 sps:$4 sm:$0xff]  }
 0x720   :  { %v9698_v29 = vld [vmem:[%s13338_s12 + $0x60] ss:$16 sps:$4 sm:$0xff]  }
 0x721   :  { %6600 = vmatmul.mubr.msk.f32.gmra.mrb[28].mxu0 %vm2154_vm2, %v2211_v6 }
 0x722   :  { %2656 = vmatprep.mubr.bf16.mxu0 %v13346_v0  ;;  %2627 = vmatpush1.bf16.msra.mxu0 %v2613_v36  ;;  %v9724_v36 = vld [vmem:[%s13338_s12 + $0x80] ss:$16 sps:$4 sm:$0xff]  }
 0x723   :  { %2987 = vmatprep.subr.bf16.mxu0 %v9610_v53 }
 0x7d5   :  { %v6496_v39 = vpop.f32.mrb[18].mxu0  ;;  %v6540_v41 = vpop.f32.mrb[20].mxu1 }
 0x7d6   :  { %v6497_v7 = vpop.f32.mrb[19].mxu0  ;;  %v6541_v31 = vpop.f32.mrb[21].mxu1 }
 0x7d7   :  { %v6498_v46 = vadd.f32 %v6497_v7, %v6496_v39  ;;  %v6542_v25 = vadd.f32 %v6541_v31, %v6540_v41  ;;  %v9736_v39 = vld [vmem:[%s13338_s12 + $0xa4] ss:$16 sps:$4 sm:$0xff]   ;;  %v9741_v41 = vld [vmem:[%s13338_s12 + $0xac] ss:$16 sps:$4 sm:$0xff]   ;;  %v9748_v7 = vld [vmem:[%s13338_s12 + $0xa0] ss:$16 sps:$4 sm:$0xff]  }
 0x7d8   :  { %v9753_v31 = vld [vmem:[%s13338_s12 + $0xa8] ss:$16 sps:$4 sm:$0xff]  }
 0x7d9   :  { %v6499_v9 = vpop.f32.mrb[20].mxu0  ;;  %v6543_v17 = vpop.f32.mrb[22].mxu1  ;;  %v2441_v59 = vadd.f32 %v6542_v25, %v6498_v46  ;;  %v9760_v46 = vld [vmem:[%s13338_s12 + $0xc4] ss:$16 sps:$4 sm:$0xff]   ;;  %v9765_v25 = vld [vmem:[%s13338_s12 + $0xcc] ss:$16 sps:$4 sm:$0xff]  }
 0x7da   :  { %v6500_v49 = vpop.f32.mrb[21].mxu0  ;;  %v6544_v33 = vpop.f32.mrb[23].mxu1 }
 0x7db   :  { %v6501_v26 = vadd.f32 %v6500_v49, %v6499_v9  ;;  %v6545_v28 = vadd.f32 %v6544_v33, %v6543_v17  ;;  %v9772_v9 = vld [vmem:[%s13338_s12 + $0xc0] ss:$16 sps:$4 sm:$0xff]   ;;  %v9777_v17 = vld [vmem:[%s13338_s12 + $0xc8] ss:$16 sps:$4 sm:$0xff]   ;;  %v9789_v49 = vld [vmem:[%s13338_s12 + $0xec] ss:$16 sps:$4 sm:$0xff]  }
 0x7dc   :  { %v9796_v33 = vld [vmem:[%s13338_s12 + $0xe0] ss:$16 sps:$4 sm:$0xff]  }
 0x7dd   :  { %v6502_v50 = vpop.f32.mrb[22].mxu0  ;;  %v6546_v42 = vpop.f32.mrb[24].mxu1  ;;  %v2446_v48 = vadd.f32 %v6545_v28, %v6501_v26  ;;  %v9801_v26 = vld [vmem:[%s13338_s12 + $0xe8] ss:$16 sps:$4 sm:$0xff]   ;;  %v9814_v28 = vld [vmem:[%s13339_s13 + $0x4] ss:$16 sps:$4 sm:$0xff]  }
 0x7de   :  { %v6503_v63 = vpop.f32.mrb[23].mxu0  ;;  %v6547_v15 = vpop.f32.mrb[25].mxu1 }
 0x7df   :  { %v6504_v61 = vadd.f32 %v6503_v63, %v6502_v50  ;;  %v6548_v23 = vadd.f32 %v6547_v15, %v6546_v42  ;;  %v9819_v50 = vld [vmem:[%s13339_s13 + $0xc] ss:$16 sps:$4 sm:$0xff]   ;;  %v9825_v42 = vld [vmem:[%s13339_s13] ss:$16 sps:$4 sm:$0xff]  }
 0x7e0   :  { %v9843_v63 = vld [vmem:[%s13339_s13 + $0x2c] ss:$16 sps:$4 sm:$0xff]   ;;  %v9848_v15 = vld [vmem:[%s13339_s13 + $0x20] ss:$16 sps:$4 sm:$0xff]  }
 0x7e1   :  { %v6505_v21 = vpop.f32.mrb[24].mxu0  ;;  %v6549_v38 = vpop.f32.mrb[26].mxu1  ;;  %v2451_v55 = vadd.f32 %v6548_v23, %v6504_v61  ;;  %v9853_v61 = vld [vmem:[%s13339_s13 + $0x28] ss:$16 sps:$4 sm:$0xff]   ;;  %v9858_v23 = vld [vmem:[%s13339_s13 + $0x44] ss:$16 sps:$4 sm:$0xff]  }
 0x7e2   :  { %v6506_v13 = vpop.f32.mrb[25].mxu0  ;;  %v6550_v27 = vpop.f32.mrb[27].mxu1 }
 0x7e3   :  { %v6507_v43 = vadd.f32 %v6506_v13, %v6505_v21  ;;  %v6551_v47 = vadd.f32 %v6550_v27, %v6549_v38  ;;  %v9865_v21 = vld [vmem:[%s13339_s13 + $0x4c] ss:$16 sps:$4 sm:$0xff]   ;;  %v9872_v38 = vld [vmem:[%s13339_s13 + $0x40] ss:$16 sps:$4 sm:$0xff]   ;;  %v9884_v13 = vld [vmem:[%s13339_s13 + $0x64] ss:$16 sps:$4 sm:$0xff]  }
 0x7e4   :  { %13868 = vst [vmem:[#allocation8_spill] sm:$0xff] %v9884_v13  ;;  %v9889_v27 = vld [vmem:[%s13339_s13 + $0x6c] ss:$16 sps:$4 sm:$0xff]  }
 0x7e5   :  { %v2456_v52 = vadd.f32 %v6551_v47, %v6507_v43  ;;  %13869 = vst [vmem:[#allocation9_spill] sm:$0xff] %v9889_v27  ;;  %v9894_v43 = vld [vmem:[%s13339_s13 + $0x60] ss:$16 sps:$4 sm:$0xff]   ;;  %v9899_v47 = vld [vmem:[%s13339_s13 + $0x68] ss:$16 sps:$4 sm:$0xff]  }
 0x7e6   :  { %13870 = vst [vmem:[#allocation10_spill] sm:$0xff] %v9894_v43  ;;  %13871 = vst [vmem:[#allocation11_spill] sm:$0xff] %v9899_v47 }
 0x7f0   :  { %v6598_v1 = vpop.f32.mrb[26].mxu0 }
 0x7f1   :  { %v2531_v37 = vadd.f32 %v6598_v1, %v2446_v48  ;;  %v2525_v54 = vpop.f32.mrb[27].mxu0  ;;  %v9838_v48 = vld [vmem:[%s13339_s13 + $0x24] ss:$16 sps:$4 sm:$0xff]   ;;  %v9913_v1 = vld [vmem:[%s13339_s13 + $0x8c] ss:$16 sps:$4 sm:$0xff]  }
 0x7f2   :  { %v2526_v8 = vadd.f32 %v2525_v54, %v2441_v59  ;;  %v9784_v59 = vld [vmem:[%s13338_s12 + $0xe4] ss:$16 sps:$4 sm:$0xff]   ;;  %13873 = vst [vmem:[#allocation13_spill] sm:$0xff] %v9913_v1  ;;  %v9923_v54 = vld [vmem:[%s13339_s13 + $0x88] ss:$16 sps:$4 sm:$0xff]  }
 0x7f3   :  { %13875 = vst [vmem:[#allocation15_spill] sm:$0xff] %v9923_v54 }
 0x7f4   :  { %v2544_v19 = vpack.c.bf16 %v2531_v37, %v2526_v8  ;;  %v6601_v2 = vpop.f32.mrb[28].mxu0  ;;  %v9918_v37 = vld [vmem:[%s13339_s13 + $0x80] ss:$16 sps:$4 sm:$0xff]   ;;  %v9928_v8 = vld [vmem:[%s13339_s13 + $0xa4] ss:$16 sps:$4 sm:$0xff]  }
 0x7f5   :  { %v2541_v34 = vadd.f32 %v6601_v2, %v2456_v52  ;;  %v2535_v16 = vpop.f32.mrb[29].mxu0  ;;  %v9906_v52 = vld [vmem:[%s13339_s13 + $0x84] ss:$16 sps:$4 sm:$0xff]   ;;  %13874 = vst [vmem:[#allocation14_spill] sm:$0xff] %v9918_v37  ;;  %13876 = vst [vmem:[#allocation16_spill] sm:$0xff] %v9928_v8 }
 0x7f6   :  { %v2536_v22 = vadd.f32 %v2535_v16, %v2451_v55  ;;  %6344 = vmatmul.mubr.msk.bf16.vlgmr.msra.gmra.mrb[32].mxu0 %vm2604_vm5, %v2544_v19  ;;  %6347 = vmatmul.mubr.msk.bf16.vlgmr.msra.gmra.mrb[28].mxu1 %vm2604_vm5, %v2544_v19  ;;  %v9877_v55 = vld [vmem:[%s13339_s13 + $0x48] ss:$16 sps:$4 sm:$0xff]   ;;  %13872 = vst [vmem:[#allocation12_spill] sm:$0xff] %v9906_v52  ;;  %v9935_v19 = vld [vmem:[%s13339_s13 + $0xac] ss:$16 sps:$4 sm:$0xff]  }
 0x7f7   :  { %2988 = vmatpush1.bf16.msra.mxu0 %v9622_v51  ;;  %3029 = vmatpush1.bf16.msra.mxu1 %v9627_v35  ;;  %13867 = vst [vmem:[#allocation7_spill] sm:$0xff] %v9877_v55  ;;  %13877 = vst [vmem:[#allocation17_spill] sm:$0xff] %v9935_v19  ;;  %v9942_v2 = vld [vmem:[%s13339_s13 + $0xa0] ss:$16 sps:$4 sm:$0xff]   ;;  %v9952_v16 = vld [vmem:[%s13339_s13 + $0xc4] ss:$16 sps:$4 sm:$0xff]  }
 0x7f8   :  { %v2545_v6 = vpack.c.bf16 %v2541_v34, %v2536_v22  ;;  %2989 = vmatprep.subr.bf16.mxu0 %v9632_v5  ;;  %3030 = vmatprep.subr.bf16.mxu1 %v9637_v10  ;;  %13878 = vst [vmem:[#allocation18_spill] sm:$0xff] %v9942_v2  ;;  %v9947_v34 = vld [vmem:[%s13339_s13 + $0xa8] ss:$16 sps:$4 sm:$0xff]   ;;  %13880 = vst [vmem:[#allocation20_spill] sm:$0xff] %v9952_v16  ;;  %v9957_v22 = vld [vmem:[%s13339_s13 + $0xcc] ss:$16 sps:$4 sm:$0xff]  }
 0x7f9   :  { %2666 = vmatprep.mubr.bf16.mxu0 %v13346_v0  ;;  %2719 = vmatprep.mubr.bf16.mxu1 %v13346_v0  ;;  %13879 = vst [vmem:[#allocation19_spill] sm:$0xff] %v9947_v34  ;;  %13881 = vst [vmem:[#allocation21_spill] sm:$0xff] %v9957_v22 }
 0x7fb   :  { %2990 = vmatpush1.bf16.msra.mxu0 %v9646_v40  ;;  %3031 = vmatpush1.bf16.msra.mxu1 %v9651_v32 }
 0x7fc   :  { %2991 = vmatprep.subr.bf16.mxu0 %v9658_v18  ;;  %3032 = vmatprep.subr.bf16.mxu1 %v9663_v12 }
 0x7fe   :  { %6345 = vmatmul.mubr.msk.bf16.gmra.mrb[36].mxu0 %vm2604_vm5, %v2545_v6  ;;  %6348 = vmatmul.mubr.msk.bf16.gmra.mrb[32].mxu1 %vm2604_vm5, %v2545_v6  ;;  %v9970_v6 = vld [vmem:[%s13339_s13 + $0xc0] ss:$16 sps:$4 sm:$0xff]  }
 0x7ff   :  { %2992 = vmatpush1.bf16.msra.mxu0 %v9672_v30  ;;  %3033 = vmatpush1.bf16.msra.mxu1 %v9677_v58  ;;  %13882 = vst [vmem:[#allocation22_spill] sm:$0xff] %v9970_v6 }
 0x800   :  { %2993 = vmatprep.subr.bf16.mxu0 %v9684_v24  ;;  %3034 = vmatprep.subr.bf16.mxu1 %v9689_v62 }
 0x801   :  { %3019 = vmatprep.mubr.bf16.mxu0 %v13346_v0  ;;  %3060 = vmatprep.mubr.bf16.mxu1 %v13346_v0 }
 0x803   :  { %2994 = vmatpush1.bf16.msra.mxu0 %v9698_v29  ;;  %3035 = vmatpush1.bf16.msra.mxu1 %v9703_v4 }
 0x804   :  { %2995 = vmatprep.subr.bf16.mxu0 %v9710_v11  ;;  %3036 = vmatprep.subr.bf16.mxu1 %v9715_v3 }
 0x807   :  { %2996 = vmatpush1.bf16.msra.mxu0 %v9724_v36  ;;  %3037 = vmatpush1.bf16.msra.mxu1 %v9729_v14 }
 0x808   :  { %2997 = vmatprep.subr.bf16.mxu0 %v9736_v39  ;;  %3038 = vmatprep.subr.bf16.mxu1 %v9741_v41 }
 0x80b   :  { %2998 = vmatpush1.bf16.msra.mxu0 %v9748_v7  ;;  %3039 = vmatpush1.bf16.msra.mxu1 %v9753_v31 }
 0x80c   :  { %2999 = vmatprep.subr.bf16.mxu0 %v9760_v46  ;;  %3040 = vmatprep.subr.bf16.mxu1 %v9765_v25 }
 0x80f   :  { %3000 = vmatpush1.bf16.msra.mxu0 %v9772_v9  ;;  %3041 = vmatpush1.bf16.msra.mxu1 %v9777_v17 }
 0x810   :  { %3001 = vmatprep.subr.bf16.mxu0 %v9784_v59  ;;  %3042 = vmatprep.subr.bf16.mxu1 %v9789_v49 }
 0x813   :  { %3002 = vmatpush1.bf16.msra.mxu0 %v9796_v33  ;;  %3043 = vmatpush1.bf16.msra.mxu1 %v9801_v26 }
 0x814   :  { %3434 = vmatprep.subr.bf16.mxu0 %v9814_v28  ;;  %3475 = vmatprep.subr.bf16.mxu1 %v9819_v50 }
 0x816   :  { %3020 = vmatmul.mubr.bf16.vlgmr.msra.gmra.mrb[40].mxu0 %v13346_v0  ;;  %3061 = vmatmul.mubr.bf16.vlgmr.msra.gmra.mrb[36].mxu1 %v13346_v0  ;;  %v9975_v0 = vld [vmem:[%s13339_s13 + $0xc8] ss:$16 sps:$4 sm:$0xff]  }
 0x817   :  { %3466 = vmatprep.mubr.bf16.mxu0 %v7714_v20  ;;  %3507 = vmatprep.mubr.bf16.mxu1 %v7714_v20  ;;  %v9830_v20 = vld [vmem:[%s13339_s13 + $0x8] ss:$16 sps:$4 sm:$0xff]   ;;  %13883 = vst [vmem:[#allocation23_spill] sm:$0xff] %v9975_v0 }
 0x818   :  { %3435 = vmatpush1.bf16.msra.mxu0 %v9825_v42  ;;  %3476 = vmatpush1.bf16.msra.mxu1 %v9830_v20 }
 0x819   :  { %3436 = vmatprep.subr.bf16.mxu0 %v9838_v48  ;;  %3477 = vmatprep.subr.bf16.mxu1 %v9843_v63 }
 0x81c   :  { %3437 = vmatpush1.bf16.msra.mxu0 %v9848_v15  ;;  %3478 = vmatpush1.bf16.msra.mxu1 %v9853_v61 }
 0x81d   :  { %3438 = vmatprep.subr.bf16.mxu0 %v9858_v23  ;;  %3479 = vmatprep.subr.bf16.mxu1 %v9865_v21 }
 0x820   :  { %3439 = vmatpush1.bf16.msra.mxu0 %v9872_v38  ;;  %3480 = vmatpush1.bf16.msra.mxu1 %v9877_v55 }
 0x821   :  { %3440 = vmatprep.subr.bf16.mxu0 %v9884_v13  ;;  %3481 = vmatprep.subr.bf16.mxu1 %v9889_v27 }
 0x824   :  { %3441 = vmatpush1.bf16.msra.mxu0 %v9894_v43  ;;  %3482 = vmatpush1.bf16.msra.mxu1 %v9899_v47 }
 0x825   :  { %3442 = vmatprep.subr.bf16.mxu0 %v9906_v52  ;;  %3483 = vmatprep.subr.bf16.mxu1 %v9913_v1 }
 0x828   :  { %3443 = vmatpush1.bf16.msra.mxu0 %v9918_v37  ;;  %3484 = vmatpush1.bf16.msra.mxu1 %v9923_v54 }
 0x829   :  { %3444 = vmatprep.subr.bf16.mxu0 %v9928_v8  ;;  %3485 = vmatprep.subr.bf16.mxu1 %v9935_v19  ;;  %v10160_v19 = vld [vmem:[%s13339_s13 + $0x1c0] ss:$16 sps:$4 sm:$0xff]   ;;  %v10165_v8 = vld [vmem:[%s13339_s13 + $0x1c8] ss:$16 sps:$4 sm:$0xff]  }
 0x82a   :  { %13914 = vst [vmem:[#allocation54_spill] sm:$0xff] %v10160_v19  ;;  %13915 = vst [vmem:[#allocation55_spill] sm:$0xff] %v10165_v8 }
 0x82c   :  { %3445 = vmatpush1.bf16.msra.mxu0 %v9942_v2  ;;  %3486 = vmatpush1.bf16.msra.mxu1 %v9947_v34  ;;  %v9992_v34 = vld [vmem:[%s13339_s13 + $0xe0] ss:$16 sps:$4 sm:$0xff]   ;;  %v10011_v2 = vld [vmem:[%s13339_s13 + $0x10c] ss:$16 sps:$4 sm:$0xff]  }
 0x82d   :  { %3446 = vmatprep.subr.bf16.mxu0 %v9952_v16  ;;  %3487 = vmatprep.subr.bf16.mxu1 %v9957_v22  ;;  %v9982_v16 = vld [vmem:[%s13339_s13 + $0xe4] ss:$16 sps:$4 sm:$0xff]   ;;  %v9987_v22 = vld [vmem:[%s13339_s13 + $0xec] ss:$16 sps:$4 sm:$0xff]   ;;  %13886 = vst [vmem:[#allocation26_spill] sm:$0xff] %v9992_v34  ;;  %13889 = vst [vmem:[#allocation29_spill] sm:$0xff] %v10011_v2 }
 0x82e   :  { %13884 = vst [vmem:[#allocation24_spill] sm:$0xff] %v9982_v16  ;;  %13885 = vst [vmem:[#allocation25_spill] sm:$0xff] %v9987_v22 }
 0x830   :  { %3447 = vmatpush1.bf16.msra.mxu0 %v9970_v6  ;;  %3488 = vmatpush1.bf16.msra.mxu1 %v9975_v0  ;;  %v9997_v6 = vld [vmem:[%s13339_s13 + $0xe8] ss:$16 sps:$4 sm:$0xff]   ;;  %v10006_v0 = vld [vmem:[%s13339_s13 + $0x104] ss:$16 sps:$4 sm:$0xff]  }
 0x831   :  { %13887 = vst [vmem:[#allocation27_spill] sm:$0xff] %v9997_v6  ;;  %3448 = vmatprep.subr.bf16.mxu0 %v9982_v16  ;;  %3489 = vmatprep.subr.bf16.mxu1 %v9987_v22  ;;  %13888 = vst [vmem:[#allocation28_spill] sm:$0xff] %v10006_v0  ;;  %v10016_v16 = vld [vmem:[%s13339_s13 + $0x100] ss:$16 sps:$4 sm:$0xff]   ;;  %v10035_v22 = vld [vmem:[%s13339_s13 + $0x12c] ss:$16 sps:$4 sm:$0xff]  }
 0x832   :  { %13890 = vst [vmem:[#allocation30_spill] sm:$0xff] %v10016_v16  ;;  %13893 = vst [vmem:[#allocation33_spill] sm:$0xff] %v10035_v22 }
 0x834   :  { %3449 = vmatpush1.bf16.msra.mxu0 %v9992_v34  ;;  %3490 = vmatpush1.bf16.msra.mxu1 %v9997_v6  ;;  %v10021_v34 = vld [vmem:[%s13339_s13 + $0x108] ss:$16 sps:$4 sm:$0xff]   ;;  %v10030_v6 = vld [vmem:[%s13339_s13 + $0x124] ss:$16 sps:$4 sm:$0xff]  }
 0x835   :  { %13891 = vst [vmem:[#allocation31_spill] sm:$0xff] %v10021_v34  ;;  %3450 = vmatprep.subr.bf16.mxu0 %v10006_v0  ;;  %3491 = vmatprep.subr.bf16.mxu1 %v10011_v2  ;;  %13892 = vst [vmem:[#allocation32_spill] sm:$0xff] %v10030_v6  ;;  %v10040_v0 = vld [vmem:[%s13339_s13 + $0x120] ss:$16 sps:$4 sm:$0xff]   ;;  %v10059_v2 = vld [vmem:[%s13339_s13 + $0x14c] ss:$16 sps:$4 sm:$0xff]  }
 0x836   :  { %13894 = vst [vmem:[#allocation34_spill] sm:$0xff] %v10040_v0  ;;  %13897 = vst [vmem:[#allocation37_spill] sm:$0xff] %v10059_v2 }
 0x838   :  { %3451 = vmatpush1.bf16.msra.mxu0 %v10016_v16  ;;  %3492 = vmatpush1.bf16.msra.mxu1 %v10021_v34  ;;  %v10045_v16 = vld [vmem:[%s13339_s13 + $0x128] ss:$16 sps:$4 sm:$0xff]   ;;  %v10054_v34 = vld [vmem:[%s13339_s13 + $0x144] ss:$16 sps:$4 sm:$0xff]  }
 0x839   :  { %13895 = vst [vmem:[#allocation35_spill] sm:$0xff] %v10045_v16  ;;  %3452 = vmatprep.subr.bf16.mxu0 %v10030_v6  ;;  %3493 = vmatprep.subr.bf16.mxu1 %v10035_v22  ;;  %13896 = vst [vmem:[#allocation36_spill] sm:$0xff] %v10054_v34  ;;  %v10064_v6 = vld [vmem:[%s13339_s13 + $0x140] ss:$16 sps:$4 sm:$0xff]   ;;  %v10083_v22 = vld [vmem:[%s13339_s13 + $0x16c] ss:$16 sps:$4 sm:$0xff]  }
 0x83a   :  { %13898 = vst [vmem:[#allocation38_spill] sm:$0xff] %v10064_v6  ;;  %13901 = vst [vmem:[#allocation41_spill] sm:$0xff] %v10083_v22 }
 0x83c   :  { %3453 = vmatpush1.bf16.msra.mxu0 %v10040_v0  ;;  %3494 = vmatpush1.bf16.msra.mxu1 %v10045_v16  ;;  %v10069_v0 = vld [vmem:[%s13339_s13 + $0x148] ss:$16 sps:$4 sm:$0xff]   ;;  %v10078_v16 = vld [vmem:[%s13339_s13 + $0x164] ss:$16 sps:$4 sm:$0xff]  }
 0x83d   :  { %13899 = vst [vmem:[#allocation39_spill] sm:$0xff] %v10069_v0  ;;  %3454 = vmatprep.subr.bf16.mxu0 %v10054_v34  ;;  %3495 = vmatprep.subr.bf16.mxu1 %v10059_v2  ;;  %13900 = vst [vmem:[#allocation40_spill] sm:$0xff] %v10078_v16  ;;  %v10088_v34 = vld [vmem:[%s13339_s13 + $0x160] ss:$16 sps:$4 sm:$0xff]   ;;  %v10107_v2 = vld [vmem:[%s13339_s13 + $0x18c] ss:$16 sps:$4 sm:$0xff]  }
 0x83e   :  { %13902 = vst [vmem:[#allocation42_spill] sm:$0xff] %v10088_v34  ;;  %13905 = vst [vmem:[#allocation45_spill] sm:$0xff] %v10107_v2 }
 0x840   :  { %3455 = vmatpush1.bf16.msra.mxu0 %v10064_v6  ;;  %3496 = vmatpush1.bf16.msra.mxu1 %v10069_v0  ;;  %v10093_v6 = vld [vmem:[%s13339_s13 + $0x168] ss:$16 sps:$4 sm:$0xff]   ;;  %v10102_v0 = vld [vmem:[%s13339_s13 + $0x184] ss:$16 sps:$4 sm:$0xff]  }
 0x841   :  { %13903 = vst [vmem:[#allocation43_spill] sm:$0xff] %v10093_v6  ;;  %3456 = vmatprep.subr.bf16.mxu0 %v10078_v16  ;;  %3497 = vmatprep.subr.bf16.mxu1 %v10083_v22  ;;  %13904 = vst [vmem:[#allocation44_spill] sm:$0xff] %v10102_v0  ;;  %v10112_v16 = vld [vmem:[%s13339_s13 + $0x180] ss:$16 sps:$4 sm:$0xff]   ;;  %v10131_v22 = vld [vmem:[%s13339_s13 + $0x1ac] ss:$16 sps:$4 sm:$0xff]  }
 0x842   :  { %13906 = vst [vmem:[#allocation46_spill] sm:$0xff] %v10112_v16  ;;  %13909 = vst [vmem:[#allocation49_spill] sm:$0xff] %v10131_v22 }
 0x844   :  { %3457 = vmatpush1.bf16.msra.mxu0 %v10088_v34  ;;  %3498 = vmatpush1.bf16.msra.mxu1 %v10093_v6  ;;  %v10117_v34 = vld [vmem:[%s13339_s13 + $0x188] ss:$16 sps:$4 sm:$0xff]   ;;  %v10126_v6 = vld [vmem:[%s13339_s13 + $0x1a4] ss:$16 sps:$4 sm:$0xff]  }
 0x845   :  { %13907 = vst [vmem:[#allocation47_spill] sm:$0xff] %v10117_v34  ;;  %3458 = vmatprep.subr.bf16.mxu0 %v10102_v0  ;;  %3499 = vmatprep.subr.bf16.mxu1 %v10107_v2  ;;  %13908 = vst [vmem:[#allocation48_spill] sm:$0xff] %v10126_v6  ;;  %v10136_v0 = vld [vmem:[%s13339_s13 + $0x1a0] ss:$16 sps:$4 sm:$0xff]   ;;  %v10151_v2 = vld [vmem:[%s13339_s13 + $0x1cc] ss:$16 sps:$4 sm:$0xff]  }
 0x846   :  { %13910 = vst [vmem:[#allocation50_spill] sm:$0xff] %v10136_v0  ;;  %13913 = vst [vmem:[#allocation53_spill] sm:$0xff] %v10151_v2 }
 0x848   :  { %3459 = vmatpush1.bf16.msra.mxu0 %v10112_v16  ;;  %3500 = vmatpush1.bf16.msra.mxu1 %v10117_v34  ;;  %v10141_v16 = vld [vmem:[%s13339_s13 + $0x1a8] ss:$16 sps:$4 sm:$0xff]   ;;  %v10146_v34 = vld [vmem:[%s13339_s13 + $0x1c4] ss:$16 sps:$4 sm:$0xff]  }
 0x849   :  { %13911 = vst [vmem:[#allocation51_spill] sm:$0xff] %v10141_v16  ;;  %13912 = vst [vmem:[#allocation52_spill] sm:$0xff] %v10146_v34  ;;  %3460 = vmatprep.subr.bf16.mxu0 %v10126_v6  ;;  %3501 = vmatprep.subr.bf16.mxu1 %v10131_v22 }
 0x84c   :  { %3461 = vmatpush1.bf16.msra.mxu0 %v10136_v0  ;;  %3502 = vmatpush1.bf16.msra.mxu1 %v10141_v16  ;;  %v10172_v0 = vld [vmem:[%s13339_s13 + $0x1e4] ss:$16 sps:$4 sm:$0xff]   ;;  %v10177_v16 = vld [vmem:[%s13339_s13 + $0x1ec] ss:$16 sps:$4 sm:$0xff]  }
 0x84d   :  { %3462 = vmatprep.subr.bf16.mxu0 %v10146_v34  ;;  %3503 = vmatprep.subr.bf16.mxu1 %v10151_v2  ;;  %13916 = vst [vmem:[#allocation56_spill] sm:$0xff] %v10172_v0  ;;  %13917 = vst [vmem:[#allocation57_spill] sm:$0xff] %v10177_v16  ;;  %v10184_v34 = vld [vmem:[%s13339_s13 + $0x1e0] ss:$16 sps:$4 sm:$0xff]   ;;  %v10189_v2 = vld [vmem:[%s13339_s13 + $0x1e8] ss:$16 sps:$4 sm:$0xff]  }
 0x84e   :  { %13918 = vst [vmem:[#allocation58_spill] sm:$0xff] %v10184_v34  ;;  %13919 = vst [vmem:[#allocation59_spill] sm:$0xff] %v10189_v2 }
 0x850   :  { %3463 = vmatpush1.bf16.msra.mxu0 %v10160_v19  ;;  %3504 = vmatpush1.bf16.msra.mxu1 %v10165_v8  ;;  %v2552_v8 = vld [vmem:[%s13340_s11] sm:$0xf] }
 0x851   :  { %3464 = vmatprep.subr.bf16.mxu0 %v10172_v0  ;;  %3505 = vmatprep.subr.bf16.mxu1 %v10177_v16  ;;  %v2557_v6 = vrot.slane %v2552_v8, %v7982_v56  ;;  %v2565_v0 = vrot.slane %v2552_v8, %v7985_v57 }
 0x854   :  { %3465 = vmatpush1.bf16.msra.mxu0 %v10184_v34  ;;  %3506 = vmatpush1.bf16.msra.mxu1 %v10189_v2  ;;  %v2561_v34 = vrot.slane %v2552_v8, %v8059_v44  ;;  %v2569_v2 = vrot.slane %v2552_v8, %v8062_v45 }
 0x855   :  { %3534 = vmatprep.subr.bf16.mxu0 %v9610_v53  ;;  %3575 = vmatprep.subr.bf16.mxu1 %v9615_v60 }
 0x8c9   :  { %v2658_v19 = vpop.f32.mrb[32].mxu0  ;;  %v2711_v22 = vpop.f32.mrb[28].mxu1 }
 0x8ca   :  { %v2660_v54 = vpop.f32.mrb[33].mxu0  ;;  %v2713_v16 = vpop.f32.mrb[29].mxu1 }
 0x8cb   :  { %v2662_v37 = vpop.f32.mrb[34].mxu0  ;;  %v2715_v53 = vpop.f32.mrb[30].mxu1 }
 0x8cc   :  { %v10204_v1 = vadd.f32 %v2662_v37, %v2557_v6  ;;  %v10206_v60 = vadd.f32 %v2715_v53, %v2565_v0  ;;  %v2664_v52 = vpop.f32.mrb[35].mxu0  ;;  %v2717_v47 = vpop.f32.mrb[31].mxu1 }
 0x8cd   :  { %v10208_v43 = vadd.f32 %v2664_v52, %v2561_v34  ;;  %v10210_v27 = vadd.f32 %v2717_v47, %v2569_v2 }
 0x8ce   :  { %13920 = vst [vmem:[#allocation60_spill] sm:$0xff] %v10204_v1  ;;  %13921 = vst [vmem:[#allocation61_spill] sm:$0xff] %v10206_v60 }
 0x8cf   :  { %13922 = vst [vmem:[#allocation62_spill] sm:$0xff] %v10208_v43  ;;  %13923 = vst [vmem:[#allocation63_spill] sm:$0xff] %v10210_v27 }
 0x8d1   :  { %v2668_v56 = vpop.f32.mrb[36].mxu0  ;;  %v2721_v57 = vpop.f32.mrb[32].mxu1 }
 0x8d2   :  { %v10212_v13 = vadd.f32 %v2668_v56, %v2557_v6  ;;  %v10214_v55 = vadd.f32 %v2721_v57, %v2565_v0  ;;  %v2670_v44 = vpop.f32.mrb[37].mxu0  ;;  %v2723_v8 = vpop.f32.mrb[33].mxu1  ;;  %v10228_v57 = vadd.f32 %v2658_v19, %v2557_v6  ;;  %v10237_v19 = vadd.f32 %v2711_v22, %v2565_v0 }
 0x8d3   :  { %v10216_v45 = vadd.f32 %v2670_v44, %v2561_v34  ;;  %v10218_v37 = vadd.f32 %v2723_v8, %v2569_v2  ;;  %v2672_v53 = vpop.f32.mrb[38].mxu0  ;;  %v2725_v60 = vpop.f32.mrb[34].mxu1 }
 0x8d4   :  { %13924 = vst [vmem:[#allocation64_spill] sm:$0xff] %v10212_v13  ;;  %13925 = vst [vmem:[#allocation65_spill] sm:$0xff] %v10214_v55  ;;  %v10220_v1 = vadd.f32 %v2672_v53, %v2557_v6  ;;  %v10222_v52 = vadd.f32 %v2725_v60, %v2565_v0  ;;  %v2674_v47 = vpop.f32.mrb[39].mxu0  ;;  %v2727_v27 = vpop.f32.mrb[35].mxu1  ;;  %v10230_v55 = vadd.f32 %v2660_v54, %v2561_v34 }
 0x8d5   :  { %13926 = vst [vmem:[#allocation66_spill] sm:$0xff] %v10216_v45  ;;  %13927 = vst [vmem:[#allocation67_spill] sm:$0xff] %v10218_v37  ;;  %v10224_v43 = vadd.f32 %v2674_v47, %v2561_v34  ;;  %v10226_v56 = vadd.f32 %v2727_v27, %v2569_v2 }
 0x8d6   :  { %13928 = vst [vmem:[#allocation68_spill] sm:$0xff] %v10220_v1  ;;  %13929 = vst [vmem:[#allocation69_spill] sm:$0xff] %v10222_v52  ;;  %v10234_v1 = vadd.f32 %v2713_v16, %v2569_v2 }
 0x8d7   :  { %13930 = vst [vmem:[#allocation70_spill] sm:$0xff] %v10224_v43  ;;  %13931 = vst [vmem:[#allocation71_spill] sm:$0xff] %v10226_v56 }
 0x8e9   :  { %v3021_v44 = vpop.f32.mrb[40].mxu0  ;;  %v3062_v45 = vpop.f32.mrb[36].mxu1 }
 0x8ea   :  { %v3069_v8 = vadd.f32 %v3021_v44, %v10228_v57  ;;  %v3023_v37 = vpop.f32.mrb[41].mxu0  ;;  %v3064_v13 = vpop.f32.mrb[37].mxu1  ;;  %v3071_v34 = vadd.f32 %v3062_v45, %v10237_v19 }
 0x8eb   :  { %v3070_v53 = vadd.f32 %v3023_v37, %v10230_v55  ;;  %v3025_v60 = vpop.f32.mrb[42].mxu0  ;;  %v3066_v52 = vpop.f32.mrb[38].mxu1  ;;  %v3072_v54 = vadd.f32 %v3064_v13, %v10234_v1 }
 0x8ec   :  { %v3073_v47 = vmul.f32 0.5, %v3069_v8  ;;  %v3026_v43 = vpop.f32.mrb[43].mxu0  ;;  %v3067_v27 = vpop.f32.mrb[39].mxu1  ;;  %v3075_v6 = vmul.f32 0.5, %v3071_v34  ;;  %v13951_v34 = vld [vmem:[#allocation25_spill] sm:$0xff] }
 0x8ed   :  { %v3074_v56 = vmul.f32 0.5, %v3070_v53 }
 0x8ee   :  { %7061 = vtanh.f32 %v3073_v47 }
 0x8ef   :  { %7063 = vtanh.f32 %v3074_v56 }
 0x8f0   :  { %7065 = vtanh.f32 %v3072_v54  ;;  %v13932_v54 = vmov 0  }
 0x8f1   :  { %7067 = vtanh.f32 %v3075_v6  ;;  %v13952_v6 = vld [vmem:[#allocation26_spill] sm:$0xff] }
 0x8f8   :  { %v7062_v44 = vpop.eup %7061 }
 0x8f9   :  { %v3079_v37 = vmul.f32 0.5, %v7062_v44  ;;  %v7064_v60 = vpop.eup %7063  ;;  %v13953_v44 = vld [vmem:[#allocation27_spill] sm:$0xff] }
 0x8fa   :  { %v3080_v2 = vmul.f32 0.5, %v7064_v60  ;;  %v7066_v16 = vpop.eup %7065  ;;  %v13955_v60 = vld [vmem:[#allocation29_spill] sm:$0xff] }
 0x8fb   :  { %v3082_v52 = vadd.f32 0.5, %v3079_v37  ;;  %v7068_v0 = vpop.eup %7067  ;;  %v13954_v37 = vld [vmem:[#allocation28_spill] sm:$0xff] }
 0x8fc   :  { %v3083_v43 = vadd.f32 0.5, %v3080_v2  ;;  %v3081_v13 = vmul.f32 0.5, %v7068_v0  ;;  %v13957_v2 = vld [vmem:[#allocation31_spill] sm:$0xff]  ;;  %v13962_v0 = vld [vmem:[#allocation36_spill] sm:$0xff] }
 0x8fd   :  { %v3087_v8 = vmul.f32 %v7066_v16, %v3082_v52  ;;  %v13956_v52 = vld [vmem:[#allocation30_spill] sm:$0xff]  ;;  %v13958_v16 = vld [vmem:[#allocation32_spill] sm:$0xff] }
 0x8fe   :  { %v3086_v53 = vmul.f32 0.0, %v3083_v43  ;;  %v3084_v22 = vadd.f32 0.5, %v3081_v13  ;;  %v13959_v43 = vld [vmem:[#allocation33_spill] sm:$0xff] }
 0x8ff   :  { %v13963_v13 = vld [vmem:[#allocation37_spill] sm:$0xff] }
 0x900   :  { %v10240_v47 = vadd.f32 %v3087_v8, %v3086_v53  ;;  %v13960_v8 = vld [vmem:[#allocation34_spill] sm:$0xff]  ;;  %v13961_v53 = vld [vmem:[#allocation35_spill] sm:$0xff] }
 0x902   :  { %7069 = vtanh.f32 %v10240_v47 }
 0x90c   :  { %v7070_v56 = vpop.eup %7069 }
 0x90d   :  { %v3090_v45 = vmul.f32 %v7070_v56, %v3084_v22  ;;  %v13964_v22 = vld [vmem:[#allocation38_spill] sm:$0xff]  ;;  %v13965_v56 = vld [vmem:[#allocation39_spill] sm:$0xff] }
 0x90f   :  { %v3091_v27 = vpack.c.bf16 %v3090_v45, %v3090_v45  ;;  %v13966_v45 = vld [vmem:[#allocation40_spill] sm:$0xff] }
 0x911   :  { %3467 = vmatmul.mubr.bf16.vlgmr.msra.gmra.mrb[44].mxu0 %v3091_v27  ;;  %3508 = vmatmul.mubr.bf16.vlgmr.msra.gmra.mrb[40].mxu1 %v3091_v27 }
 0x912   :  { %3535 = vmatpush1.bf16.msra.mxu0 %v9622_v51  ;;  %3576 = vmatpush1.bf16.msra.mxu1 %v9627_v35  ;;  %v13933_v51 = vld [vmem:[#allocation7_spill] sm:$0xff]  ;;  %v13934_v35 = vld [vmem:[#allocation8_spill] sm:$0xff] }
 0x913   :  { %3536 = vmatprep.subr.bf16.mxu0 %v9632_v5  ;;  %3577 = vmatprep.subr.bf16.mxu1 %v9637_v10  ;;  %v13935_v5 = vld [vmem:[#allocation9_spill] sm:$0xff]  ;;  %v13936_v10 = vld [vmem:[#allocation10_spill] sm:$0xff] }
 0x914   :  { %3566 = vmatprep.mubr.bf16.mxu0 %v13932_v54  ;;  %3607 = vmatprep.mubr.bf16.mxu1 %v13932_v54 }
 0x916   :  { %3537 = vmatpush1.bf16.msra.mxu0 %v9646_v40  ;;  %3578 = vmatpush1.bf16.msra.mxu1 %v9651_v32  ;;  %v13937_v40 = vld [vmem:[#allocation11_spill] sm:$0xff]  ;;  %v13938_v32 = vld [vmem:[#allocation12_spill] sm:$0xff] }
 0x917   :  { %3538 = vmatprep.subr.bf16.mxu0 %v9658_v18  ;;  %3579 = vmatprep.subr.bf16.mxu1 %v9663_v12  ;;  %v13939_v18 = vld [vmem:[#allocation13_spill] sm:$0xff]  ;;  %v13940_v12 = vld [vmem:[#allocation14_spill] sm:$0xff] }
 0x91a   :  { %3539 = vmatpush1.bf16.msra.mxu0 %v9672_v30  ;;  %3580 = vmatpush1.bf16.msra.mxu1 %v9677_v58  ;;  %v13941_v30 = vld [vmem:[#allocation15_spill] sm:$0xff]  ;;  %v13942_v58 = vld [vmem:[#allocation16_spill] sm:$0xff] }
 0x91b   :  { %3540 = vmatprep.subr.bf16.mxu0 %v9684_v24  ;;  %3581 = vmatprep.subr.bf16.mxu1 %v9689_v62  ;;  %v13943_v24 = vld [vmem:[#allocation17_spill] sm:$0xff]  ;;  %v13944_v62 = vld [vmem:[#allocation18_spill] sm:$0xff] }
 0x91e   :  { %3541 = vmatpush1.bf16.msra.mxu0 %v9698_v29  ;;  %3582 = vmatpush1.bf16.msra.mxu1 %v9703_v4  ;;  %v13945_v29 = vld [vmem:[#allocation19_spill] sm:$0xff]  ;;  %v13946_v4 = vld [vmem:[#allocation20_spill] sm:$0xff] }
 0x91f   :  { %3542 = vmatprep.subr.bf16.mxu0 %v9710_v11  ;;  %3583 = vmatprep.subr.bf16.mxu1 %v9715_v3  ;;  %v13947_v11 = vld [vmem:[#allocation21_spill] sm:$0xff]  ;;  %v13948_v3 = vld [vmem:[#allocation22_spill] sm:$0xff] }
 0x922   :  { %3543 = vmatpush1.bf16.msra.mxu0 %v9724_v36  ;;  %3584 = vmatpush1.bf16.msra.mxu1 %v9729_v14  ;;  %v13949_v36 = vld [vmem:[#allocation23_spill] sm:$0xff]  ;;  %v13950_v14 = vld [vmem:[#allocation24_spill] sm:$0xff] }
 0x923   :  { %3544 = vmatprep.subr.bf16.mxu0 %v9736_v39  ;;  %3585 = vmatprep.subr.bf16.mxu1 %v9741_v41 }
 0x926   :  { %3545 = vmatpush1.bf16.msra.mxu0 %v9748_v7  ;;  %3586 = vmatpush1.bf16.msra.mxu1 %v9753_v31 }
 0x927   :  { %3546 = vmatprep.subr.bf16.mxu0 %v9760_v46  ;;  %3587 = vmatprep.subr.bf16.mxu1 %v9765_v25 }
 0x92a   :  { %3547 = vmatpush1.bf16.msra.mxu0 %v9772_v9  ;;  %3588 = vmatpush1.bf16.msra.mxu1 %v9777_v17 }
 0x92b   :  { %3548 = vmatprep.subr.bf16.mxu0 %v9784_v59  ;;  %3589 = vmatprep.subr.bf16.mxu1 %v9789_v49 }
 0x92e   :  { %3549 = vmatpush1.bf16.msra.mxu0 %v9796_v33  ;;  %3590 = vmatpush1.bf16.msra.mxu1 %v9801_v26 }
 0x92f   :  { %3664 = vmatprep.subr.bf16.mxu0 %v9814_v28  ;;  %3705 = vmatprep.subr.bf16.mxu1 %v9819_v50 }
 0x931   :  { %3567 = vmatmul.mubr.bf16.vlgmr.msra.gmra.mrb[48].mxu0 %v3091_v27  ;;  %3608 = vmatmul.mubr.bf16.vlgmr.msra.gmra.mrb[44].mxu1 %v3091_v27  ;;  %v13967_v27 = vld [vmem:[#allocation41_spill] sm:$0xff] }
 0x932   :  { %3665 = vmatpush1.bf16.msra.mxu0 %v9825_v42  ;;  %3706 = vmatpush1.bf16.msra.mxu1 %v9830_v20 }
 0x933   :  { %3666 = vmatprep.subr.bf16.mxu0 %v9838_v48  ;;  %3707 = vmatprep.subr.bf16.mxu1 %v9843_v63 }
 0x936   :  { %3667 = vmatpush1.bf16.msra.mxu0 %v9848_v15  ;;  %3708 = vmatpush1.bf16.msra.mxu1 %v9853_v61 }
 0x937   :  { %3668 = vmatprep.subr.bf16.mxu0 %v9858_v23  ;;  %3709 = vmatprep.subr.bf16.mxu1 %v9865_v21 }
 0x93a   :  { %3669 = vmatpush1.bf16.msra.mxu0 %v9872_v38  ;;  %3710 = vmatpush1.bf16.msra.mxu1 %v13933_v51 }
 0x93b   :  { %3670 = vmatprep.subr.bf16.mxu0 %v13934_v35  ;;  %3711 = vmatprep.subr.bf16.mxu1 %v13935_v5 }
 0x93e   :  { %3671 = vmatpush1.bf16.msra.mxu0 %v13936_v10  ;;  %3712 = vmatpush1.bf16.msra.mxu1 %v13937_v40 }
 0x93f   :  { %3672 = vmatprep.subr.bf16.mxu0 %v13938_v32  ;;  %3713 = vmatprep.subr.bf16.mxu1 %v13939_v18 }
 0x942   :  { %3673 = vmatpush1.bf16.msra.mxu0 %v13940_v12  ;;  %3714 = vmatpush1.bf16.msra.mxu1 %v13941_v30 }
 0x943   :  { %3674 = vmatprep.subr.bf16.mxu0 %v13942_v58  ;;  %3715 = vmatprep.subr.bf16.mxu1 %v13943_v24 }
 0x946   :  { %3675 = vmatpush1.bf16.msra.mxu0 %v13944_v62  ;;  %3716 = vmatpush1.bf16.msra.mxu1 %v13945_v29 }
 0x947   :  { %3676 = vmatprep.subr.bf16.mxu0 %v13946_v4  ;;  %3717 = vmatprep.subr.bf16.mxu1 %v13947_v11 }
 0x94a   :  { %3677 = vmatpush1.bf16.msra.mxu0 %v13948_v3  ;;  %3718 = vmatpush1.bf16.msra.mxu1 %v13949_v36  ;;  %v13994_v36 = vld [vmem:[#allocation4_spill] sm:$0xff] }
 0x94b   :  { %3678 = vmatprep.subr.bf16.mxu0 %v13950_v14  ;;  %3719 = vmatprep.subr.bf16.mxu1 %v13951_v34 }
 0x94e   :  { %3679 = vmatpush1.bf16.msra.mxu0 %v13952_v6  ;;  %3720 = vmatpush1.bf16.msra.mxu1 %v13953_v44 }
 0x94f   :  { %3680 = vmatprep.subr.bf16.mxu0 %v13954_v37  ;;  %3721 = vmatprep.subr.bf16.mxu1 %v13955_v60 }
 0x952   :  { %3681 = vmatpush1.bf16.msra.mxu0 %v13956_v52  ;;  %3722 = vmatpush1.bf16.msra.mxu1 %v13957_v2  ;;  %v13968_v2 = vld [vmem:[#allocation42_spill] sm:$0xff] }
 0x953   :  { %3682 = vmatprep.subr.bf16.mxu0 %v13958_v16  ;;  %3723 = vmatprep.subr.bf16.mxu1 %v13959_v43  ;;  %v13969_v16 = vld [vmem:[#allocation43_spill] sm:$0xff]  ;;  %v13970_v43 = vld [vmem:[#allocation44_spill] sm:$0xff] }
 0x956   :  { %3683 = vmatpush1.bf16.msra.mxu0 %v13960_v8  ;;  %3724 = vmatpush1.bf16.msra.mxu1 %v13961_v53  ;;  %v13971_v8 = vld [vmem:[#allocation45_spill] sm:$0xff]  ;;  %v13972_v53 = vld [vmem:[#allocation46_spill] sm:$0xff] }
 0x957   :  { %3684 = vmatprep.subr.bf16.mxu0 %v13962_v0  ;;  %3725 = vmatprep.subr.bf16.mxu1 %v13963_v13  ;;  %v13973_v0 = vld [vmem:[#allocation47_spill] sm:$0xff]  ;;  %v13974_v13 = vld [vmem:[#allocation48_spill] sm:$0xff] }
 0x95a   :  { %3685 = vmatpush1.bf16.msra.mxu0 %v13964_v22  ;;  %3726 = vmatpush1.bf16.msra.mxu1 %v13965_v56  ;;  %v13975_v22 = vld [vmem:[#allocation49_spill] sm:$0xff]  ;;  %v13976_v56 = vld [vmem:[#allocation50_spill] sm:$0xff] }
 0x95b   :  { %3686 = vmatprep.subr.bf16.mxu0 %v13966_v45  ;;  %3727 = vmatprep.subr.bf16.mxu1 %v13967_v27  ;;  %v13977_v45 = vld [vmem:[#allocation51_spill] sm:$0xff]  ;;  %v13978_v27 = vld [vmem:[#allocation52_spill] sm:$0xff] }
 0x95e   :  { %3687 = vmatpush1.bf16.msra.mxu0 %v13968_v2  ;;  %3728 = vmatpush1.bf16.msra.mxu1 %v13969_v16  ;;  %v13979_v2 = vld [vmem:[#allocation53_spill] sm:$0xff]  ;;  %v13980_v16 = vld [vmem:[#allocation54_spill] sm:$0xff] }
 0x95f   :  { %3688 = vmatprep.subr.bf16.mxu0 %v13970_v43  ;;  %3729 = vmatprep.subr.bf16.mxu1 %v13971_v8  ;;  %v13981_v43 = vld [vmem:[#allocation55_spill] sm:$0xff]  ;;  %v13982_v8 = vld [vmem:[#allocation56_spill] sm:$0xff] }
 0x962   :  { %3689 = vmatpush1.bf16.msra.mxu0 %v13972_v53  ;;  %3730 = vmatpush1.bf16.msra.mxu1 %v13973_v0  ;;  %v13983_v53 = vld [vmem:[#allocation57_spill] sm:$0xff]  ;;  %v13984_v0 = vld [vmem:[#allocation58_spill] sm:$0xff] }
 0x963   :  { %3690 = vmatprep.subr.bf16.mxu0 %v13974_v13  ;;  %3731 = vmatprep.subr.bf16.mxu1 %v13975_v22  ;;  %v13985_v13 = vld [vmem:[#allocation59_spill] sm:$0xff]  ;;  %v13992_v22 = vld [vmem:[#allocation6_spill] sm:$0xff] }
 0x966   :  { %3691 = vmatpush1.bf16.msra.mxu0 %v13976_v56  ;;  %3732 = vmatpush1.bf16.msra.mxu1 %v13977_v45  ;;  %v10342_v45 = vld [vmem:[%s13338_s12 + $0x4] ss:$16 sps:$4 sm:$0xff]  }
 0x967   :  { %3692 = vmatprep.subr.bf16.mxu0 %v13978_v27  ;;  %3733 = vmatprep.subr.bf16.mxu1 %v13979_v2  ;;  %13986 = vst [vmem:[#allocation7_spill] sm:$0xff] %v10342_v45 }
 0x96a   :  { %3693 = vmatpush1.bf16.msra.mxu0 %v13980_v16  ;;  %3734 = vmatpush1.bf16.msra.mxu1 %v13981_v43  ;;  %v10348_v16 = vld [vmem:[%s13338_s12 + $0xc] ss:$16 sps:$4 sm:$0xff]  }
 0x96b   :  { %3694 = vmatprep.subr.bf16.mxu0 %v13982_v8  ;;  %3735 = vmatprep.subr.bf16.mxu1 %v13983_v53  ;;  %13987 = vst [vmem:[#allocation8_spill] sm:$0xff] %v10348_v16  ;;  %v13988_v53 = vld [vmem:[#allocation3_spill] sm:$0xff]  ;;  %v13990_v8 = vld [vmem:[#allocation5_spill] sm:$0xff] }
 0x96e   :  { %3695 = vmatpush1.bf16.msra.mxu0 %v13984_v0  ;;  %3736 = vmatpush1.bf16.msra.mxu1 %v13985_v13  ;;  %v2826_v0 = vld [vmem:[%s13341_s14] sm:$0xf] }
 0x96f   :  { %3764 = vmatprep.subr.bf16.mxu0 %v10342_v45  ;;  %3805 = vmatprep.subr.bf16.mxu1 %v10348_v16  ;;  %v10355_v13 = vrot.slane %v2826_v0, %v13988_v53  ;;  %v10358_v43 = vrot.slane %v2826_v0, %v13990_v8  ;;  %v10362_v52 = vrot.slane %v2826_v0, %v13992_v22 }
 0x970   :  { %v10367_v3 = vrot.slane %v2826_v0, %v13994_v36 }
 0x971   :  { %13989 = vst [vmem:[#allocation9_spill] sm:$0xff] %v10355_v13  ;;  %13991 = vst [vmem:[#allocation10_spill] sm:$0xff] %v10358_v43 }
 0x972   :  { %13993 = vst [vmem:[#allocation11_spill] sm:$0xff] %v10362_v52  ;;  %13995 = vst [vmem:[#allocation12_spill] sm:$0xff] %v10367_v3 }
 0x9e4   :  { %v3468_v2 = vpop.f32.mrb[44].mxu0  ;;  %v3509_v27 = vpop.f32.mrb[40].mxu1 }
 0x9e5   :  { %v3469_v45 = vadd.f32 %v3468_v2, %v10355_v13  ;;  %v3470_v56 = vpop.f32.mrb[45].mxu0  ;;  %v3511_v60 = vpop.f32.mrb[41].mxu1  ;;  %v3510_v2 = vadd.f32 %v3509_v27, %v10367_v3 }
 0x9e6   :  { %v3471_v16 = vadd.f32 %v3470_v56, %v10358_v43  ;;  %v3472_v37 = vpop.f32.mrb[46].mxu0  ;;  %v3513_v44 = vpop.f32.mrb[42].mxu1  ;;  %v3512_v8 = vadd.f32 %v3511_v60, %v10362_v52 }
 0x9e7   :  { %v3516_v6 = vmul.f32 0.5, %v3469_v45  ;;  %v3473_v34 = vpop.f32.mrb[47].mxu0  ;;  %v3514_v53 = vpop.f32.mrb[43].mxu1  ;;  %v3518_v22 = vmul.f32 0.5, %v3510_v2 }
 0x9e8   :  { %v3517_v14 = vmul.f32 0.5, %v3471_v16 }
 0x9e9   :  { %7071 = vtanh.f32 %v3516_v6 }
 0x9ea   :  { %7073 = vtanh.f32 %v3517_v14 }
 0x9eb   :  { %7075 = vtanh.f32 %v3512_v8 }
 0x9ec   :  { %7077 = vtanh.f32 %v3518_v22 }
 0x9f3   :  { %v7072_v13 = vpop.eup %7071 }
 0x9f4   :  { %v3522_v11 = vmul.f32 0.5, %v7072_v13  ;;  %v7074_v56 = vpop.eup %7073 }
 0x9f5   :  { %v3523_v44 = vmul.f32 0.5, %v7074_v56  ;;  %v7076_v34 = vpop.eup %7075 }
 0x9f6   :  { %v3525_v37 = vadd.f32 0.5, %v3522_v11  ;;  %v7078_v36 = vpop.eup %7077 }
 0x9f7   :  { %v3526_v45 = vadd.f32 0.5, %v3523_v44  ;;  %v3524_v14 = vmul.f32 0.5, %v7078_v36 }
 0x9f8   :  { %v3530_v16 = vmul.f32 %v7076_v34, %v3525_v37 }
 0x9f9   :  { %v3529_v6 = vmul.f32 0.0, %v3526_v45  ;;  %v3527_v22 = vadd.f32 0.5, %v3524_v14 }
 0x9fb   :  { %v10370_v53 = vadd.f32 %v3530_v16, %v3529_v6 }
 0x9fd   :  { %13996 = vst [vmem:[#allocation13_spill] sm:$0xff] %v10370_v53  ;;  %7079 = vtanh.f32 %v10370_v53 }
 0xa04   :  { %v3568_v60 = vpop.f32.mrb[48].mxu0  ;;  %v3609_v0 = vpop.f32.mrb[44].mxu1 }
 0xa05   :  { %v3620_v27 = vrot.slane %v3568_v60, 6  ;;  %v3570_v8 = vpop.f32.mrb[49].mxu0  ;;  %v3611_v2 = vpop.f32.mrb[45].mxu1  ;;  %v3622_v43 = vrot.slane %v3609_v0, 6 }
 0xa06   :  { %v3621_v13 = vrot.slane %v3570_v8, 6  ;;  %v3572_v3 = vpop.f32.mrb[50].mxu0  ;;  %v3613_v11 = vpop.f32.mrb[46].mxu1  ;;  %v3623_v44 = vrot.slane %v3611_v2, 6 }
 0xa07   :  { %v3628_v56 = vadd.f32 %v3620_v27, %v10228_v57  ;;  %v3573_v37 = vpop.f32.mrb[51].mxu0  ;;  %v3614_v34 = vpop.f32.mrb[47].mxu1  ;;  %v3630_v27 = vadd.f32 %v3622_v43, %v10237_v19 }
 0xa08   :  { %v7080_v45 = vpop.eup %7079  ;;  %v3629_v16 = vadd.f32 %v3621_v13, %v10230_v55  ;;  %v3631_v60 = vadd.f32 %v3623_v44, %v10234_v1 }
 0xa09   :  { %v3632_v6 = vmul.f32 0.5, %v3628_v56  ;;  %v3533_v53 = vmul.f32 %v7080_v45, %v3527_v22  ;;  %v3634_v8 = vmul.f32 0.5, %v3630_v27  ;;  %v10396_v27 = vld [vmem:[%s13338_s12 + $0x24] ss:$16 sps:$4 sm:$0xff]  }
 0xa0a   :  { %v3633_v36 = vmul.f32 0.5, %v3629_v16 }
 0xa0b   :  { %7081 = vtanh.f32 %v3632_v6  ;;  %v3654_v52 = vrot.slane %v3533_v53, 6  ;;  %v3646_v53 = vrot.slane %v10240_v47, 6  ;;  %v10390_v47 = vld [vmem:[%s13338_s12 + $0x8] ss:$16 sps:$4 sm:$0xff]  }
 0xa0c   :  { %7083 = vtanh.f32 %v3633_v36 }
 0xa0d   :  { %v3657_v3 = vpack.c.bf16 %v3654_v52, %v3654_v52  ;;  %7085 = vtanh.f32 %v3631_v60 }
 0xa0e   :  { %7087 = vtanh.f32 %v3634_v8  ;;  %v10402_v8 = vld [vmem:[%s13338_s12 + $0x2c] ss:$16 sps:$4 sm:$0xff]  }
 0xa0f   :  { %v3661_v14 = vrot.slane %v3657_v3, 1 }
 0xa11   :  { %3696 = vmatprep.mubr.bf16.mxu0 %v3661_v14  ;;  %3737 = vmatprep.mubr.bf16.mxu1 %v3661_v14  ;;  %v10384_v14 = vld [vmem:[%s13338_s12] ss:$16 sps:$4 sm:$0xff]  }
 0xa15   :  { %v7082_v2 = vpop.eup %7081 }
 0xa16   :  { %v3638_v11 = vmul.f32 0.5, %v7082_v2  ;;  %v7084_v13 = vpop.eup %7083  ;;  %v10410_v2 = vld [vmem:[%s13338_s12 + $0x20] ss:$16 sps:$4 sm:$0xff]  }
 0xa17   :  { %v3639_v22 = vmul.f32 0.5, %v7084_v13  ;;  %v7086_v37 = vpop.eup %7085  ;;  %v10422_v13 = vld [vmem:[%s13338_s12 + $0x44] ss:$16 sps:$4 sm:$0xff]  }
 0xa18   :  { %v3641_v56 = vadd.f32 0.5, %v3638_v11  ;;  %v7088_v43 = vpop.eup %7087  ;;  %v10416_v11 = vld [vmem:[%s13338_s12 + $0x28] ss:$16 sps:$4 sm:$0xff]  }
 0xa19   :  { %v3642_v34 = vadd.f32 0.5, %v3639_v22  ;;  %v3640_v45 = vmul.f32 0.5, %v7088_v43  ;;  %v10434_v22 = vld [vmem:[%s13338_s12 + $0x40] ss:$16 sps:$4 sm:$0xff]   ;;  %v10470_v43 = vld [vmem:[%s13338_s12 + $0x84] ss:$16 sps:$4 sm:$0xff]  }
 0xa1a   :  { %v3649_v0 = vmul.f32 %v7086_v37, %v3641_v56  ;;  %v10428_v56 = vld [vmem:[%s13338_s12 + $0x4c] ss:$16 sps:$4 sm:$0xff]   ;;  %v10440_v37 = vld [vmem:[%s13338_s12 + $0x48] ss:$16 sps:$4 sm:$0xff]  }
 0xa1b   :  { %v3648_v44 = vmul.f32 %v3646_v53, %v3642_v34  ;;  %v3643_v16 = vadd.f32 0.5, %v3640_v45  ;;  %v10446_v34 = vld [vmem:[%s13338_s12 + $0x64] ss:$16 sps:$4 sm:$0xff]   ;;  %v10452_v53 = vld [vmem:[%s13338_s12 + $0x6c] ss:$16 sps:$4 sm:$0xff]  }
 0xa1c   :  { %v10476_v45 = vld [vmem:[%s13338_s12 + $0x8c] ss:$16 sps:$4 sm:$0xff]  }
 0xa1d   :  { %v10378_v52 = vadd.f32 %v3649_v0, %v3648_v44  ;;  %v10458_v0 = vld [vmem:[%s13338_s12 + $0x60] ss:$16 sps:$4 sm:$0xff]   ;;  %v10464_v44 = vld [vmem:[%s13338_s12 + $0x68] ss:$16 sps:$4 sm:$0xff]  }
 0xa1f   :  { %7089 = vtanh.f32 %v10378_v52 }
 0xa29   :  { %v7090_v6 = vpop.eup %7089 }
 0xa2a   :  { %v3652_v36 = vmul.f32 %v7090_v6, %v3643_v16  ;;  %v10482_v16 = vld [vmem:[%s13338_s12 + $0x80] ss:$16 sps:$4 sm:$0xff]   ;;  %v10488_v6 = vld [vmem:[%s13338_s12 + $0x88] ss:$16 sps:$4 sm:$0xff]  }
 0xa2c   :  { %v3656_v60 = vpack.c.bf16 %v3652_v36, %v3652_v36  ;;  %v14034_v36 = vld [vmem:[#allocation58_spill] sm:$0xff] }
 0xa2e   :  { %v3660_v3 = vrot.slane %v3656_v60, 1  ;;  %v14035_v60 = vld [vmem:[#allocation59_spill] sm:$0xff] }
 0xa30   :  { %3697 = vmatmul.mubr.bf16.vlgmr.msra.gmra.mrb[52].mxu0 %v3660_v3  ;;  %3738 = vmatmul.mubr.bf16.vlgmr.msra.gmra.mrb[48].mxu1 %v3660_v3 }
 0xa31   :  { %3765 = vmatpush1.bf16.msra.mxu0 %v10384_v14  ;;  %3806 = vmatpush1.bf16.msra.mxu1 %v10390_v47 }
 0xa32   :  { %3766 = vmatprep.subr.bf16.mxu0 %v10396_v27  ;;  %3807 = vmatprep.subr.bf16.mxu1 %v10402_v8 }
 0xa33   :  { %3796 = vmatprep.mubr.bf16.mxu0 %v13932_v54  ;;  %3837 = vmatprep.mubr.bf16.mxu1 %v13932_v54 }
 0xa35   :  { %3767 = vmatpush1.bf16.msra.mxu0 %v10410_v2  ;;  %3808 = vmatpush1.bf16.msra.mxu1 %v10416_v11 }
 0xa36   :  { %3768 = vmatprep.subr.bf16.mxu0 %v10422_v13  ;;  %3809 = vmatprep.subr.bf16.mxu1 %v10428_v56 }
 0xa39   :  { %3769 = vmatpush1.bf16.msra.mxu0 %v10434_v22  ;;  %3810 = vmatpush1.bf16.msra.mxu1 %v10440_v37 }
 0xa3a   :  { %3770 = vmatprep.subr.bf16.mxu0 %v10446_v34  ;;  %3811 = vmatprep.subr.bf16.mxu1 %v10452_v53 }
 0xa3d   :  { %3771 = vmatpush1.bf16.msra.mxu0 %v10458_v0  ;;  %3812 = vmatpush1.bf16.msra.mxu1 %v10464_v44 }
 0xa3e   :  { %3772 = vmatprep.subr.bf16.mxu0 %v10470_v43  ;;  %3813 = vmatprep.subr.bf16.mxu1 %v10476_v45 }
 0xa41   :  { %3773 = vmatpush1.bf16.msra.mxu0 %v10482_v16  ;;  %3814 = vmatpush1.bf16.msra.mxu1 %v10488_v6 }
 0xa42   :  { %3774 = vmatprep.subr.bf16.mxu0 %v9736_v39  ;;  %3815 = vmatprep.subr.bf16.mxu1 %v9741_v41  ;;  %v13997_v39 = vld [vmem:[#allocation21_spill] sm:$0xff]  ;;  %v13998_v41 = vld [vmem:[#allocation22_spill] sm:$0xff] }
 0xa45   :  { %3775 = vmatpush1.bf16.msra.mxu0 %v9748_v7  ;;  %3816 = vmatpush1.bf16.msra.mxu1 %v9753_v31  ;;  %v13999_v7 = vld [vmem:[#allocation23_spill] sm:$0xff]  ;;  %v14000_v31 = vld [vmem:[#allocation24_spill] sm:$0xff] }
 0xa46   :  { %3776 = vmatprep.subr.bf16.mxu0 %v9760_v46  ;;  %3817 = vmatprep.subr.bf16.mxu1 %v9765_v25  ;;  %v14001_v46 = vld [vmem:[#allocation25_spill] sm:$0xff]  ;;  %v14002_v25 = vld [vmem:[#allocation26_spill] sm:$0xff] }
 0xa49   :  { %3777 = vmatpush1.bf16.msra.mxu0 %v9772_v9  ;;  %3818 = vmatpush1.bf16.msra.mxu1 %v9777_v17  ;;  %v14003_v9 = vld [vmem:[#allocation27_spill] sm:$0xff]  ;;  %v14004_v17 = vld [vmem:[#allocation28_spill] sm:$0xff] }
 0xa4a   :  { %3778 = vmatprep.subr.bf16.mxu0 %v9784_v59  ;;  %3819 = vmatprep.subr.bf16.mxu1 %v9789_v49  ;;  %v14005_v59 = vld [vmem:[#allocation29_spill] sm:$0xff]  ;;  %v14006_v49 = vld [vmem:[#allocation30_spill] sm:$0xff] }
 0xa4d   :  { %3779 = vmatpush1.bf16.msra.mxu0 %v9796_v33  ;;  %3820 = vmatpush1.bf16.msra.mxu1 %v9801_v26  ;;  %v14007_v33 = vld [vmem:[#allocation31_spill] sm:$0xff]  ;;  %v14008_v26 = vld [vmem:[#allocation32_spill] sm:$0xff] }
 0xa4e   :  { %3894 = vmatprep.subr.bf16.mxu0 %v9814_v28  ;;  %3935 = vmatprep.subr.bf16.mxu1 %v9819_v50  ;;  %v14009_v28 = vld [vmem:[#allocation33_spill] sm:$0xff]  ;;  %v14010_v50 = vld [vmem:[#allocation34_spill] sm:$0xff] }
 0xa50   :  { %3797 = vmatmul.mubr.bf16.vlgmr.msra.gmra.mrb[56].mxu0 %v3660_v3  ;;  %3838 = vmatmul.mubr.bf16.vlgmr.msra.gmra.mrb[52].mxu1 %v3660_v3  ;;  %v14036_v3 = vld [vmem:[#allocation7_spill] sm:$0xff] }
 0xa51   :  { %3895 = vmatpush1.bf16.msra.mxu0 %v9825_v42  ;;  %3936 = vmatpush1.bf16.msra.mxu1 %v9830_v20  ;;  %v14011_v42 = vld [vmem:[#allocation35_spill] sm:$0xff]  ;;  %v14012_v20 = vld [vmem:[#allocation36_spill] sm:$0xff] }
 0xa52   :  { %3896 = vmatprep.subr.bf16.mxu0 %v9838_v48  ;;  %3937 = vmatprep.subr.bf16.mxu1 %v9843_v63  ;;  %v14013_v48 = vld [vmem:[#allocation37_spill] sm:$0xff]  ;;  %v14014_v63 = vld [vmem:[#allocation38_spill] sm:$0xff] }
 0xa55   :  { %3897 = vmatpush1.bf16.msra.mxu0 %v9848_v15  ;;  %3938 = vmatpush1.bf16.msra.mxu1 %v9853_v61  ;;  %v14015_v15 = vld [vmem:[#allocation39_spill] sm:$0xff]  ;;  %v14016_v61 = vld [vmem:[#allocation40_spill] sm:$0xff] }
 0xa56   :  { %3898 = vmatprep.subr.bf16.mxu0 %v9858_v23  ;;  %3939 = vmatprep.subr.bf16.mxu1 %v9865_v21  ;;  %v14017_v23 = vld [vmem:[#allocation41_spill] sm:$0xff]  ;;  %v14018_v21 = vld [vmem:[#allocation42_spill] sm:$0xff] }
 0xa59   :  { %3899 = vmatpush1.bf16.msra.mxu0 %v9872_v38  ;;  %3940 = vmatpush1.bf16.msra.mxu1 %v13933_v51  ;;  %v14019_v38 = vld [vmem:[#allocation43_spill] sm:$0xff]  ;;  %v14020_v51 = vld [vmem:[#allocation44_spill] sm:$0xff] }
 0xa5a   :  { %3900 = vmatprep.subr.bf16.mxu0 %v13934_v35  ;;  %3941 = vmatprep.subr.bf16.mxu1 %v13935_v5  ;;  %v14021_v35 = vld [vmem:[#allocation45_spill] sm:$0xff]  ;;  %v14022_v5 = vld [vmem:[#allocation46_spill] sm:$0xff] }
 0xa5d   :  { %3901 = vmatpush1.bf16.msra.mxu0 %v13936_v10  ;;  %3942 = vmatpush1.bf16.msra.mxu1 %v13937_v40  ;;  %v14023_v10 = vld [vmem:[#allocation47_spill] sm:$0xff]  ;;  %v14024_v40 = vld [vmem:[#allocation48_spill] sm:$0xff] }
 0xa5e   :  { %3902 = vmatprep.subr.bf16.mxu0 %v13938_v32  ;;  %3943 = vmatprep.subr.bf16.mxu1 %v13939_v18  ;;  %v14025_v32 = vld [vmem:[#allocation49_spill] sm:$0xff]  ;;  %v14026_v18 = vld [vmem:[#allocation50_spill] sm:$0xff] }
 0xa61   :  { %3903 = vmatpush1.bf16.msra.mxu0 %v13940_v12  ;;  %3944 = vmatpush1.bf16.msra.mxu1 %v13941_v30  ;;  %v14027_v12 = vld [vmem:[#allocation51_spill] sm:$0xff]  ;;  %v14028_v30 = vld [vmem:[#allocation52_spill] sm:$0xff] }
 0xa62   :  { %3904 = vmatprep.subr.bf16.mxu0 %v13942_v58  ;;  %3945 = vmatprep.subr.bf16.mxu1 %v13943_v24  ;;  %v14029_v58 = vld [vmem:[#allocation53_spill] sm:$0xff]  ;;  %v14030_v24 = vld [vmem:[#allocation54_spill] sm:$0xff] }
 0xa65   :  { %3905 = vmatpush1.bf16.msra.mxu0 %v13944_v62  ;;  %3946 = vmatpush1.bf16.msra.mxu1 %v13945_v29  ;;  %v14031_v62 = vld [vmem:[#allocation55_spill] sm:$0xff]  ;;  %v14032_v29 = vld [vmem:[#allocation56_spill] sm:$0xff] }
 0xa66   :  { %3906 = vmatprep.subr.bf16.mxu0 %v13946_v4  ;;  %3947 = vmatprep.subr.bf16.mxu1 %v13997_v39  ;;  %v14033_v4 = vld [vmem:[#allocation57_spill] sm:$0xff]  ;;  %v14037_v39 = vld [vmem:[#allocation8_spill] sm:$0xff] }
 0xa69   :  { %3907 = vmatpush1.bf16.msra.mxu0 %v13998_v41  ;;  %3948 = vmatpush1.bf16.msra.mxu1 %v13999_v7 }
 0xa6a   :  { %3908 = vmatprep.subr.bf16.mxu0 %v14000_v31  ;;  %3949 = vmatprep.subr.bf16.mxu1 %v14001_v46  ;;  %v14038_v31 = vld [vmem:[#allocation9_spill] sm:$0xff] }
 0xa6d   :  { %3909 = vmatpush1.bf16.msra.mxu0 %v14002_v25  ;;  %3950 = vmatpush1.bf16.msra.mxu1 %v14003_v9 }
 0xa6e   :  { %3910 = vmatprep.subr.bf16.mxu0 %v14004_v17  ;;  %3951 = vmatprep.subr.bf16.mxu1 %v14005_v59  ;;  %v14039_v17 = vld [vmem:[#allocation10_spill] sm:$0xff] }
 0xa71   :  { %3911 = vmatpush1.bf16.msra.mxu0 %v14006_v49  ;;  %3952 = vmatpush1.bf16.msra.mxu1 %v14007_v33 }
 0xa72   :  { %3912 = vmatprep.subr.bf16.mxu0 %v14008_v26  ;;  %3953 = vmatprep.subr.bf16.mxu1 %v14009_v28 }
 0xa75   :  { %3913 = vmatpush1.bf16.msra.mxu0 %v14010_v50  ;;  %3954 = vmatpush1.bf16.msra.mxu1 %v14011_v42 }
 0xa76   :  { %3914 = vmatprep.subr.bf16.mxu0 %v14012_v20  ;;  %3955 = vmatprep.subr.bf16.mxu1 %v14013_v48  ;;  %v14040_v20 = vld [vmem:[#allocation11_spill] sm:$0xff] }
 0xa79   :  { %3915 = vmatpush1.bf16.msra.mxu0 %v14014_v63  ;;  %3956 = vmatpush1.bf16.msra.mxu1 %v14015_v15  ;;  %v14041_v63 = vld [vmem:[#allocation12_spill] sm:$0xff] }
 0xa7a   :  { %3916 = vmatprep.subr.bf16.mxu0 %v14016_v61  ;;  %3957 = vmatprep.subr.bf16.mxu1 %v14017_v23 }
 0xa7d   :  { %3917 = vmatpush1.bf16.msra.mxu0 %v14018_v21  ;;  %3958 = vmatpush1.bf16.msra.mxu1 %v14019_v38 }
 0xa7e   :  { %3918 = vmatprep.subr.bf16.mxu0 %v14020_v51  ;;  %3959 = vmatprep.subr.bf16.mxu1 %v14021_v35 }
 0xa81   :  { %3919 = vmatpush1.bf16.msra.mxu0 %v14022_v5  ;;  %3960 = vmatpush1.bf16.msra.mxu1 %v14023_v10 }
 0xa82   :  { %3920 = vmatprep.subr.bf16.mxu0 %v14024_v40  ;;  %3961 = vmatprep.subr.bf16.mxu1 %v14025_v32  ;;  %v14042_v32 = vld [vmem:[#allocation13_spill] sm:$0xff] }
 0xa85   :  { %3921 = vmatpush1.bf16.msra.mxu0 %v14026_v18  ;;  %3962 = vmatpush1.bf16.msra.mxu1 %v14027_v12 }
 0xa86   :  { %3922 = vmatprep.subr.bf16.mxu0 %v14028_v30  ;;  %3963 = vmatprep.subr.bf16.mxu1 %v14029_v58 }
 0xa89   :  { %3923 = vmatpush1.bf16.msra.mxu0 %v14030_v24  ;;  %3964 = vmatpush1.bf16.msra.mxu1 %v14031_v62 }
 0xa8a   :  { %3924 = vmatprep.subr.bf16.mxu0 %v14032_v29  ;;  %3965 = vmatprep.subr.bf16.mxu1 %v14033_v4 }
 0xa8d   :  { %3925 = vmatpush1.bf16.msra.mxu0 %v14034_v36  ;;  %3966 = vmatpush1.bf16.msra.mxu1 %v14035_v60 }
 0xa8e   :  { %3994 = vmatprep.subr.bf16.mxu0 %v14036_v3  ;;  %4035 = vmatprep.subr.bf16.mxu1 %v14037_v39 }
 0xb03   :  { %v3698_v41 = vpop.f32.mrb[52].mxu0  ;;  %v3739_v7 = vpop.f32.mrb[48].mxu1 }
 0xb04   :  { %v3699_v46 = vadd.f32 %v3698_v41, %v14038_v31  ;;  %v3700_v25 = vpop.f32.mrb[53].mxu0  ;;  %v3741_v9 = vpop.f32.mrb[49].mxu1  ;;  %v3740_v15 = vadd.f32 %v3739_v7, %v14041_v63 }
 0xb05   :  { %v3701_v59 = vadd.f32 %v3700_v25, %v14039_v17  ;;  %v3702_v49 = vpop.f32.mrb[54].mxu0  ;;  %v3743_v33 = vpop.f32.mrb[50].mxu1  ;;  %v3742_v48 = vadd.f32 %v3741_v9, %v14040_v20 }
 0xb06   :  { %v3746_v26 = vmul.f32 0.5, %v3699_v46  ;;  %v3703_v28 = vpop.f32.mrb[55].mxu0  ;;  %v3744_v50 = vpop.f32.mrb[51].mxu1  ;;  %v3748_v61 = vmul.f32 0.5, %v3740_v15 }
 0xb07   :  { %v3747_v42 = vmul.f32 0.5, %v3701_v59 }
 0xb08   :  { %7091 = vtanh.f32 %v3746_v26 }
 0xb09   :  { %7093 = vtanh.f32 %v3747_v42 }
 0xb0a   :  { %7095 = vtanh.f32 %v3742_v48 }
 0xb0b   :  { %7097 = vtanh.f32 %v3748_v61 }
 0xb12   :  { %v7092_v23 = vpop.eup %7091 }
 0xb13   :  { %v3752_v21 = vmul.f32 0.5, %v7092_v23  ;;  %v7094_v38 = vpop.eup %7093 }
 0xb14   :  { %v3753_v35 = vmul.f32 0.5, %v7094_v38  ;;  %v7096_v5 = vpop.eup %7095 }
 0xb15   :  { %v3755_v51 = vadd.f32 0.5, %v3752_v21  ;;  %v7098_v30 = vpop.eup %7097 }
 0xb16   :  { %v3756_v10 = vadd.f32 0.5, %v3753_v35  ;;  %v3754_v58 = vmul.f32 0.5, %v7098_v30 }
 0xb17   :  { %v3760_v40 = vmul.f32 %v7096_v5, %v3755_v51 }
 0xb18   :  { %v3759_v18 = vmul.f32 %v3756_v10, %v14042_v32  ;;  %v3757_v46 = vadd.f32 0.5, %v3754_v58  ;;  %v3876_v58 = vrot.slane %v10378_v52, 6  ;;  %v10608_v52 = vld [vmem:[%s13338_s12 + $0xa4] ss:$16 sps:$4 sm:$0xff]  }
 0xb1a   :  { %v10574_v12 = vadd.f32 %v3760_v40, %v3759_v18 }
 0xb1c   :  { %7099 = vtanh.f32 %v10574_v12 }
 0xb23   :  { %v3798_v24 = vpop.f32.mrb[56].mxu0  ;;  %v3839_v62 = vpop.f32.mrb[52].mxu1 }
 0xb24   :  { %v3850_v29 = vrot.slane %v3798_v24, 4  ;;  %v3800_v4 = vpop.f32.mrb[57].mxu0  ;;  %v3841_v36 = vpop.f32.mrb[53].mxu1  ;;  %v3852_v61 = vrot.slane %v3839_v62, 4 }
 0xb25   :  { %v3851_v60 = vrot.slane %v3800_v4, 4  ;;  %v3802_v41 = vpop.f32.mrb[58].mxu0  ;;  %v3843_v7 = vpop.f32.mrb[54].mxu1  ;;  %v3853_v9 = vrot.slane %v3841_v36, 4 }
 0xb26   :  { %v3858_v25 = vadd.f32 %v3850_v29, %v10228_v57  ;;  %v3803_v59 = vpop.f32.mrb[59].mxu0  ;;  %v3844_v49 = vpop.f32.mrb[55].mxu1  ;;  %v3860_v38 = vadd.f32 %v3852_v61, %v10237_v19  ;;  %v10674_v61 = vld [vmem:[%s13338_s12 + $0xe8] ss:$16 sps:$4 sm:$0xff]  }
 0xb27   :  { %v7100_v33 = vpop.eup %7099  ;;  %v3859_v26 = vadd.f32 %v3851_v60, %v10230_v55  ;;  %v3861_v48 = vadd.f32 %v3853_v9, %v10234_v1  ;;  %v10614_v9 = vld [vmem:[%s13338_s12 + $0xac] ss:$16 sps:$4 sm:$0xff]   ;;  %v10620_v59 = vld [vmem:[%s13338_s12 + $0xa0] ss:$16 sps:$4 sm:$0xff]   ;;  %v10626_v49 = vld [vmem:[%s13338_s12 + $0xa8] ss:$16 sps:$4 sm:$0xff]  }
 0xb28   :  { %v3862_v28 = vmul.f32 0.5, %v3858_v25  ;;  %v3763_v50 = vmul.f32 %v7100_v33, %v3757_v46  ;;  %v3864_v51 = vmul.f32 0.5, %v3860_v38  ;;  %v10632_v33 = vld [vmem:[%s13338_s12 + $0xc4] ss:$16 sps:$4 sm:$0xff]   ;;  %v10692_v38 = vld [vmem:[%s13339_s13] ss:$16 sps:$4 sm:$0xff]  }
 0xb29   :  { %v3863_v42 = vmul.f32 0.5, %v3859_v26  ;;  %v10638_v26 = vld [vmem:[%s13338_s12 + $0xcc] ss:$16 sps:$4 sm:$0xff]  }
 0xb2a   :  { %7101 = vtanh.f32 %v3862_v28  ;;  %v3884_v15 = vrot.slane %v3763_v50, 4  ;;  %v10644_v28 = vld [vmem:[%s13338_s12 + $0xc0] ss:$16 sps:$4 sm:$0xff]   ;;  %v10650_v50 = vld [vmem:[%s13338_s12 + $0xc8] ss:$16 sps:$4 sm:$0xff]  }
 0xb2b   :  { %7103 = vtanh.f32 %v3863_v42  ;;  %v10656_v42 = vld [vmem:[%s13338_s12 + $0xe4] ss:$16 sps:$4 sm:$0xff]  }
 0xb2c   :  { %v3887_v23 = vpack.c.bf16 %v3884_v15, %v3884_v15  ;;  %7105 = vtanh.f32 %v3861_v48  ;;  %v10662_v48 = vld [vmem:[%s13338_s12 + $0xec] ss:$16 sps:$4 sm:$0xff]   ;;  %v10668_v15 = vld [vmem:[%s13338_s12 + $0xe0] ss:$16 sps:$4 sm:$0xff]  }
 0xb2d   :  { %7107 = vtanh.f32 %v3864_v51  ;;  %v10698_v51 = vld [vmem:[%s13339_s13 + $0x8] ss:$16 sps:$4 sm:$0xff]  }
 0xb2e   :  { %v3891_v21 = vrot.slane %v3887_v23, 2  ;;  %v10680_v23 = vld [vmem:[%s13339_s13 + $0x4] ss:$16 sps:$4 sm:$0xff]  }
 0xb30   :  { %3926 = vmatprep.mubr.bf16.mxu0 %v3891_v21  ;;  %3967 = vmatprep.mubr.bf16.mxu1 %v3891_v21  ;;  %v10686_v21 = vld [vmem:[%s13339_s13 + $0xc] ss:$16 sps:$4 sm:$0xff]  }
 0xb34   :  { %v7102_v35 = vpop.eup %7101 }
 0xb35   :  { %v3868_v5 = vmul.f32 0.5, %v7102_v35  ;;  %v7104_v10 = vpop.eup %7103  ;;  %v10704_v35 = vld [vmem:[%s13339_s13 + $0x24] ss:$16 sps:$4 sm:$0xff]  }
 0xb36   :  { %v3869_v32 = vmul.f32 0.5, %v7104_v10  ;;  %v7106_v18 = vpop.eup %7105  ;;  %v10716_v10 = vld [vmem:[%s13339_s13 + $0x20] ss:$16 sps:$4 sm:$0xff]  }
 0xb37   :  { %v3871_v40 = vadd.f32 0.5, %v3868_v5  ;;  %v7108_v4 = vpop.eup %7107  ;;  %v10710_v5 = vld [vmem:[%s13339_s13 + $0x2c] ss:$16 sps:$4 sm:$0xff]   ;;  %14043 = vst [vmem:[#allocation14_spill] sm:$0xff] %v10716_v10 }
 0xb38   :  { %v3872_v30 = vadd.f32 0.5, %v3869_v32  ;;  %v3870_v36 = vmul.f32 0.5, %v7108_v4  ;;  %v10728_v32 = vld [vmem:[%s13339_s13 + $0x44] ss:$16 sps:$4 sm:$0xff]   ;;  %v10764_v4 = vld [vmem:[%s13339_s13 + $0x60] ss:$16 sps:$4 sm:$0xff]  }
 0xb39   :  { %v3879_v24 = vmul.f32 %v7106_v18, %v3871_v40  ;;  %v10722_v40 = vld [vmem:[%s13339_s13 + $0x28] ss:$16 sps:$4 sm:$0xff]   ;;  %14045 = vst [vmem:[#allocation16_spill] sm:$0xff] %v10728_v32  ;;  %v10734_v18 = vld [vmem:[%s13339_s13 + $0x4c] ss:$16 sps:$4 sm:$0xff]   ;;  %14051 = vst [vmem:[#allocation5_spill] sm:$0xff] %v10764_v4 }
 0xb3a   :  { %v3878_v62 = vmul.f32 %v3876_v58, %v3872_v30  ;;  %v3873_v60 = vadd.f32 0.5, %v3870_v36  ;;  %14044 = vst [vmem:[#allocation15_spill] sm:$0xff] %v10722_v40  ;;  %14046 = vst [vmem:[#allocation17_spill] sm:$0xff] %v10734_v18  ;;  %v10740_v30 = vld [vmem:[%s13339_s13 + $0x40] ss:$16 sps:$4 sm:$0xff]  }
 0xb3b   :  { %14047 = vst [vmem:[#allocation18_spill] sm:$0xff] %v10740_v30  ;;  %v10746_v58 = vld [vmem:[%s13339_s13 + $0x48] ss:$16 sps:$4 sm:$0xff]  }
 0xb3c   :  { %v10582_v29 = vadd.f32 %v3879_v24, %v3878_v62  ;;  %14048 = vst [vmem:[#allocation19_spill] sm:$0xff] %v10746_v58  ;;  %v10752_v24 = vld [vmem:[%s13339_s13 + $0x64] ss:$16 sps:$4 sm:$0xff]   ;;  %v10758_v62 = vld [vmem:[%s13339_s13 + $0x6c] ss:$16 sps:$4 sm:$0xff]  }
 0xb3d   :  { %14049 = vst [vmem:[#allocation20_spill] sm:$0xff] %v10752_v24  ;;  %14050 = vst [vmem:[#allocation3_spill] sm:$0xff] %v10758_v62  ;;  %v10770_v36 = vld [vmem:[%s13339_s13 + $0x68] ss:$16 sps:$4 sm:$0xff]  }
 0xb3e   :  { %7109 = vtanh.f32 %v10582_v29  ;;  %14052 = vst [vmem:[#allocation6_spill] sm:$0xff] %v10770_v36 }
 0xb48   :  { %v7110_v41 = vpop.eup %7109 }
 0xb49   :  { %v3882_v7 = vmul.f32 %v7110_v41, %v3873_v60  ;;  %v10776_v60 = vld [vmem:[%s13339_s13 + $0x84] ss:$16 sps:$4 sm:$0xff]   ;;  %v10782_v41 = vld [vmem:[%s13339_s13 + $0x8c] ss:$16 sps:$4 sm:$0xff]  }
 0xb4a   :  { %14053 = vst [vmem:[#allocation4_spill] sm:$0xff] %v10776_v60  ;;  %14054 = vst [vmem:[#allocation21_spill] sm:$0xff] %v10782_v41 }
 0xb4b   :  { %v3886_v46 = vpack.c.bf16 %v3882_v7, %v3882_v7  ;;  %v10788_v7 = vld [vmem:[%s13339_s13 + $0x80] ss:$16 sps:$4 sm:$0xff]  }
 0xb4c   :  { %14055 = vst [vmem:[#allocation22_spill] sm:$0xff] %v10788_v7 }
 0xb4d   :  { %v3890_v25 = vrot.slane %v3886_v46, 2  ;;  %v10794_v46 = vld [vmem:[%s13339_s13 + $0x88] ss:$16 sps:$4 sm:$0xff]  }
 0xb4e   :  { %14056 = vst [vmem:[#allocation23_spill] sm:$0xff] %v10794_v46 }
 0xb4f   :  { %3927 = vmatmul.mubr.bf16.vlgmr.msra.gmra.mrb[60].mxu0 %v3890_v25  ;;  %3968 = vmatmul.mubr.bf16.vlgmr.msra.gmra.mrb[56].mxu1 %v3890_v25 }
 0xb50   :  { %3995 = vmatpush1.bf16.msra.mxu0 %v10384_v14  ;;  %4036 = vmatpush1.bf16.msra.mxu1 %v10390_v47 }
 0xb51   :  { %3996 = vmatprep.subr.bf16.mxu0 %v10396_v27  ;;  %4037 = vmatprep.subr.bf16.mxu1 %v10402_v8 }
 0xb52   :  { %4026 = vmatprep.mubr.bf16.mxu0 %v13932_v54  ;;  %4067 = vmatprep.mubr.bf16.mxu1 %v13932_v54 }
 0xb54   :  { %3997 = vmatpush1.bf16.msra.mxu0 %v10410_v2  ;;  %4038 = vmatpush1.bf16.msra.mxu1 %v10416_v11 }
 0xb55   :  { %3998 = vmatprep.subr.bf16.mxu0 %v10422_v13  ;;  %4039 = vmatprep.subr.bf16.mxu1 %v10428_v56 }
 0xb58   :  { %3999 = vmatpush1.bf16.msra.mxu0 %v10434_v22  ;;  %4040 = vmatpush1.bf16.msra.mxu1 %v10440_v37 }
 0xb59   :  { %4000 = vmatprep.subr.bf16.mxu0 %v10446_v34  ;;  %4041 = vmatprep.subr.bf16.mxu1 %v10452_v53 }
 0xb5c   :  { %4001 = vmatpush1.bf16.msra.mxu0 %v10458_v0  ;;  %4042 = vmatpush1.bf16.msra.mxu1 %v10464_v44 }
 0xb5d   :  { %4002 = vmatprep.subr.bf16.mxu0 %v10470_v43  ;;  %4043 = vmatprep.subr.bf16.mxu1 %v10476_v45 }
 0xb60   :  { %4003 = vmatpush1.bf16.msra.mxu0 %v10482_v16  ;;  %4044 = vmatpush1.bf16.msra.mxu1 %v10488_v6 }
 0xb61   :  { %4004 = vmatprep.subr.bf16.mxu0 %v10608_v52  ;;  %4045 = vmatprep.subr.bf16.mxu1 %v10614_v9 }
 0xb64   :  { %4005 = vmatpush1.bf16.msra.mxu0 %v10620_v59  ;;  %4046 = vmatpush1.bf16.msra.mxu1 %v10626_v49 }
 0xb65   :  { %4006 = vmatprep.subr.bf16.mxu0 %v10632_v33  ;;  %4047 = vmatprep.subr.bf16.mxu1 %v10638_v26 }
 0xb68   :  { %4007 = vmatpush1.bf16.msra.mxu0 %v10644_v28  ;;  %4048 = vmatpush1.bf16.msra.mxu1 %v10650_v50 }
 0xb69   :  { %4008 = vmatprep.subr.bf16.mxu0 %v10656_v42  ;;  %4049 = vmatprep.subr.bf16.mxu1 %v10662_v48 }
 0xb6c   :  { %4009 = vmatpush1.bf16.msra.mxu0 %v10668_v15  ;;  %4050 = vmatpush1.bf16.msra.mxu1 %v10674_v61 }
 0xb6d   :  { %4124 = vmatprep.subr.bf16.mxu0 %v10680_v23  ;;  %4165 = vmatprep.subr.bf16.mxu1 %v10686_v21 }
 0xb6f   :  { %4027 = vmatmul.mubr.bf16.vlgmr.msra.gmra.mrb[64].mxu0 %v3890_v25  ;;  %4068 = vmatmul.mubr.bf16.vlgmr.msra.gmra.mrb[60].mxu1 %v3890_v25  ;;  %v10800_v25 = vld [vmem:[%s13339_s13 + $0xa4] ss:$16 sps:$4 sm:$0xff]  }
 0xb70   :  { %4125 = vmatpush1.bf16.msra.mxu0 %v10692_v38  ;;  %4166 = vmatpush1.bf16.msra.mxu1 %v10698_v51  ;;  %14057 = vst [vmem:[#allocation24_spill] sm:$0xff] %v10800_v25 }
 0xb71   :  { %4126 = vmatprep.subr.bf16.mxu0 %v10704_v35  ;;  %4167 = vmatprep.subr.bf16.mxu1 %v10710_v5 }
 0xb74   :  { %4127 = vmatpush1.bf16.msra.mxu0 %v10716_v10  ;;  %4168 = vmatpush1.bf16.msra.mxu1 %v10722_v40 }
 0xb75   :  { %4128 = vmatprep.subr.bf16.mxu0 %v10728_v32  ;;  %4169 = vmatprep.subr.bf16.mxu1 %v10734_v18 }
 0xb78   :  { %4129 = vmatpush1.bf16.msra.mxu0 %v10740_v30  ;;  %4170 = vmatpush1.bf16.msra.mxu1 %v10746_v58 }
 0xb79   :  { %4130 = vmatprep.subr.bf16.mxu0 %v10752_v24  ;;  %4171 = vmatprep.subr.bf16.mxu1 %v10758_v62 }
 0xb7c   :  { %4131 = vmatpush1.bf16.msra.mxu0 %v10764_v4  ;;  %4172 = vmatpush1.bf16.msra.mxu1 %v10770_v36 }
 0xb7d   :  { %4132 = vmatprep.subr.bf16.mxu0 %v10776_v60  ;;  %4173 = vmatprep.subr.bf16.mxu1 %v10782_v41  ;;  %v10806_v41 = vld [vmem:[%s13339_s13 + $0xac] ss:$16 sps:$4 sm:$0xff]  }
 0xb7e   :  { %14058 = vst [vmem:[#allocation25_spill] sm:$0xff] %v10806_v41 }
 0xb80   :  { %4133 = vmatpush1.bf16.msra.mxu0 %v10788_v7  ;;  %4174 = vmatpush1.bf16.msra.mxu1 %v10794_v46  ;;  %v10812_v7 = vld [vmem:[%s13339_s13 + $0xa0] ss:$16 sps:$4 sm:$0xff]   ;;  %v10818_v46 = vld [vmem:[%s13339_s13 + $0xa8] ss:$16 sps:$4 sm:$0xff]  }
 0xb81   :  { %4134 = vmatprep.subr.bf16.mxu0 %v10800_v25  ;;  %4175 = vmatprep.subr.bf16.mxu1 %v10806_v41  ;;  %14059 = vst [vmem:[#allocation26_spill] sm:$0xff] %v10812_v7  ;;  %14060 = vst [vmem:[#allocation27_spill] sm:$0xff] %v10818_v46  ;;  %v10824_v25 = vld [vmem:[%s13339_s13 + $0xc4] ss:$16 sps:$4 sm:$0xff]   ;;  %v10830_v41 = vld [vmem:[%s13339_s13 + $0xcc] ss:$16 sps:$4 sm:$0xff]  }
 0xb82   :  { %14061 = vst [vmem:[#allocation28_spill] sm:$0xff] %v10824_v25  ;;  %14062 = vst [vmem:[#allocation29_spill] sm:$0xff] %v10830_v41 }
 0xb84   :  { %4135 = vmatpush1.bf16.msra.mxu0 %v10812_v7  ;;  %4176 = vmatpush1.bf16.msra.mxu1 %v10818_v46  ;;  %v10836_v7 = vld [vmem:[%s13339_s13 + $0xc0] ss:$16 sps:$4 sm:$0xff]   ;;  %v10842_v46 = vld [vmem:[%s13339_s13 + $0xc8] ss:$16 sps:$4 sm:$0xff]  }
 0xb85   :  { %4136 = vmatprep.subr.bf16.mxu0 %v10824_v25  ;;  %4177 = vmatprep.subr.bf16.mxu1 %v10830_v41  ;;  %14063 = vst [vmem:[#allocation30_spill] sm:$0xff] %v10836_v7  ;;  %14064 = vst [vmem:[#allocation31_spill] sm:$0xff] %v10842_v46  ;;  %v10848_v25 = vld [vmem:[%s13339_s13 + $0xe4] ss:$16 sps:$4 sm:$0xff]   ;;  %v10854_v41 = vld [vmem:[%s13339_s13 + $0xec] ss:$16 sps:$4 sm:$0xff]  }
 0xb86   :  { %14065 = vst [vmem:[#allocation32_spill] sm:$0xff] %v10848_v25  ;;  %14066 = vst [vmem:[#allocation33_spill] sm:$0xff] %v10854_v41 }
 0xb88   :  { %4137 = vmatpush1.bf16.msra.mxu0 %v10836_v7  ;;  %4178 = vmatpush1.bf16.msra.mxu1 %v10842_v46  ;;  %v10860_v7 = vld [vmem:[%s13339_s13 + $0xe0] ss:$16 sps:$4 sm:$0xff]   ;;  %v10866_v46 = vld [vmem:[%s13339_s13 + $0xe8] ss:$16 sps:$4 sm:$0xff]  }
 0xb89   :  { %4138 = vmatprep.subr.bf16.mxu0 %v10848_v25  ;;  %4179 = vmatprep.subr.bf16.mxu1 %v10854_v41  ;;  %14067 = vst [vmem:[#allocation34_spill] sm:$0xff] %v10860_v7  ;;  %14068 = vst [vmem:[#allocation35_spill] sm:$0xff] %v10866_v46  ;;  %v10872_v25 = vld [vmem:[%s13339_s13 + $0x104] ss:$16 sps:$4 sm:$0xff]   ;;  %v10878_v41 = vld [vmem:[%s13339_s13 + $0x10c] ss:$16 sps:$4 sm:$0xff]  }
 0xb8a   :  { %14069 = vst [vmem:[#allocation36_spill] sm:$0xff] %v10872_v25  ;;  %14070 = vst [vmem:[#allocation37_spill] sm:$0xff] %v10878_v41 }
 0xb8c   :  { %4139 = vmatpush1.bf16.msra.mxu0 %v10860_v7  ;;  %4180 = vmatpush1.bf16.msra.mxu1 %v10866_v46  ;;  %v10884_v7 = vld [vmem:[%s13339_s13 + $0x100] ss:$16 sps:$4 sm:$0xff]   ;;  %v10890_v46 = vld [vmem:[%s13339_s13 + $0x108] ss:$16 sps:$4 sm:$0xff]  }
 0xb8d   :  { %4140 = vmatprep.subr.bf16.mxu0 %v10872_v25  ;;  %4181 = vmatprep.subr.bf16.mxu1 %v10878_v41  ;;  %14071 = vst [vmem:[#allocation38_spill] sm:$0xff] %v10884_v7  ;;  %14072 = vst [vmem:[#allocation39_spill] sm:$0xff] %v10890_v46  ;;  %v10896_v25 = vld [vmem:[%s13339_s13 + $0x124] ss:$16 sps:$4 sm:$0xff]   ;;  %v10902_v41 = vld [vmem:[%s13339_s13 + $0x12c] ss:$16 sps:$4 sm:$0xff]  }
 0xb8e   :  { %14073 = vst [vmem:[#allocation40_spill] sm:$0xff] %v10896_v25  ;;  %14074 = vst [vmem:[#allocation41_spill] sm:$0xff] %v10902_v41 }
 0xb90   :  { %4141 = vmatpush1.bf16.msra.mxu0 %v10884_v7  ;;  %4182 = vmatpush1.bf16.msra.mxu1 %v10890_v46  ;;  %v10908_v7 = vld [vmem:[%s13339_s13 + $0x120] ss:$16 sps:$4 sm:$0xff]   ;;  %v10914_v46 = vld [vmem:[%s13339_s13 + $0x128] ss:$16 sps:$4 sm:$0xff]  }
 0xb91   :  { %4142 = vmatprep.subr.bf16.mxu0 %v10896_v25  ;;  %4183 = vmatprep.subr.bf16.mxu1 %v10902_v41  ;;  %14075 = vst [vmem:[#allocation42_spill] sm:$0xff] %v10908_v7  ;;  %14076 = vst [vmem:[#allocation43_spill] sm:$0xff] %v10914_v46  ;;  %v10920_v25 = vld [vmem:[%s13339_s13 + $0x144] ss:$16 sps:$4 sm:$0xff]   ;;  %v10926_v41 = vld [vmem:[%s13339_s13 + $0x14c] ss:$16 sps:$4 sm:$0xff]  }
 0xb92   :  { %14077 = vst [vmem:[#allocation44_spill] sm:$0xff] %v10920_v25  ;;  %14078 = vst [vmem:[#allocation45_spill] sm:$0xff] %v10926_v41 }
 0xb94   :  { %4143 = vmatpush1.bf16.msra.mxu0 %v10908_v7  ;;  %4184 = vmatpush1.bf16.msra.mxu1 %v10914_v46  ;;  %v10932_v7 = vld [vmem:[%s13339_s13 + $0x140] ss:$16 sps:$4 sm:$0xff]   ;;  %v10938_v46 = vld [vmem:[%s13339_s13 + $0x148] ss:$16 sps:$4 sm:$0xff]  }
 0xb95   :  { %4144 = vmatprep.subr.bf16.mxu0 %v10920_v25  ;;  %4185 = vmatprep.subr.bf16.mxu1 %v10926_v41  ;;  %14079 = vst [vmem:[#allocation46_spill] sm:$0xff] %v10932_v7  ;;  %14080 = vst [vmem:[#allocation47_spill] sm:$0xff] %v10938_v46  ;;  %v10944_v25 = vld [vmem:[%s13339_s13 + $0x164] ss:$16 sps:$4 sm:$0xff]   ;;  %v10950_v41 = vld [vmem:[%s13339_s13 + $0x16c] ss:$16 sps:$4 sm:$0xff]  }
 0xb96   :  { %14081 = vst [vmem:[#allocation48_spill] sm:$0xff] %v10944_v25  ;;  %14082 = vst [vmem:[#allocation49_spill] sm:$0xff] %v10950_v41 }
 0xb98   :  { %4145 = vmatpush1.bf16.msra.mxu0 %v10932_v7  ;;  %4186 = vmatpush1.bf16.msra.mxu1 %v10938_v46  ;;  %v10956_v7 = vld [vmem:[%s13339_s13 + $0x160] ss:$16 sps:$4 sm:$0xff]   ;;  %v10962_v46 = vld [vmem:[%s13339_s13 + $0x168] ss:$16 sps:$4 sm:$0xff]  }
 0xb99   :  { %4146 = vmatprep.subr.bf16.mxu0 %v10944_v25  ;;  %4187 = vmatprep.subr.bf16.mxu1 %v10950_v41  ;;  %14083 = vst [vmem:[#allocation50_spill] sm:$0xff] %v10956_v7  ;;  %14084 = vst [vmem:[#allocation51_spill] sm:$0xff] %v10962_v46  ;;  %v10968_v25 = vld [vmem:[%s13339_s13 + $0x184] ss:$16 sps:$4 sm:$0xff]   ;;  %v10974_v41 = vld [vmem:[%s13339_s13 + $0x18c] ss:$16 sps:$4 sm:$0xff]  }
 0xb9a   :  { %14085 = vst [vmem:[#allocation52_spill] sm:$0xff] %v10968_v25  ;;  %14086 = vst [vmem:[#allocation53_spill] sm:$0xff] %v10974_v41 }
 0xb9c   :  { %4147 = vmatpush1.bf16.msra.mxu0 %v10956_v7  ;;  %4188 = vmatpush1.bf16.msra.mxu1 %v10962_v46  ;;  %v10980_v7 = vld [vmem:[%s13339_s13 + $0x180] ss:$16 sps:$4 sm:$0xff]   ;;  %v10986_v46 = vld [vmem:[%s13339_s13 + $0x188] ss:$16 sps:$4 sm:$0xff]  }
 0xb9d   :  { %4148 = vmatprep.subr.bf16.mxu0 %v10968_v25  ;;  %4189 = vmatprep.subr.bf16.mxu1 %v10974_v41  ;;  %14087 = vst [vmem:[#allocation54_spill] sm:$0xff] %v10980_v7  ;;  %14088 = vst [vmem:[#allocation55_spill] sm:$0xff] %v10986_v46  ;;  %v10992_v25 = vld [vmem:[%s13339_s13 + $0x1a4] ss:$16 sps:$4 sm:$0xff]   ;;  %v10998_v41 = vld [vmem:[%s13339_s13 + $0x1ac] ss:$16 sps:$4 sm:$0xff]  }
 0xb9e   :  { %14089 = vst [vmem:[#allocation56_spill] sm:$0xff] %v10992_v25  ;;  %14090 = vst [vmem:[#allocation57_spill] sm:$0xff] %v10998_v41 }
 0xba0   :  { %4149 = vmatpush1.bf16.msra.mxu0 %v10980_v7  ;;  %4190 = vmatpush1.bf16.msra.mxu1 %v10986_v46  ;;  %v11004_v7 = vld [vmem:[%s13339_s13 + $0x1a0] ss:$16 sps:$4 sm:$0xff]   ;;  %v11010_v46 = vld [vmem:[%s13339_s13 + $0x1a8] ss:$16 sps:$4 sm:$0xff]  }
 0xba1   :  { %4150 = vmatprep.subr.bf16.mxu0 %v10992_v25  ;;  %4191 = vmatprep.subr.bf16.mxu1 %v10998_v41  ;;  %14091 = vst [vmem:[#allocation58_spill] sm:$0xff] %v11004_v7  ;;  %14092 = vst [vmem:[#allocation59_spill] sm:$0xff] %v11010_v46  ;;  %v11016_v25 = vld [vmem:[%s13339_s13 + $0x1c4] ss:$16 sps:$4 sm:$0xff]   ;;  %v11022_v41 = vld [vmem:[%s13339_s13 + $0x1cc] ss:$16 sps:$4 sm:$0xff]  }
 0xba2   :  { %14093 = vst [vmem:[#allocation7_spill] sm:$0xff] %v11016_v25  ;;  %14094 = vst [vmem:[#allocation8_spill] sm:$0xff] %v11022_v41 }
 0xba4   :  { %4151 = vmatpush1.bf16.msra.mxu0 %v11004_v7  ;;  %4192 = vmatpush1.bf16.msra.mxu1 %v11010_v46  ;;  %v11028_v7 = vld [vmem:[%s13339_s13 + $0x1c0] ss:$16 sps:$4 sm:$0xff]   ;;  %v11034_v46 = vld [vmem:[%s13339_s13 + $0x1c8] ss:$16 sps:$4 sm:$0xff]  }
 0xba5   :  { %4152 = vmatprep.subr.bf16.mxu0 %v11016_v25  ;;  %4193 = vmatprep.subr.bf16.mxu1 %v11022_v41  ;;  %14095 = vst [vmem:[#allocation13_spill] sm:$0xff] %v11028_v7  ;;  %14096 = vst [vmem:[#allocation72_spill] sm:$0xff] %v11034_v46  ;;  %v11040_v25 = vld [vmem:[%s13339_s13 + $0x1e4] ss:$16 sps:$4 sm:$0xff]   ;;  %v11046_v41 = vld [vmem:[%s13339_s13 + $0x1ec] ss:$16 sps:$4 sm:$0xff]  }
 0xba6   :  { %14097 = vst [vmem:[#allocation73_spill] sm:$0xff] %v11040_v25  ;;  %14098 = vst [vmem:[#allocation74_spill] sm:$0xff] %v11046_v41 }
 0xba8   :  { %4153 = vmatpush1.bf16.msra.mxu0 %v11028_v7  ;;  %4194 = vmatpush1.bf16.msra.mxu1 %v11034_v46  ;;  %v11052_v7 = vld [vmem:[%s13339_s13 + $0x1e0] ss:$16 sps:$4 sm:$0xff]   ;;  %v11058_v46 = vld [vmem:[%s13339_s13 + $0x1e8] ss:$16 sps:$4 sm:$0xff]  }
 0xba9   :  { %4154 = vmatprep.subr.bf16.mxu0 %v11040_v25  ;;  %4195 = vmatprep.subr.bf16.mxu1 %v11046_v41  ;;  %14099 = vst [vmem:[#allocation75_spill] sm:$0xff] %v11052_v7  ;;  %14100 = vst [vmem:[#allocation76_spill] sm:$0xff] %v11058_v46 }
 0xbac   :  { %4155 = vmatpush1.bf16.msra.mxu0 %v11052_v7  ;;  %4196 = vmatpush1.bf16.msra.mxu1 %v11058_v46 }
 0xbad   :  { %4224 = vmatprep.subr.bf16.mxu0 %v14036_v3  ;;  %4265 = vmatprep.subr.bf16.mxu1 %v14037_v39 }
 0xc22   :  { %v3928_v25 = vpop.f32.mrb[60].mxu0  ;;  %v3969_v41 = vpop.f32.mrb[56].mxu1 }
 0xc23   :  { %v3929_v60 = vadd.f32 %v3928_v25, %v14038_v31  ;;  %v3930_v36 = vpop.f32.mrb[61].mxu0  ;;  %v3971_v4 = vpop.f32.mrb[57].mxu1  ;;  %v3970_v3 = vadd.f32 %v3969_v41, %v14041_v63 }
 0xc24   :  { %v3931_v62 = vadd.f32 %v3930_v36, %v14039_v17  ;;  %v3932_v7 = vpop.f32.mrb[62].mxu0  ;;  %v3973_v24 = vpop.f32.mrb[58].mxu1  ;;  %v3972_v46 = vadd.f32 %v3971_v4, %v14040_v20 }
 0xc25   :  { %v3976_v58 = vmul.f32 0.5, %v3929_v60  ;;  %v3933_v30 = vpop.f32.mrb[63].mxu0  ;;  %v3974_v18 = vpop.f32.mrb[59].mxu1  ;;  %v3978_v39 = vmul.f32 0.5, %v3970_v3 }
 0xc26   :  { %v3977_v32 = vmul.f32 0.5, %v3931_v62 }
 0xc27   :  { %7111 = vtanh.f32 %v3976_v58 }
 0xc28   :  { %7113 = vtanh.f32 %v3977_v32 }
 0xc29   :  { %7115 = vtanh.f32 %v3972_v46 }
 0xc2a   :  { %7117 = vtanh.f32 %v3978_v39 }
 0xc31   :  { %v7112_v40 = vpop.eup %7111 }
 0xc32   :  { %v3982_v25 = vmul.f32 0.5, %v7112_v40  ;;  %v7114_v31 = vpop.eup %7113 }
 0xc33   :  { %v3983_v36 = vmul.f32 0.5, %v7114_v31  ;;  %v7116_v7 = vpop.eup %7115 }
 0xc34   :  { %v3985_v10 = vadd.f32 0.5, %v3982_v25  ;;  %v7118_v32 = vpop.eup %7117 }
 0xc35   :  { %v3986_v24 = vadd.f32 0.5, %v3983_v36  ;;  %v3984_v58 = vmul.f32 0.5, %v7118_v32 }
 0xc36   :  { %v3990_v60 = vmul.f32 %v7116_v7, %v3985_v10 }
 0xc37   :  { %v3989_v18 = vmul.f32 %v3986_v24, %v10574_v12  ;;  %v3987_v31 = vadd.f32 0.5, %v3984_v58 }
 0xc39   :  { %v11068_v30 = vadd.f32 %v3990_v60, %v3989_v18 }
 0xc3b   :  { %14101 = vst [vmem:[#allocation77_spill] sm:$0xff] %v11068_v30  ;;  %7119 = vtanh.f32 %v11068_v30 }
 0xc42   :  { %v4028_v62 = vpop.f32.mrb[64].mxu0  ;;  %v4069_v4 = vpop.f32.mrb[60].mxu1 }
 0xc43   :  { %v4080_v41 = vrot.slane %v4028_v62, 2  ;;  %v4030_v46 = vpop.f32.mrb[65].mxu0  ;;  %v4071_v40 = vpop.f32.mrb[61].mxu1  ;;  %v4082_v20 = vrot.slane %v4069_v4, 2 }
 0xc44   :  { %v4081_v3 = vrot.slane %v4030_v46, 2  ;;  %v4032_v25 = vpop.f32.mrb[66].mxu0  ;;  %v4073_v39 = vpop.f32.mrb[62].mxu1  ;;  %v4083_v10 = vrot.slane %v4071_v40, 2 }
 0xc45   :  { %v4088_v36 = vadd.f32 %v4080_v41, %v10228_v57  ;;  %v4033_v7 = vpop.f32.mrb[67].mxu0  ;;  %v4074_v12 = vpop.f32.mrb[63].mxu1  ;;  %v4090_v57 = vadd.f32 %v4082_v20, %v10237_v19 }
 0xc46   :  { %v7120_v24 = vpop.eup %7119  ;;  %v4089_v60 = vadd.f32 %v4081_v3, %v10230_v55  ;;  %v4091_v62 = vadd.f32 %v4083_v10, %v10234_v1  ;;  %v4106_v1 = vrot.slane %v10582_v29, 6  ;;  %v14120_v29 = vld [vmem:[#allocation28_spill] sm:$0xff] }
 0xc47   :  { %v4092_v18 = vmul.f32 0.5, %v4088_v36  ;;  %v3993_v30 = vmul.f32 %v7120_v24, %v3987_v31  ;;  %v4094_v41 = vmul.f32 0.5, %v4090_v57  ;;  %v14126_v57 = vld [vmem:[#allocation34_spill] sm:$0xff] }
 0xc48   :  { %v4093_v32 = vmul.f32 0.5, %v4089_v60 }
 0xc49   :  { %7121 = vtanh.f32 %v4092_v18  ;;  %v4114_v63 = vrot.slane %v3993_v30, 2  ;;  %v14121_v18 = vld [vmem:[#allocation29_spill] sm:$0xff] }
 0xc4a   :  { %7123 = vtanh.f32 %v4093_v32  ;;  %v14122_v32 = vld [vmem:[#allocation30_spill] sm:$0xff] }
 0xc4b   :  { %v4117_v46 = vpack.c.bf16 %v4114_v63, %v4114_v63  ;;  %7125 = vtanh.f32 %v4091_v62  ;;  %v14123_v62 = vld [vmem:[#allocation31_spill] sm:$0xff] }
 0xc4c   :  { %7127 = vtanh.f32 %v4094_v41  ;;  %v14127_v41 = vld [vmem:[#allocation35_spill] sm:$0xff] }
 0xc4d   :  { %v4121_v58 = vrot.slane %v4117_v46, 3  ;;  %v14124_v46 = vld [vmem:[#allocation32_spill] sm:$0xff] }
 0xc4f   :  { %4156 = vmatprep.mubr.bf16.mxu0 %v4121_v58  ;;  %4197 = vmatprep.mubr.bf16.mxu1 %v4121_v58  ;;  %v14125_v58 = vld [vmem:[#allocation33_spill] sm:$0xff] }
 0xc53   :  { %v7122_v40 = vpop.eup %7121 }
 0xc54   :  { %v4098_v25 = vmul.f32 0.5, %v7122_v40  ;;  %v7124_v55 = vpop.eup %7123  ;;  %v14128_v40 = vld [vmem:[#allocation36_spill] sm:$0xff] }
 0xc55   :  { %v4099_v39 = vmul.f32 0.5, %v7124_v55  ;;  %v7126_v31 = vpop.eup %7125  ;;  %v14130_v55 = vld [vmem:[#allocation38_spill] sm:$0xff] }
 0xc56   :  { %v4101_v3 = vadd.f32 0.5, %v4098_v25  ;;  %v7128_v19 = vpop.eup %7127  ;;  %v14129_v25 = vld [vmem:[#allocation37_spill] sm:$0xff] }
 0xc57   :  { %v4102_v36 = vadd.f32 0.5, %v4099_v39  ;;  %v4100_v20 = vmul.f32 0.5, %v7128_v19  ;;  %v14132_v39 = vld [vmem:[#allocation40_spill] sm:$0xff]  ;;  %v14138_v19 = vld [vmem:[#allocation46_spill] sm:$0xff] }
 0xc58   :  { %v4109_v30 = vmul.f32 %v7126_v31, %v4101_v3  ;;  %v14131_v3 = vld [vmem:[#allocation39_spill] sm:$0xff]  ;;  %v14133_v31 = vld [vmem:[#allocation41_spill] sm:$0xff] }
 0xc59   :  { %v4108_v4 = vmul.f32 %v4106_v1, %v4102_v36  ;;  %v4103_v10 = vadd.f32 0.5, %v4100_v20  ;;  %v14134_v36 = vld [vmem:[#allocation42_spill] sm:$0xff]  ;;  %v14135_v1 = vld [vmem:[#allocation43_spill] sm:$0xff] }
 0xc5a   :  { %v14139_v20 = vld [vmem:[#allocation47_spill] sm:$0xff] }
 0xc5b   :  { %v11076_v63 = vadd.f32 %v4109_v30, %v4108_v4  ;;  %v14136_v30 = vld [vmem:[#allocation44_spill] sm:$0xff]  ;;  %v14137_v4 = vld [vmem:[#allocation45_spill] sm:$0xff] }
 0xc5d   :  { %7129 = vtanh.f32 %v11076_v63 }
 0xc67   :  { %v7130_v7 = vpop.eup %7129 }
 0xc68   :  { %v4112_v12 = vmul.f32 %v7130_v7, %v4103_v10  ;;  %v14140_v10 = vld [vmem:[#allocation48_spill] sm:$0xff]  ;;  %v14141_v7 = vld [vmem:[#allocation49_spill] sm:$0xff] }
 0xc6a   :  { %v4116_v24 = vpack.c.bf16 %v4112_v12, %v4112_v12  ;;  %v14142_v12 = vld [vmem:[#allocation50_spill] sm:$0xff] }
 0xc6c   :  { %v4120_v60 = vrot.slane %v4116_v24, 3  ;;  %v14143_v24 = vld [vmem:[#allocation51_spill] sm:$0xff] }
 0xc6e   :  { %4157 = vmatmul.mubr.bf16.vlgmr.msra.gmra.mrb[68].mxu0 %v4120_v60  ;;  %4198 = vmatmul.mubr.bf16.vlgmr.msra.gmra.mrb[64].mxu1 %v4120_v60 }
 0xc6f   :  { %4225 = vmatpush1.bf16.msra.mxu0 %v10384_v14  ;;  %4266 = vmatpush1.bf16.msra.mxu1 %v10390_v47  ;;  %v14102_v14 = vld [vmem:[#allocation14_spill] sm:$0xff]  ;;  %v14103_v47 = vld [vmem:[#allocation15_spill] sm:$0xff] }
 0xc70   :  { %4226 = vmatprep.subr.bf16.mxu0 %v10396_v27  ;;  %4267 = vmatprep.subr.bf16.mxu1 %v10402_v8  ;;  %v14104_v27 = vld [vmem:[#allocation16_spill] sm:$0xff]  ;;  %v14105_v8 = vld [vmem:[#allocation17_spill] sm:$0xff] }
 0xc71   :  { %4256 = vmatprep.mubr.bf16.mxu0 %v13932_v54  ;;  %4297 = vmatprep.mubr.bf16.mxu1 %v13932_v54 }
 0xc73   :  { %4227 = vmatpush1.bf16.msra.mxu0 %v10410_v2  ;;  %4268 = vmatpush1.bf16.msra.mxu1 %v10416_v11  ;;  %v14106_v2 = vld [vmem:[#allocation18_spill] sm:$0xff]  ;;  %v14107_v11 = vld [vmem:[#allocation19_spill] sm:$0xff] }
 0xc74   :  { %4228 = vmatprep.subr.bf16.mxu0 %v10422_v13  ;;  %4269 = vmatprep.subr.bf16.mxu1 %v10428_v56  ;;  %v14108_v13 = vld [vmem:[#allocation20_spill] sm:$0xff]  ;;  %v14109_v56 = vld [vmem:[#allocation3_spill] sm:$0xff] }
 0xc77   :  { %4229 = vmatpush1.bf16.msra.mxu0 %v10434_v22  ;;  %4270 = vmatpush1.bf16.msra.mxu1 %v10440_v37  ;;  %v14110_v22 = vld [vmem:[#allocation5_spill] sm:$0xff]  ;;  %v14111_v37 = vld [vmem:[#allocation6_spill] sm:$0xff] }
 0xc78   :  { %4230 = vmatprep.subr.bf16.mxu0 %v10446_v34  ;;  %4271 = vmatprep.subr.bf16.mxu1 %v10452_v53  ;;  %v14112_v34 = vld [vmem:[#allocation4_spill] sm:$0xff]  ;;  %v14113_v53 = vld [vmem:[#allocation21_spill] sm:$0xff] }
 0xc7b   :  { %4231 = vmatpush1.bf16.msra.mxu0 %v10458_v0  ;;  %4272 = vmatpush1.bf16.msra.mxu1 %v10464_v44  ;;  %v14114_v0 = vld [vmem:[#allocation22_spill] sm:$0xff]  ;;  %v14115_v44 = vld [vmem:[#allocation23_spill] sm:$0xff] }
 0xc7c   :  { %4232 = vmatprep.subr.bf16.mxu0 %v10470_v43  ;;  %4273 = vmatprep.subr.bf16.mxu1 %v10476_v45  ;;  %v14116_v43 = vld [vmem:[#allocation24_spill] sm:$0xff]  ;;  %v14117_v45 = vld [vmem:[#allocation25_spill] sm:$0xff] }
 0xc7f   :  { %4233 = vmatpush1.bf16.msra.mxu0 %v10482_v16  ;;  %4274 = vmatpush1.bf16.msra.mxu1 %v10488_v6  ;;  %v14118_v16 = vld [vmem:[#allocation26_spill] sm:$0xff]  ;;  %v14119_v6 = vld [vmem:[#allocation27_spill] sm:$0xff] }
 0xc80   :  { %4234 = vmatprep.subr.bf16.mxu0 %v10608_v52  ;;  %4275 = vmatprep.subr.bf16.mxu1 %v10614_v9 }
 0xc83   :  { %4235 = vmatpush1.bf16.msra.mxu0 %v10620_v59  ;;  %4276 = vmatpush1.bf16.msra.mxu1 %v10626_v49 }
 0xc84   :  { %4236 = vmatprep.subr.bf16.mxu0 %v10632_v33  ;;  %4277 = vmatprep.subr.bf16.mxu1 %v10638_v26 }
 0xc87   :  { %4237 = vmatpush1.bf16.msra.mxu0 %v10644_v28  ;;  %4278 = vmatpush1.bf16.msra.mxu1 %v10650_v50 }
 0xc88   :  { %4238 = vmatprep.subr.bf16.mxu0 %v10656_v42  ;;  %4279 = vmatprep.subr.bf16.mxu1 %v10662_v48 }
 0xc8b   :  { %4239 = vmatpush1.bf16.msra.mxu0 %v10668_v15  ;;  %4280 = vmatpush1.bf16.msra.mxu1 %v10674_v61 }
 0xc8c   :  { %4333 = vmatprep.subr.bf16.mxu0 %v10680_v23  ;;  %4374 = vmatprep.subr.bf16.mxu1 %v10686_v21 }
 0xc8e   :  { %4257 = vmatmul.mubr.bf16.vlgmr.msra.gmra.mrb[72].mxu0 %v4120_v60  ;;  %4298 = vmatmul.mubr.bf16.vlgmr.msra.gmra.mrb[68].mxu1 %v4120_v60  ;;  %v14144_v60 = vld [vmem:[#allocation52_spill] sm:$0xff] }
 0xc8f   :  { %4334 = vmatpush1.bf16.msra.mxu0 %v10692_v38  ;;  %4375 = vmatpush1.bf16.msra.mxu1 %v10698_v51 }
 0xc90   :  { %4335 = vmatprep.subr.bf16.mxu0 %v10704_v35  ;;  %4376 = vmatprep.subr.bf16.mxu1 %v10710_v5 }
 0xc93   :  { %4336 = vmatpush1.bf16.msra.mxu0 %v14102_v14  ;;  %4377 = vmatpush1.bf16.msra.mxu1 %v14103_v47 }
 0xc94   :  { %4337 = vmatprep.subr.bf16.mxu0 %v14104_v27  ;;  %4378 = vmatprep.subr.bf16.mxu1 %v14105_v8 }
 0xc97   :  { %4338 = vmatpush1.bf16.msra.mxu0 %v14106_v2  ;;  %4379 = vmatpush1.bf16.msra.mxu1 %v14107_v11 }
 0xc98   :  { %4339 = vmatprep.subr.bf16.mxu0 %v14108_v13  ;;  %4380 = vmatprep.subr.bf16.mxu1 %v14109_v56 }
 0xc9b   :  { %4340 = vmatpush1.bf16.msra.mxu0 %v14110_v22  ;;  %4381 = vmatpush1.bf16.msra.mxu1 %v14111_v37 }
 0xc9c   :  { %4341 = vmatprep.subr.bf16.mxu0 %v14112_v34  ;;  %4382 = vmatprep.subr.bf16.mxu1 %v14113_v53 }
 0xc9f   :  { %4342 = vmatpush1.bf16.msra.mxu0 %v14114_v0  ;;  %4383 = vmatpush1.bf16.msra.mxu1 %v14115_v44 }
 0xca0   :  { %4343 = vmatprep.subr.bf16.mxu0 %v14116_v43  ;;  %4384 = vmatprep.subr.bf16.mxu1 %v14117_v45 }
 0xca3   :  { %4344 = vmatpush1.bf16.msra.mxu0 %v14118_v16  ;;  %4385 = vmatpush1.bf16.msra.mxu1 %v14119_v6 }
 0xca4   :  { %4345 = vmatprep.subr.bf16.mxu0 %v14120_v29  ;;  %4386 = vmatprep.subr.bf16.mxu1 %v14121_v18 }
 0xca7   :  { %4346 = vmatpush1.bf16.msra.mxu0 %v14122_v32  ;;  %4387 = vmatpush1.bf16.msra.mxu1 %v14123_v62 }
 0xca8   :  { %4347 = vmatprep.subr.bf16.mxu0 %v14124_v46  ;;  %4388 = vmatprep.subr.bf16.mxu1 %v14125_v58 }
 0xcab   :  { %4348 = vmatpush1.bf16.msra.mxu0 %v14126_v57  ;;  %4389 = vmatpush1.bf16.msra.mxu1 %v14127_v41 }
 0xcac   :  { %4349 = vmatprep.subr.bf16.mxu0 %v14128_v40  ;;  %4390 = vmatprep.subr.bf16.mxu1 %v14129_v25 }
 0xcaf   :  { %4350 = vmatpush1.bf16.msra.mxu0 %v14130_v55  ;;  %4391 = vmatpush1.bf16.msra.mxu1 %v14131_v3  ;;  %v14163_v55 = vld [vmem:[#allocation11_spill] sm:$0xff] }
 0xcb0   :  { %4351 = vmatprep.subr.bf16.mxu0 %v14132_v39  ;;  %4392 = vmatprep.subr.bf16.mxu1 %v14133_v31 }
 0xcb3   :  { %4352 = vmatpush1.bf16.msra.mxu0 %v14134_v36  ;;  %4393 = vmatpush1.bf16.msra.mxu1 %v14135_v1  ;;  %v14145_v36 = vld [vmem:[#allocation53_spill] sm:$0xff]  ;;  %v14146_v1 = vld [vmem:[#allocation54_spill] sm:$0xff] }
 0xcb4   :  { %4353 = vmatprep.subr.bf16.mxu0 %v14136_v30  ;;  %4394 = vmatprep.subr.bf16.mxu1 %v14137_v4  ;;  %v14147_v30 = vld [vmem:[#allocation55_spill] sm:$0xff]  ;;  %v14148_v4 = vld [vmem:[#allocation56_spill] sm:$0xff] }
 0xcb7   :  { %4354 = vmatpush1.bf16.msra.mxu0 %v14138_v19  ;;  %4395 = vmatpush1.bf16.msra.mxu1 %v14139_v20  ;;  %v14149_v19 = vld [vmem:[#allocation57_spill] sm:$0xff]  ;;  %v14150_v20 = vld [vmem:[#allocation58_spill] sm:$0xff] }
 0xcb8   :  { %4355 = vmatprep.subr.bf16.mxu0 %v14140_v10  ;;  %4396 = vmatprep.subr.bf16.mxu1 %v14141_v7  ;;  %v14151_v10 = vld [vmem:[#allocation59_spill] sm:$0xff] }
 0xcb9   :  { %v14152_v7 = vld [vmem:[#allocation7_spill] sm:$0xff] }
 0xcbb   :  { %4356 = vmatpush1.bf16.msra.mxu0 %v14142_v12  ;;  %4397 = vmatpush1.bf16.msra.mxu1 %v14143_v24  ;;  %v14153_v12 = vld [vmem:[#allocation8_spill] sm:$0xff]  ;;  %v14154_v24 = vld [vmem:[#allocation13_spill] sm:$0xff] }
 0xcbc   :  { %4357 = vmatprep.subr.bf16.mxu0 %v14144_v60  ;;  %4398 = vmatprep.subr.bf16.mxu1 %v14145_v36  ;;  %v14155_v60 = vld [vmem:[#allocation72_spill] sm:$0xff]  ;;  %v14156_v36 = vld [vmem:[#allocation73_spill] sm:$0xff] }
 0xcbf   :  { %4358 = vmatpush1.bf16.msra.mxu0 %v14146_v1  ;;  %4399 = vmatpush1.bf16.msra.mxu1 %v14147_v30  ;;  %v14157_v1 = vld [vmem:[#allocation74_spill] sm:$0xff]  ;;  %v14158_v30 = vld [vmem:[#allocation75_spill] sm:$0xff] }
 0xcc0   :  { %4359 = vmatprep.subr.bf16.mxu0 %v14148_v4  ;;  %4400 = vmatprep.subr.bf16.mxu1 %v14149_v19  ;;  %v14159_v4 = vld [vmem:[#allocation76_spill] sm:$0xff] }
 0xcc3   :  { %4360 = vmatpush1.bf16.msra.mxu0 %v14150_v20  ;;  %4401 = vmatpush1.bf16.msra.mxu1 %v14151_v10  ;;  %v11178_v10 = vld [vmem:[%s13338_s12 + $0x4] ss:$16 sps:$4 sm:$0xff]  }
 0xcc4   :  { %4361 = vmatprep.subr.bf16.mxu0 %v14152_v7  ;;  %4402 = vmatprep.subr.bf16.mxu1 %v14153_v12  ;;  %14160 = vst [vmem:[#allocation14_spill] sm:$0xff] %v11178_v10 }
 0xcc7   :  { %4362 = vmatpush1.bf16.msra.mxu0 %v14154_v24  ;;  %4403 = vmatpush1.bf16.msra.mxu1 %v14155_v60  ;;  %v11184_v24 = vld [vmem:[%s13338_s12 + $0xc] ss:$16 sps:$4 sm:$0xff]   ;;  %v14162_v60 = vld [vmem:[#allocation9_spill] sm:$0xff] }
 0xcc8   :  { %4363 = vmatprep.subr.bf16.mxu0 %v14156_v36  ;;  %4404 = vmatprep.subr.bf16.mxu1 %v14157_v1  ;;  %14161 = vst [vmem:[#allocation15_spill] sm:$0xff] %v11184_v24 }
 0xccb   :  { %4364 = vmatpush1.bf16.msra.mxu0 %v14158_v30  ;;  %4405 = vmatpush1.bf16.msra.mxu1 %v14159_v4 }
 0xccc   :  { %4433 = vmatprep.subr.bf16.mxu0 %v11178_v10  ;;  %4474 = vmatprep.subr.bf16.mxu1 %v11184_v24  ;;  %v14164_v24 = vld [vmem:[#allocation12_spill] sm:$0xff] }
 0xd41   :  { %v4158_v36 = vpop.f32.mrb[68].mxu0  ;;  %v4199_v1 = vpop.f32.mrb[64].mxu1 }
 0xd42   :  { %v4159_v30 = vadd.f32 %v4158_v36, %v14162_v60  ;;  %v4160_v12 = vpop.f32.mrb[69].mxu0  ;;  %v4201_v4 = vpop.f32.mrb[65].mxu1  ;;  %v4200_v40 = vadd.f32 %v4199_v1, %v14164_v24 }
 0xd43   :  { %v4161_v7 = vadd.f32 %v4160_v12, %v14039_v17  ;;  %v4162_v20 = vpop.f32.mrb[70].mxu0  ;;  %v4203_v19 = vpop.f32.mrb[66].mxu1  ;;  %v4202_v25 = vadd.f32 %v4201_v4, %v14163_v55 }
 0xd44   :  { %v4206_v31 = vmul.f32 0.5, %v4159_v30  ;;  %v4163_v39 = vpop.f32.mrb[71].mxu0  ;;  %v4204_v10 = vpop.f32.mrb[67].mxu1  ;;  %v4208_v41 = vmul.f32 0.5, %v4200_v40  ;;  %v14167_v40 = vld [vmem:[#allocation60_spill] sm:$0xff] }
 0xd45   :  { %v4207_v3 = vmul.f32 0.5, %v4161_v7  ;;  %v14165_v39 = vld [vmem:[#allocation77_spill] sm:$0xff] }
 0xd46   :  { %7131 = vtanh.f32 %v4206_v31 }
 0xd47   :  { %7133 = vtanh.f32 %v4207_v3 }
 0xd48   :  { %7135 = vtanh.f32 %v4202_v25 }
 0xd49   :  { %7137 = vtanh.f32 %v4208_v41 }
 0xd50   :  { %v7132_v57 = vpop.eup %7131 }
 0xd51   :  { %v4212_v36 = vmul.f32 0.5, %v7132_v57  ;;  %v7134_v60 = vpop.eup %7133 }
 0xd52   :  { %v4213_v12 = vmul.f32 0.5, %v7134_v60  ;;  %v7136_v20 = vpop.eup %7135 }
 0xd53   :  { %v4215_v58 = vadd.f32 0.5, %v4212_v36  ;;  %v7138_v3 = vpop.eup %7137  ;;  %v14168_v36 = vld [vmem:[#allocation62_spill] sm:$0xff] }
 0xd54   :  { %v4216_v19 = vadd.f32 0.5, %v4213_v12  ;;  %v4214_v25 = vmul.f32 0.5, %v7138_v3 }
 0xd55   :  { %v4220_v30 = vmul.f32 %v7136_v20, %v4215_v58 }
 0xd56   :  { %v4219_v10 = vmul.f32 %v4216_v19, %v14165_v39  ;;  %v4217_v12 = vadd.f32 0.5, %v4214_v25 }
 0xd58   :  { %v11192_v7 = vadd.f32 %v4220_v30, %v4219_v10  ;;  %v14169_v10 = vld [vmem:[#allocation63_spill] sm:$0xff] }
 0xd5a   :  { %14166 = vst [vmem:[#allocation16_spill] sm:$0xff] %v11192_v7  ;;  %7139 = vtanh.f32 %v11192_v7 }
 0xd61   :  { %v4258_v31 = vpop.f32.mrb[72].mxu0  ;;  %v4299_v1 = vpop.f32.mrb[68].mxu1 }
 0xd62   :  { %v4306_v4 = vadd.f32 %v4258_v31, %v14167_v40  ;;  %v4260_v57 = vpop.f32.mrb[73].mxu0  ;;  %v4301_v24 = vpop.f32.mrb[69].mxu1  ;;  %v14170_v31 = vld [vmem:[#allocation61_spill] sm:$0xff] }
 0xd63   :  { %v4307_v41 = vadd.f32 %v4260_v57, %v14168_v36  ;;  %v4262_v60 = vpop.f32.mrb[74].mxu0  ;;  %v4303_v55 = vpop.f32.mrb[70].mxu1  ;;  %v4309_v7 = vadd.f32 %v4301_v24, %v14169_v10  ;;  %v4308_v40 = vadd.f32 %v4299_v1, %v14170_v31 }
 0xd64   :  { %v4310_v58 = vmul.f32 0.5, %v4306_v4  ;;  %v4263_v20 = vpop.f32.mrb[75].mxu0  ;;  %v4304_v19 = vpop.f32.mrb[71].mxu1 }
 0xd65   :  { %v7140_v30 = vpop.eup %7139  ;;  %v4311_v39 = vmul.f32 0.5, %v4307_v41  ;;  %v4312_v57 = vmul.f32 0.5, %v4308_v40 }
 0xd66   :  { %7141 = vtanh.f32 %v4310_v58  ;;  %v4223_v3 = vmul.f32 %v7140_v30, %v4217_v12  ;;  %v4324_v58 = vrot.slane %v11076_v63, 6  ;;  %v11212_v63 = vld [vmem:[%s13338_s12 + $0x8] ss:$16 sps:$4 sm:$0xff]  }
 0xd67   :  { %7143 = vtanh.f32 %v4311_v39 }
 0xd68   :  { %v4332_v17 = vpack.c.bf16 %v4223_v3, %v4223_v3  ;;  %7145 = vtanh.f32 %v4309_v7 }
 0xd69   :  { %7147 = vtanh.f32 %v4312_v57  ;;  %v11206_v57 = vld [vmem:[%s13338_s12] ss:$16 sps:$4 sm:$0xff]  }
 0xd6a   :  { %4365 = vmatprep.mubr.bf16.mxu0 %v4332_v17  ;;  %4406 = vmatprep.mubr.bf16.mxu1 %v4332_v17 }
 0xd70   :  { %v7142_v60 = vpop.eup %7141 }
 0xd71   :  { %v4316_v55 = vmul.f32 0.5, %v7142_v60  ;;  %v7144_v25 = vpop.eup %7143  ;;  %v11218_v60 = vld [vmem:[%s13338_s12 + $0x24] ss:$16 sps:$4 sm:$0xff]  }
 0xd72   :  { %v4317_v20 = vmul.f32 0.5, %v7144_v25  ;;  %v7146_v19 = vpop.eup %7145  ;;  %v11232_v25 = vld [vmem:[%s13338_s12 + $0x20] ss:$16 sps:$4 sm:$0xff]  }
 0xd73   :  { %v4319_v4 = vadd.f32 0.5, %v4316_v55  ;;  %v7148_v17 = vpop.eup %7147  ;;  %v11224_v55 = vld [vmem:[%s13338_s12 + $0x2c] ss:$16 sps:$4 sm:$0xff]  }
 0xd74   :  { %v4320_v41 = vadd.f32 0.5, %v4317_v20  ;;  %v4318_v7 = vmul.f32 0.5, %v7148_v17  ;;  %v11244_v20 = vld [vmem:[%s13338_s12 + $0x44] ss:$16 sps:$4 sm:$0xff]   ;;  %v11280_v17 = vld [vmem:[%s13338_s12 + $0x60] ss:$16 sps:$4 sm:$0xff]  }
 0xd75   :  { %v4327_v24 = vmul.f32 %v7146_v19, %v4319_v4  ;;  %v11238_v4 = vld [vmem:[%s13338_s12 + $0x28] ss:$16 sps:$4 sm:$0xff]   ;;  %v11250_v19 = vld [vmem:[%s13338_s12 + $0x4c] ss:$16 sps:$4 sm:$0xff]  }
 0xd76   :  { %v4326_v12 = vmul.f32 %v4324_v58, %v4320_v41  ;;  %v4321_v1 = vadd.f32 0.5, %v4318_v7  ;;  %v11256_v41 = vld [vmem:[%s13338_s12 + $0x40] ss:$16 sps:$4 sm:$0xff]   ;;  %v11262_v58 = vld [vmem:[%s13338_s12 + $0x48] ss:$16 sps:$4 sm:$0xff]  }
 0xd77   :  { %v11286_v7 = vld [vmem:[%s13338_s12 + $0x68] ss:$16 sps:$4 sm:$0xff]  }
 0xd78   :  { %v11200_v30 = vadd.f32 %v4327_v24, %v4326_v12  ;;  %v11268_v24 = vld [vmem:[%s13338_s12 + $0x64] ss:$16 sps:$4 sm:$0xff]   ;;  %v11274_v12 = vld [vmem:[%s13338_s12 + $0x6c] ss:$16 sps:$4 sm:$0xff]   ;;  %14171 = vst [vmem:[#allocation17_spill] sm:$0xff] %v11286_v7 }
 0xd7a   :  { %7149 = vtanh.f32 %v11200_v30 }
 0xd84   :  { %v7150_v40 = vpop.eup %7149 }
 0xd85   :  { %v4330_v39 = vmul.f32 %v7150_v40, %v4321_v1  ;;  %v11292_v1 = vld [vmem:[%s13338_s12 + $0x84] ss:$16 sps:$4 sm:$0xff]   ;;  %v11298_v40 = vld [vmem:[%s13338_s12 + $0x8c] ss:$16 sps:$4 sm:$0xff]  }
 0xd87   :  { %v4331_v3 = vpack.c.bf16 %v4330_v39, %v4330_v39  ;;  %v11304_v39 = vld [vmem:[%s13338_s12 + $0x80] ss:$16 sps:$4 sm:$0xff]  }
 0xd89   :  { %4366 = vmatmul.mubr.bf16.vlgmr.msra.gmra.mrb[76].mxu0 %v4331_v3  ;;  %4407 = vmatmul.mubr.bf16.vlgmr.msra.gmra.mrb[72].mxu1 %v4331_v3 }
 0xd8a   :  { %4434 = vmatpush1.bf16.msra.mxu0 %v11206_v57  ;;  %4475 = vmatpush1.bf16.msra.mxu1 %v11212_v63 }
 0xd8b   :  { %4435 = vmatprep.subr.bf16.mxu0 %v11218_v60  ;;  %4476 = vmatprep.subr.bf16.mxu1 %v11224_v55 }
 0xd8c   :  { %4465 = vmatprep.mubr.bf16.mxu0 %v13932_v54  ;;  %4506 = vmatprep.mubr.bf16.mxu1 %v13932_v54 }
 0xd8e   :  { %4436 = vmatpush1.bf16.msra.mxu0 %v11232_v25  ;;  %4477 = vmatpush1.bf16.msra.mxu1 %v11238_v4 }
 0xd8f   :  { %4437 = vmatprep.subr.bf16.mxu0 %v11244_v20  ;;  %4478 = vmatprep.subr.bf16.mxu1 %v11250_v19 }
 0xd92   :  { %4438 = vmatpush1.bf16.msra.mxu0 %v11256_v41  ;;  %4479 = vmatpush1.bf16.msra.mxu1 %v11262_v58 }
 0xd93   :  { %4439 = vmatprep.subr.bf16.mxu0 %v11268_v24  ;;  %4480 = vmatprep.subr.bf16.mxu1 %v11274_v12 }
 0xd96   :  { %4440 = vmatpush1.bf16.msra.mxu0 %v11280_v17  ;;  %4481 = vmatpush1.bf16.msra.mxu1 %v11286_v7  ;;  %v11310_v7 = vld [vmem:[%s13338_s12 + $0x88] ss:$16 sps:$4 sm:$0xff]  }
 0xd97   :  { %4441 = vmatprep.subr.bf16.mxu0 %v11292_v1  ;;  %4482 = vmatprep.subr.bf16.mxu1 %v11298_v40 }
 0xd9a   :  { %4442 = vmatpush1.bf16.msra.mxu0 %v11304_v39  ;;  %4483 = vmatpush1.bf16.msra.mxu1 %v11310_v7 }
 0xd9b   :  { %4443 = vmatprep.subr.bf16.mxu0 %v10608_v52  ;;  %4484 = vmatprep.subr.bf16.mxu1 %v10614_v9  ;;  %v14172_v52 = vld [vmem:[#allocation33_spill] sm:$0xff]  ;;  %v14173_v9 = vld [vmem:[#allocation34_spill] sm:$0xff] }
 0xd9e   :  { %4444 = vmatpush1.bf16.msra.mxu0 %v10620_v59  ;;  %4485 = vmatpush1.bf16.msra.mxu1 %v10626_v49  ;;  %v14174_v59 = vld [vmem:[#allocation35_spill] sm:$0xff]  ;;  %v14175_v49 = vld [vmem:[#allocation36_spill] sm:$0xff] }
 0xd9f   :  { %4445 = vmatprep.subr.bf16.mxu0 %v10632_v33  ;;  %4486 = vmatprep.subr.bf16.mxu1 %v10638_v26  ;;  %v14176_v33 = vld [vmem:[#allocation37_spill] sm:$0xff]  ;;  %v14177_v26 = vld [vmem:[#allocation38_spill] sm:$0xff] }
 0xda2   :  { %4446 = vmatpush1.bf16.msra.mxu0 %v10644_v28  ;;  %4487 = vmatpush1.bf16.msra.mxu1 %v10650_v50  ;;  %v14178_v28 = vld [vmem:[#allocation39_spill] sm:$0xff]  ;;  %v14179_v50 = vld [vmem:[#allocation40_spill] sm:$0xff] }
 0xda3   :  { %4447 = vmatprep.subr.bf16.mxu0 %v10656_v42  ;;  %4488 = vmatprep.subr.bf16.mxu1 %v10662_v48  ;;  %v14180_v42 = vld [vmem:[#allocation41_spill] sm:$0xff]  ;;  %v14181_v48 = vld [vmem:[#allocation42_spill] sm:$0xff] }
 0xda6   :  { %4448 = vmatpush1.bf16.msra.mxu0 %v10668_v15  ;;  %4489 = vmatpush1.bf16.msra.mxu1 %v10674_v61  ;;  %v14182_v15 = vld [vmem:[#allocation43_spill] sm:$0xff]  ;;  %v14183_v61 = vld [vmem:[#allocation44_spill] sm:$0xff] }
 0xda7   :  { %4563 = vmatprep.subr.bf16.mxu0 %v10680_v23  ;;  %4604 = vmatprep.subr.bf16.mxu1 %v10686_v21  ;;  %v14184_v23 = vld [vmem:[#allocation45_spill] sm:$0xff]  ;;  %v14185_v21 = vld [vmem:[#allocation46_spill] sm:$0xff] }
 0xda9   :  { %4466 = vmatmul.mubr.bf16.vlgmr.msra.gmra.mrb[80].mxu0 %v4331_v3  ;;  %4507 = vmatmul.mubr.bf16.vlgmr.msra.gmra.mrb[76].mxu1 %v4331_v3 }
 0xdaa   :  { %4564 = vmatpush1.bf16.msra.mxu0 %v10692_v38  ;;  %4605 = vmatpush1.bf16.msra.mxu1 %v10698_v51  ;;  %v14186_v38 = vld [vmem:[#allocation47_spill] sm:$0xff]  ;;  %v14187_v51 = vld [vmem:[#allocation48_spill] sm:$0xff] }
 0xdab   :  { %4565 = vmatprep.subr.bf16.mxu0 %v10704_v35  ;;  %4606 = vmatprep.subr.bf16.mxu1 %v10710_v5  ;;  %v14188_v35 = vld [vmem:[#allocation49_spill] sm:$0xff]  ;;  %v14189_v5 = vld [vmem:[#allocation50_spill] sm:$0xff] }
 0xdae   :  { %4566 = vmatpush1.bf16.msra.mxu0 %v14102_v14  ;;  %4607 = vmatpush1.bf16.msra.mxu1 %v14103_v47  ;;  %v14190_v14 = vld [vmem:[#allocation51_spill] sm:$0xff]  ;;  %v14191_v47 = vld [vmem:[#allocation52_spill] sm:$0xff] }
 0xdaf   :  { %4567 = vmatprep.subr.bf16.mxu0 %v14104_v27  ;;  %4608 = vmatprep.subr.bf16.mxu1 %v14105_v8  ;;  %v14192_v27 = vld [vmem:[#allocation53_spill] sm:$0xff]  ;;  %v14193_v8 = vld [vmem:[#allocation54_spill] sm:$0xff] }
 0xdb2   :  { %4568 = vmatpush1.bf16.msra.mxu0 %v14106_v2  ;;  %4609 = vmatpush1.bf16.msra.mxu1 %v14107_v11  ;;  %v14194_v2 = vld [vmem:[#allocation55_spill] sm:$0xff]  ;;  %v14195_v11 = vld [vmem:[#allocation56_spill] sm:$0xff] }
 0xdb3   :  { %4569 = vmatprep.subr.bf16.mxu0 %v14108_v13  ;;  %4610 = vmatprep.subr.bf16.mxu1 %v14109_v56  ;;  %v14196_v13 = vld [vmem:[#allocation57_spill] sm:$0xff]  ;;  %v14197_v56 = vld [vmem:[#allocation58_spill] sm:$0xff] }
 0xdb6   :  { %4570 = vmatpush1.bf16.msra.mxu0 %v14110_v22  ;;  %4611 = vmatpush1.bf16.msra.mxu1 %v14111_v37  ;;  %v14198_v22 = vld [vmem:[#allocation59_spill] sm:$0xff] }
 0xdb7   :  { %4571 = vmatprep.subr.bf16.mxu0 %v14112_v34  ;;  %4612 = vmatprep.subr.bf16.mxu1 %v14113_v53  ;;  %v14199_v37 = vld [vmem:[#allocation7_spill] sm:$0xff]  ;;  %v14200_v34 = vld [vmem:[#allocation8_spill] sm:$0xff]  ;;  %v14201_v53 = vld [vmem:[#allocation13_spill] sm:$0xff] }
 0xdba   :  { %4572 = vmatpush1.bf16.msra.mxu0 %v14114_v0  ;;  %4613 = vmatpush1.bf16.msra.mxu1 %v14115_v44  ;;  %v14202_v0 = vld [vmem:[#allocation72_spill] sm:$0xff]  ;;  %v14203_v44 = vld [vmem:[#allocation73_spill] sm:$0xff] }
 0xdbb   :  { %4573 = vmatprep.subr.bf16.mxu0 %v14116_v43  ;;  %4614 = vmatprep.subr.bf16.mxu1 %v14117_v45  ;;  %v14204_v43 = vld [vmem:[#allocation74_spill] sm:$0xff]  ;;  %v14205_v45 = vld [vmem:[#allocation75_spill] sm:$0xff] }
 0xdbe   :  { %4574 = vmatpush1.bf16.msra.mxu0 %v14118_v16  ;;  %4615 = vmatpush1.bf16.msra.mxu1 %v14119_v6  ;;  %v14206_v16 = vld [vmem:[#allocation76_spill] sm:$0xff]  ;;  %v14207_v6 = vld [vmem:[#allocation14_spill] sm:$0xff] }
 0xdbf   :  { %4575 = vmatprep.subr.bf16.mxu0 %v14120_v29  ;;  %4616 = vmatprep.subr.bf16.mxu1 %v14121_v18  ;;  %v14208_v29 = vld [vmem:[#allocation15_spill] sm:$0xff] }
 0xdc2   :  { %4576 = vmatpush1.bf16.msra.mxu0 %v14122_v32  ;;  %4617 = vmatpush1.bf16.msra.mxu1 %v14123_v62  ;;  %v14209_v62 = vld [vmem:[#allocation9_spill] sm:$0xff] }
 0xdc3   :  { %4577 = vmatprep.subr.bf16.mxu0 %v14124_v46  ;;  %4618 = vmatprep.subr.bf16.mxu1 %v14172_v52 }
 0xdc6   :  { %4578 = vmatpush1.bf16.msra.mxu0 %v14173_v9  ;;  %4619 = vmatpush1.bf16.msra.mxu1 %v14174_v59  ;;  %v14210_v9 = vld [vmem:[#allocation10_spill] sm:$0xff] }
 0xdc7   :  { %4579 = vmatprep.subr.bf16.mxu0 %v14175_v49  ;;  %4620 = vmatprep.subr.bf16.mxu1 %v14176_v33 }
 0xdca   :  { %4580 = vmatpush1.bf16.msra.mxu0 %v14177_v26  ;;  %4621 = vmatpush1.bf16.msra.mxu1 %v14178_v28 }
 0xdcb   :  { %4581 = vmatprep.subr.bf16.mxu0 %v14179_v50  ;;  %4622 = vmatprep.subr.bf16.mxu1 %v14180_v42 }
 0xdce   :  { %4582 = vmatpush1.bf16.msra.mxu0 %v14181_v48  ;;  %4623 = vmatpush1.bf16.msra.mxu1 %v14182_v15  ;;  %v14211_v48 = vld [vmem:[#allocation11_spill] sm:$0xff] }
 0xdcf   :  { %4583 = vmatprep.subr.bf16.mxu0 %v14183_v61  ;;  %4624 = vmatprep.subr.bf16.mxu1 %v14184_v23  ;;  %v14212_v61 = vld [vmem:[#allocation12_spill] sm:$0xff] }
 0xdd2   :  { %4584 = vmatpush1.bf16.msra.mxu0 %v14185_v21  ;;  %4625 = vmatpush1.bf16.msra.mxu1 %v14186_v38 }
 0xdd3   :  { %4585 = vmatprep.subr.bf16.mxu0 %v14187_v51  ;;  %4626 = vmatprep.subr.bf16.mxu1 %v14188_v35 }
 0xdd6   :  { %4586 = vmatpush1.bf16.msra.mxu0 %v14189_v5  ;;  %4627 = vmatpush1.bf16.msra.mxu1 %v14190_v14 }
 0xdd7   :  { %4587 = vmatprep.subr.bf16.mxu0 %v14191_v47  ;;  %4628 = vmatprep.subr.bf16.mxu1 %v14192_v27 }
 0xdda   :  { %4588 = vmatpush1.bf16.msra.mxu0 %v14193_v8  ;;  %4629 = vmatpush1.bf16.msra.mxu1 %v14194_v2  ;;  %v14213_v2 = vld [vmem:[#allocation16_spill] sm:$0xff] }
 0xddb   :  { %4589 = vmatprep.subr.bf16.mxu0 %v14195_v11  ;;  %4630 = vmatprep.subr.bf16.mxu1 %v14196_v13 }
 0xdde   :  { %4590 = vmatpush1.bf16.msra.mxu0 %v14197_v56  ;;  %4631 = vmatpush1.bf16.msra.mxu1 %v14198_v22 }
 0xddf   :  { %4591 = vmatprep.subr.bf16.mxu0 %v14199_v37  ;;  %4632 = vmatprep.subr.bf16.mxu1 %v14200_v34 }
 0xde2   :  { %4592 = vmatpush1.bf16.msra.mxu0 %v14201_v53  ;;  %4633 = vmatpush1.bf16.msra.mxu1 %v14202_v0 }
 0xde3   :  { %4593 = vmatprep.subr.bf16.mxu0 %v14203_v44  ;;  %4634 = vmatprep.subr.bf16.mxu1 %v14204_v43 }
 0xde6   :  { %4594 = vmatpush1.bf16.msra.mxu0 %v14205_v45  ;;  %4635 = vmatpush1.bf16.msra.mxu1 %v14206_v16 }
 0xde7   :  { %4663 = vmatprep.subr.bf16.mxu0 %v14207_v6  ;;  %4704 = vmatprep.subr.bf16.mxu1 %v14208_v29 }
 0xe5c   :  { %v4367_v18 = vpop.f32.mrb[76].mxu0  ;;  %v4408_v32 = vpop.f32.mrb[72].mxu1 }
 0xe5d   :  { %v4368_v46 = vadd.f32 %v4367_v18, %v14209_v62  ;;  %v4369_v3 = vpop.f32.mrb[77].mxu0  ;;  %v4410_v52 = vpop.f32.mrb[73].mxu1  ;;  %v4409_v23 = vadd.f32 %v4408_v32, %v14212_v61  ;;  %v14214_v32 = vld [vmem:[#allocation60_spill] sm:$0xff] }
 0xe5e   :  { %v4370_v59 = vadd.f32 %v4369_v3, %v14210_v9  ;;  %v4371_v49 = vpop.f32.mrb[78].mxu0  ;;  %v4412_v33 = vpop.f32.mrb[74].mxu1  ;;  %v4411_v15 = vadd.f32 %v4410_v52, %v14211_v48 }
 0xe5f   :  { %v4415_v26 = vmul.f32 0.5, %v4368_v46  ;;  %v4372_v28 = vpop.f32.mrb[79].mxu0  ;;  %v4413_v50 = vpop.f32.mrb[75].mxu1  ;;  %v4417_v21 = vmul.f32 0.5, %v4409_v23 }
 0xe60   :  { %v4416_v42 = vmul.f32 0.5, %v4370_v59 }
 0xe61   :  { %7151 = vtanh.f32 %v4415_v26 }
 0xe62   :  { %7153 = vtanh.f32 %v4416_v42 }
 0xe63   :  { %7155 = vtanh.f32 %v4411_v15 }
 0xe64   :  { %7157 = vtanh.f32 %v4417_v21 }
 0xe6b   :  { %v7152_v38 = vpop.eup %7151 }
 0xe6c   :  { %v4421_v51 = vmul.f32 0.5, %v7152_v38  ;;  %v7154_v35 = vpop.eup %7153 }
 0xe6d   :  { %v4422_v14 = vmul.f32 0.5, %v7154_v35  ;;  %v7156_v47 = vpop.eup %7155 }
 0xe6e   :  { %v4424_v5 = vadd.f32 0.5, %v4421_v51  ;;  %v7158_v56 = vpop.eup %7157 }
 0xe6f   :  { %v4425_v27 = vadd.f32 0.5, %v4422_v14  ;;  %v4423_v22 = vmul.f32 0.5, %v7158_v56  ;;  %v4545_v56 = vrot.slane %v11200_v30, 6  ;;  %v14215_v30 = vld [vmem:[#allocation17_spill] sm:$0xff] }
 0xe70   :  { %v4429_v8 = vmul.f32 %v7156_v47, %v4424_v5 }
 0xe71   :  { %v4428_v11 = vmul.f32 %v4425_v27, %v14213_v2  ;;  %v4426_v18 = vadd.f32 0.5, %v4423_v22 }
 0xe73   :  { %v11396_v13 = vadd.f32 %v4429_v8, %v4428_v11 }
 0xe75   :  { %7159 = vtanh.f32 %v11396_v13 }
 0xe7c   :  { %v4467_v37 = vpop.f32.mrb[80].mxu0  ;;  %v4508_v34 = vpop.f32.mrb[76].mxu1 }
 0xe7d   :  { %v4519_v53 = vrot.slane %v4467_v37, 6  ;;  %v4469_v0 = vpop.f32.mrb[81].mxu0  ;;  %v4510_v44 = vpop.f32.mrb[77].mxu1  ;;  %v4521_v23 = vrot.slane %v4508_v34, 6 }
 0xe7e   :  { %v4520_v43 = vrot.slane %v4469_v0, 6  ;;  %v4471_v45 = vpop.f32.mrb[82].mxu0  ;;  %v4512_v16 = vpop.f32.mrb[78].mxu1  ;;  %v4522_v3 = vrot.slane %v4510_v44, 6 }
 0xe7f   :  { %v4527_v46 = vadd.f32 %v4519_v53, %v14214_v32  ;;  %v4472_v52 = vpop.f32.mrb[83].mxu0  ;;  %v4513_v59 = vpop.f32.mrb[79].mxu1  ;;  %v4529_v51 = vadd.f32 %v4521_v23, %v14170_v31  ;;  %v11496_v23 = vld [vmem:[%s13338_s12 + $0xe8] ss:$16 sps:$4 sm:$0xff]  }
 0xe80   :  { %v7160_v49 = vpop.eup %7159  ;;  %v4528_v33 = vadd.f32 %v4520_v43, %v14168_v36  ;;  %v4530_v42 = vadd.f32 %v4522_v3, %v14169_v10  ;;  %v11436_v3 = vld [vmem:[%s13338_s12 + $0xac] ss:$16 sps:$4 sm:$0xff]   ;;  %v11442_v52 = vld [vmem:[%s13338_s12 + $0xa0] ss:$16 sps:$4 sm:$0xff]   ;;  %v11448_v59 = vld [vmem:[%s13338_s12 + $0xa8] ss:$16 sps:$4 sm:$0xff]  }
 0xe81   :  { %v4531_v26 = vmul.f32 0.5, %v4527_v46  ;;  %v4432_v28 = vmul.f32 %v7160_v49, %v4426_v18  ;;  %v4533_v35 = vmul.f32 0.5, %v4529_v51  ;;  %v11430_v46 = vld [vmem:[%s13338_s12 + $0xa4] ss:$16 sps:$4 sm:$0xff]   ;;  %v11514_v51 = vld [vmem:[%s13339_s13] ss:$16 sps:$4 sm:$0xff]  }
 0xe82   :  { %v4532_v50 = vmul.f32 0.5, %v4528_v33  ;;  %v11454_v49 = vld [vmem:[%s13338_s12 + $0xc4] ss:$16 sps:$4 sm:$0xff]   ;;  %v11460_v33 = vld [vmem:[%s13338_s12 + $0xcc] ss:$16 sps:$4 sm:$0xff]  }
 0xe83   :  { %7161 = vtanh.f32 %v4531_v26  ;;  %v4553_v15 = vrot.slane %v4432_v28, 6  ;;  %v11466_v26 = vld [vmem:[%s13338_s12 + $0xc0] ss:$16 sps:$4 sm:$0xff]   ;;  %v11472_v28 = vld [vmem:[%s13338_s12 + $0xc8] ss:$16 sps:$4 sm:$0xff]  }
 0xe84   :  { %7163 = vtanh.f32 %v4532_v50  ;;  %v11478_v50 = vld [vmem:[%s13338_s12 + $0xe4] ss:$16 sps:$4 sm:$0xff]  }
 0xe85   :  { %v4556_v21 = vpack.c.bf16 %v4553_v15, %v4553_v15  ;;  %7165 = vtanh.f32 %v4530_v42  ;;  %v11484_v42 = vld [vmem:[%s13338_s12 + $0xec] ss:$16 sps:$4 sm:$0xff]   ;;  %v11490_v15 = vld [vmem:[%s13338_s12 + $0xe0] ss:$16 sps:$4 sm:$0xff]  }
 0xe86   :  { %7167 = vtanh.f32 %v4533_v35  ;;  %v11520_v35 = vld [vmem:[%s13339_s13 + $0x8] ss:$16 sps:$4 sm:$0xff]  }
 0xe87   :  { %v4560_v38 = vrot.slane %v4556_v21, 1  ;;  %v11502_v21 = vld [vmem:[%s13339_s13 + $0x4] ss:$16 sps:$4 sm:$0xff]  }
 0xe89   :  { %4595 = vmatprep.mubr.bf16.mxu0 %v4560_v38  ;;  %4636 = vmatprep.mubr.bf16.mxu1 %v4560_v38  ;;  %v11508_v38 = vld [vmem:[%s13339_s13 + $0xc] ss:$16 sps:$4 sm:$0xff]  }
 0xe8d   :  { %v7162_v5 = vpop.eup %7161 }
 0xe8e   :  { %v4537_v14 = vmul.f32 0.5, %v7162_v5  ;;  %v7164_v47 = vpop.eup %7163  ;;  %v11526_v5 = vld [vmem:[%s13339_s13 + $0x24] ss:$16 sps:$4 sm:$0xff]  }
 0xe8f   :  { %v4538_v8 = vmul.f32 0.5, %v7164_v47  ;;  %v7166_v2 = vpop.eup %7165  ;;  %v11538_v47 = vld [vmem:[%s13339_s13 + $0x20] ss:$16 sps:$4 sm:$0xff]  }
 0xe90   :  { %v4540_v27 = vadd.f32 0.5, %v4537_v14  ;;  %v7168_v53 = vpop.eup %7167  ;;  %v11532_v14 = vld [vmem:[%s13339_s13 + $0x2c] ss:$16 sps:$4 sm:$0xff]   ;;  %14216 = vst [vmem:[#allocation18_spill] sm:$0xff] %v11538_v47 }
 0xe91   :  { %v4541_v11 = vadd.f32 0.5, %v4538_v8  ;;  %v4539_v0 = vmul.f32 0.5, %v7168_v53  ;;  %v11550_v8 = vld [vmem:[%s13339_s13 + $0x44] ss:$16 sps:$4 sm:$0xff]   ;;  %v11586_v53 = vld [vmem:[%s13339_s13 + $0x60] ss:$16 sps:$4 sm:$0xff]  }
 0xe92   :  { %v4548_v22 = vmul.f32 %v7166_v2, %v4540_v27  ;;  %v11544_v27 = vld [vmem:[%s13339_s13 + $0x28] ss:$16 sps:$4 sm:$0xff]   ;;  %14218 = vst [vmem:[#allocation20_spill] sm:$0xff] %v11550_v8  ;;  %v11556_v2 = vld [vmem:[%s13339_s13 + $0x4c] ss:$16 sps:$4 sm:$0xff]   ;;  %14224 = vst [vmem:[#allocation22_spill] sm:$0xff] %v11586_v53 }
 0xe93   :  { %v4547_v37 = vmul.f32 %v4545_v56, %v4541_v11  ;;  %v4542_v44 = vadd.f32 0.5, %v4539_v0  ;;  %14217 = vst [vmem:[#allocation19_spill] sm:$0xff] %v11544_v27  ;;  %14219 = vst [vmem:[#allocation3_spill] sm:$0xff] %v11556_v2  ;;  %v11562_v11 = vld [vmem:[%s13339_s13 + $0x40] ss:$16 sps:$4 sm:$0xff]  }
 0xe94   :  { %14220 = vst [vmem:[#allocation5_spill] sm:$0xff] %v11562_v11  ;;  %v11568_v56 = vld [vmem:[%s13339_s13 + $0x48] ss:$16 sps:$4 sm:$0xff]  }
 0xe95   :  { %v11404_v34 = vadd.f32 %v4548_v22, %v4547_v37  ;;  %14221 = vst [vmem:[#allocation6_spill] sm:$0xff] %v11568_v56  ;;  %v11574_v22 = vld [vmem:[%s13339_s13 + $0x64] ss:$16 sps:$4 sm:$0xff]   ;;  %v11580_v37 = vld [vmem:[%s13339_s13 + $0x6c] ss:$16 sps:$4 sm:$0xff]  }
 0xe96   :  { %14222 = vst [vmem:[#allocation4_spill] sm:$0xff] %v11574_v22  ;;  %14223 = vst [vmem:[#allocation21_spill] sm:$0xff] %v11580_v37  ;;  %v11592_v0 = vld [vmem:[%s13339_s13 + $0x68] ss:$16 sps:$4 sm:$0xff]  }
 0xe97   :  { %7169 = vtanh.f32 %v11404_v34  ;;  %14225 = vst [vmem:[#allocation23_spill] sm:$0xff] %v11592_v0 }
 0xea1   :  { %v7170_v43 = vpop.eup %7169 }
 0xea2   :  { %v4551_v45 = vmul.f32 %v7170_v43, %v4542_v44  ;;  %v11598_v44 = vld [vmem:[%s13339_s13 + $0x84] ss:$16 sps:$4 sm:$0xff]   ;;  %v11604_v43 = vld [vmem:[%s13339_s13 + $0x8c] ss:$16 sps:$4 sm:$0xff]  }
 0xea3   :  { %14226 = vst [vmem:[#allocation24_spill] sm:$0xff] %v11598_v44  ;;  %14227 = vst [vmem:[#allocation25_spill] sm:$0xff] %v11604_v43 }
 0xea4   :  { %v4555_v16 = vpack.c.bf16 %v4551_v45, %v4551_v45  ;;  %v11610_v45 = vld [vmem:[%s13339_s13 + $0x80] ss:$16 sps:$4 sm:$0xff]  }
 0xea5   :  { %14228 = vst [vmem:[#allocation26_spill] sm:$0xff] %v11610_v45 }
 0xea6   :  { %v4559_v18 = vrot.slane %v4555_v16, 1  ;;  %v11616_v16 = vld [vmem:[%s13339_s13 + $0x88] ss:$16 sps:$4 sm:$0xff]  }
 0xea7   :  { %14229 = vst [vmem:[#allocation27_spill] sm:$0xff] %v11616_v16 }
 0xea8   :  { %4596 = vmatmul.mubr.bf16.vlgmr.msra.gmra.mrb[84].mxu0 %v4559_v18  ;;  %4637 = vmatmul.mubr.bf16.vlgmr.msra.gmra.mrb[80].mxu1 %v4559_v18 }
 0xea9   :  { %4664 = vmatpush1.bf16.msra.mxu0 %v11206_v57  ;;  %4705 = vmatpush1.bf16.msra.mxu1 %v11212_v63 }
 0xeaa   :  { %4665 = vmatprep.subr.bf16.mxu0 %v11218_v60  ;;  %4706 = vmatprep.subr.bf16.mxu1 %v11224_v55 }
 0xeab   :  { %4695 = vmatprep.mubr.bf16.mxu0 %v13932_v54  ;;  %4736 = vmatprep.mubr.bf16.mxu1 %v13932_v54 }
 0xead   :  { %4666 = vmatpush1.bf16.msra.mxu0 %v11232_v25  ;;  %4707 = vmatpush1.bf16.msra.mxu1 %v11238_v4 }
 0xeae   :  { %4667 = vmatprep.subr.bf16.mxu0 %v11244_v20  ;;  %4708 = vmatprep.subr.bf16.mxu1 %v11250_v19 }
 0xeb1   :  { %4668 = vmatpush1.bf16.msra.mxu0 %v11256_v41  ;;  %4709 = vmatpush1.bf16.msra.mxu1 %v11262_v58 }
 0xeb2   :  { %4669 = vmatprep.subr.bf16.mxu0 %v11268_v24  ;;  %4710 = vmatprep.subr.bf16.mxu1 %v11274_v12 }
 0xeb5   :  { %4670 = vmatpush1.bf16.msra.mxu0 %v11280_v17  ;;  %4711 = vmatpush1.bf16.msra.mxu1 %v14215_v30 }
 0xeb6   :  { %4671 = vmatprep.subr.bf16.mxu0 %v11292_v1  ;;  %4712 = vmatprep.subr.bf16.mxu1 %v11298_v40 }
 0xeb9   :  { %4672 = vmatpush1.bf16.msra.mxu0 %v11304_v39  ;;  %4713 = vmatpush1.bf16.msra.mxu1 %v11310_v7 }
 0xeba   :  { %4673 = vmatprep.subr.bf16.mxu0 %v11430_v46  ;;  %4714 = vmatprep.subr.bf16.mxu1 %v11436_v3 }
 0xebd   :  { %4674 = vmatpush1.bf16.msra.mxu0 %v11442_v52  ;;  %4715 = vmatpush1.bf16.msra.mxu1 %v11448_v59 }
 0xebe   :  { %4675 = vmatprep.subr.bf16.mxu0 %v11454_v49  ;;  %4716 = vmatprep.subr.bf16.mxu1 %v11460_v33 }
 0xec1   :  { %4676 = vmatpush1.bf16.msra.mxu0 %v11466_v26  ;;  %4717 = vmatpush1.bf16.msra.mxu1 %v11472_v28 }
 0xec2   :  { %4677 = vmatprep.subr.bf16.mxu0 %v11478_v50  ;;  %4718 = vmatprep.subr.bf16.mxu1 %v11484_v42 }
 0xec5   :  { %4678 = vmatpush1.bf16.msra.mxu0 %v11490_v15  ;;  %4719 = vmatpush1.bf16.msra.mxu1 %v11496_v23 }
 0xec6   :  { %4793 = vmatprep.subr.bf16.mxu0 %v11502_v21  ;;  %4834 = vmatprep.subr.bf16.mxu1 %v11508_v38 }
 0xec8   :  { %4696 = vmatmul.mubr.bf16.vlgmr.msra.gmra.mrb[88].mxu0 %v4559_v18  ;;  %4737 = vmatmul.mubr.bf16.vlgmr.msra.gmra.mrb[84].mxu1 %v4559_v18  ;;  %v11622_v18 = vld [vmem:[%s13339_s13 + $0xa4] ss:$16 sps:$4 sm:$0xff]  }
 0xec9   :  { %4794 = vmatpush1.bf16.msra.mxu0 %v11514_v51  ;;  %4835 = vmatpush1.bf16.msra.mxu1 %v11520_v35  ;;  %14230 = vst [vmem:[#allocation28_spill] sm:$0xff] %v11622_v18 }
 0xeca   :  { %4795 = vmatprep.subr.bf16.mxu0 %v11526_v5  ;;  %4836 = vmatprep.subr.bf16.mxu1 %v11532_v14 }
 0xecd   :  { %4796 = vmatpush1.bf16.msra.mxu0 %v11538_v47  ;;  %4837 = vmatpush1.bf16.msra.mxu1 %v11544_v27 }
 0xece   :  { %4797 = vmatprep.subr.bf16.mxu0 %v11550_v8  ;;  %4838 = vmatprep.subr.bf16.mxu1 %v11556_v2 }
 0xed1   :  { %4798 = vmatpush1.bf16.msra.mxu0 %v11562_v11  ;;  %4839 = vmatpush1.bf16.msra.mxu1 %v11568_v56 }
 0xed2   :  { %4799 = vmatprep.subr.bf16.mxu0 %v11574_v22  ;;  %4840 = vmatprep.subr.bf16.mxu1 %v11580_v37 }
 0xed5   :  { %4800 = vmatpush1.bf16.msra.mxu0 %v11586_v53  ;;  %4841 = vmatpush1.bf16.msra.mxu1 %v11592_v0 }
 0xed6   :  { %4801 = vmatprep.subr.bf16.mxu0 %v11598_v44  ;;  %4842 = vmatprep.subr.bf16.mxu1 %v11604_v43  ;;  %v11628_v43 = vld [vmem:[%s13339_s13 + $0xac] ss:$16 sps:$4 sm:$0xff]  }
 0xed7   :  { %14231 = vst [vmem:[#allocation29_spill] sm:$0xff] %v11628_v43 }
 0xed9   :  { %4802 = vmatpush1.bf16.msra.mxu0 %v11610_v45  ;;  %4843 = vmatpush1.bf16.msra.mxu1 %v11616_v16  ;;  %v11634_v45 = vld [vmem:[%s13339_s13 + $0xa0] ss:$16 sps:$4 sm:$0xff]   ;;  %v11640_v16 = vld [vmem:[%s13339_s13 + $0xa8] ss:$16 sps:$4 sm:$0xff]  }
 0xeda   :  { %4803 = vmatprep.subr.bf16.mxu0 %v11622_v18  ;;  %4844 = vmatprep.subr.bf16.mxu1 %v11628_v43  ;;  %14232 = vst [vmem:[#allocation30_spill] sm:$0xff] %v11634_v45  ;;  %14233 = vst [vmem:[#allocation31_spill] sm:$0xff] %v11640_v16  ;;  %v11646_v18 = vld [vmem:[%s13339_s13 + $0xc4] ss:$16 sps:$4 sm:$0xff]   ;;  %v11652_v43 = vld [vmem:[%s13339_s13 + $0xcc] ss:$16 sps:$4 sm:$0xff]  }
 0xedb   :  { %14234 = vst [vmem:[#allocation32_spill] sm:$0xff] %v11646_v18  ;;  %14235 = vst [vmem:[#allocation77_spill] sm:$0xff] %v11652_v43 }
 0xedd   :  { %4804 = vmatpush1.bf16.msra.mxu0 %v11634_v45  ;;  %4845 = vmatpush1.bf16.msra.mxu1 %v11640_v16  ;;  %v11658_v45 = vld [vmem:[%s13339_s13 + $0xc0] ss:$16 sps:$4 sm:$0xff]   ;;  %v11664_v16 = vld [vmem:[%s13339_s13 + $0xc8] ss:$16 sps:$4 sm:$0xff]  }
 0xede   :  { %4805 = vmatprep.subr.bf16.mxu0 %v11646_v18  ;;  %4846 = vmatprep.subr.bf16.mxu1 %v11652_v43  ;;  %14236 = vst [vmem:[#allocation62_spill] sm:$0xff] %v11658_v45  ;;  %14237 = vst [vmem:[#allocation63_spill] sm:$0xff] %v11664_v16  ;;  %v11670_v18 = vld [vmem:[%s13339_s13 + $0xe4] ss:$16 sps:$4 sm:$0xff]   ;;  %v11676_v43 = vld [vmem:[%s13339_s13 + $0xec] ss:$16 sps:$4 sm:$0xff]  }
 0xedf   :  { %14238 = vst [vmem:[#allocation61_spill] sm:$0xff] %v11670_v18  ;;  %14239 = vst [vmem:[#allocation33_spill] sm:$0xff] %v11676_v43 }
 0xee1   :  { %4806 = vmatpush1.bf16.msra.mxu0 %v11658_v45  ;;  %4847 = vmatpush1.bf16.msra.mxu1 %v11664_v16  ;;  %v11682_v45 = vld [vmem:[%s13339_s13 + $0xe0] ss:$16 sps:$4 sm:$0xff]   ;;  %v11688_v16 = vld [vmem:[%s13339_s13 + $0xe8] ss:$16 sps:$4 sm:$0xff]  }
 0xee2   :  { %4807 = vmatprep.subr.bf16.mxu0 %v11670_v18  ;;  %4848 = vmatprep.subr.bf16.mxu1 %v11676_v43  ;;  %14240 = vst [vmem:[#allocation34_spill] sm:$0xff] %v11682_v45  ;;  %14241 = vst [vmem:[#allocation35_spill] sm:$0xff] %v11688_v16  ;;  %v11694_v18 = vld [vmem:[%s13339_s13 + $0x104] ss:$16 sps:$4 sm:$0xff]   ;;  %v11700_v43 = vld [vmem:[%s13339_s13 + $0x10c] ss:$16 sps:$4 sm:$0xff]  }
 0xee3   :  { %14242 = vst [vmem:[#allocation36_spill] sm:$0xff] %v11694_v18  ;;  %14243 = vst [vmem:[#allocation37_spill] sm:$0xff] %v11700_v43 }
 0xee5   :  { %4808 = vmatpush1.bf16.msra.mxu0 %v11682_v45  ;;  %4849 = vmatpush1.bf16.msra.mxu1 %v11688_v16  ;;  %v11706_v45 = vld [vmem:[%s13339_s13 + $0x100] ss:$16 sps:$4 sm:$0xff]   ;;  %v11712_v16 = vld [vmem:[%s13339_s13 + $0x108] ss:$16 sps:$4 sm:$0xff]  }
 0xee6   :  { %4809 = vmatprep.subr.bf16.mxu0 %v11694_v18  ;;  %4850 = vmatprep.subr.bf16.mxu1 %v11700_v43  ;;  %14244 = vst [vmem:[#allocation38_spill] sm:$0xff] %v11706_v45  ;;  %14245 = vst [vmem:[#allocation39_spill] sm:$0xff] %v11712_v16  ;;  %v11718_v18 = vld [vmem:[%s13339_s13 + $0x124] ss:$16 sps:$4 sm:$0xff]   ;;  %v11724_v43 = vld [vmem:[%s13339_s13 + $0x12c] ss:$16 sps:$4 sm:$0xff]  }
 0xee7   :  { %14246 = vst [vmem:[#allocation40_spill] sm:$0xff] %v11718_v18  ;;  %14247 = vst [vmem:[#allocation41_spill] sm:$0xff] %v11724_v43 }
 0xee9   :  { %4810 = vmatpush1.bf16.msra.mxu0 %v11706_v45  ;;  %4851 = vmatpush1.bf16.msra.mxu1 %v11712_v16  ;;  %v11730_v45 = vld [vmem:[%s13339_s13 + $0x120] ss:$16 sps:$4 sm:$0xff]   ;;  %v11736_v16 = vld [vmem:[%s13339_s13 + $0x128] ss:$16 sps:$4 sm:$0xff]  }
 0xeea   :  { %4811 = vmatprep.subr.bf16.mxu0 %v11718_v18  ;;  %4852 = vmatprep.subr.bf16.mxu1 %v11724_v43  ;;  %14248 = vst [vmem:[#allocation42_spill] sm:$0xff] %v11730_v45  ;;  %14249 = vst [vmem:[#allocation43_spill] sm:$0xff] %v11736_v16  ;;  %v11742_v18 = vld [vmem:[%s13339_s13 + $0x144] ss:$16 sps:$4 sm:$0xff]   ;;  %v11748_v43 = vld [vmem:[%s13339_s13 + $0x14c] ss:$16 sps:$4 sm:$0xff]  }
 0xeeb   :  { %14250 = vst [vmem:[#allocation44_spill] sm:$0xff] %v11742_v18  ;;  %14251 = vst [vmem:[#allocation45_spill] sm:$0xff] %v11748_v43 }
 0xeed   :  { %4812 = vmatpush1.bf16.msra.mxu0 %v11730_v45  ;;  %4853 = vmatpush1.bf16.msra.mxu1 %v11736_v16  ;;  %v11754_v45 = vld [vmem:[%s13339_s13 + $0x140] ss:$16 sps:$4 sm:$0xff]   ;;  %v11760_v16 = vld [vmem:[%s13339_s13 + $0x148] ss:$16 sps:$4 sm:$0xff]  }
 0xeee   :  { %4813 = vmatprep.subr.bf16.mxu0 %v11742_v18  ;;  %4854 = vmatprep.subr.bf16.mxu1 %v11748_v43  ;;  %14252 = vst [vmem:[#allocation46_spill] sm:$0xff] %v11754_v45  ;;  %14253 = vst [vmem:[#allocation47_spill] sm:$0xff] %v11760_v16  ;;  %v11766_v18 = vld [vmem:[%s13339_s13 + $0x164] ss:$16 sps:$4 sm:$0xff]   ;;  %v11772_v43 = vld [vmem:[%s13339_s13 + $0x16c] ss:$16 sps:$4 sm:$0xff]  }
 0xeef   :  { %14254 = vst [vmem:[#allocation48_spill] sm:$0xff] %v11766_v18  ;;  %14255 = vst [vmem:[#allocation49_spill] sm:$0xff] %v11772_v43 }
 0xef1   :  { %4814 = vmatpush1.bf16.msra.mxu0 %v11754_v45  ;;  %4855 = vmatpush1.bf16.msra.mxu1 %v11760_v16  ;;  %v11778_v45 = vld [vmem:[%s13339_s13 + $0x160] ss:$16 sps:$4 sm:$0xff]   ;;  %v11784_v16 = vld [vmem:[%s13339_s13 + $0x168] ss:$16 sps:$4 sm:$0xff]  }
 0xef2   :  { %4815 = vmatprep.subr.bf16.mxu0 %v11766_v18  ;;  %4856 = vmatprep.subr.bf16.mxu1 %v11772_v43  ;;  %14256 = vst [vmem:[#allocation50_spill] sm:$0xff] %v11778_v45  ;;  %14257 = vst [vmem:[#allocation51_spill] sm:$0xff] %v11784_v16  ;;  %v11790_v18 = vld [vmem:[%s13339_s13 + $0x184] ss:$16 sps:$4 sm:$0xff]   ;;  %v11796_v43 = vld [vmem:[%s13339_s13 + $0x18c] ss:$16 sps:$4 sm:$0xff]  }
 0xef3   :  { %14258 = vst [vmem:[#allocation52_spill] sm:$0xff] %v11790_v18  ;;  %14259 = vst [vmem:[#allocation53_spill] sm:$0xff] %v11796_v43 }
 0xef5   :  { %4816 = vmatpush1.bf16.msra.mxu0 %v11778_v45  ;;  %4857 = vmatpush1.bf16.msra.mxu1 %v11784_v16  ;;  %v11802_v45 = vld [vmem:[%s13339_s13 + $0x180] ss:$16 sps:$4 sm:$0xff]   ;;  %v11808_v16 = vld [vmem:[%s13339_s13 + $0x188] ss:$16 sps:$4 sm:$0xff]  }
 0xef6   :  { %4817 = vmatprep.subr.bf16.mxu0 %v11790_v18  ;;  %4858 = vmatprep.subr.bf16.mxu1 %v11796_v43  ;;  %14260 = vst [vmem:[#allocation54_spill] sm:$0xff] %v11802_v45  ;;  %14261 = vst [vmem:[#allocation55_spill] sm:$0xff] %v11808_v16  ;;  %v11814_v18 = vld [vmem:[%s13339_s13 + $0x1a4] ss:$16 sps:$4 sm:$0xff]   ;;  %v11820_v43 = vld [vmem:[%s13339_s13 + $0x1ac] ss:$16 sps:$4 sm:$0xff]  }
 0xef7   :  { %14262 = vst [vmem:[#allocation56_spill] sm:$0xff] %v11814_v18  ;;  %14263 = vst [vmem:[#allocation57_spill] sm:$0xff] %v11820_v43 }
 0xef9   :  { %4818 = vmatpush1.bf16.msra.mxu0 %v11802_v45  ;;  %4859 = vmatpush1.bf16.msra.mxu1 %v11808_v16  ;;  %v11826_v45 = vld [vmem:[%s13339_s13 + $0x1a0] ss:$16 sps:$4 sm:$0xff]   ;;  %v11832_v16 = vld [vmem:[%s13339_s13 + $0x1a8] ss:$16 sps:$4 sm:$0xff]  }
 0xefa   :  { %4819 = vmatprep.subr.bf16.mxu0 %v11814_v18  ;;  %4860 = vmatprep.subr.bf16.mxu1 %v11820_v43  ;;  %14264 = vst [vmem:[#allocation58_spill] sm:$0xff] %v11826_v45  ;;  %14265 = vst [vmem:[#allocation59_spill] sm:$0xff] %v11832_v16  ;;  %v11838_v18 = vld [vmem:[%s13339_s13 + $0x1c4] ss:$16 sps:$4 sm:$0xff]   ;;  %v11844_v43 = vld [vmem:[%s13339_s13 + $0x1cc] ss:$16 sps:$4 sm:$0xff]  }
 0xefb   :  { %14266 = vst [vmem:[#allocation7_spill] sm:$0xff] %v11838_v18  ;;  %14267 = vst [vmem:[#allocation8_spill] sm:$0xff] %v11844_v43 }
 0xefd   :  { %4820 = vmatpush1.bf16.msra.mxu0 %v11826_v45  ;;  %4861 = vmatpush1.bf16.msra.mxu1 %v11832_v16  ;;  %v11850_v45 = vld [vmem:[%s13339_s13 + $0x1c0] ss:$16 sps:$4 sm:$0xff]   ;;  %v11856_v16 = vld [vmem:[%s13339_s13 + $0x1c8] ss:$16 sps:$4 sm:$0xff]  }
 0xefe   :  { %4821 = vmatprep.subr.bf16.mxu0 %v11838_v18  ;;  %4862 = vmatprep.subr.bf16.mxu1 %v11844_v43  ;;  %14268 = vst [vmem:[#allocation13_spill] sm:$0xff] %v11850_v45  ;;  %14269 = vst [vmem:[#allocation72_spill] sm:$0xff] %v11856_v16  ;;  %v11862_v18 = vld [vmem:[%s13339_s13 + $0x1e4] ss:$16 sps:$4 sm:$0xff]   ;;  %v11868_v43 = vld [vmem:[%s13339_s13 + $0x1ec] ss:$16 sps:$4 sm:$0xff]  }
 0xeff   :  { %14270 = vst [vmem:[#allocation73_spill] sm:$0xff] %v11862_v18  ;;  %14271 = vst [vmem:[#allocation74_spill] sm:$0xff] %v11868_v43 }
 0xf01   :  { %4822 = vmatpush1.bf16.msra.mxu0 %v11850_v45  ;;  %4863 = vmatpush1.bf16.msra.mxu1 %v11856_v16  ;;  %v11874_v45 = vld [vmem:[%s13339_s13 + $0x1e0] ss:$16 sps:$4 sm:$0xff]   ;;  %v11880_v16 = vld [vmem:[%s13339_s13 + $0x1e8] ss:$16 sps:$4 sm:$0xff]  }
 0xf02   :  { %4823 = vmatprep.subr.bf16.mxu0 %v11862_v18  ;;  %4864 = vmatprep.subr.bf16.mxu1 %v11868_v43  ;;  %14272 = vst [vmem:[#allocation75_spill] sm:$0xff] %v11874_v45  ;;  %14273 = vst [vmem:[#allocation76_spill] sm:$0xff] %v11880_v16 }
 0xf05   :  { %4824 = vmatpush1.bf16.msra.mxu0 %v11874_v45  ;;  %4865 = vmatpush1.bf16.msra.mxu1 %v11880_v16 }
 0xf06   :  { %4893 = vmatprep.subr.bf16.mxu0 %v14207_v6  ;;  %4934 = vmatprep.subr.bf16.mxu1 %v14208_v29 }
 0xf7b   :  { %v4597_v18 = vpop.f32.mrb[84].mxu0  ;;  %v4638_v43 = vpop.f32.mrb[80].mxu1 }
 0xf7c   :  { %v4598_v44 = vadd.f32 %v4597_v18, %v14209_v62  ;;  %v4599_v0 = vpop.f32.mrb[85].mxu0  ;;  %v4640_v53 = vpop.f32.mrb[81].mxu1  ;;  %v4639_v6 = vadd.f32 %v4638_v43, %v14212_v61 }
 0xf7d   :  { %v4600_v37 = vadd.f32 %v4599_v0, %v14210_v9  ;;  %v4601_v45 = vpop.f32.mrb[86].mxu0  ;;  %v4642_v22 = vpop.f32.mrb[82].mxu1  ;;  %v4641_v16 = vadd.f32 %v4640_v53, %v14211_v48 }
 0xf7e   :  { %v4645_v56 = vmul.f32 0.5, %v4598_v44  ;;  %v4602_v11 = vpop.f32.mrb[87].mxu0  ;;  %v4643_v2 = vpop.f32.mrb[83].mxu1  ;;  %v4647_v29 = vmul.f32 0.5, %v4639_v6 }
 0xf7f   :  { %v4646_v8 = vmul.f32 0.5, %v4600_v37 }
 0xf80   :  { %7171 = vtanh.f32 %v4645_v56 }
 0xf81   :  { %7173 = vtanh.f32 %v4646_v8 }
 0xf82   :  { %7175 = vtanh.f32 %v4641_v16 }
 0xf83   :  { %7177 = vtanh.f32 %v4647_v29 }
 0xf8a   :  { %v7172_v27 = vpop.eup %7171 }
 0xf8b   :  { %v4651_v18 = vmul.f32 0.5, %v7172_v27  ;;  %v7174_v62 = vpop.eup %7173 }
 0xf8c   :  { %v4652_v0 = vmul.f32 0.5, %v7174_v62  ;;  %v7176_v45 = vpop.eup %7175 }
 0xf8d   :  { %v4654_v47 = vadd.f32 0.5, %v4651_v18  ;;  %v7178_v8 = vpop.eup %7177 }
 0xf8e   :  { %v4655_v22 = vadd.f32 0.5, %v4652_v0  ;;  %v4653_v56 = vmul.f32 0.5, %v7178_v8 }
 0xf8f   :  { %v4659_v44 = vmul.f32 %v7176_v45, %v4654_v47 }
 0xf90   :  { %v4658_v2 = vmul.f32 %v4655_v22, %v11396_v13  ;;  %v4656_v62 = vadd.f32 0.5, %v4653_v56 }
 0xf92   :  { %v11890_v11 = vadd.f32 %v4659_v44, %v4658_v2 }
 0xf94   :  { %14274 = vst [vmem:[#allocation14_spill] sm:$0xff] %v11890_v11  ;;  %7179 = vtanh.f32 %v11890_v11 }
 0xf9b   :  { %v4697_v37 = vpop.f32.mrb[88].mxu0  ;;  %v4738_v53 = vpop.f32.mrb[84].mxu1 }
 0xf9c   :  { %v4749_v43 = vrot.slane %v4697_v37, 4  ;;  %v4699_v16 = vpop.f32.mrb[89].mxu0  ;;  %v4740_v27 = vpop.f32.mrb[85].mxu1  ;;  %v4751_v48 = vrot.slane %v4738_v53, 4 }
 0xf9d   :  { %v4750_v6 = vrot.slane %v4699_v16, 4  ;;  %v4701_v18 = vpop.f32.mrb[90].mxu0  ;;  %v4742_v29 = vpop.f32.mrb[86].mxu1  ;;  %v4752_v47 = vrot.slane %v4740_v27, 4 }
 0xf9e   :  { %v4757_v0 = vadd.f32 %v4749_v43, %v14214_v32  ;;  %v4702_v45 = vpop.f32.mrb[91].mxu0  ;;  %v4743_v13 = vpop.f32.mrb[87].mxu1  ;;  %v4759_v43 = vadd.f32 %v4751_v48, %v14170_v31 }
 0xf9f   :  { %v7180_v22 = vpop.eup %7179  ;;  %v4758_v44 = vadd.f32 %v4750_v6, %v14168_v36  ;;  %v4760_v37 = vadd.f32 %v4752_v47, %v14169_v10 }
 0xfa0   :  { %v4761_v2 = vmul.f32 0.5, %v4757_v0  ;;  %v4662_v11 = vmul.f32 %v7180_v22, %v4656_v62  ;;  %v4763_v27 = vmul.f32 0.5, %v4759_v43  ;;  %v14295_v43 = vld [vmem:[#allocation62_spill] sm:$0xff] }
 0xfa1   :  { %v4762_v8 = vmul.f32 0.5, %v4758_v44 }
 0xfa2   :  { %7181 = vtanh.f32 %v4761_v2  ;;  %v4783_v61 = vrot.slane %v4662_v11, 4  ;;  %v4775_v11 = vrot.slane %v11404_v34, 6  ;;  %v14292_v34 = vld [vmem:[#allocation31_spill] sm:$0xff] }
 0xfa3   :  { %7183 = vtanh.f32 %v4762_v8 }
 0xfa4   :  { %v4786_v16 = vpack.c.bf16 %v4783_v61, %v4783_v61  ;;  %7185 = vtanh.f32 %v4760_v37 }
 0xfa5   :  { %7187 = vtanh.f32 %v4763_v27  ;;  %v14296_v27 = vld [vmem:[#allocation63_spill] sm:$0xff] }
 0xfa6   :  { %v4790_v56 = vrot.slane %v4786_v16, 2 }
 0xfa8   :  { %4825 = vmatprep.mubr.bf16.mxu0 %v4790_v56  ;;  %4866 = vmatprep.mubr.bf16.mxu1 %v4790_v56  ;;  %v14294_v56 = vld [vmem:[#allocation77_spill] sm:$0xff] }
 0xfac   :  { %v7182_v18 = vpop.eup %7181 }
 0xfad   :  { %v4767_v29 = vmul.f32 0.5, %v7182_v18  ;;  %v7184_v6 = vpop.eup %7183  ;;  %v14297_v18 = vld [vmem:[#allocation61_spill] sm:$0xff] }
 0xfae   :  { %v4768_v62 = vmul.f32 0.5, %v7184_v6  ;;  %v7186_v45 = vpop.eup %7185  ;;  %v14299_v6 = vld [vmem:[#allocation34_spill] sm:$0xff] }
 0xfaf   :  { %v4770_v0 = vadd.f32 0.5, %v4767_v29  ;;  %v7188_v48 = vpop.eup %7187  ;;  %v14298_v29 = vld [vmem:[#allocation33_spill] sm:$0xff] }
 0xfb0   :  { %v4771_v13 = vadd.f32 0.5, %v4768_v62  ;;  %v4769_v22 = vmul.f32 0.5, %v7188_v48  ;;  %v14301_v62 = vld [vmem:[#allocation36_spill] sm:$0xff]  ;;  %v14307_v48 = vld [vmem:[#allocation42_spill] sm:$0xff] }
 0xfb1   :  { %v4778_v53 = vmul.f32 %v7186_v45, %v4770_v0  ;;  %v14300_v0 = vld [vmem:[#allocation35_spill] sm:$0xff]  ;;  %v14302_v45 = vld [vmem:[#allocation37_spill] sm:$0xff] }
 0xfb2   :  { %v4777_v47 = vmul.f32 %v4775_v11, %v4771_v13  ;;  %v4772_v44 = vadd.f32 0.5, %v4769_v22  ;;  %v14303_v13 = vld [vmem:[#allocation38_spill] sm:$0xff]  ;;  %v14304_v11 = vld [vmem:[#allocation39_spill] sm:$0xff] }
 0xfb3   :  { %v14308_v22 = vld [vmem:[#allocation43_spill] sm:$0xff] }
 0xfb4   :  { %v11898_v61 = vadd.f32 %v4778_v53, %v4777_v47  ;;  %v14305_v53 = vld [vmem:[#allocation40_spill] sm:$0xff]  ;;  %v14306_v47 = vld [vmem:[#allocation41_spill] sm:$0xff] }
 0xfb6   :  { %7189 = vtanh.f32 %v11898_v61 }
 0xfc0   :  { %v7190_v2 = vpop.eup %7189 }
 0xfc1   :  { %v4781_v8 = vmul.f32 %v7190_v2, %v4772_v44  ;;  %v14309_v44 = vld [vmem:[#allocation44_spill] sm:$0xff]  ;;  %v14310_v2 = vld [vmem:[#allocation45_spill] sm:$0xff] }
 0xfc3   :  { %v4785_v37 = vpack.c.bf16 %v4781_v8, %v4781_v8  ;;  %v14311_v8 = vld [vmem:[#allocation46_spill] sm:$0xff] }
 0xfc5   :  { %v4789_v16 = vrot.slane %v4785_v37, 2  ;;  %v14312_v37 = vld [vmem:[#allocation47_spill] sm:$0xff] }
 0xfc7   :  { %4826 = vmatmul.mubr.bf16.vlgmr.msra.gmra.mrb[92].mxu0 %v4789_v16  ;;  %4867 = vmatmul.mubr.bf16.vlgmr.msra.gmra.mrb[88].mxu1 %v4789_v16 }
 0xfc8   :  { %4894 = vmatpush1.bf16.msra.mxu0 %v11206_v57  ;;  %4935 = vmatpush1.bf16.msra.mxu1 %v11212_v63  ;;  %v14275_v57 = vld [vmem:[#allocation18_spill] sm:$0xff]  ;;  %v14276_v63 = vld [vmem:[#allocation19_spill] sm:$0xff] }
 0xfc9   :  { %4895 = vmatprep.subr.bf16.mxu0 %v11218_v60  ;;  %4936 = vmatprep.subr.bf16.mxu1 %v11224_v55  ;;  %v14277_v60 = vld [vmem:[#allocation20_spill] sm:$0xff]  ;;  %v14278_v55 = vld [vmem:[#allocation3_spill] sm:$0xff] }
 0xfca   :  { %4925 = vmatprep.mubr.bf16.mxu0 %v13932_v54  ;;  %4966 = vmatprep.mubr.bf16.mxu1 %v13932_v54 }
 0xfcc   :  { %4896 = vmatpush1.bf16.msra.mxu0 %v11232_v25  ;;  %4937 = vmatpush1.bf16.msra.mxu1 %v11238_v4  ;;  %v14279_v25 = vld [vmem:[#allocation5_spill] sm:$0xff]  ;;  %v14280_v4 = vld [vmem:[#allocation6_spill] sm:$0xff] }
 0xfcd   :  { %4897 = vmatprep.subr.bf16.mxu0 %v11244_v20  ;;  %4938 = vmatprep.subr.bf16.mxu1 %v11250_v19  ;;  %v14281_v20 = vld [vmem:[#allocation4_spill] sm:$0xff]  ;;  %v14282_v19 = vld [vmem:[#allocation21_spill] sm:$0xff] }
 0xfd0   :  { %4898 = vmatpush1.bf16.msra.mxu0 %v11256_v41  ;;  %4939 = vmatpush1.bf16.msra.mxu1 %v11262_v58  ;;  %v14283_v41 = vld [vmem:[#allocation22_spill] sm:$0xff]  ;;  %v14284_v58 = vld [vmem:[#allocation23_spill] sm:$0xff] }
 0xfd1   :  { %4899 = vmatprep.subr.bf16.mxu0 %v11268_v24  ;;  %4940 = vmatprep.subr.bf16.mxu1 %v11274_v12  ;;  %v14285_v24 = vld [vmem:[#allocation24_spill] sm:$0xff]  ;;  %v14286_v12 = vld [vmem:[#allocation25_spill] sm:$0xff] }
 0xfd4   :  { %4900 = vmatpush1.bf16.msra.mxu0 %v11280_v17  ;;  %4941 = vmatpush1.bf16.msra.mxu1 %v14215_v30  ;;  %v14287_v17 = vld [vmem:[#allocation26_spill] sm:$0xff]  ;;  %v14293_v30 = vld [vmem:[#allocation32_spill] sm:$0xff] }
 0xfd5   :  { %4901 = vmatprep.subr.bf16.mxu0 %v11292_v1  ;;  %4942 = vmatprep.subr.bf16.mxu1 %v11298_v40  ;;  %v14289_v1 = vld [vmem:[#allocation28_spill] sm:$0xff]  ;;  %v14290_v40 = vld [vmem:[#allocation29_spill] sm:$0xff] }
 0xfd8   :  { %4902 = vmatpush1.bf16.msra.mxu0 %v11304_v39  ;;  %4943 = vmatpush1.bf16.msra.mxu1 %v11310_v7  ;;  %v14288_v7 = vld [vmem:[#allocation27_spill] sm:$0xff]  ;;  %v14291_v39 = vld [vmem:[#allocation30_spill] sm:$0xff] }
 0xfd9   :  { %4903 = vmatprep.subr.bf16.mxu0 %v11430_v46  ;;  %4944 = vmatprep.subr.bf16.mxu1 %v11436_v3 }
 0xfdc   :  { %4904 = vmatpush1.bf16.msra.mxu0 %v11442_v52  ;;  %4945 = vmatpush1.bf16.msra.mxu1 %v11448_v59 }
 0xfdd   :  { %4905 = vmatprep.subr.bf16.mxu0 %v11454_v49  ;;  %4946 = vmatprep.subr.bf16.mxu1 %v11460_v33 }
 0xfe0   :  { %4906 = vmatpush1.bf16.msra.mxu0 %v11466_v26  ;;  %4947 = vmatpush1.bf16.msra.mxu1 %v11472_v28 }
 0xfe1   :  { %4907 = vmatprep.subr.bf16.mxu0 %v11478_v50  ;;  %4948 = vmatprep.subr.bf16.mxu1 %v11484_v42 }
 0xfe4   :  { %4908 = vmatpush1.bf16.msra.mxu0 %v11490_v15  ;;  %4949 = vmatpush1.bf16.msra.mxu1 %v11496_v23 }
 0xfe5   :  { %5023 = vmatprep.subr.bf16.mxu0 %v11502_v21  ;;  %5064 = vmatprep.subr.bf16.mxu1 %v11508_v38 }
 0xfe7   :  { %4926 = vmatmul.mubr.bf16.vlgmr.msra.gmra.mrb[96].mxu0 %v4789_v16  ;;  %4967 = vmatmul.mubr.bf16.vlgmr.msra.gmra.mrb[92].mxu1 %v4789_v16  ;;  %v14313_v16 = vld [vmem:[#allocation48_spill] sm:$0xff] }
 0xfe8   :  { %5024 = vmatpush1.bf16.msra.mxu0 %v11514_v51  ;;  %5065 = vmatpush1.bf16.msra.mxu1 %v11520_v35 }
 0xfe9   :  { %5025 = vmatprep.subr.bf16.mxu0 %v11526_v5  ;;  %5066 = vmatprep.subr.bf16.mxu1 %v11532_v14 }
 0xfec   :  { %5026 = vmatpush1.bf16.msra.mxu0 %v14275_v57  ;;  %5067 = vmatpush1.bf16.msra.mxu1 %v14276_v63 }
 0xfed   :  { %5027 = vmatprep.subr.bf16.mxu0 %v14277_v60  ;;  %5068 = vmatprep.subr.bf16.mxu1 %v14278_v55 }
 0xff0   :  { %5028 = vmatpush1.bf16.msra.mxu0 %v14279_v25  ;;  %5069 = vmatpush1.bf16.msra.mxu1 %v14280_v4 }
 0xff1   :  { %5029 = vmatprep.subr.bf16.mxu0 %v14281_v20  ;;  %5070 = vmatprep.subr.bf16.mxu1 %v14282_v19 }
 0xff4   :  { %5030 = vmatpush1.bf16.msra.mxu0 %v14283_v41  ;;  %5071 = vmatpush1.bf16.msra.mxu1 %v14284_v58 }
 0xff5   :  { %5031 = vmatprep.subr.bf16.mxu0 %v14285_v24  ;;  %5072 = vmatprep.subr.bf16.mxu1 %v14286_v12 }
 0xff8   :  { %5032 = vmatpush1.bf16.msra.mxu0 %v14287_v17  ;;  %5073 = vmatpush1.bf16.msra.mxu1 %v14288_v7 }
 0xff9   :  { %5033 = vmatprep.subr.bf16.mxu0 %v14289_v1  ;;  %5074 = vmatprep.subr.bf16.mxu1 %v14290_v40 }
 0xffc   :  { %5034 = vmatpush1.bf16.msra.mxu0 %v14291_v39  ;;  %5075 = vmatpush1.bf16.msra.mxu1 %v14292_v34 }
 0xffd   :  { %5035 = vmatprep.subr.bf16.mxu0 %v14293_v30  ;;  %5076 = vmatprep.subr.bf16.mxu1 %v14294_v56 }
0x1000   :  { %5036 = vmatpush1.bf16.msra.mxu0 %v14295_v43  ;;  %5077 = vmatpush1.bf16.msra.mxu1 %v14296_v27 }
0x1001   :  { %5037 = vmatprep.subr.bf16.mxu0 %v14297_v18  ;;  %5078 = vmatprep.subr.bf16.mxu1 %v14298_v29 }
0x1004   :  { %5038 = vmatpush1.bf16.msra.mxu0 %v14299_v6  ;;  %5079 = vmatpush1.bf16.msra.mxu1 %v14300_v0  ;;  %v14336_v6 = vld [vmem:[#allocation11_spill] sm:$0xff] }
0x1005   :  { %5039 = vmatprep.subr.bf16.mxu0 %v14301_v62  ;;  %5080 = vmatprep.subr.bf16.mxu1 %v14302_v45 }
0x1008   :  { %5040 = vmatpush1.bf16.msra.mxu0 %v14303_v13  ;;  %5081 = vmatpush1.bf16.msra.mxu1 %v14304_v11  ;;  %v14314_v13 = vld [vmem:[#allocation49_spill] sm:$0xff]  ;;  %v14315_v11 = vld [vmem:[#allocation50_spill] sm:$0xff] }
0x1009   :  { %5041 = vmatprep.subr.bf16.mxu0 %v14305_v53  ;;  %5082 = vmatprep.subr.bf16.mxu1 %v14306_v47  ;;  %v14316_v53 = vld [vmem:[#allocation51_spill] sm:$0xff]  ;;  %v14317_v47 = vld [vmem:[#allocation52_spill] sm:$0xff] }
0x100c   :  { %5042 = vmatpush1.bf16.msra.mxu0 %v14307_v48  ;;  %5083 = vmatpush1.bf16.msra.mxu1 %v14308_v22  ;;  %v14318_v48 = vld [vmem:[#allocation53_spill] sm:$0xff]  ;;  %v14319_v22 = vld [vmem:[#allocation54_spill] sm:$0xff] }
0x100d   :  { %5043 = vmatprep.subr.bf16.mxu0 %v14309_v44  ;;  %5084 = vmatprep.subr.bf16.mxu1 %v14310_v2  ;;  %v14320_v44 = vld [vmem:[#allocation55_spill] sm:$0xff]  ;;  %v14321_v2 = vld [vmem:[#allocation56_spill] sm:$0xff] }
0x1010   :  { %5044 = vmatpush1.bf16.msra.mxu0 %v14311_v8  ;;  %5085 = vmatpush1.bf16.msra.mxu1 %v14312_v37  ;;  %v14322_v8 = vld [vmem:[#allocation57_spill] sm:$0xff]  ;;  %v14323_v37 = vld [vmem:[#allocation58_spill] sm:$0xff] }
0x1011   :  { %5045 = vmatprep.subr.bf16.mxu0 %v14313_v16  ;;  %5086 = vmatprep.subr.bf16.mxu1 %v14314_v13  ;;  %v14324_v16 = vld [vmem:[#allocation59_spill] sm:$0xff] }
0x1012   :  { %v14325_v13 = vld [vmem:[#allocation7_spill] sm:$0xff] }
0x1014   :  { %5046 = vmatpush1.bf16.msra.mxu0 %v14315_v11  ;;  %5087 = vmatpush1.bf16.msra.mxu1 %v14316_v53  ;;  %v14326_v11 = vld [vmem:[#allocation8_spill] sm:$0xff]  ;;  %v14327_v53 = vld [vmem:[#allocation13_spill] sm:$0xff] }
0x1015   :  { %5047 = vmatprep.subr.bf16.mxu0 %v14317_v47  ;;  %5088 = vmatprep.subr.bf16.mxu1 %v14318_v48  ;;  %v14328_v47 = vld [vmem:[#allocation72_spill] sm:$0xff]  ;;  %v14329_v48 = vld [vmem:[#allocation73_spill] sm:$0xff] }
0x1018   :  { %5048 = vmatpush1.bf16.msra.mxu0 %v14319_v22  ;;  %5089 = vmatpush1.bf16.msra.mxu1 %v14320_v44  ;;  %v14330_v22 = vld [vmem:[#allocation74_spill] sm:$0xff]  ;;  %v14331_v44 = vld [vmem:[#allocation75_spill] sm:$0xff] }
0x1019   :  { %5049 = vmatprep.subr.bf16.mxu0 %v14321_v2  ;;  %5090 = vmatprep.subr.bf16.mxu1 %v14322_v8  ;;  %v14332_v2 = vld [vmem:[#allocation76_spill] sm:$0xff] }
0x101c   :  { %5050 = vmatpush1.bf16.msra.mxu0 %v14323_v37  ;;  %5091 = vmatpush1.bf16.msra.mxu1 %v14324_v16  ;;  %v12000_v16 = vld [vmem:[%s13338_s12 + $0x4] ss:$16 sps:$4 sm:$0xff]  }
0x101d   :  { %5051 = vmatprep.subr.bf16.mxu0 %v14325_v13  ;;  %5092 = vmatprep.subr.bf16.mxu1 %v14326_v11  ;;  %14333 = vst [vmem:[#allocation15_spill] sm:$0xff] %v12000_v16 }
0x1020   :  { %5052 = vmatpush1.bf16.msra.mxu0 %v14327_v53  ;;  %5093 = vmatpush1.bf16.msra.mxu1 %v14328_v47  ;;  %v12006_v53 = vld [vmem:[%s13338_s12 + $0xc] ss:$16 sps:$4 sm:$0xff]   ;;  %v14335_v47 = vld [vmem:[#allocation9_spill] sm:$0xff] }
0x1021   :  { %5053 = vmatprep.subr.bf16.mxu0 %v14329_v48  ;;  %5094 = vmatprep.subr.bf16.mxu1 %v14330_v22  ;;  %14334 = vst [vmem:[#allocation16_spill] sm:$0xff] %v12006_v53 }
0x1024   :  { %5054 = vmatpush1.bf16.msra.mxu0 %v14331_v44  ;;  %5095 = vmatpush1.bf16.msra.mxu1 %v14332_v2 }
0x1025   :  { %5123 = vmatprep.subr.bf16.mxu0 %v12000_v16  ;;  %5164 = vmatprep.subr.bf16.mxu1 %v12006_v53  ;;  %v14337_v53 = vld [vmem:[#allocation12_spill] sm:$0xff] }
0x109a   :  { %v4827_v48 = vpop.f32.mrb[92].mxu0  ;;  %v4868_v22 = vpop.f32.mrb[88].mxu1 }
0x109b   :  { %v4828_v44 = vadd.f32 %v4827_v48, %v14335_v47  ;;  %v4829_v11 = vpop.f32.mrb[93].mxu0  ;;  %v4870_v2 = vpop.f32.mrb[89].mxu1  ;;  %v4869_v18 = vadd.f32 %v4868_v22, %v14337_v53 }
0x109c   :  { %v4830_v13 = vadd.f32 %v4829_v11, %v14210_v9  ;;  %v4831_v37 = vpop.f32.mrb[94].mxu0  ;;  %v4872_v8 = vpop.f32.mrb[90].mxu1  ;;  %v4871_v29 = vadd.f32 %v4870_v2, %v14336_v6 }
0x109d   :  { %v4875_v45 = vmul.f32 0.5, %v4828_v44  ;;  %v4832_v62 = vpop.f32.mrb[95].mxu0  ;;  %v4873_v16 = vpop.f32.mrb[91].mxu1  ;;  %v4877_v27 = vmul.f32 0.5, %v4869_v18 }
0x109e   :  { %v4876_v0 = vmul.f32 0.5, %v4830_v13  ;;  %v14338_v62 = vld [vmem:[#allocation14_spill] sm:$0xff] }
0x109f   :  { %7191 = vtanh.f32 %v4875_v45 }
0x10a0   :  { %7193 = vtanh.f32 %v4876_v0 }
0x10a1   :  { %7195 = vtanh.f32 %v4871_v29 }
0x10a2   :  { %7197 = vtanh.f32 %v4877_v27 }
0x10a9   :  { %v7192_v43 = vpop.eup %7191 }
0x10aa   :  { %v4881_v48 = vmul.f32 0.5, %v7192_v43  ;;  %v7194_v47 = vpop.eup %7193 }
0x10ab   :  { %v4882_v11 = vmul.f32 0.5, %v7194_v47  ;;  %v7196_v37 = vpop.eup %7195 }
0x10ac   :  { %v4884_v56 = vadd.f32 0.5, %v4881_v48  ;;  %v7198_v0 = vpop.eup %7197 }
0x10ad   :  { %v4885_v8 = vadd.f32 0.5, %v4882_v11  ;;  %v4883_v29 = vmul.f32 0.5, %v7198_v0 }
0x10ae   :  { %v4889_v44 = vmul.f32 %v7196_v37, %v4884_v56 }
0x10af   :  { %v4888_v16 = vmul.f32 %v4885_v8, %v14338_v62  ;;  %v4886_v47 = vadd.f32 0.5, %v4883_v29 }
0x10b1   :  { %v12014_v13 = vadd.f32 %v4889_v44, %v4888_v16 }
0x10b3   :  { %14339 = vst [vmem:[#allocation60_spill] sm:$0xff] %v12014_v13  ;;  %7199 = vtanh.f32 %v12014_v13 }
0x10ba   :  { %v4927_v45 = vpop.f32.mrb[96].mxu0  ;;  %v4968_v22 = vpop.f32.mrb[92].mxu1 }
0x10bb   :  { %v4979_v18 = vrot.slane %v4927_v45, 2  ;;  %v4929_v2 = vpop.f32.mrb[97].mxu0  ;;  %v4970_v43 = vpop.f32.mrb[93].mxu1  ;;  %v4981_v9 = vrot.slane %v4968_v22, 2 }
0x10bc   :  { %v4980_v53 = vrot.slane %v4929_v2, 2  ;;  %v4931_v48 = vpop.f32.mrb[98].mxu0  ;;  %v4972_v27 = vpop.f32.mrb[94].mxu1  ;;  %v4982_v56 = vrot.slane %v4970_v43, 2 }
0x10bd   :  { %v4987_v11 = vadd.f32 %v4979_v18, %v14214_v32  ;;  %v4932_v37 = vpop.f32.mrb[99].mxu0  ;;  %v4973_v8 = vpop.f32.mrb[95].mxu1  ;;  %v4989_v32 = vadd.f32 %v4981_v9, %v14170_v31 }
0x10be   :  { %v7200_v44 = vpop.eup %7199  ;;  %v4988_v62 = vadd.f32 %v4980_v53, %v14168_v36  ;;  %v4990_v45 = vadd.f32 %v4982_v56, %v14169_v10  ;;  %v5005_v10 = vrot.slane %v11898_v61, 6  ;;  %v12034_v61 = vld [vmem:[%s13338_s12 + $0x8] ss:$16 sps:$4 sm:$0xff]  }
0x10bf   :  { %v4991_v16 = vmul.f32 0.5, %v4987_v11  ;;  %v4892_v13 = vmul.f32 %v7200_v44, %v4886_v47  ;;  %v4993_v18 = vmul.f32 0.5, %v4989_v32  ;;  %v12066_v32 = vld [vmem:[%s13338_s12 + $0x44] ss:$16 sps:$4 sm:$0xff]  }
0x10c0   :  { %v4992_v0 = vmul.f32 0.5, %v4988_v62 }
0x10c1   :  { %7201 = vtanh.f32 %v4991_v16  ;;  %v5013_v6 = vrot.slane %v4892_v13, 2  ;;  %v12028_v16 = vld [vmem:[%s13338_s12] ss:$16 sps:$4 sm:$0xff]  }
0x10c2   :  { %7203 = vtanh.f32 %v4992_v0  ;;  %v12040_v0 = vld [vmem:[%s13338_s12 + $0x24] ss:$16 sps:$4 sm:$0xff]  }
0x10c3   :  { %v5016_v2 = vpack.c.bf16 %v5013_v6, %v5013_v6  ;;  %7205 = vtanh.f32 %v4990_v45  ;;  %v12046_v45 = vld [vmem:[%s13338_s12 + $0x2c] ss:$16 sps:$4 sm:$0xff]  }
0x10c4   :  { %7207 = vtanh.f32 %v4993_v18  ;;  %v12072_v18 = vld [vmem:[%s13338_s12 + $0x4c] ss:$16 sps:$4 sm:$0xff]  }
0x10c5   :  { %v5020_v29 = vrot.slane %v5016_v2, 3  ;;  %v12054_v2 = vld [vmem:[%s13338_s12 + $0x20] ss:$16 sps:$4 sm:$0xff]  }
0x10c7   :  { %5055 = vmatprep.mubr.bf16.mxu0 %v5020_v29  ;;  %5096 = vmatprep.mubr.bf16.mxu1 %v5020_v29  ;;  %v12060_v29 = vld [vmem:[%s13338_s12 + $0x28] ss:$16 sps:$4 sm:$0xff]  }
0x10cb   :  { %v7202_v43 = vpop.eup %7201 }
0x10cc   :  { %v4997_v48 = vmul.f32 0.5, %v7202_v43  ;;  %v7204_v36 = vpop.eup %7203  ;;  %v12078_v43 = vld [vmem:[%s13338_s12 + $0x40] ss:$16 sps:$4 sm:$0xff]  }
0x10cd   :  { %v4998_v27 = vmul.f32 0.5, %v7204_v36  ;;  %v7206_v47 = vpop.eup %7205  ;;  %v12090_v36 = vld [vmem:[%s13338_s12 + $0x64] ss:$16 sps:$4 sm:$0xff]  }
0x10ce   :  { %v5000_v53 = vadd.f32 0.5, %v4997_v48  ;;  %v7208_v31 = vpop.eup %7207  ;;  %v12084_v48 = vld [vmem:[%s13338_s12 + $0x48] ss:$16 sps:$4 sm:$0xff]  }
0x10cf   :  { %v5001_v11 = vadd.f32 0.5, %v4998_v27  ;;  %v4999_v9 = vmul.f32 0.5, %v7208_v31  ;;  %v12102_v27 = vld [vmem:[%s13338_s12 + $0x60] ss:$16 sps:$4 sm:$0xff]  }
0x10d0   :  { %v5008_v13 = vmul.f32 %v7206_v47, %v5000_v53  ;;  %v12096_v53 = vld [vmem:[%s13338_s12 + $0x6c] ss:$16 sps:$4 sm:$0xff]   ;;  %v12108_v47 = vld [vmem:[%s13338_s12 + $0x68] ss:$16 sps:$4 sm:$0xff]  }
0x10d1   :  { %v5007_v22 = vmul.f32 %v5005_v10, %v5001_v11  ;;  %v5002_v56 = vadd.f32 0.5, %v4999_v9  ;;  %v12114_v11 = vld [vmem:[%s13338_s12 + $0x84] ss:$16 sps:$4 sm:$0xff]   ;;  %v12120_v10 = vld [vmem:[%s13338_s12 + $0x8c] ss:$16 sps:$4 sm:$0xff]  }
0x10d2   :  { %v14377_v31 = vld [vmem:[#allocation75_spill] sm:$0xff]  ;;  %v14378_v9 = vld [vmem:[#allocation76_spill] sm:$0xff] }
0x10d3   :  { %v12022_v6 = vadd.f32 %v5008_v13, %v5007_v22  ;;  %v12126_v13 = vld [vmem:[%s13338_s12 + $0x80] ss:$16 sps:$4 sm:$0xff]   ;;  %v12132_v22 = vld [vmem:[%s13338_s12 + $0x88] ss:$16 sps:$4 sm:$0xff]  }
0x10d5   :  { %7209 = vtanh.f32 %v12022_v6 }
0x10df   :  { %v7210_v37 = vpop.eup %7209 }
0x10e0   :  { %v5011_v8 = vmul.f32 %v7210_v37, %v5002_v56  ;;  %v14379_v56 = vld [vmem:[#allocation15_spill] sm:$0xff]  ;;  %v14380_v37 = vld [vmem:[#allocation16_spill] sm:$0xff] }
0x10e2   :  { %v5015_v44 = vpack.c.bf16 %v5011_v8, %v5011_v8 }
0x10e4   :  { %v5019_v62 = vrot.slane %v5015_v44, 3 }
0x10e6   :  { %5056 = vmatmul.mubr.bf16.vlgmr.msra.gmra.mrb[100].mxu0 %v5019_v62  ;;  %5097 = vmatmul.mubr.bf16.vlgmr.msra.gmra.mrb[96].mxu1 %v5019_v62 }
0x10e7   :  { %5124 = vmatpush1.bf16.msra.mxu0 %v12028_v16  ;;  %5165 = vmatpush1.bf16.msra.mxu1 %v12034_v61 }
0x10e8   :  { %5125 = vmatprep.subr.bf16.mxu0 %v12040_v0  ;;  %5166 = vmatprep.subr.bf16.mxu1 %v12046_v45 }
0x10e9   :  { %5155 = vmatprep.mubr.bf16.mxu0 %v13932_v54  ;;  %5196 = vmatprep.mubr.bf16.mxu1 %v13932_v54 }
0x10eb   :  { %5126 = vmatpush1.bf16.msra.mxu0 %v12054_v2  ;;  %5167 = vmatpush1.bf16.msra.mxu1 %v12060_v29 }
0x10ec   :  { %5127 = vmatprep.subr.bf16.mxu0 %v12066_v32  ;;  %5168 = vmatprep.subr.bf16.mxu1 %v12072_v18 }
0x10ef   :  { %5128 = vmatpush1.bf16.msra.mxu0 %v12078_v43  ;;  %5169 = vmatpush1.bf16.msra.mxu1 %v12084_v48 }
0x10f0   :  { %5129 = vmatprep.subr.bf16.mxu0 %v12090_v36  ;;  %5170 = vmatprep.subr.bf16.mxu1 %v12096_v53 }
0x10f3   :  { %5130 = vmatpush1.bf16.msra.mxu0 %v12102_v27  ;;  %5171 = vmatpush1.bf16.msra.mxu1 %v12108_v47 }
0x10f4   :  { %5131 = vmatprep.subr.bf16.mxu0 %v12114_v11  ;;  %5172 = vmatprep.subr.bf16.mxu1 %v12120_v10 }
0x10f7   :  { %5132 = vmatpush1.bf16.msra.mxu0 %v12126_v13  ;;  %5173 = vmatpush1.bf16.msra.mxu1 %v12132_v22 }
0x10f8   :  { %5133 = vmatprep.subr.bf16.mxu0 %v11430_v46  ;;  %5174 = vmatprep.subr.bf16.mxu1 %v11436_v3  ;;  %v14340_v46 = vld [vmem:[#allocation77_spill] sm:$0xff]  ;;  %v14341_v3 = vld [vmem:[#allocation62_spill] sm:$0xff] }
0x10fb   :  { %5134 = vmatpush1.bf16.msra.mxu0 %v11442_v52  ;;  %5175 = vmatpush1.bf16.msra.mxu1 %v11448_v59  ;;  %v14342_v52 = vld [vmem:[#allocation63_spill] sm:$0xff]  ;;  %v14343_v59 = vld [vmem:[#allocation61_spill] sm:$0xff] }
0x10fc   :  { %5135 = vmatprep.subr.bf16.mxu0 %v11454_v49  ;;  %5176 = vmatprep.subr.bf16.mxu1 %v11460_v33  ;;  %v14344_v49 = vld [vmem:[#allocation33_spill] sm:$0xff]  ;;  %v14345_v33 = vld [vmem:[#allocation34_spill] sm:$0xff] }
0x10ff   :  { %5136 = vmatpush1.bf16.msra.mxu0 %v11466_v26  ;;  %5177 = vmatpush1.bf16.msra.mxu1 %v11472_v28  ;;  %v14346_v26 = vld [vmem:[#allocation35_spill] sm:$0xff]  ;;  %v14347_v28 = vld [vmem:[#allocation36_spill] sm:$0xff] }
0x1100   :  { %5137 = vmatprep.subr.bf16.mxu0 %v11478_v50  ;;  %5178 = vmatprep.subr.bf16.mxu1 %v11484_v42  ;;  %v14348_v50 = vld [vmem:[#allocation37_spill] sm:$0xff]  ;;  %v14349_v42 = vld [vmem:[#allocation38_spill] sm:$0xff] }
0x1103   :  { %5138 = vmatpush1.bf16.msra.mxu0 %v11490_v15  ;;  %5179 = vmatpush1.bf16.msra.mxu1 %v11496_v23  ;;  %v14350_v15 = vld [vmem:[#allocation39_spill] sm:$0xff]  ;;  %v14351_v23 = vld [vmem:[#allocation40_spill] sm:$0xff] }
0x1104   :  { %5232 = vmatprep.subr.bf16.mxu0 %v11502_v21  ;;  %5273 = vmatprep.subr.bf16.mxu1 %v11508_v38  ;;  %v14352_v21 = vld [vmem:[#allocation41_spill] sm:$0xff]  ;;  %v14353_v38 = vld [vmem:[#allocation42_spill] sm:$0xff] }
0x1106   :  { %5156 = vmatmul.mubr.bf16.vlgmr.msra.gmra.mrb[104].mxu0 %v5019_v62  ;;  %5197 = vmatmul.mubr.bf16.vlgmr.msra.gmra.mrb[100].mxu1 %v5019_v62  ;;  %v14381_v62 = vld [vmem:[#allocation9_spill] sm:$0xff] }
0x1107   :  { %5233 = vmatpush1.bf16.msra.mxu0 %v11514_v51  ;;  %5274 = vmatpush1.bf16.msra.mxu1 %v11520_v35  ;;  %v14354_v51 = vld [vmem:[#allocation43_spill] sm:$0xff]  ;;  %v14355_v35 = vld [vmem:[#allocation44_spill] sm:$0xff] }
0x1108   :  { %5234 = vmatprep.subr.bf16.mxu0 %v11526_v5  ;;  %5275 = vmatprep.subr.bf16.mxu1 %v11532_v14  ;;  %v14356_v5 = vld [vmem:[#allocation45_spill] sm:$0xff]  ;;  %v14357_v14 = vld [vmem:[#allocation46_spill] sm:$0xff] }
0x110b   :  { %5235 = vmatpush1.bf16.msra.mxu0 %v14275_v57  ;;  %5276 = vmatpush1.bf16.msra.mxu1 %v14276_v63  ;;  %v14358_v57 = vld [vmem:[#allocation47_spill] sm:$0xff]  ;;  %v14359_v63 = vld [vmem:[#allocation48_spill] sm:$0xff] }
0x110c   :  { %5236 = vmatprep.subr.bf16.mxu0 %v14277_v60  ;;  %5277 = vmatprep.subr.bf16.mxu1 %v14278_v55  ;;  %v14360_v60 = vld [vmem:[#allocation49_spill] sm:$0xff]  ;;  %v14361_v55 = vld [vmem:[#allocation50_spill] sm:$0xff] }
0x110f   :  { %5237 = vmatpush1.bf16.msra.mxu0 %v14279_v25  ;;  %5278 = vmatpush1.bf16.msra.mxu1 %v14280_v4  ;;  %v14362_v25 = vld [vmem:[#allocation51_spill] sm:$0xff]  ;;  %v14363_v4 = vld [vmem:[#allocation52_spill] sm:$0xff] }
0x1110   :  { %5238 = vmatprep.subr.bf16.mxu0 %v14281_v20  ;;  %5279 = vmatprep.subr.bf16.mxu1 %v14282_v19  ;;  %v14364_v20 = vld [vmem:[#allocation53_spill] sm:$0xff]  ;;  %v14365_v19 = vld [vmem:[#allocation54_spill] sm:$0xff] }
0x1113   :  { %5239 = vmatpush1.bf16.msra.mxu0 %v14283_v41  ;;  %5280 = vmatpush1.bf16.msra.mxu1 %v14284_v58  ;;  %v14366_v41 = vld [vmem:[#allocation55_spill] sm:$0xff]  ;;  %v14367_v58 = vld [vmem:[#allocation56_spill] sm:$0xff] }
0x1114   :  { %5240 = vmatprep.subr.bf16.mxu0 %v14285_v24  ;;  %5281 = vmatprep.subr.bf16.mxu1 %v14286_v12  ;;  %v14368_v24 = vld [vmem:[#allocation57_spill] sm:$0xff]  ;;  %v14369_v12 = vld [vmem:[#allocation58_spill] sm:$0xff] }
0x1117   :  { %5241 = vmatpush1.bf16.msra.mxu0 %v14287_v17  ;;  %5282 = vmatpush1.bf16.msra.mxu1 %v14288_v7  ;;  %v14370_v17 = vld [vmem:[#allocation59_spill] sm:$0xff] }
0x1118   :  { %5242 = vmatprep.subr.bf16.mxu0 %v14289_v1  ;;  %5283 = vmatprep.subr.bf16.mxu1 %v14290_v40  ;;  %v14371_v7 = vld [vmem:[#allocation7_spill] sm:$0xff]  ;;  %v14372_v1 = vld [vmem:[#allocation8_spill] sm:$0xff]  ;;  %v14373_v40 = vld [vmem:[#allocation13_spill] sm:$0xff] }
0x111b   :  { %5243 = vmatpush1.bf16.msra.mxu0 %v14291_v39  ;;  %5284 = vmatpush1.bf16.msra.mxu1 %v14292_v34  ;;  %v14374_v39 = vld [vmem:[#allocation72_spill] sm:$0xff]  ;;  %v14375_v34 = vld [vmem:[#allocation73_spill] sm:$0xff] }
0x111c   :  { %5244 = vmatprep.subr.bf16.mxu0 %v14293_v30  ;;  %5285 = vmatprep.subr.bf16.mxu1 %v14340_v46  ;;  %v14376_v30 = vld [vmem:[#allocation74_spill] sm:$0xff] }
0x111f   :  { %5245 = vmatpush1.bf16.msra.mxu0 %v14341_v3  ;;  %5286 = vmatpush1.bf16.msra.mxu1 %v14342_v52 }
0x1120   :  { %5246 = vmatprep.subr.bf16.mxu0 %v14343_v59  ;;  %5287 = vmatprep.subr.bf16.mxu1 %v14344_v49  ;;  %v14382_v59 = vld [vmem:[#allocation10_spill] sm:$0xff] }
0x1123   :  { %5247 = vmatpush1.bf16.msra.mxu0 %v14345_v33  ;;  %5288 = vmatpush1.bf16.msra.mxu1 %v14346_v26 }
0x1124   :  { %5248 = vmatprep.subr.bf16.mxu0 %v14347_v28  ;;  %5289 = vmatprep.subr.bf16.mxu1 %v14348_v50 }
0x1127   :  { %5249 = vmatpush1.bf16.msra.mxu0 %v14349_v42  ;;  %5290 = vmatpush1.bf16.msra.mxu1 %v14350_v15 }
0x1128   :  { %5250 = vmatprep.subr.bf16.mxu0 %v14351_v23  ;;  %5291 = vmatprep.subr.bf16.mxu1 %v14352_v21  ;;  %v14383_v23 = vld [vmem:[#allocation11_spill] sm:$0xff] }
0x112b   :  { %5251 = vmatpush1.bf16.msra.mxu0 %v14353_v38  ;;  %5292 = vmatpush1.bf16.msra.mxu1 %v14354_v51  ;;  %v14384_v38 = vld [vmem:[#allocation12_spill] sm:$0xff] }
0x112c   :  { %5252 = vmatprep.subr.bf16.mxu0 %v14355_v35  ;;  %5293 = vmatprep.subr.bf16.mxu1 %v14356_v5 }
0x112f   :  { %5253 = vmatpush1.bf16.msra.mxu0 %v14357_v14  ;;  %5294 = vmatpush1.bf16.msra.mxu1 %v14358_v57 }
0x1130   :  { %5254 = vmatprep.subr.bf16.mxu0 %v14359_v63  ;;  %5295 = vmatprep.subr.bf16.mxu1 %v14360_v60 }
0x1133   :  { %5255 = vmatpush1.bf16.msra.mxu0 %v14361_v55  ;;  %5296 = vmatpush1.bf16.msra.mxu1 %v14362_v25 }
0x1134   :  { %5256 = vmatprep.subr.bf16.mxu0 %v14363_v4  ;;  %5297 = vmatprep.subr.bf16.mxu1 %v14364_v20  ;;  %v14385_v20 = vld [vmem:[#allocation60_spill] sm:$0xff] }
0x1137   :  { %5257 = vmatpush1.bf16.msra.mxu0 %v14365_v19  ;;  %5298 = vmatpush1.bf16.msra.mxu1 %v14366_v41 }
0x1138   :  { %5258 = vmatprep.subr.bf16.mxu0 %v14367_v58  ;;  %5299 = vmatprep.subr.bf16.mxu1 %v14368_v24 }
0x113b   :  { %5259 = vmatpush1.bf16.msra.mxu0 %v14369_v12  ;;  %5300 = vmatpush1.bf16.msra.mxu1 %v14370_v17 }
0x113c   :  { %5260 = vmatprep.subr.bf16.mxu0 %v14371_v7  ;;  %5301 = vmatprep.subr.bf16.mxu1 %v14372_v1  ;;  %v14386_v7 = vld [vmem:[#allocation64_spill] sm:$0xff] }
0x113f   :  { %5261 = vmatpush1.bf16.msra.mxu0 %v14373_v40  ;;  %5302 = vmatpush1.bf16.msra.mxu1 %v14374_v39 }
0x1140   :  { %5262 = vmatprep.subr.bf16.mxu0 %v14375_v34  ;;  %5303 = vmatprep.subr.bf16.mxu1 %v14376_v30  ;;  %v14387_v34 = vld [vmem:[#allocation66_spill] sm:$0xff] }
0x1143   :  { %5263 = vmatpush1.bf16.msra.mxu0 %v14377_v31  ;;  %5304 = vmatpush1.bf16.msra.mxu1 %v14378_v9 }
0x1144   :  { %5332 = vmatprep.subr.bf16.mxu0 %v14379_v56  ;;  %5373 = vmatprep.subr.bf16.mxu1 %v14380_v37 }
0x11b9   :  { %v5057_v8 = vpop.f32.mrb[100].mxu0  ;;  %v5098_v44 = vpop.f32.mrb[96].mxu1 }
0x11ba   :  { %v5058_v46 = vadd.f32 %v5057_v8, %v14381_v62  ;;  %v5059_v3 = vpop.f32.mrb[101].mxu0  ;;  %v5100_v52 = vpop.f32.mrb[97].mxu1  ;;  %v5099_v51 = vadd.f32 %v5098_v44, %v14384_v38 }
0x11bb   :  { %v5060_v49 = vadd.f32 %v5059_v3, %v14382_v59  ;;  %v5061_v33 = vpop.f32.mrb[102].mxu0  ;;  %v5102_v26 = vpop.f32.mrb[98].mxu1  ;;  %v5101_v21 = vadd.f32 %v5100_v52, %v14383_v23 }
0x11bc   :  { %v5105_v28 = vmul.f32 0.5, %v5058_v46  ;;  %v5062_v50 = vpop.f32.mrb[103].mxu0  ;;  %v5103_v42 = vpop.f32.mrb[99].mxu1  ;;  %v5107_v35 = vmul.f32 0.5, %v5099_v51  ;;  %v14388_v33 = vld [vmem:[#allocation67_spill] sm:$0xff] }
0x11bd   :  { %v5106_v15 = vmul.f32 0.5, %v5060_v49  ;;  %v14389_v42 = vld [vmem:[#allocation65_spill] sm:$0xff] }
0x11be   :  { %7211 = vtanh.f32 %v5105_v28 }
0x11bf   :  { %7213 = vtanh.f32 %v5106_v15 }
0x11c0   :  { %7215 = vtanh.f32 %v5101_v21 }
0x11c1   :  { %7217 = vtanh.f32 %v5107_v35 }
0x11c8   :  { %v7212_v5 = vpop.eup %7211 }
0x11c9   :  { %v5111_v14 = vmul.f32 0.5, %v7212_v5  ;;  %v7214_v57 = vpop.eup %7213 }
0x11ca   :  { %v5112_v60 = vmul.f32 0.5, %v7214_v57  ;;  %v7216_v55 = vpop.eup %7215 }
0x11cb   :  { %v5114_v63 = vadd.f32 0.5, %v5111_v14  ;;  %v7218_v58 = vpop.eup %7217 }
0x11cc   :  { %v5115_v25 = vadd.f32 0.5, %v5112_v60  ;;  %v5113_v24 = vmul.f32 0.5, %v7218_v58 }
0x11cd   :  { %v5119_v4 = vmul.f32 %v7216_v55, %v5114_v63  ;;  %v5223_v55 = vrot.slane %v12022_v6, 6  ;;  %v12252_v6 = vld [vmem:[%s13338_s12 + $0xa4] ss:$16 sps:$4 sm:$0xff]  }
0x11ce   :  { %v5118_v19 = vmul.f32 %v5115_v25, %v14385_v20  ;;  %v5116_v8 = vadd.f32 0.5, %v5113_v24 }
0x11d0   :  { %v12218_v41 = vadd.f32 %v5119_v4, %v5118_v19 }
0x11d2   :  { %7219 = vtanh.f32 %v12218_v41 }
0x11d9   :  { %v5157_v12 = vpop.f32.mrb[104].mxu0  ;;  %v5198_v17 = vpop.f32.mrb[100].mxu1 }
0x11da   :  { %v5205_v1 = vadd.f32 %v5157_v12, %v14386_v7  ;;  %v5159_v40 = vpop.f32.mrb[105].mxu0  ;;  %v5200_v39 = vpop.f32.mrb[101].mxu1  ;;  %v5207_v15 = vadd.f32 %v5198_v17, %v14389_v42 }
0x11db   :  { %v5206_v30 = vadd.f32 %v5159_v40, %v14387_v34  ;;  %v5161_v31 = vpop.f32.mrb[106].mxu0  ;;  %v5202_v9 = vpop.f32.mrb[102].mxu1  ;;  %v5208_v26 = vadd.f32 %v5200_v39, %v14388_v33  ;;  %v12258_v40 = vld [vmem:[%s13338_s12 + $0xac] ss:$16 sps:$4 sm:$0xff]   ;;  %v12264_v39 = vld [vmem:[%s13338_s12 + $0xa0] ss:$16 sps:$4 sm:$0xff]  }
0x11dc   :  { %v5209_v44 = vmul.f32 0.5, %v5205_v1  ;;  %v5162_v46 = vpop.f32.mrb[107].mxu0  ;;  %v5203_v3 = vpop.f32.mrb[103].mxu1  ;;  %v5211_v21 = vmul.f32 0.5, %v5207_v15  ;;  %v12276_v31 = vld [vmem:[%s13338_s12 + $0xc4] ss:$16 sps:$4 sm:$0xff]  }
0x11dd   :  { %v7220_v52 = vpop.eup %7219  ;;  %v5210_v49 = vmul.f32 0.5, %v5206_v30  ;;  %v12270_v30 = vld [vmem:[%s13338_s12 + $0xa8] ss:$16 sps:$4 sm:$0xff]   ;;  %v12282_v9 = vld [vmem:[%s13338_s12 + $0xcc] ss:$16 sps:$4 sm:$0xff]  }
0x11de   :  { %7221 = vtanh.f32 %v5209_v44  ;;  %v5122_v28 = vmul.f32 %v7220_v52, %v5116_v8  ;;  %v12288_v8 = vld [vmem:[%s13338_s12 + $0xc0] ss:$16 sps:$4 sm:$0xff]   ;;  %v12294_v44 = vld [vmem:[%s13338_s12 + $0xc8] ss:$16 sps:$4 sm:$0xff]   ;;  %v12300_v46 = vld [vmem:[%s13338_s12 + $0xe4] ss:$16 sps:$4 sm:$0xff]  }
0x11df   :  { %7223 = vtanh.f32 %v5210_v49  ;;  %v12306_v3 = vld [vmem:[%s13338_s12 + $0xec] ss:$16 sps:$4 sm:$0xff]   ;;  %v12312_v52 = vld [vmem:[%s13338_s12 + $0xe0] ss:$16 sps:$4 sm:$0xff]   ;;  %v12318_v49 = vld [vmem:[%s13338_s12 + $0xe8] ss:$16 sps:$4 sm:$0xff]  }
0x11e0   :  { %v5231_v50 = vpack.c.bf16 %v5122_v28, %v5122_v28  ;;  %7225 = vtanh.f32 %v5208_v26  ;;  %v12324_v26 = vld [vmem:[%s13339_s13 + $0x4] ss:$16 sps:$4 sm:$0xff]   ;;  %v12330_v28 = vld [vmem:[%s13339_s13 + $0xc] ss:$16 sps:$4 sm:$0xff]   ;;  %v12342_v15 = vld [vmem:[%s13339_s13 + $0x8] ss:$16 sps:$4 sm:$0xff]  }
0x11e1   :  { %7227 = vtanh.f32 %v5211_v21  ;;  %v12348_v21 = vld [vmem:[%s13339_s13 + $0x24] ss:$16 sps:$4 sm:$0xff]  }
0x11e2   :  { %5264 = vmatprep.mubr.bf16.mxu0 %v5231_v50  ;;  %5305 = vmatprep.mubr.bf16.mxu1 %v5231_v50  ;;  %v12336_v50 = vld [vmem:[%s13339_s13] ss:$16 sps:$4 sm:$0xff]  }
0x11e8   :  { %v7222_v51 = vpop.eup %7221 }
0x11e9   :  { %v5215_v35 = vmul.f32 0.5, %v7222_v51  ;;  %v7224_v5 = vpop.eup %7223  ;;  %v12354_v51 = vld [vmem:[%s13339_s13 + $0x2c] ss:$16 sps:$4 sm:$0xff]  }
0x11ea   :  { %v5216_v57 = vmul.f32 0.5, %v7224_v5  ;;  %v7226_v63 = vpop.eup %7225  ;;  %v12366_v5 = vld [vmem:[%s13339_s13 + $0x28] ss:$16 sps:$4 sm:$0xff]  }
0x11eb   :  { %v5218_v14 = vadd.f32 0.5, %v5215_v35  ;;  %v7228_v19 = vpop.eup %7227  ;;  %v12360_v35 = vld [vmem:[%s13339_s13 + $0x20] ss:$16 sps:$4 sm:$0xff]   ;;  %14391 = vst [vmem:[#allocation18_spill] sm:$0xff] %v12366_v5 }
0x11ec   :  { %v5219_v60 = vadd.f32 0.5, %v5216_v57  ;;  %v5217_v58 = vmul.f32 0.5, %v7228_v19  ;;  %14390 = vst [vmem:[#allocation17_spill] sm:$0xff] %v12360_v35  ;;  %v12378_v57 = vld [vmem:[%s13339_s13 + $0x4c] ss:$16 sps:$4 sm:$0xff]  }
0x11ed   :  { %v5226_v25 = vmul.f32 %v7226_v63, %v5218_v14  ;;  %v12372_v14 = vld [vmem:[%s13339_s13 + $0x44] ss:$16 sps:$4 sm:$0xff]   ;;  %14393 = vst [vmem:[#allocation20_spill] sm:$0xff] %v12378_v57  ;;  %v12384_v63 = vld [vmem:[%s13339_s13 + $0x40] ss:$16 sps:$4 sm:$0xff]  }
0x11ee   :  { %v5225_v4 = vmul.f32 %v5223_v55, %v5219_v60  ;;  %v5220_v24 = vadd.f32 0.5, %v5217_v58  ;;  %14392 = vst [vmem:[#allocation19_spill] sm:$0xff] %v12372_v14  ;;  %14394 = vst [vmem:[#allocation3_spill] sm:$0xff] %v12384_v63  ;;  %v12390_v60 = vld [vmem:[%s13339_s13 + $0x48] ss:$16 sps:$4 sm:$0xff]  }
0x11ef   :  { %14395 = vst [vmem:[#allocation5_spill] sm:$0xff] %v12390_v60  ;;  %v12396_v55 = vld [vmem:[%s13339_s13 + $0x64] ss:$16 sps:$4 sm:$0xff]   ;;  %v12414_v19 = vld [vmem:[%s13339_s13 + $0x68] ss:$16 sps:$4 sm:$0xff]  }
0x11f0   :  { %v12226_v20 = vadd.f32 %v5226_v25, %v5225_v4  ;;  %14396 = vst [vmem:[#allocation6_spill] sm:$0xff] %v12396_v55  ;;  %v12402_v25 = vld [vmem:[%s13339_s13 + $0x6c] ss:$16 sps:$4 sm:$0xff]   ;;  %v12408_v4 = vld [vmem:[%s13339_s13 + $0x60] ss:$16 sps:$4 sm:$0xff]   ;;  %14399 = vst [vmem:[#allocation22_spill] sm:$0xff] %v12414_v19 }
0x11f1   :  { %14397 = vst [vmem:[#allocation4_spill] sm:$0xff] %v12402_v25  ;;  %14398 = vst [vmem:[#allocation21_spill] sm:$0xff] %v12408_v4  ;;  %v12420_v58 = vld [vmem:[%s13339_s13 + $0x84] ss:$16 sps:$4 sm:$0xff]  }
0x11f2   :  { %7229 = vtanh.f32 %v12226_v20  ;;  %14400 = vst [vmem:[#allocation23_spill] sm:$0xff] %v12420_v58 }
0x11fc   :  { %v7230_v12 = vpop.eup %7229 }
0x11fd   :  { %v5229_v17 = vmul.f32 %v7230_v12, %v5220_v24  ;;  %v12426_v24 = vld [vmem:[%s13339_s13 + $0x8c] ss:$16 sps:$4 sm:$0xff]   ;;  %v12432_v12 = vld [vmem:[%s13339_s13 + $0x80] ss:$16 sps:$4 sm:$0xff]  }
0x11fe   :  { %14401 = vst [vmem:[#allocation24_spill] sm:$0xff] %v12426_v24  ;;  %14402 = vst [vmem:[#allocation25_spill] sm:$0xff] %v12432_v12 }
0x11ff   :  { %v5230_v1 = vpack.c.bf16 %v5229_v17, %v5229_v17  ;;  %v12438_v17 = vld [vmem:[%s13339_s13 + $0x88] ss:$16 sps:$4 sm:$0xff]  }
0x1200   :  { %14403 = vst [vmem:[#allocation26_spill] sm:$0xff] %v12438_v17 }
0x1201   :  { %5265 = vmatmul.mubr.bf16.vlgmr.msra.gmra.mrb[108].mxu0 %v5230_v1  ;;  %5306 = vmatmul.mubr.bf16.vlgmr.msra.gmra.mrb[104].mxu1 %v5230_v1 }
0x1202   :  { %5333 = vmatpush1.bf16.msra.mxu0 %v12028_v16  ;;  %5374 = vmatpush1.bf16.msra.mxu1 %v12034_v61 }
0x1203   :  { %5334 = vmatprep.subr.bf16.mxu0 %v12040_v0  ;;  %5375 = vmatprep.subr.bf16.mxu1 %v12046_v45 }
0x1204   :  { %5364 = vmatprep.mubr.bf16.mxu0 %v13932_v54  ;;  %5405 = vmatprep.mubr.bf16.mxu1 %v13932_v54 }
0x1206   :  { %5335 = vmatpush1.bf16.msra.mxu0 %v12054_v2  ;;  %5376 = vmatpush1.bf16.msra.mxu1 %v12060_v29 }
0x1207   :  { %5336 = vmatprep.subr.bf16.mxu0 %v12066_v32  ;;  %5377 = vmatprep.subr.bf16.mxu1 %v12072_v18 }
0x120a   :  { %5337 = vmatpush1.bf16.msra.mxu0 %v12078_v43  ;;  %5378 = vmatpush1.bf16.msra.mxu1 %v12084_v48 }
0x120b   :  { %5338 = vmatprep.subr.bf16.mxu0 %v12090_v36  ;;  %5379 = vmatprep.subr.bf16.mxu1 %v12096_v53 }
0x120e   :  { %5339 = vmatpush1.bf16.msra.mxu0 %v12102_v27  ;;  %5380 = vmatpush1.bf16.msra.mxu1 %v12108_v47 }
0x120f   :  { %5340 = vmatprep.subr.bf16.mxu0 %v12114_v11  ;;  %5381 = vmatprep.subr.bf16.mxu1 %v12120_v10 }
0x1212   :  { %5341 = vmatpush1.bf16.msra.mxu0 %v12126_v13  ;;  %5382 = vmatpush1.bf16.msra.mxu1 %v12132_v22 }
0x1213   :  { %5342 = vmatprep.subr.bf16.mxu0 %v12252_v6  ;;  %5383 = vmatprep.subr.bf16.mxu1 %v12258_v40 }
0x1216   :  { %5343 = vmatpush1.bf16.msra.mxu0 %v12264_v39  ;;  %5384 = vmatpush1.bf16.msra.mxu1 %v12270_v30 }
0x1217   :  { %5344 = vmatprep.subr.bf16.mxu0 %v12276_v31  ;;  %5385 = vmatprep.subr.bf16.mxu1 %v12282_v9 }
0x121a   :  { %5345 = vmatpush1.bf16.msra.mxu0 %v12288_v8  ;;  %5386 = vmatpush1.bf16.msra.mxu1 %v12294_v44 }
0x121b   :  { %5346 = vmatprep.subr.bf16.mxu0 %v12300_v46  ;;  %5387 = vmatprep.subr.bf16.mxu1 %v12306_v3 }
0x121e   :  { %5347 = vmatpush1.bf16.msra.mxu0 %v12312_v52  ;;  %5388 = vmatpush1.bf16.msra.mxu1 %v12318_v49 }
0x121f   :  { %5462 = vmatprep.subr.bf16.mxu0 %v12324_v26  ;;  %5503 = vmatprep.subr.bf16.mxu1 %v12330_v28 }
0x1221   :  { %5365 = vmatmul.mubr.bf16.vlgmr.msra.gmra.mrb[112].mxu0 %v5230_v1  ;;  %5406 = vmatmul.mubr.bf16.vlgmr.msra.gmra.mrb[108].mxu1 %v5230_v1  ;;  %v12444_v1 = vld [vmem:[%s13339_s13 + $0xa4] ss:$16 sps:$4 sm:$0xff]  }
0x1222   :  { %5463 = vmatpush1.bf16.msra.mxu0 %v12336_v50  ;;  %5504 = vmatpush1.bf16.msra.mxu1 %v12342_v15  ;;  %14404 = vst [vmem:[#allocation27_spill] sm:$0xff] %v12444_v1 }
0x1223   :  { %5464 = vmatprep.subr.bf16.mxu0 %v12348_v21  ;;  %5505 = vmatprep.subr.bf16.mxu1 %v12354_v51 }
0x1226   :  { %5465 = vmatpush1.bf16.msra.mxu0 %v12360_v35  ;;  %5506 = vmatpush1.bf16.msra.mxu1 %v12366_v5 }
0x1227   :  { %5466 = vmatprep.subr.bf16.mxu0 %v12372_v14  ;;  %5507 = vmatprep.subr.bf16.mxu1 %v12378_v57 }
0x122a   :  { %5467 = vmatpush1.bf16.msra.mxu0 %v12384_v63  ;;  %5508 = vmatpush1.bf16.msra.mxu1 %v12390_v60 }
0x122b   :  { %5468 = vmatprep.subr.bf16.mxu0 %v12396_v55  ;;  %5509 = vmatprep.subr.bf16.mxu1 %v12402_v25 }
0x122e   :  { %5469 = vmatpush1.bf16.msra.mxu0 %v12408_v4  ;;  %5510 = vmatpush1.bf16.msra.mxu1 %v12414_v19 }
0x122f   :  { %5470 = vmatprep.subr.bf16.mxu0 %v12420_v58  ;;  %5511 = vmatprep.subr.bf16.mxu1 %v12426_v24  ;;  %v12450_v24 = vld [vmem:[%s13339_s13 + $0xac] ss:$16 sps:$4 sm:$0xff]  }
0x1230   :  { %14405 = vst [vmem:[#allocation28_spill] sm:$0xff] %v12450_v24 }
0x1232   :  { %5471 = vmatpush1.bf16.msra.mxu0 %v12432_v12  ;;  %5512 = vmatpush1.bf16.msra.mxu1 %v12438_v17  ;;  %v12456_v12 = vld [vmem:[%s13339_s13 + $0xa0] ss:$16 sps:$4 sm:$0xff]   ;;  %v12462_v17 = vld [vmem:[%s13339_s13 + $0xa8] ss:$16 sps:$4 sm:$0xff]  }
0x1233   :  { %5472 = vmatprep.subr.bf16.mxu0 %v12444_v1  ;;  %5513 = vmatprep.subr.bf16.mxu1 %v12450_v24  ;;  %14406 = vst [vmem:[#allocation29_spill] sm:$0xff] %v12456_v12  ;;  %14407 = vst [vmem:[#allocation30_spill] sm:$0xff] %v12462_v17  ;;  %v12468_v1 = vld [vmem:[%s13339_s13 + $0xc4] ss:$16 sps:$4 sm:$0xff]   ;;  %v12474_v24 = vld [vmem:[%s13339_s13 + $0xcc] ss:$16 sps:$4 sm:$0xff]  }
0x1234   :  { %14408 = vst [vmem:[#allocation31_spill] sm:$0xff] %v12468_v1  ;;  %14409 = vst [vmem:[#allocation32_spill] sm:$0xff] %v12474_v24 }
0x1236   :  { %5473 = vmatpush1.bf16.msra.mxu0 %v12456_v12  ;;  %5514 = vmatpush1.bf16.msra.mxu1 %v12462_v17  ;;  %v12480_v12 = vld [vmem:[%s13339_s13 + $0xc0] ss:$16 sps:$4 sm:$0xff]   ;;  %v12486_v17 = vld [vmem:[%s13339_s13 + $0xc8] ss:$16 sps:$4 sm:$0xff]  }
0x1237   :  { %5474 = vmatprep.subr.bf16.mxu0 %v12468_v1  ;;  %5515 = vmatprep.subr.bf16.mxu1 %v12474_v24  ;;  %14410 = vst [vmem:[#allocation14_spill] sm:$0xff] %v12480_v12  ;;  %14411 = vst [vmem:[#allocation77_spill] sm:$0xff] %v12486_v17  ;;  %v12492_v1 = vld [vmem:[%s13339_s13 + $0xe4] ss:$16 sps:$4 sm:$0xff]   ;;  %v12498_v24 = vld [vmem:[%s13339_s13 + $0xec] ss:$16 sps:$4 sm:$0xff]  }
0x1238   :  { %14412 = vst [vmem:[#allocation62_spill] sm:$0xff] %v12492_v1  ;;  %14413 = vst [vmem:[#allocation63_spill] sm:$0xff] %v12498_v24 }
0x123a   :  { %5475 = vmatpush1.bf16.msra.mxu0 %v12480_v12  ;;  %5516 = vmatpush1.bf16.msra.mxu1 %v12486_v17  ;;  %v12504_v12 = vld [vmem:[%s13339_s13 + $0xe0] ss:$16 sps:$4 sm:$0xff]   ;;  %v12510_v17 = vld [vmem:[%s13339_s13 + $0xe8] ss:$16 sps:$4 sm:$0xff]  }
0x123b   :  { %5476 = vmatprep.subr.bf16.mxu0 %v12492_v1  ;;  %5517 = vmatprep.subr.bf16.mxu1 %v12498_v24  ;;  %14414 = vst [vmem:[#allocation61_spill] sm:$0xff] %v12504_v12  ;;  %14415 = vst [vmem:[#allocation33_spill] sm:$0xff] %v12510_v17  ;;  %v12516_v1 = vld [vmem:[%s13339_s13 + $0x104] ss:$16 sps:$4 sm:$0xff]   ;;  %v12522_v24 = vld [vmem:[%s13339_s13 + $0x10c] ss:$16 sps:$4 sm:$0xff]  }
0x123c   :  { %14416 = vst [vmem:[#allocation34_spill] sm:$0xff] %v12516_v1  ;;  %14417 = vst [vmem:[#allocation35_spill] sm:$0xff] %v12522_v24 }
0x123e   :  { %5477 = vmatpush1.bf16.msra.mxu0 %v12504_v12  ;;  %5518 = vmatpush1.bf16.msra.mxu1 %v12510_v17  ;;  %v12528_v12 = vld [vmem:[%s13339_s13 + $0x100] ss:$16 sps:$4 sm:$0xff]   ;;  %v12534_v17 = vld [vmem:[%s13339_s13 + $0x108] ss:$16 sps:$4 sm:$0xff]  }
0x123f   :  { %5478 = vmatprep.subr.bf16.mxu0 %v12516_v1  ;;  %5519 = vmatprep.subr.bf16.mxu1 %v12522_v24  ;;  %14418 = vst [vmem:[#allocation36_spill] sm:$0xff] %v12528_v12  ;;  %14419 = vst [vmem:[#allocation37_spill] sm:$0xff] %v12534_v17  ;;  %v12540_v1 = vld [vmem:[%s13339_s13 + $0x124] ss:$16 sps:$4 sm:$0xff]   ;;  %v12546_v24 = vld [vmem:[%s13339_s13 + $0x12c] ss:$16 sps:$4 sm:$0xff]  }
0x1240   :  { %14420 = vst [vmem:[#allocation38_spill] sm:$0xff] %v12540_v1  ;;  %14421 = vst [vmem:[#allocation39_spill] sm:$0xff] %v12546_v24 }
0x1242   :  { %5479 = vmatpush1.bf16.msra.mxu0 %v12528_v12  ;;  %5520 = vmatpush1.bf16.msra.mxu1 %v12534_v17  ;;  %v12552_v12 = vld [vmem:[%s13339_s13 + $0x120] ss:$16 sps:$4 sm:$0xff]   ;;  %v12558_v17 = vld [vmem:[%s13339_s13 + $0x128] ss:$16 sps:$4 sm:$0xff]  }
0x1243   :  { %5480 = vmatprep.subr.bf16.mxu0 %v12540_v1  ;;  %5521 = vmatprep.subr.bf16.mxu1 %v12546_v24  ;;  %14422 = vst [vmem:[#allocation40_spill] sm:$0xff] %v12552_v12  ;;  %14423 = vst [vmem:[#allocation41_spill] sm:$0xff] %v12558_v17  ;;  %v12564_v1 = vld [vmem:[%s13339_s13 + $0x144] ss:$16 sps:$4 sm:$0xff]   ;;  %v12570_v24 = vld [vmem:[%s13339_s13 + $0x14c] ss:$16 sps:$4 sm:$0xff]  }
0x1244   :  { %14424 = vst [vmem:[#allocation42_spill] sm:$0xff] %v12564_v1  ;;  %14425 = vst [vmem:[#allocation43_spill] sm:$0xff] %v12570_v24 }
0x1246   :  { %5481 = vmatpush1.bf16.msra.mxu0 %v12552_v12  ;;  %5522 = vmatpush1.bf16.msra.mxu1 %v12558_v17  ;;  %v12576_v12 = vld [vmem:[%s13339_s13 + $0x140] ss:$16 sps:$4 sm:$0xff]   ;;  %v12582_v17 = vld [vmem:[%s13339_s13 + $0x148] ss:$16 sps:$4 sm:$0xff]  }
0x1247   :  { %5482 = vmatprep.subr.bf16.mxu0 %v12564_v1  ;;  %5523 = vmatprep.subr.bf16.mxu1 %v12570_v24  ;;  %14426 = vst [vmem:[#allocation44_spill] sm:$0xff] %v12576_v12  ;;  %14427 = vst [vmem:[#allocation45_spill] sm:$0xff] %v12582_v17  ;;  %v12588_v1 = vld [vmem:[%s13339_s13 + $0x164] ss:$16 sps:$4 sm:$0xff]   ;;  %v12594_v24 = vld [vmem:[%s13339_s13 + $0x16c] ss:$16 sps:$4 sm:$0xff]  }
0x1248   :  { %14428 = vst [vmem:[#allocation46_spill] sm:$0xff] %v12588_v1  ;;  %14429 = vst [vmem:[#allocation47_spill] sm:$0xff] %v12594_v24 }
0x124a   :  { %5483 = vmatpush1.bf16.msra.mxu0 %v12576_v12  ;;  %5524 = vmatpush1.bf16.msra.mxu1 %v12582_v17  ;;  %v12600_v12 = vld [vmem:[%s13339_s13 + $0x160] ss:$16 sps:$4 sm:$0xff]   ;;  %v12606_v17 = vld [vmem:[%s13339_s13 + $0x168] ss:$16 sps:$4 sm:$0xff]  }
0x124b   :  { %5484 = vmatprep.subr.bf16.mxu0 %v12588_v1  ;;  %5525 = vmatprep.subr.bf16.mxu1 %v12594_v24  ;;  %14430 = vst [vmem:[#allocation48_spill] sm:$0xff] %v12600_v12  ;;  %14431 = vst [vmem:[#allocation49_spill] sm:$0xff] %v12606_v17  ;;  %v12612_v1 = vld [vmem:[%s13339_s13 + $0x184] ss:$16 sps:$4 sm:$0xff]   ;;  %v12618_v24 = vld [vmem:[%s13339_s13 + $0x18c] ss:$16 sps:$4 sm:$0xff]  }
0x124c   :  { %14432 = vst [vmem:[#allocation50_spill] sm:$0xff] %v12612_v1  ;;  %14433 = vst [vmem:[#allocation51_spill] sm:$0xff] %v12618_v24 }
0x124e   :  { %5485 = vmatpush1.bf16.msra.mxu0 %v12600_v12  ;;  %5526 = vmatpush1.bf16.msra.mxu1 %v12606_v17  ;;  %v12624_v12 = vld [vmem:[%s13339_s13 + $0x180] ss:$16 sps:$4 sm:$0xff]   ;;  %v12630_v17 = vld [vmem:[%s13339_s13 + $0x188] ss:$16 sps:$4 sm:$0xff]  }
0x124f   :  { %5486 = vmatprep.subr.bf16.mxu0 %v12612_v1  ;;  %5527 = vmatprep.subr.bf16.mxu1 %v12618_v24  ;;  %14434 = vst [vmem:[#allocation52_spill] sm:$0xff] %v12624_v12  ;;  %14435 = vst [vmem:[#allocation53_spill] sm:$0xff] %v12630_v17  ;;  %v12636_v1 = vld [vmem:[%s13339_s13 + $0x1a4] ss:$16 sps:$4 sm:$0xff]   ;;  %v12642_v24 = vld [vmem:[%s13339_s13 + $0x1ac] ss:$16 sps:$4 sm:$0xff]  }
0x1250   :  { %14436 = vst [vmem:[#allocation54_spill] sm:$0xff] %v12636_v1  ;;  %14437 = vst [vmem:[#allocation55_spill] sm:$0xff] %v12642_v24 }
0x1252   :  { %5487 = vmatpush1.bf16.msra.mxu0 %v12624_v12  ;;  %5528 = vmatpush1.bf16.msra.mxu1 %v12630_v17  ;;  %v12648_v12 = vld [vmem:[%s13339_s13 + $0x1a0] ss:$16 sps:$4 sm:$0xff]   ;;  %v12654_v17 = vld [vmem:[%s13339_s13 + $0x1a8] ss:$16 sps:$4 sm:$0xff]  }
0x1253   :  { %5488 = vmatprep.subr.bf16.mxu0 %v12636_v1  ;;  %5529 = vmatprep.subr.bf16.mxu1 %v12642_v24  ;;  %14438 = vst [vmem:[#allocation56_spill] sm:$0xff] %v12648_v12  ;;  %14439 = vst [vmem:[#allocation57_spill] sm:$0xff] %v12654_v17  ;;  %v12660_v1 = vld [vmem:[%s13339_s13 + $0x1c4] ss:$16 sps:$4 sm:$0xff]   ;;  %v12666_v24 = vld [vmem:[%s13339_s13 + $0x1cc] ss:$16 sps:$4 sm:$0xff]  }
0x1254   :  { %14440 = vst [vmem:[#allocation58_spill] sm:$0xff] %v12660_v1  ;;  %14441 = vst [vmem:[#allocation59_spill] sm:$0xff] %v12666_v24 }
0x1256   :  { %5489 = vmatpush1.bf16.msra.mxu0 %v12648_v12  ;;  %5530 = vmatpush1.bf16.msra.mxu1 %v12654_v17  ;;  %v12672_v12 = vld [vmem:[%s13339_s13 + $0x1c0] ss:$16 sps:$4 sm:$0xff]   ;;  %v12678_v17 = vld [vmem:[%s13339_s13 + $0x1c8] ss:$16 sps:$4 sm:$0xff]  }
0x1257   :  { %5490 = vmatprep.subr.bf16.mxu0 %v12660_v1  ;;  %5531 = vmatprep.subr.bf16.mxu1 %v12666_v24  ;;  %14442 = vst [vmem:[#allocation7_spill] sm:$0xff] %v12672_v12  ;;  %14443 = vst [vmem:[#allocation8_spill] sm:$0xff] %v12678_v17  ;;  %v12684_v1 = vld [vmem:[%s13339_s13 + $0x1e4] ss:$16 sps:$4 sm:$0xff]   ;;  %v12690_v24 = vld [vmem:[%s13339_s13 + $0x1ec] ss:$16 sps:$4 sm:$0xff]  }
0x1258   :  { %14444 = vst [vmem:[#allocation13_spill] sm:$0xff] %v12684_v1  ;;  %14445 = vst [vmem:[#allocation72_spill] sm:$0xff] %v12690_v24 }
0x125a   :  { %5491 = vmatpush1.bf16.msra.mxu0 %v12672_v12  ;;  %5532 = vmatpush1.bf16.msra.mxu1 %v12678_v17  ;;  %v12696_v12 = vld [vmem:[%s13339_s13 + $0x1e0] ss:$16 sps:$4 sm:$0xff]   ;;  %v12702_v17 = vld [vmem:[%s13339_s13 + $0x1e8] ss:$16 sps:$4 sm:$0xff]  }
0x125b   :  { %5492 = vmatprep.subr.bf16.mxu0 %v12684_v1  ;;  %5533 = vmatprep.subr.bf16.mxu1 %v12690_v24  ;;  %14446 = vst [vmem:[#allocation73_spill] sm:$0xff] %v12696_v12  ;;  %14447 = vst [vmem:[#allocation74_spill] sm:$0xff] %v12702_v17 }
0x125e   :  { %5493 = vmatpush1.bf16.msra.mxu0 %v12696_v12  ;;  %5534 = vmatpush1.bf16.msra.mxu1 %v12702_v17 }
0x125f   :  { %5562 = vmatprep.subr.bf16.mxu0 %v14379_v56  ;;  %5603 = vmatprep.subr.bf16.mxu1 %v14380_v37 }
0x12d4   :  { %v5266_v1 = vpop.f32.mrb[108].mxu0  ;;  %v5307_v24 = vpop.f32.mrb[104].mxu1 }
0x12d5   :  { %v5267_v58 = vadd.f32 %v5266_v1, %v14381_v62  ;;  %v5268_v19 = vpop.f32.mrb[109].mxu0  ;;  %v5309_v4 = vpop.f32.mrb[105].mxu1  ;;  %v5308_v56 = vadd.f32 %v5307_v24, %v14384_v38 }
0x12d6   :  { %v5269_v25 = vadd.f32 %v5268_v19, %v14382_v59  ;;  %v5270_v12 = vpop.f32.mrb[110].mxu0  ;;  %v5311_v55 = vpop.f32.mrb[106].mxu1  ;;  %v5310_v17 = vadd.f32 %v5309_v4, %v14383_v23 }
0x12d7   :  { %v5314_v60 = vmul.f32 0.5, %v5267_v58  ;;  %v5271_v63 = vpop.f32.mrb[111].mxu0  ;;  %v5312_v57 = vpop.f32.mrb[107].mxu1  ;;  %v5316_v37 = vmul.f32 0.5, %v5308_v56 }
0x12d8   :  { %v5315_v14 = vmul.f32 0.5, %v5269_v25 }
0x12d9   :  { %7231 = vtanh.f32 %v5314_v60 }
0x12da   :  { %7233 = vtanh.f32 %v5315_v14 }
0x12db   :  { %7235 = vtanh.f32 %v5310_v17 }
0x12dc   :  { %7237 = vtanh.f32 %v5316_v37 }
0x12e3   :  { %v7232_v5 = vpop.eup %7231 }
0x12e4   :  { %v5320_v1 = vmul.f32 0.5, %v7232_v5  ;;  %v7234_v62 = vpop.eup %7233 }
0x12e5   :  { %v5321_v19 = vmul.f32 0.5, %v7234_v62  ;;  %v7236_v12 = vpop.eup %7235 }
0x12e6   :  { %v5323_v35 = vadd.f32 0.5, %v5320_v1  ;;  %v7238_v14 = vpop.eup %7237 }
0x12e7   :  { %v5324_v55 = vadd.f32 0.5, %v5321_v19  ;;  %v5322_v60 = vmul.f32 0.5, %v7238_v14 }
0x12e8   :  { %v5328_v58 = vmul.f32 %v7236_v12, %v5323_v35 }
0x12e9   :  { %v5327_v57 = vmul.f32 %v5324_v55, %v12218_v41  ;;  %v5325_v62 = vadd.f32 0.5, %v5322_v60 }
0x12eb   :  { %v12712_v63 = vadd.f32 %v5328_v58, %v5327_v57 }
0x12ed   :  { %14448 = vst [vmem:[#allocation75_spill] sm:$0xff] %v12712_v63  ;;  %7239 = vtanh.f32 %v12712_v63 }
0x12f4   :  { %v5366_v25 = vpop.f32.mrb[112].mxu0  ;;  %v5407_v4 = vpop.f32.mrb[108].mxu1 }
0x12f5   :  { %v5418_v24 = vrot.slane %v5366_v25, 6  ;;  %v5368_v17 = vpop.f32.mrb[113].mxu0  ;;  %v5409_v5 = vpop.f32.mrb[109].mxu1  ;;  %v5420_v23 = vrot.slane %v5407_v4, 6 }
0x12f6   :  { %v5419_v56 = vrot.slane %v5368_v17, 6  ;;  %v5370_v1 = vpop.f32.mrb[114].mxu0  ;;  %v5411_v37 = vpop.f32.mrb[110].mxu1  ;;  %v5421_v35 = vrot.slane %v5409_v5, 6 }
0x12f7   :  { %v5426_v19 = vadd.f32 %v5418_v24, %v14386_v7  ;;  %v5371_v12 = vpop.f32.mrb[115].mxu0  ;;  %v5412_v41 = vpop.f32.mrb[111].mxu1  ;;  %v5428_v24 = vadd.f32 %v5420_v23, %v14389_v42 }
0x12f8   :  { %v7240_v55 = vpop.eup %7239  ;;  %v5427_v58 = vadd.f32 %v5419_v56, %v14387_v34  ;;  %v5429_v25 = vadd.f32 %v5421_v35, %v14388_v33 }
0x12f9   :  { %v5430_v57 = vmul.f32 0.5, %v5426_v19  ;;  %v5331_v63 = vmul.f32 %v7240_v55, %v5325_v62  ;;  %v5432_v5 = vmul.f32 0.5, %v5428_v24  ;;  %v14469_v24 = vld [vmem:[#allocation14_spill] sm:$0xff] }
0x12fa   :  { %v5431_v14 = vmul.f32 0.5, %v5427_v58 }
0x12fb   :  { %7241 = vtanh.f32 %v5430_v57  ;;  %v5452_v38 = vrot.slane %v5331_v63, 6  ;;  %v5444_v63 = vrot.slane %v12226_v20, 6  ;;  %v14467_v20 = vld [vmem:[#allocation31_spill] sm:$0xff] }
0x12fc   :  { %7243 = vtanh.f32 %v5431_v14 }
0x12fd   :  { %v5455_v17 = vpack.c.bf16 %v5452_v38, %v5452_v38  ;;  %7245 = vtanh.f32 %v5429_v25 }
0x12fe   :  { %7247 = vtanh.f32 %v5432_v5  ;;  %v14470_v5 = vld [vmem:[#allocation77_spill] sm:$0xff] }
0x12ff   :  { %v5459_v60 = vrot.slane %v5455_v17, 1 }
0x1301   :  { %5494 = vmatprep.mubr.bf16.mxu0 %v5459_v60  ;;  %5535 = vmatprep.mubr.bf16.mxu1 %v5459_v60  ;;  %v14468_v60 = vld [vmem:[#allocation32_spill] sm:$0xff] }
0x1305   :  { %v7242_v1 = vpop.eup %7241 }
0x1306   :  { %v5436_v37 = vmul.f32 0.5, %v7242_v1  ;;  %v7244_v56 = vpop.eup %7243  ;;  %v14471_v1 = vld [vmem:[#allocation62_spill] sm:$0xff] }
0x1307   :  { %v5437_v62 = vmul.f32 0.5, %v7244_v56  ;;  %v7246_v12 = vpop.eup %7245  ;;  %v14473_v56 = vld [vmem:[#allocation61_spill] sm:$0xff] }
0x1308   :  { %v5439_v19 = vadd.f32 0.5, %v5436_v37  ;;  %v7248_v23 = vpop.eup %7247  ;;  %v14472_v37 = vld [vmem:[#allocation63_spill] sm:$0xff] }
0x1309   :  { %v5440_v41 = vadd.f32 0.5, %v5437_v62  ;;  %v5438_v55 = vmul.f32 0.5, %v7248_v23  ;;  %v14475_v62 = vld [vmem:[#allocation34_spill] sm:$0xff]  ;;  %v14481_v23 = vld [vmem:[#allocation40_spill] sm:$0xff] }
0x130a   :  { %v5447_v4 = vmul.f32 %v7246_v12, %v5439_v19  ;;  %v14474_v19 = vld [vmem:[#allocation33_spill] sm:$0xff]  ;;  %v14476_v12 = vld [vmem:[#allocation35_spill] sm:$0xff] }
0x130b   :  { %v5446_v35 = vmul.f32 %v5444_v63, %v5440_v41  ;;  %v5441_v58 = vadd.f32 0.5, %v5438_v55  ;;  %v14477_v41 = vld [vmem:[#allocation36_spill] sm:$0xff]  ;;  %v14478_v63 = vld [vmem:[#allocation37_spill] sm:$0xff] }
0x130c   :  { %v14482_v55 = vld [vmem:[#allocation41_spill] sm:$0xff] }
0x130d   :  { %v12720_v38 = vadd.f32 %v5447_v4, %v5446_v35  ;;  %v14479_v4 = vld [vmem:[#allocation38_spill] sm:$0xff]  ;;  %v14480_v35 = vld [vmem:[#allocation39_spill] sm:$0xff] }
0x130f   :  { %7249 = vtanh.f32 %v12720_v38 }
0x1319   :  { %v7250_v57 = vpop.eup %7249 }
0x131a   :  { %v5450_v14 = vmul.f32 %v7250_v57, %v5441_v58  ;;  %v14483_v58 = vld [vmem:[#allocation42_spill] sm:$0xff]  ;;  %v14484_v57 = vld [vmem:[#allocation43_spill] sm:$0xff] }
0x131c   :  { %v5454_v25 = vpack.c.bf16 %v5450_v14, %v5450_v14  ;;  %v14485_v14 = vld [vmem:[#allocation44_spill] sm:$0xff] }
0x131e   :  { %v5458_v17 = vrot.slane %v5454_v25, 1  ;;  %v14486_v25 = vld [vmem:[#allocation45_spill] sm:$0xff] }
0x1320   :  { %5495 = vmatmul.mubr.bf16.vlgmr.msra.gmra.mrb[116].mxu0 %v5458_v17  ;;  %5536 = vmatmul.mubr.bf16.vlgmr.msra.gmra.mrb[112].mxu1 %v5458_v17 }
0x1321   :  { %5563 = vmatpush1.bf16.msra.mxu0 %v12028_v16  ;;  %5604 = vmatpush1.bf16.msra.mxu1 %v12034_v61  ;;  %v14449_v16 = vld [vmem:[#allocation17_spill] sm:$0xff]  ;;  %v14450_v61 = vld [vmem:[#allocation18_spill] sm:$0xff] }
0x1322   :  { %5564 = vmatprep.subr.bf16.mxu0 %v12040_v0  ;;  %5605 = vmatprep.subr.bf16.mxu1 %v12046_v45  ;;  %v14451_v0 = vld [vmem:[#allocation19_spill] sm:$0xff]  ;;  %v14452_v45 = vld [vmem:[#allocation20_spill] sm:$0xff] }
0x1323   :  { %5594 = vmatprep.mubr.bf16.mxu0 %v13932_v54  ;;  %5635 = vmatprep.mubr.bf16.mxu1 %v13932_v54 }
0x1325   :  { %5565 = vmatpush1.bf16.msra.mxu0 %v12054_v2  ;;  %5606 = vmatpush1.bf16.msra.mxu1 %v12060_v29  ;;  %v14453_v2 = vld [vmem:[#allocation3_spill] sm:$0xff]  ;;  %v14454_v29 = vld [vmem:[#allocation5_spill] sm:$0xff] }
0x1326   :  { %5566 = vmatprep.subr.bf16.mxu0 %v12066_v32  ;;  %5607 = vmatprep.subr.bf16.mxu1 %v12072_v18  ;;  %v14455_v32 = vld [vmem:[#allocation6_spill] sm:$0xff]  ;;  %v14456_v18 = vld [vmem:[#allocation4_spill] sm:$0xff] }
0x1329   :  { %5567 = vmatpush1.bf16.msra.mxu0 %v12078_v43  ;;  %5608 = vmatpush1.bf16.msra.mxu1 %v12084_v48  ;;  %v14457_v43 = vld [vmem:[#allocation21_spill] sm:$0xff]  ;;  %v14458_v48 = vld [vmem:[#allocation22_spill] sm:$0xff] }
0x132a   :  { %5568 = vmatprep.subr.bf16.mxu0 %v12090_v36  ;;  %5609 = vmatprep.subr.bf16.mxu1 %v12096_v53  ;;  %v14459_v36 = vld [vmem:[#allocation23_spill] sm:$0xff]  ;;  %v14460_v53 = vld [vmem:[#allocation24_spill] sm:$0xff] }
0x132d   :  { %5569 = vmatpush1.bf16.msra.mxu0 %v12102_v27  ;;  %5610 = vmatpush1.bf16.msra.mxu1 %v12108_v47  ;;  %v14461_v27 = vld [vmem:[#allocation25_spill] sm:$0xff]  ;;  %v14462_v47 = vld [vmem:[#allocation26_spill] sm:$0xff] }
0x132e   :  { %5570 = vmatprep.subr.bf16.mxu0 %v12114_v11  ;;  %5611 = vmatprep.subr.bf16.mxu1 %v12120_v10  ;;  %v14463_v11 = vld [vmem:[#allocation27_spill] sm:$0xff]  ;;  %v14464_v10 = vld [vmem:[#allocation28_spill] sm:$0xff] }
0x1331   :  { %5571 = vmatpush1.bf16.msra.mxu0 %v12126_v13  ;;  %5612 = vmatpush1.bf16.msra.mxu1 %v12132_v22  ;;  %v14465_v13 = vld [vmem:[#allocation29_spill] sm:$0xff]  ;;  %v14466_v22 = vld [vmem:[#allocation30_spill] sm:$0xff] }
0x1332   :  { %5572 = vmatprep.subr.bf16.mxu0 %v12252_v6  ;;  %5613 = vmatprep.subr.bf16.mxu1 %v12258_v40 }
0x1335   :  { %5573 = vmatpush1.bf16.msra.mxu0 %v12264_v39  ;;  %5614 = vmatpush1.bf16.msra.mxu1 %v12270_v30 }
0x1336   :  { %5574 = vmatprep.subr.bf16.mxu0 %v12276_v31  ;;  %5615 = vmatprep.subr.bf16.mxu1 %v12282_v9 }
0x1339   :  { %5575 = vmatpush1.bf16.msra.mxu0 %v12288_v8  ;;  %5616 = vmatpush1.bf16.msra.mxu1 %v12294_v44 }
0x133a   :  { %5576 = vmatprep.subr.bf16.mxu0 %v12300_v46  ;;  %5617 = vmatprep.subr.bf16.mxu1 %v12306_v3 }
0x133d   :  { %5577 = vmatpush1.bf16.msra.mxu0 %v12312_v52  ;;  %5618 = vmatpush1.bf16.msra.mxu1 %v12318_v49 }
0x133e   :  { %5692 = vmatprep.subr.bf16.mxu0 %v12324_v26  ;;  %5733 = vmatprep.subr.bf16.mxu1 %v12330_v28 }
0x1340   :  { %5595 = vmatmul.mubr.bf16.vlgmr.msra.gmra.mrb[120].mxu0 %v5458_v17  ;;  %5636 = vmatmul.mubr.bf16.vlgmr.msra.gmra.mrb[116].mxu1 %v5458_v17  ;;  %v14487_v17 = vld [vmem:[#allocation46_spill] sm:$0xff] }
0x1341   :  { %5693 = vmatpush1.bf16.msra.mxu0 %v12336_v50  ;;  %5734 = vmatpush1.bf16.msra.mxu1 %v12342_v15 }
0x1342   :  { %5694 = vmatprep.subr.bf16.mxu0 %v12348_v21  ;;  %5735 = vmatprep.subr.bf16.mxu1 %v12354_v51 }
0x1345   :  { %5695 = vmatpush1.bf16.msra.mxu0 %v14449_v16  ;;  %5736 = vmatpush1.bf16.msra.mxu1 %v14450_v61 }
0x1346   :  { %5696 = vmatprep.subr.bf16.mxu0 %v14451_v0  ;;  %5737 = vmatprep.subr.bf16.mxu1 %v14452_v45 }
0x1349   :  { %5697 = vmatpush1.bf16.msra.mxu0 %v14453_v2  ;;  %5738 = vmatpush1.bf16.msra.mxu1 %v14454_v29 }
0x134a   :  { %5698 = vmatprep.subr.bf16.mxu0 %v14455_v32  ;;  %5739 = vmatprep.subr.bf16.mxu1 %v14456_v18 }
0x134d   :  { %5699 = vmatpush1.bf16.msra.mxu0 %v14457_v43  ;;  %5740 = vmatpush1.bf16.msra.mxu1 %v14458_v48 }
0x134e   :  { %5700 = vmatprep.subr.bf16.mxu0 %v14459_v36  ;;  %5741 = vmatprep.subr.bf16.mxu1 %v14460_v53 }
0x1351   :  { %5701 = vmatpush1.bf16.msra.mxu0 %v14461_v27  ;;  %5742 = vmatpush1.bf16.msra.mxu1 %v14462_v47 }
0x1352   :  { %5702 = vmatprep.subr.bf16.mxu0 %v14463_v11  ;;  %5743 = vmatprep.subr.bf16.mxu1 %v14464_v10 }
0x1355   :  { %5703 = vmatpush1.bf16.msra.mxu0 %v14465_v13  ;;  %5744 = vmatpush1.bf16.msra.mxu1 %v14466_v22 }
0x1356   :  { %5704 = vmatprep.subr.bf16.mxu0 %v14467_v20  ;;  %5745 = vmatprep.subr.bf16.mxu1 %v14468_v60 }
0x1359   :  { %5705 = vmatpush1.bf16.msra.mxu0 %v14469_v24  ;;  %5746 = vmatpush1.bf16.msra.mxu1 %v14470_v5 }
0x135a   :  { %5706 = vmatprep.subr.bf16.mxu0 %v14471_v1  ;;  %5747 = vmatprep.subr.bf16.mxu1 %v14472_v37 }
0x135d   :  { %5707 = vmatpush1.bf16.msra.mxu0 %v14473_v56  ;;  %5748 = vmatpush1.bf16.msra.mxu1 %v14474_v19  ;;  %v14510_v56 = vld [vmem:[#allocation11_spill] sm:$0xff] }
0x135e   :  { %5708 = vmatprep.subr.bf16.mxu0 %v14475_v62  ;;  %5749 = vmatprep.subr.bf16.mxu1 %v14476_v12 }
0x1361   :  { %5709 = vmatpush1.bf16.msra.mxu0 %v14477_v41  ;;  %5750 = vmatpush1.bf16.msra.mxu1 %v14478_v63  ;;  %v14488_v41 = vld [vmem:[#allocation47_spill] sm:$0xff]  ;;  %v14489_v63 = vld [vmem:[#allocation48_spill] sm:$0xff] }
0x1362   :  { %5710 = vmatprep.subr.bf16.mxu0 %v14479_v4  ;;  %5751 = vmatprep.subr.bf16.mxu1 %v14480_v35  ;;  %v14490_v4 = vld [vmem:[#allocation49_spill] sm:$0xff]  ;;  %v14491_v35 = vld [vmem:[#allocation50_spill] sm:$0xff] }
0x1365   :  { %5711 = vmatpush1.bf16.msra.mxu0 %v14481_v23  ;;  %5752 = vmatpush1.bf16.msra.mxu1 %v14482_v55  ;;  %v14492_v23 = vld [vmem:[#allocation51_spill] sm:$0xff]  ;;  %v14493_v55 = vld [vmem:[#allocation52_spill] sm:$0xff] }
0x1366   :  { %5712 = vmatprep.subr.bf16.mxu0 %v14483_v58  ;;  %5753 = vmatprep.subr.bf16.mxu1 %v14484_v57  ;;  %v14494_v58 = vld [vmem:[#allocation53_spill] sm:$0xff]  ;;  %v14495_v57 = vld [vmem:[#allocation54_spill] sm:$0xff] }
0x1369   :  { %5713 = vmatpush1.bf16.msra.mxu0 %v14485_v14  ;;  %5754 = vmatpush1.bf16.msra.mxu1 %v14486_v25  ;;  %v14496_v14 = vld [vmem:[#allocation55_spill] sm:$0xff]  ;;  %v14497_v25 = vld [vmem:[#allocation56_spill] sm:$0xff] }
0x136a   :  { %5714 = vmatprep.subr.bf16.mxu0 %v14487_v17  ;;  %5755 = vmatprep.subr.bf16.mxu1 %v14488_v41  ;;  %v14498_v17 = vld [vmem:[#allocation57_spill] sm:$0xff]  ;;  %v14499_v41 = vld [vmem:[#allocation58_spill] sm:$0xff] }
0x136d   :  { %5715 = vmatpush1.bf16.msra.mxu0 %v14489_v63  ;;  %5756 = vmatpush1.bf16.msra.mxu1 %v14490_v4  ;;  %v14500_v63 = vld [vmem:[#allocation59_spill] sm:$0xff] }
0x136e   :  { %5716 = vmatprep.subr.bf16.mxu0 %v14491_v35  ;;  %5757 = vmatprep.subr.bf16.mxu1 %v14492_v23  ;;  %v14501_v4 = vld [vmem:[#allocation7_spill] sm:$0xff]  ;;  %v14502_v35 = vld [vmem:[#allocation8_spill] sm:$0xff]  ;;  %v14503_v23 = vld [vmem:[#allocation13_spill] sm:$0xff] }
0x1371   :  { %5717 = vmatpush1.bf16.msra.mxu0 %v14493_v55  ;;  %5758 = vmatpush1.bf16.msra.mxu1 %v14494_v58  ;;  %v14504_v55 = vld [vmem:[#allocation72_spill] sm:$0xff]  ;;  %v14505_v58 = vld [vmem:[#allocation73_spill] sm:$0xff] }
0x1372   :  { %5718 = vmatprep.subr.bf16.mxu0 %v14495_v57  ;;  %5759 = vmatprep.subr.bf16.mxu1 %v14496_v14  ;;  %v14506_v57 = vld [vmem:[#allocation74_spill] sm:$0xff] }
0x1375   :  { %5719 = vmatpush1.bf16.msra.mxu0 %v14497_v25  ;;  %5760 = vmatpush1.bf16.msra.mxu1 %v14498_v17  ;;  %v12822_v17 = vld [vmem:[%s13338_s12 + $0x4] ss:$16 sps:$4 sm:$0xff]  }
0x1376   :  { %5720 = vmatprep.subr.bf16.mxu0 %v14499_v41  ;;  %5761 = vmatprep.subr.bf16.mxu1 %v14500_v63  ;;  %14507 = vst [vmem:[#allocation76_spill] sm:$0xff] %v12822_v17 }
0x1379   :  { %5721 = vmatpush1.bf16.msra.mxu0 %v14501_v4  ;;  %5762 = vmatpush1.bf16.msra.mxu1 %v14502_v35  ;;  %v12828_v4 = vld [vmem:[%s13338_s12 + $0xc] ss:$16 sps:$4 sm:$0xff]   ;;  %v14509_v35 = vld [vmem:[#allocation9_spill] sm:$0xff] }
0x137a   :  { %5722 = vmatprep.subr.bf16.mxu0 %v14503_v23  ;;  %5763 = vmatprep.subr.bf16.mxu1 %v14504_v55  ;;  %14508 = vst [vmem:[#allocation15_spill] sm:$0xff] %v12828_v4 }
0x137d   :  { %5723 = vmatpush1.bf16.msra.mxu0 %v14505_v58  ;;  %5764 = vmatpush1.bf16.msra.mxu1 %v14506_v57 }
0x137e   :  { %5792 = vmatprep.subr.bf16.mxu0 %v12822_v17  ;;  %5833 = vmatprep.subr.bf16.mxu1 %v12828_v4  ;;  %v14511_v4 = vld [vmem:[#allocation12_spill] sm:$0xff] }
0x13f3   :  { %v5496_v23 = vpop.f32.mrb[116].mxu0  ;;  %v5537_v55 = vpop.f32.mrb[112].mxu1 }
0x13f4   :  { %v5497_v58 = vadd.f32 %v5496_v23, %v14509_v35  ;;  %v5498_v63 = vpop.f32.mrb[117].mxu0  ;;  %v5539_v57 = vpop.f32.mrb[113].mxu1  ;;  %v5538_v1 = vadd.f32 %v5537_v55, %v14511_v4 }
0x13f5   :  { %v5499_v41 = vadd.f32 %v5498_v63, %v14382_v59  ;;  %v5500_v25 = vpop.f32.mrb[118].mxu0  ;;  %v5541_v14 = vpop.f32.mrb[114].mxu1  ;;  %v5540_v37 = vadd.f32 %v5539_v57, %v14510_v56 }
0x13f6   :  { %v5544_v12 = vmul.f32 0.5, %v5497_v58  ;;  %v5501_v62 = vpop.f32.mrb[119].mxu0  ;;  %v5542_v17 = vpop.f32.mrb[115].mxu1  ;;  %v5546_v5 = vmul.f32 0.5, %v5538_v1 }
0x13f7   :  { %v5545_v19 = vmul.f32 0.5, %v5499_v41  ;;  %v14512_v62 = vld [vmem:[#allocation75_spill] sm:$0xff] }
0x13f8   :  { %7251 = vtanh.f32 %v5544_v12 }
0x13f9   :  { %7253 = vtanh.f32 %v5545_v19 }
0x13fa   :  { %7255 = vtanh.f32 %v5540_v37 }
0x13fb   :  { %7257 = vtanh.f32 %v5546_v5 }
0x1402   :  { %v7252_v24 = vpop.eup %7251 }
0x1403   :  { %v5550_v23 = vmul.f32 0.5, %v7252_v24  ;;  %v7254_v35 = vpop.eup %7253 }
0x1404   :  { %v5551_v63 = vmul.f32 0.5, %v7254_v35  ;;  %v7256_v25 = vpop.eup %7255 }
0x1405   :  { %v5553_v60 = vadd.f32 0.5, %v5550_v23  ;;  %v7258_v19 = vpop.eup %7257 }
0x1406   :  { %v5554_v14 = vadd.f32 0.5, %v5551_v63  ;;  %v5552_v37 = vmul.f32 0.5, %v7258_v19 }
0x1407   :  { %v5558_v58 = vmul.f32 %v7256_v25, %v5553_v60 }
0x1408   :  { %v5557_v17 = vmul.f32 %v5554_v14, %v14512_v62  ;;  %v5555_v35 = vadd.f32 0.5, %v5552_v37 }
0x140a   :  { %v12836_v41 = vadd.f32 %v5558_v58, %v5557_v17 }
0x140c   :  { %14513 = vst [vmem:[#allocation16_spill] sm:$0xff] %v12836_v41  ;;  %7259 = vtanh.f32 %v12836_v41 }
0x1413   :  { %v5596_v12 = vpop.f32.mrb[120].mxu0  ;;  %v5637_v55 = vpop.f32.mrb[116].mxu1 }
0x1414   :  { %v5648_v1 = vrot.slane %v5596_v12, 4  ;;  %v5598_v57 = vpop.f32.mrb[121].mxu0  ;;  %v5639_v24 = vpop.f32.mrb[117].mxu1  ;;  %v5650_v59 = vrot.slane %v5637_v55, 4 }
0x1415   :  { %v5649_v4 = vrot.slane %v5598_v57, 4  ;;  %v5600_v23 = vpop.f32.mrb[122].mxu0  ;;  %v5641_v5 = vpop.f32.mrb[118].mxu1  ;;  %v5651_v60 = vrot.slane %v5639_v24, 4 }
0x1416   :  { %v5656_v63 = vadd.f32 %v5648_v1, %v14386_v7  ;;  %v5601_v25 = vpop.f32.mrb[123].mxu0  ;;  %v5642_v14 = vpop.f32.mrb[119].mxu1  ;;  %v5658_v1 = vadd.f32 %v5650_v59, %v14389_v42 }
0x1417   :  { %v7260_v58 = vpop.eup %7259  ;;  %v5657_v62 = vadd.f32 %v5649_v4, %v14387_v34  ;;  %v5659_v12 = vadd.f32 %v5651_v60, %v14388_v33 }
0x1418   :  { %v5660_v17 = vmul.f32 0.5, %v5656_v63  ;;  %v5561_v41 = vmul.f32 %v7260_v58, %v5555_v35  ;;  %v5662_v24 = vmul.f32 0.5, %v5658_v1  ;;  %v12862_v1 = vld [vmem:[%s13338_s12 + $0x24] ss:$16 sps:$4 sm:$0xff]  }
0x1419   :  { %v5661_v19 = vmul.f32 0.5, %v5657_v62 }
0x141a   :  { %7261 = vtanh.f32 %v5660_v17  ;;  %v5682_v56 = vrot.slane %v5561_v41, 4  ;;  %v5674_v41 = vrot.slane %v12720_v38, 6  ;;  %v12856_v38 = vld [vmem:[%s13338_s12 + $0x8] ss:$16 sps:$4 sm:$0xff]  }
0x141b   :  { %7263 = vtanh.f32 %v5661_v19 }
0x141c   :  { %v5685_v57 = vpack.c.bf16 %v5682_v56, %v5682_v56  ;;  %7265 = vtanh.f32 %v5659_v12 }
0x141d   :  { %7267 = vtanh.f32 %v5662_v24  ;;  %v12868_v24 = vld [vmem:[%s13338_s12 + $0x2c] ss:$16 sps:$4 sm:$0xff]  }
0x141e   :  { %v5689_v37 = vrot.slane %v5685_v57, 2 }
0x1420   :  { %5724 = vmatprep.mubr.bf16.mxu0 %v5689_v37  ;;  %5765 = vmatprep.mubr.bf16.mxu1 %v5689_v37  ;;  %v12850_v37 = vld [vmem:[%s13338_s12] ss:$16 sps:$4 sm:$0xff]  }
0x1424   :  { %v7262_v23 = vpop.eup %7261 }
0x1425   :  { %v5666_v5 = vmul.f32 0.5, %v7262_v23  ;;  %v7264_v4 = vpop.eup %7263  ;;  %v12876_v23 = vld [vmem:[%s13338_s12 + $0x20] ss:$16 sps:$4 sm:$0xff]  }
0x1426   :  { %v5667_v35 = vmul.f32 0.5, %v7264_v4  ;;  %v7266_v25 = vpop.eup %7265  ;;  %v12888_v4 = vld [vmem:[%s13338_s12 + $0x44] ss:$16 sps:$4 sm:$0xff]  }
0x1427   :  { %v5669_v63 = vadd.f32 0.5, %v5666_v5  ;;  %v7268_v59 = vpop.eup %7267  ;;  %v12882_v5 = vld [vmem:[%s13338_s12 + $0x28] ss:$16 sps:$4 sm:$0xff]  }
0x1428   :  { %v5670_v14 = vadd.f32 0.5, %v5667_v35  ;;  %v5668_v58 = vmul.f32 0.5, %v7268_v59  ;;  %v12900_v35 = vld [vmem:[%s13338_s12 + $0x40] ss:$16 sps:$4 sm:$0xff]   ;;  %v12936_v59 = vld [vmem:[%s13338_s12 + $0x84] ss:$16 sps:$4 sm:$0xff]  }
0x1429   :  { %v5677_v55 = vmul.f32 %v7266_v25, %v5669_v63  ;;  %v12894_v63 = vld [vmem:[%s13338_s12 + $0x4c] ss:$16 sps:$4 sm:$0xff]   ;;  %v12906_v25 = vld [vmem:[%s13338_s12 + $0x48] ss:$16 sps:$4 sm:$0xff]  }
0x142a   :  { %v5676_v60 = vmul.f32 %v5674_v41, %v5670_v14  ;;  %v5671_v62 = vadd.f32 0.5, %v5668_v58  ;;  %v12912_v14 = vld [vmem:[%s13338_s12 + $0x64] ss:$16 sps:$4 sm:$0xff]   ;;  %v12918_v41 = vld [vmem:[%s13338_s12 + $0x6c] ss:$16 sps:$4 sm:$0xff]  }
0x142b   :  { %v12942_v58 = vld [vmem:[%s13338_s12 + $0x8c] ss:$16 sps:$4 sm:$0xff]  }
0x142c   :  { %v12844_v56 = vadd.f32 %v5677_v55, %v5676_v60  ;;  %v12924_v55 = vld [vmem:[%s13338_s12 + $0x60] ss:$16 sps:$4 sm:$0xff]   ;;  %v12930_v60 = vld [vmem:[%s13338_s12 + $0x68] ss:$16 sps:$4 sm:$0xff]  }
0x142e   :  { %7269 = vtanh.f32 %v12844_v56 }
0x1438   :  { %v7270_v17 = vpop.eup %7269 }
0x1439   :  { %v5680_v19 = vmul.f32 %v7270_v17, %v5671_v62  ;;  %v12948_v62 = vld [vmem:[%s13338_s12 + $0x80] ss:$16 sps:$4 sm:$0xff]   ;;  %v12954_v17 = vld [vmem:[%s13338_s12 + $0x88] ss:$16 sps:$4 sm:$0xff]  }
0x143b   :  { %v5684_v12 = vpack.c.bf16 %v5680_v19, %v5680_v19  ;;  %v14551_v19 = vld [vmem:[#allocation73_spill] sm:$0xff] }
0x143d   :  { %v5688_v57 = vrot.slane %v5684_v12, 2  ;;  %v14552_v12 = vld [vmem:[#allocation74_spill] sm:$0xff] }
0x143f   :  { %5725 = vmatmul.mubr.bf16.vlgmr.msra.gmra.mrb[124].mxu0 %v5688_v57  ;;  %5766 = vmatmul.mubr.bf16.vlgmr.msra.gmra.mrb[120].mxu1 %v5688_v57 }
0x1440   :  { %5793 = vmatpush1.bf16.msra.mxu0 %v12850_v37  ;;  %5834 = vmatpush1.bf16.msra.mxu1 %v12856_v38 }
0x1441   :  { %5794 = vmatprep.subr.bf16.mxu0 %v12862_v1  ;;  %5835 = vmatprep.subr.bf16.mxu1 %v12868_v24 }
0x1442   :  { %5824 = vmatprep.mubr.bf16.mxu0 %v13932_v54  ;;  %5865 = vmatprep.mubr.bf16.mxu1 %v13932_v54 }
0x1444   :  { %5795 = vmatpush1.bf16.msra.mxu0 %v12876_v23  ;;  %5836 = vmatpush1.bf16.msra.mxu1 %v12882_v5 }
0x1445   :  { %5796 = vmatprep.subr.bf16.mxu0 %v12888_v4  ;;  %5837 = vmatprep.subr.bf16.mxu1 %v12894_v63 }
0x1448   :  { %5797 = vmatpush1.bf16.msra.mxu0 %v12900_v35  ;;  %5838 = vmatpush1.bf16.msra.mxu1 %v12906_v25 }
0x1449   :  { %5798 = vmatprep.subr.bf16.mxu0 %v12912_v14  ;;  %5839 = vmatprep.subr.bf16.mxu1 %v12918_v41 }
0x144c   :  { %5799 = vmatpush1.bf16.msra.mxu0 %v12924_v55  ;;  %5840 = vmatpush1.bf16.msra.mxu1 %v12930_v60 }
0x144d   :  { %5800 = vmatprep.subr.bf16.mxu0 %v12936_v59  ;;  %5841 = vmatprep.subr.bf16.mxu1 %v12942_v58 }
0x1450   :  { %5801 = vmatpush1.bf16.msra.mxu0 %v12948_v62  ;;  %5842 = vmatpush1.bf16.msra.mxu1 %v12954_v17 }
0x1451   :  { %5802 = vmatprep.subr.bf16.mxu0 %v12252_v6  ;;  %5843 = vmatprep.subr.bf16.mxu1 %v12258_v40  ;;  %v14514_v6 = vld [vmem:[#allocation32_spill] sm:$0xff]  ;;  %v14515_v40 = vld [vmem:[#allocation14_spill] sm:$0xff] }
0x1454   :  { %5803 = vmatpush1.bf16.msra.mxu0 %v12264_v39  ;;  %5844 = vmatpush1.bf16.msra.mxu1 %v12270_v30  ;;  %v14516_v39 = vld [vmem:[#allocation77_spill] sm:$0xff]  ;;  %v14517_v30 = vld [vmem:[#allocation62_spill] sm:$0xff] }
0x1455   :  { %5804 = vmatprep.subr.bf16.mxu0 %v12276_v31  ;;  %5845 = vmatprep.subr.bf16.mxu1 %v12282_v9  ;;  %v14518_v31 = vld [vmem:[#allocation63_spill] sm:$0xff]  ;;  %v14519_v9 = vld [vmem:[#allocation61_spill] sm:$0xff] }
0x1458   :  { %5805 = vmatpush1.bf16.msra.mxu0 %v12288_v8  ;;  %5846 = vmatpush1.bf16.msra.mxu1 %v12294_v44  ;;  %v14520_v8 = vld [vmem:[#allocation33_spill] sm:$0xff]  ;;  %v14521_v44 = vld [vmem:[#allocation34_spill] sm:$0xff] }
0x1459   :  { %5806 = vmatprep.subr.bf16.mxu0 %v12300_v46  ;;  %5847 = vmatprep.subr.bf16.mxu1 %v12306_v3  ;;  %v14522_v46 = vld [vmem:[#allocation35_spill] sm:$0xff]  ;;  %v14523_v3 = vld [vmem:[#allocation36_spill] sm:$0xff] }
0x145c   :  { %5807 = vmatpush1.bf16.msra.mxu0 %v12312_v52  ;;  %5848 = vmatpush1.bf16.msra.mxu1 %v12318_v49  ;;  %v14524_v52 = vld [vmem:[#allocation37_spill] sm:$0xff]  ;;  %v14525_v49 = vld [vmem:[#allocation38_spill] sm:$0xff] }
0x145d   :  { %5922 = vmatprep.subr.bf16.mxu0 %v12324_v26  ;;  %5963 = vmatprep.subr.bf16.mxu1 %v12330_v28  ;;  %v14526_v26 = vld [vmem:[#allocation39_spill] sm:$0xff]  ;;  %v14527_v28 = vld [vmem:[#allocation40_spill] sm:$0xff] }
0x145f   :  { %5825 = vmatmul.mubr.bf16.vlgmr.msra.gmra.mrb[128].mxu0 %v5688_v57  ;;  %5866 = vmatmul.mubr.bf16.vlgmr.msra.gmra.mrb[124].mxu1 %v5688_v57  ;;  %v14553_v57 = vld [vmem:[#allocation76_spill] sm:$0xff] }
0x1460   :  { %5923 = vmatpush1.bf16.msra.mxu0 %v12336_v50  ;;  %5964 = vmatpush1.bf16.msra.mxu1 %v12342_v15  ;;  %v14528_v50 = vld [vmem:[#allocation41_spill] sm:$0xff]  ;;  %v14529_v15 = vld [vmem:[#allocation42_spill] sm:$0xff] }
0x1461   :  { %5924 = vmatprep.subr.bf16.mxu0 %v12348_v21  ;;  %5965 = vmatprep.subr.bf16.mxu1 %v12354_v51  ;;  %v14530_v21 = vld [vmem:[#allocation43_spill] sm:$0xff]  ;;  %v14531_v51 = vld [vmem:[#allocation44_spill] sm:$0xff] }
0x1464   :  { %5925 = vmatpush1.bf16.msra.mxu0 %v14449_v16  ;;  %5966 = vmatpush1.bf16.msra.mxu1 %v14450_v61  ;;  %v14532_v16 = vld [vmem:[#allocation45_spill] sm:$0xff]  ;;  %v14533_v61 = vld [vmem:[#allocation46_spill] sm:$0xff] }
0x1465   :  { %5926 = vmatprep.subr.bf16.mxu0 %v14451_v0  ;;  %5967 = vmatprep.subr.bf16.mxu1 %v14452_v45  ;;  %v14534_v0 = vld [vmem:[#allocation47_spill] sm:$0xff]  ;;  %v14535_v45 = vld [vmem:[#allocation48_spill] sm:$0xff] }
0x1468   :  { %5927 = vmatpush1.bf16.msra.mxu0 %v14453_v2  ;;  %5968 = vmatpush1.bf16.msra.mxu1 %v14454_v29  ;;  %v14536_v2 = vld [vmem:[#allocation49_spill] sm:$0xff]  ;;  %v14537_v29 = vld [vmem:[#allocation50_spill] sm:$0xff] }
0x1469   :  { %5928 = vmatprep.subr.bf16.mxu0 %v14455_v32  ;;  %5969 = vmatprep.subr.bf16.mxu1 %v14456_v18  ;;  %v14538_v32 = vld [vmem:[#allocation51_spill] sm:$0xff]  ;;  %v14539_v18 = vld [vmem:[#allocation52_spill] sm:$0xff] }
0x146c   :  { %5929 = vmatpush1.bf16.msra.mxu0 %v14457_v43  ;;  %5970 = vmatpush1.bf16.msra.mxu1 %v14458_v48  ;;  %v14540_v43 = vld [vmem:[#allocation53_spill] sm:$0xff]  ;;  %v14541_v48 = vld [vmem:[#allocation54_spill] sm:$0xff] }
0x146d   :  { %5930 = vmatprep.subr.bf16.mxu0 %v14459_v36  ;;  %5971 = vmatprep.subr.bf16.mxu1 %v14460_v53  ;;  %v14542_v36 = vld [vmem:[#allocation55_spill] sm:$0xff]  ;;  %v14543_v53 = vld [vmem:[#allocation56_spill] sm:$0xff] }
0x1470   :  { %5931 = vmatpush1.bf16.msra.mxu0 %v14461_v27  ;;  %5972 = vmatpush1.bf16.msra.mxu1 %v14462_v47  ;;  %v14544_v27 = vld [vmem:[#allocation57_spill] sm:$0xff]  ;;  %v14545_v47 = vld [vmem:[#allocation58_spill] sm:$0xff] }
0x1471   :  { %5932 = vmatprep.subr.bf16.mxu0 %v14463_v11  ;;  %5973 = vmatprep.subr.bf16.mxu1 %v14464_v10  ;;  %v14546_v11 = vld [vmem:[#allocation59_spill] sm:$0xff] }
0x1472   :  { %v14547_v10 = vld [vmem:[#allocation7_spill] sm:$0xff] }
0x1474   :  { %5933 = vmatpush1.bf16.msra.mxu0 %v14465_v13  ;;  %5974 = vmatpush1.bf16.msra.mxu1 %v14466_v22  ;;  %v14548_v13 = vld [vmem:[#allocation8_spill] sm:$0xff]  ;;  %v14549_v22 = vld [vmem:[#allocation13_spill] sm:$0xff] }
0x1475   :  { %5934 = vmatprep.subr.bf16.mxu0 %v14467_v20  ;;  %5975 = vmatprep.subr.bf16.mxu1 %v14514_v6  ;;  %v14550_v20 = vld [vmem:[#allocation72_spill] sm:$0xff]  ;;  %v14554_v6 = vld [vmem:[#allocation15_spill] sm:$0xff] }
0x1478   :  { %5935 = vmatpush1.bf16.msra.mxu0 %v14515_v40  ;;  %5976 = vmatpush1.bf16.msra.mxu1 %v14516_v39 }
0x1479   :  { %5936 = vmatprep.subr.bf16.mxu0 %v14517_v30  ;;  %5977 = vmatprep.subr.bf16.mxu1 %v14518_v31  ;;  %v14555_v30 = vld [vmem:[#allocation9_spill] sm:$0xff] }
0x147c   :  { %5937 = vmatpush1.bf16.msra.mxu0 %v14519_v9  ;;  %5978 = vmatpush1.bf16.msra.mxu1 %v14520_v8 }
0x147d   :  { %5938 = vmatprep.subr.bf16.mxu0 %v14521_v44  ;;  %5979 = vmatprep.subr.bf16.mxu1 %v14522_v46  ;;  %v14556_v44 = vld [vmem:[#allocation10_spill] sm:$0xff] }
0x1480   :  { %5939 = vmatpush1.bf16.msra.mxu0 %v14523_v3  ;;  %5980 = vmatpush1.bf16.msra.mxu1 %v14524_v52 }
0x1481   :  { %5940 = vmatprep.subr.bf16.mxu0 %v14525_v49  ;;  %5981 = vmatprep.subr.bf16.mxu1 %v14526_v26 }
0x1484   :  { %5941 = vmatpush1.bf16.msra.mxu0 %v14527_v28  ;;  %5982 = vmatpush1.bf16.msra.mxu1 %v14528_v50 }
0x1485   :  { %5942 = vmatprep.subr.bf16.mxu0 %v14529_v15  ;;  %5983 = vmatprep.subr.bf16.mxu1 %v14530_v21  ;;  %v14557_v15 = vld [vmem:[#allocation11_spill] sm:$0xff] }
0x1488   :  { %5943 = vmatpush1.bf16.msra.mxu0 %v14531_v51  ;;  %5984 = vmatpush1.bf16.msra.mxu1 %v14532_v16  ;;  %v14558_v51 = vld [vmem:[#allocation12_spill] sm:$0xff] }
0x1489   :  { %5944 = vmatprep.subr.bf16.mxu0 %v14533_v61  ;;  %5985 = vmatprep.subr.bf16.mxu1 %v14534_v0 }
0x148c   :  { %5945 = vmatpush1.bf16.msra.mxu0 %v14535_v45  ;;  %5986 = vmatpush1.bf16.msra.mxu1 %v14536_v2 }
0x148d   :  { %5946 = vmatprep.subr.bf16.mxu0 %v14537_v29  ;;  %5987 = vmatprep.subr.bf16.mxu1 %v14538_v32 }
0x1490   :  { %5947 = vmatpush1.bf16.msra.mxu0 %v14539_v18  ;;  %5988 = vmatpush1.bf16.msra.mxu1 %v14540_v43 }
0x1491   :  { %5948 = vmatprep.subr.bf16.mxu0 %v14541_v48  ;;  %5989 = vmatprep.subr.bf16.mxu1 %v14542_v36  ;;  %v14559_v36 = vld [vmem:[#allocation16_spill] sm:$0xff] }
0x1494   :  { %5949 = vmatpush1.bf16.msra.mxu0 %v14543_v53  ;;  %5990 = vmatpush1.bf16.msra.mxu1 %v14544_v27 }
0x1495   :  { %5950 = vmatprep.subr.bf16.mxu0 %v14545_v47  ;;  %5991 = vmatprep.subr.bf16.mxu1 %v14546_v11 }
0x1498   :  { %5951 = vmatpush1.bf16.msra.mxu0 %v14547_v10  ;;  %5992 = vmatpush1.bf16.msra.mxu1 %v14548_v13 }
0x1499   :  { %5952 = vmatprep.subr.bf16.mxu0 %v14549_v22  ;;  %5993 = vmatprep.subr.bf16.mxu1 %v14550_v20 }
0x149c   :  { %5953 = vmatpush1.bf16.msra.mxu0 %v14551_v19  ;;  %5994 = vmatpush1.bf16.msra.mxu1 %v14552_v12 }
0x149d   :  { %6022 = vmatprep.subr.bf16.mxu0 %v14553_v57  ;;  %6063 = vmatprep.subr.bf16.mxu1 %v14554_v6 }
0x1512   :  { %v5726_v40 = vpop.f32.mrb[124].mxu0  ;;  %v5767_v39 = vpop.f32.mrb[120].mxu1 }
0x1513   :  { %v5727_v31 = vadd.f32 %v5726_v40, %v14555_v30  ;;  %v5728_v9 = vpop.f32.mrb[125].mxu0  ;;  %v5769_v8 = vpop.f32.mrb[121].mxu1  ;;  %v5768_v16 = vadd.f32 %v5767_v39, %v14558_v51 }
0x1514   :  { %v5729_v46 = vadd.f32 %v5728_v9, %v14556_v44  ;;  %v5730_v3 = vpop.f32.mrb[126].mxu0  ;;  %v5771_v52 = vpop.f32.mrb[122].mxu1  ;;  %v5770_v21 = vadd.f32 %v5769_v8, %v14557_v15 }
0x1515   :  { %v5774_v49 = vmul.f32 0.5, %v5727_v31  ;;  %v5731_v26 = vpop.f32.mrb[127].mxu0  ;;  %v5772_v28 = vpop.f32.mrb[123].mxu1  ;;  %v5776_v61 = vmul.f32 0.5, %v5768_v16 }
0x1516   :  { %v5775_v50 = vmul.f32 0.5, %v5729_v46 }
0x1517   :  { %7271 = vtanh.f32 %v5774_v49 }
0x1518   :  { %7273 = vtanh.f32 %v5775_v50 }
0x1519   :  { %7275 = vtanh.f32 %v5770_v21 }
0x151a   :  { %7277 = vtanh.f32 %v5776_v61 }
0x1521   :  { %v7272_v0 = vpop.eup %7271 }
0x1522   :  { %v5780_v45 = vmul.f32 0.5, %v7272_v0  ;;  %v7274_v2 = vpop.eup %7273 }
0x1523   :  { %v5781_v32 = vmul.f32 0.5, %v7274_v2  ;;  %v7276_v18 = vpop.eup %7275 }
0x1524   :  { %v5783_v29 = vadd.f32 0.5, %v5780_v45  ;;  %v7278_v47 = vpop.eup %7277 }
0x1525   :  { %v5784_v43 = vadd.f32 0.5, %v5781_v32  ;;  %v5782_v11 = vmul.f32 0.5, %v7278_v47 }
0x1526   :  { %v5788_v48 = vmul.f32 %v7276_v18, %v5783_v29 }
0x1527   :  { %v5787_v53 = vmul.f32 %v5784_v43, %v14559_v36  ;;  %v5785_v40 = vadd.f32 0.5, %v5782_v11 }
0x1529   :  { %v13040_v27 = vadd.f32 %v5788_v48, %v5787_v53 }
0x152b   :  { %7279 = vtanh.f32 %v13040_v27 }
0x1532   :  { %v5826_v10 = vpop.f32.mrb[128].mxu0  ;;  %v5867_v13 = vpop.f32.mrb[124].mxu1 }
0x1533   :  { %v5878_v22 = vrot.slane %v5826_v10, 2  ;;  %v5828_v20 = vpop.f32.mrb[129].mxu0  ;;  %v5869_v19 = vpop.f32.mrb[125].mxu1  ;;  %v5880_v21 = vrot.slane %v5867_v13, 2 }
0x1534   :  { %v5879_v12 = vrot.slane %v5828_v20, 2  ;;  %v5830_v57 = vpop.f32.mrb[130].mxu0  ;;  %v5871_v6 = vpop.f32.mrb[126].mxu1  ;;  %v5881_v31 = vrot.slane %v5869_v19, 2  ;;  %v7649_v19 = vld [vmem:[%s13339_s13 + $0x44] ss:$16 sps:$4 sm:$0xff]  }
0x1535   :  { %v5886_v39 = vadd.f32 %v5878_v22, %v14386_v7  ;;  %v5831_v9 = vpop.f32.mrb[131].mxu0  ;;  %v5872_v8 = vpop.f32.mrb[127].mxu1  ;;  %v5888_v7 = vadd.f32 %v5880_v21, %v14389_v42  ;;  %v7651_v57 = vld [vmem:[%s13339_s13 + $0x40] ss:$16 sps:$4 sm:$0xff]   ;;  %v7652_v6 = vld [vmem:[%s13339_s13 + $0x48] ss:$16 sps:$4 sm:$0xff]  }
0x1536   :  { %v7280_v46 = vpop.eup %7279  ;;  %v5887_v3 = vadd.f32 %v5879_v12, %v14387_v34  ;;  %v5889_v28 = vadd.f32 %v5881_v31, %v14388_v33  ;;  %v5904_v33 = vrot.slane %v12844_v56, 6  ;;  %v7630_v56 = vld [vmem:[%s13338_s12 + $0xac] ss:$16 sps:$4 sm:$0xff]   ;;  %v7655_v31 = vld [vmem:[%s13339_s13 + $0x60] ss:$16 sps:$4 sm:$0xff]  }
0x1537   :  { %v5890_v52 = vmul.f32 0.5, %v5886_v39  ;;  %v5791_v49 = vmul.f32 %v7280_v46, %v5785_v40  ;;  %v5892_v0 = vmul.f32 0.5, %v5888_v7  ;;  %v7650_v12 = vld [vmem:[%s13339_s13 + $0x4c] ss:$16 sps:$4 sm:$0xff]   ;;  %v7653_v40 = vld [vmem:[%s13339_s13 + $0x64] ss:$16 sps:$4 sm:$0xff]  }
0x1538   :  { %v5891_v26 = vmul.f32 0.5, %v5887_v3  ;;  %v7654_v39 = vld [vmem:[%s13339_s13 + $0x6c] ss:$16 sps:$4 sm:$0xff]   ;;  %v7656_v9 = vld [vmem:[%s13339_s13 + $0x68] ss:$16 sps:$4 sm:$0xff]  }
0x1539   :  { %7281 = vtanh.f32 %v5890_v52  ;;  %v5912_v50 = vrot.slane %v5791_v49, 2  ;;  %v7657_v8 = vld [vmem:[%s13339_s13 + $0x84] ss:$16 sps:$4 sm:$0xff]   ;;  %v7658_v46 = vld [vmem:[%s13339_s13 + $0x8c] ss:$16 sps:$4 sm:$0xff]  }
0x153a   :  { %7283 = vtanh.f32 %v5891_v26  ;;  %v7659_v3 = vld [vmem:[%s13339_s13 + $0x80] ss:$16 sps:$4 sm:$0xff]   ;;  %v7660_v52 = vld [vmem:[%s13339_s13 + $0x88] ss:$16 sps:$4 sm:$0xff]   ;;  %v7661_v49 = vld [vmem:[%s13339_s13 + $0xa4] ss:$16 sps:$4 sm:$0xff]  }
0x153b   :  { %v5915_v16 = vpack.c.bf16 %v5912_v50, %v5912_v50  ;;  %7285 = vtanh.f32 %v5889_v28  ;;  %v7662_v26 = vld [vmem:[%s13339_s13 + $0xac] ss:$16 sps:$4 sm:$0xff]   ;;  %v7663_v28 = vld [vmem:[%s13339_s13 + $0xa0] ss:$16 sps:$4 sm:$0xff]   ;;  %v7664_v50 = vld [vmem:[%s13339_s13 + $0xa8] ss:$16 sps:$4 sm:$0xff]  }
0x153c   :  { %7287 = vtanh.f32 %v5892_v0  ;;  %v7665_v21 = vld [vmem:[%s13339_s13 + $0xc4] ss:$16 sps:$4 sm:$0xff]   ;;  %v7668_v7 = vld [vmem:[%s13339_s13 + $0xc8] ss:$16 sps:$4 sm:$0xff]  }
0x153d   :  { %v5919_v61 = vrot.slane %v5915_v16, 3  ;;  %v7666_v16 = vld [vmem:[%s13339_s13 + $0xcc] ss:$16 sps:$4 sm:$0xff]   ;;  %v7669_v0 = vld [vmem:[%s13339_s13 + $0xe4] ss:$16 sps:$4 sm:$0xff]  }
0x153f   :  { %5954 = vmatprep.mubr.bf16.mxu0 %v5919_v61  ;;  %5995 = vmatprep.mubr.bf16.mxu1 %v5919_v61  ;;  %v7667_v61 = vld [vmem:[%s13339_s13 + $0xc0] ss:$16 sps:$4 sm:$0xff]  }
0x1543   :  { %v7282_v45 = vpop.eup %7281 }
0x1544   :  { %v5896_v2 = vmul.f32 0.5, %v7282_v45  ;;  %v7284_v34 = vpop.eup %7283  ;;  %v7670_v45 = vld [vmem:[%s13339_s13 + $0xec] ss:$16 sps:$4 sm:$0xff]  }
0x1545   :  { %v5897_v32 = vmul.f32 0.5, %v7284_v34  ;;  %v7286_v18 = vpop.eup %7285  ;;  %v7672_v34 = vld [vmem:[%s13339_s13 + $0xe8] ss:$16 sps:$4 sm:$0xff]  }
0x1546   :  { %v5899_v29 = vadd.f32 0.5, %v5896_v2  ;;  %v7288_v42 = vpop.eup %7287  ;;  %v7671_v2 = vld [vmem:[%s13339_s13 + $0xe0] ss:$16 sps:$4 sm:$0xff]  }
0x1547   :  { %v5900_v43 = vadd.f32 0.5, %v5897_v32  ;;  %v5898_v47 = vmul.f32 0.5, %v7288_v42  ;;  %v7674_v32 = vld [vmem:[%s13339_s13 + $0x10c] ss:$16 sps:$4 sm:$0xff]   ;;  %v7680_v42 = vld [vmem:[%s13339_s13 + $0x128] ss:$16 sps:$4 sm:$0xff]  }
0x1548   :  { %v5907_v48 = vmul.f32 %v7286_v18, %v5899_v29  ;;  %v7673_v29 = vld [vmem:[%s13339_s13 + $0x104] ss:$16 sps:$4 sm:$0xff]   ;;  %v7675_v18 = vld [vmem:[%s13339_s13 + $0x100] ss:$16 sps:$4 sm:$0xff]  }
0x1549   :  { %v5906_v36 = vmul.f32 %v5904_v33, %v5900_v43  ;;  %v5901_v11 = vadd.f32 0.5, %v5898_v47  ;;  %v7676_v43 = vld [vmem:[%s13339_s13 + $0x108] ss:$16 sps:$4 sm:$0xff]   ;;  %v7677_v33 = vld [vmem:[%s13339_s13 + $0x124] ss:$16 sps:$4 sm:$0xff]  }
0x154a   :  { %v7681_v47 = vld [vmem:[%s13339_s13 + $0x144] ss:$16 sps:$4 sm:$0xff]  }
0x154b   :  { %v13048_v53 = vadd.f32 %v5907_v48, %v5906_v36  ;;  %v7678_v48 = vld [vmem:[%s13339_s13 + $0x12c] ss:$16 sps:$4 sm:$0xff]   ;;  %v7679_v36 = vld [vmem:[%s13339_s13 + $0x120] ss:$16 sps:$4 sm:$0xff]  }
0x154d   :  { %7289 = vtanh.f32 %v13048_v53 }
0x1557   :  { %v7290_v10 = vpop.eup %7289 }
0x1558   :  { %v5910_v13 = vmul.f32 %v7290_v10, %v5901_v11  ;;  %v7682_v11 = vld [vmem:[%s13339_s13 + $0x14c] ss:$16 sps:$4 sm:$0xff]   ;;  %v7683_v10 = vld [vmem:[%s13339_s13 + $0x140] ss:$16 sps:$4 sm:$0xff]  }
0x155a   :  { %v5914_v22 = vpack.c.bf16 %v5910_v13, %v5910_v13  ;;  %v7684_v13 = vld [vmem:[%s13339_s13 + $0x148] ss:$16 sps:$4 sm:$0xff]  }
0x155c   :  { %v5918_v20 = vrot.slane %v5914_v22, 3  ;;  %v7685_v22 = vld [vmem:[%s13339_s13 + $0x164] ss:$16 sps:$4 sm:$0xff]  }
0x155e   :  { %5955 = vmatmul.mubr.bf16.vlgmr.msra.gmra.mrb[132].mxu0 %v5918_v20  ;;  %5996 = vmatmul.mubr.bf16.vlgmr.msra.gmra.mrb[128].mxu1 %v5918_v20 }
0x155f   :  { %6023 = vmatpush1.bf16.msra.mxu0 %v12850_v37  ;;  %6064 = vmatpush1.bf16.msra.mxu1 %v12856_v38  ;;  %v7631_v37 = vld [vmem:[%s13338_s12 + $0xa0] ss:$16 sps:$4 sm:$0xff]   ;;  %v7632_v38 = vld [vmem:[%s13338_s12 + $0xa8] ss:$16 sps:$4 sm:$0xff]  }
0x1560   :  { %6024 = vmatprep.subr.bf16.mxu0 %v12862_v1  ;;  %6065 = vmatprep.subr.bf16.mxu1 %v12868_v24  ;;  %v7633_v1 = vld [vmem:[%s13338_s12 + $0xc4] ss:$16 sps:$4 sm:$0xff]   ;;  %v7634_v24 = vld [vmem:[%s13338_s12 + $0xcc] ss:$16 sps:$4 sm:$0xff]  }
0x1561   :  { %6054 = vmatprep.mubr.bf16.mxu0 %v13932_v54  ;;  %6095 = vmatprep.mubr.bf16.mxu1 %v13932_v54  ;;  %v7629_v54 = vld [vmem:[%s13338_s12 + $0xa4] ss:$16 sps:$4 sm:$0xff]  }
0x1563   :  { %6025 = vmatpush1.bf16.msra.mxu0 %v12876_v23  ;;  %6066 = vmatpush1.bf16.msra.mxu1 %v12882_v5  ;;  %v7635_v23 = vld [vmem:[%s13338_s12 + $0xc0] ss:$16 sps:$4 sm:$0xff]   ;;  %v7636_v5 = vld [vmem:[%s13338_s12 + $0xc8] ss:$16 sps:$4 sm:$0xff]  }
0x1564   :  { %6026 = vmatprep.subr.bf16.mxu0 %v12888_v4  ;;  %6067 = vmatprep.subr.bf16.mxu1 %v12894_v63  ;;  %v7637_v4 = vld [vmem:[%s13338_s12 + $0xe4] ss:$16 sps:$4 sm:$0xff]   ;;  %v7638_v63 = vld [vmem:[%s13338_s12 + $0xec] ss:$16 sps:$4 sm:$0xff]  }
0x1567   :  { %6027 = vmatpush1.bf16.msra.mxu0 %v12900_v35  ;;  %6068 = vmatpush1.bf16.msra.mxu1 %v12906_v25  ;;  %v7639_v35 = vld [vmem:[%s13338_s12 + $0xe0] ss:$16 sps:$4 sm:$0xff]   ;;  %v7640_v25 = vld [vmem:[%s13338_s12 + $0xe8] ss:$16 sps:$4 sm:$0xff]  }
0x1568   :  { %6028 = vmatprep.subr.bf16.mxu0 %v12912_v14  ;;  %6069 = vmatprep.subr.bf16.mxu1 %v12918_v41  ;;  %v7641_v14 = vld [vmem:[%s13339_s13 + $0x4] ss:$16 sps:$4 sm:$0xff]   ;;  %v7642_v41 = vld [vmem:[%s13339_s13 + $0xc] ss:$16 sps:$4 sm:$0xff]  }
0x156b   :  { %6029 = vmatpush1.bf16.msra.mxu0 %v12924_v55  ;;  %6070 = vmatpush1.bf16.msra.mxu1 %v12930_v60  ;;  %v7643_v55 = vld [vmem:[%s13339_s13] ss:$16 sps:$4 sm:$0xff]   ;;  %v7644_v60 = vld [vmem:[%s13339_s13 + $0x8] ss:$16 sps:$4 sm:$0xff]  }
0x156c   :  { %6030 = vmatprep.subr.bf16.mxu0 %v12936_v59  ;;  %6071 = vmatprep.subr.bf16.mxu1 %v12942_v58  ;;  %v7645_v59 = vld [vmem:[%s13339_s13 + $0x24] ss:$16 sps:$4 sm:$0xff]   ;;  %v7646_v58 = vld [vmem:[%s13339_s13 + $0x2c] ss:$16 sps:$4 sm:$0xff]  }
0x156f   :  { %6031 = vmatpush1.bf16.msra.mxu0 %v12948_v62  ;;  %6072 = vmatpush1.bf16.msra.mxu1 %v12954_v17  ;;  %v7647_v62 = vld [vmem:[%s13339_s13 + $0x20] ss:$16 sps:$4 sm:$0xff]   ;;  %v7648_v17 = vld [vmem:[%s13339_s13 + $0x28] ss:$16 sps:$4 sm:$0xff]  }
0x1570   :  { %6032 = vmatprep.subr.bf16.mxu0 %v7629_v54  ;;  %6073 = vmatprep.subr.bf16.mxu1 %v7630_v56  ;;  %v7687_v54 = vld [vmem:[%s13339_s13 + $0x160] ss:$16 sps:$4 sm:$0xff]   ;;  %v7688_v56 = vld [vmem:[%s13339_s13 + $0x168] ss:$16 sps:$4 sm:$0xff]  }
0x1573   :  { %6033 = vmatpush1.bf16.msra.mxu0 %v7631_v37  ;;  %6074 = vmatpush1.bf16.msra.mxu1 %v7632_v38  ;;  %v7689_v37 = vld [vmem:[%s13339_s13 + $0x184] ss:$16 sps:$4 sm:$0xff]   ;;  %v7690_v38 = vld [vmem:[%s13339_s13 + $0x18c] ss:$16 sps:$4 sm:$0xff]  }
0x1574   :  { %6034 = vmatprep.subr.bf16.mxu0 %v7633_v1  ;;  %6075 = vmatprep.subr.bf16.mxu1 %v7634_v24  ;;  %v7691_v1 = vld [vmem:[%s13339_s13 + $0x180] ss:$16 sps:$4 sm:$0xff]   ;;  %v7692_v24 = vld [vmem:[%s13339_s13 + $0x188] ss:$16 sps:$4 sm:$0xff]  }
0x1577   :  { %6035 = vmatpush1.bf16.msra.mxu0 %v7635_v23  ;;  %6076 = vmatpush1.bf16.msra.mxu1 %v7636_v5  ;;  %v7693_v23 = vld [vmem:[%s13339_s13 + $0x1a4] ss:$16 sps:$4 sm:$0xff]   ;;  %v7694_v5 = vld [vmem:[%s13339_s13 + $0x1ac] ss:$16 sps:$4 sm:$0xff]  }
0x1578   :  { %6036 = vmatprep.subr.bf16.mxu0 %v7637_v4  ;;  %6077 = vmatprep.subr.bf16.mxu1 %v7638_v63  ;;  %v7695_v4 = vld [vmem:[%s13339_s13 + $0x1a0] ss:$16 sps:$4 sm:$0xff]   ;;  %v7696_v63 = vld [vmem:[%s13339_s13 + $0x1a8] ss:$16 sps:$4 sm:$0xff]  }
0x157b   :  { %6037 = vmatpush1.bf16.msra.mxu0 %v7639_v35  ;;  %6078 = vmatpush1.bf16.msra.mxu1 %v7640_v25  ;;  %v7697_v35 = vld [vmem:[%s13339_s13 + $0x1c4] ss:$16 sps:$4 sm:$0xff]   ;;  %v7698_v25 = vld [vmem:[%s13339_s13 + $0x1cc] ss:$16 sps:$4 sm:$0xff]  }
0x157c   :  { %6131 = vmatprep.subr.bf16.mxu0 %v7641_v14  ;;  %6172 = vmatprep.subr.bf16.mxu1 %v7642_v41  ;;  %v7699_v14 = vld [vmem:[%s13339_s13 + $0x1c0] ss:$16 sps:$4 sm:$0xff]   ;;  %v7700_v41 = vld [vmem:[%s13339_s13 + $0x1c8] ss:$16 sps:$4 sm:$0xff]  }
0x157e   :  { %6055 = vmatmul.mubr.bf16.vlgmr.msra.gmra.mrb[136].mxu0 %v5918_v20  ;;  %6096 = vmatmul.mubr.bf16.vlgmr.msra.gmra.mrb[132].mxu1 %v5918_v20  ;;  %v7686_v20 = vld [vmem:[%s13339_s13 + $0x16c] ss:$16 sps:$4 sm:$0xff]  }
0x157f   :  { %6132 = vmatpush1.bf16.msra.mxu0 %v7643_v55  ;;  %6173 = vmatpush1.bf16.msra.mxu1 %v7644_v60  ;;  %v7701_v55 = vld [vmem:[%s13339_s13 + $0x1e4] ss:$16 sps:$4 sm:$0xff]   ;;  %v7702_v60 = vld [vmem:[%s13339_s13 + $0x1ec] ss:$16 sps:$4 sm:$0xff]  }
0x1580   :  { %6133 = vmatprep.subr.bf16.mxu0 %v7645_v59  ;;  %6174 = vmatprep.subr.bf16.mxu1 %v7646_v58  ;;  %v7703_v59 = vld [vmem:[%s13339_s13 + $0x1e0] ss:$16 sps:$4 sm:$0xff]   ;;  %v7704_v58 = vld [vmem:[%s13339_s13 + $0x1e8] ss:$16 sps:$4 sm:$0xff]  }
0x1583   :  { %6134 = vmatpush1.bf16.msra.mxu0 %v7647_v62  ;;  %6175 = vmatpush1.bf16.msra.mxu1 %v7648_v17 }
0x1584   :  { %6135 = vmatprep.subr.bf16.mxu0 %v7649_v19  ;;  %6176 = vmatprep.subr.bf16.mxu1 %v7650_v12 }
0x1587   :  { %6136 = vmatpush1.bf16.msra.mxu0 %v7651_v57  ;;  %6177 = vmatpush1.bf16.msra.mxu1 %v7652_v6 }
0x1588   :  { %6137 = vmatprep.subr.bf16.mxu0 %v7653_v40  ;;  %6178 = vmatprep.subr.bf16.mxu1 %v7654_v39 }
0x158b   :  { %6138 = vmatpush1.bf16.msra.mxu0 %v7655_v31  ;;  %6179 = vmatpush1.bf16.msra.mxu1 %v7656_v9 }
0x158c   :  { %6139 = vmatprep.subr.bf16.mxu0 %v7657_v8  ;;  %6180 = vmatprep.subr.bf16.mxu1 %v7658_v46 }
0x158f   :  { %6140 = vmatpush1.bf16.msra.mxu0 %v7659_v3  ;;  %6181 = vmatpush1.bf16.msra.mxu1 %v7660_v52 }
0x1590   :  { %6141 = vmatprep.subr.bf16.mxu0 %v7661_v49  ;;  %6182 = vmatprep.subr.bf16.mxu1 %v7662_v26 }
0x1593   :  { %6142 = vmatpush1.bf16.msra.mxu0 %v7663_v28  ;;  %6183 = vmatpush1.bf16.msra.mxu1 %v7664_v50 }
0x1594   :  { %6143 = vmatprep.subr.bf16.mxu0 %v7665_v21  ;;  %6184 = vmatprep.subr.bf16.mxu1 %v7666_v16 }
0x1597   :  { %6144 = vmatpush1.bf16.msra.mxu0 %v7667_v61  ;;  %6185 = vmatpush1.bf16.msra.mxu1 %v7668_v7 }
0x1598   :  { %6145 = vmatprep.subr.bf16.mxu0 %v7669_v0  ;;  %6186 = vmatprep.subr.bf16.mxu1 %v7670_v45 }
0x159b   :  { %6146 = vmatpush1.bf16.msra.mxu0 %v7671_v2  ;;  %6187 = vmatpush1.bf16.msra.mxu1 %v7672_v34 }
0x159c   :  { %6147 = vmatprep.subr.bf16.mxu0 %v7673_v29  ;;  %6188 = vmatprep.subr.bf16.mxu1 %v7674_v32 }
0x159f   :  { %6148 = vmatpush1.bf16.msra.mxu0 %v7675_v18  ;;  %6189 = vmatpush1.bf16.msra.mxu1 %v7676_v43  ;;  %v14560_v43 = vld [vmem:[#allocation68_spill] sm:$0xff] }
0x15a0   :  { %6149 = vmatprep.subr.bf16.mxu0 %v7677_v33  ;;  %6190 = vmatprep.subr.bf16.mxu1 %v7678_v48  ;;  %v14561_v48 = vld [vmem:[#allocation69_spill] sm:$0xff] }
0x15a3   :  { %6150 = vmatpush1.bf16.msra.mxu0 %v7679_v36  ;;  %6191 = vmatpush1.bf16.msra.mxu1 %v7680_v42 }
0x15a4   :  { %6151 = vmatprep.subr.bf16.mxu0 %v7681_v47  ;;  %6192 = vmatprep.subr.bf16.mxu1 %v7682_v11  ;;  %v14562_v11 = vld [vmem:[#allocation70_spill] sm:$0xff] }
0x15a7   :  { %6152 = vmatpush1.bf16.msra.mxu0 %v7683_v10  ;;  %6193 = vmatpush1.bf16.msra.mxu1 %v7684_v13  ;;  %v14563_v13 = vld [vmem:[#allocation71_spill] sm:$0xff] }
0x15a8   :  { %6153 = vmatprep.subr.bf16.mxu0 %v7685_v22  ;;  %6194 = vmatprep.subr.bf16.mxu1 %v7686_v20 }
0x15ab   :  { %6154 = vmatpush1.bf16.msra.mxu0 %v7687_v54  ;;  %6195 = vmatpush1.bf16.msra.mxu1 %v7688_v56 }
0x15ac   :  { %6155 = vmatprep.subr.bf16.mxu0 %v7689_v37  ;;  %6196 = vmatprep.subr.bf16.mxu1 %v7690_v38 }
0x15af   :  { %6156 = vmatpush1.bf16.msra.mxu0 %v7691_v1  ;;  %6197 = vmatpush1.bf16.msra.mxu1 %v7692_v24 }
0x15b0   :  { %6157 = vmatprep.subr.bf16.mxu0 %v7693_v23  ;;  %6198 = vmatprep.subr.bf16.mxu1 %v7694_v5 }
0x15b3   :  { %6158 = vmatpush1.bf16.msra.mxu0 %v7695_v4  ;;  %6199 = vmatpush1.bf16.msra.mxu1 %v7696_v63 }
0x15b4   :  { %6159 = vmatprep.subr.bf16.mxu0 %v7697_v35  ;;  %6200 = vmatprep.subr.bf16.mxu1 %v7698_v25 }
0x15b7   :  { %6160 = vmatpush1.bf16.msra.mxu0 %v7699_v14  ;;  %6201 = vmatpush1.bf16.msra.mxu1 %v7700_v41 }
0x15b8   :  { %6161 = vmatprep.subr.bf16.mxu0 %v7701_v55  ;;  %6202 = vmatprep.subr.bf16.mxu1 %v7702_v60 }
0x15bb   :  { %6162 = vmatpush1.bf16.msra.mxu0 %v7703_v59  ;;  %6203 = vmatpush1.bf16.msra.mxu1 %v7704_v58  ;;  %v6122_v59 = vrot.slane %v13048_v53, 6 }
0x1631   :  { %v5956_v62 = vpop.f32.mrb[132].mxu0  ;;  %v5997_v17 = vpop.f32.mrb[128].mxu1 }
0x1632   :  { %v5957_v19 = vadd.f32 %v5956_v62, %v14555_v30  ;;  %v5958_v12 = vpop.f32.mrb[133].mxu0  ;;  %v5999_v57 = vpop.f32.mrb[129].mxu1  ;;  %v5998_v52 = vadd.f32 %v5997_v17, %v14558_v51 }
0x1633   :  { %v5959_v6 = vadd.f32 %v5958_v12, %v14556_v44  ;;  %v5960_v40 = vpop.f32.mrb[134].mxu0  ;;  %v6001_v39 = vpop.f32.mrb[130].mxu1  ;;  %v6000_v3 = vadd.f32 %v5999_v57, %v14557_v15 }
0x1634   :  { %v6004_v31 = vmul.f32 0.5, %v5957_v19  ;;  %v5961_v9 = vpop.f32.mrb[135].mxu0  ;;  %v6002_v8 = vpop.f32.mrb[131].mxu1  ;;  %v6006_v49 = vmul.f32 0.5, %v5998_v52 }
0x1635   :  { %v6005_v46 = vmul.f32 0.5, %v5959_v6 }
0x1636   :  { %7291 = vtanh.f32 %v6004_v31  ;;  %v22_v31 = vstv %s13342_s16 }
0x1637   :  { %7293 = vtanh.f32 %v6005_v46  ;;  %23 = vst [vmem:[#allocation2] sm:$0x1] %v22_v31 }
0x1638   :  { %7295 = vtanh.f32 %v6000_v3 }
0x1639   :  { %7297 = vtanh.f32 %v6006_v49 }
0x1640   :  { %v7292_v26 = vpop.eup %7291 }
0x1641   :  { %v6010_v28 = vmul.f32 0.5, %v7292_v26  ;;  %v7294_v50 = vpop.eup %7293 }
0x1642   :  { %v6011_v16 = vmul.f32 0.5, %v7294_v50  ;;  %v7296_v61 = vpop.eup %7295 }
0x1643   :  { %v6013_v21 = vadd.f32 0.5, %v6010_v28  ;;  %v7298_v34 = vpop.eup %7297 }
0x1644   :  { %v6014_v7 = vadd.f32 0.5, %v6011_v16  ;;  %v6012_v29 = vmul.f32 0.5, %v7298_v34 }
0x1645   :  { %v6018_v0 = vmul.f32 %v7296_v61, %v6013_v21 }
0x1646   :  { %v6017_v45 = vmul.f32 %v6014_v7, %v13040_v27  ;;  %v6015_v54 = vadd.f32 0.5, %v6012_v29 }
0x1648   :  { %v13304_v2 = vadd.f32 %v6018_v0, %v6017_v45 }
0x164a   :  { %7299 = vtanh.f32 %v13304_v2 }
0x1651   :  { %v6056_v32 = vpop.f32.mrb[136].mxu0  ;;  %v6097_v18 = vpop.f32.mrb[132].mxu1 }
0x1652   :  { %v6104_v33 = vadd.f32 %v6056_v32, %v14560_v43  ;;  %v6106_v36 = vadd.f32 %v6097_v18, %v14561_v48  ;;  %v6058_v42 = vpop.f32.mrb[137].mxu0  ;;  %v6099_v47 = vpop.f32.mrb[133].mxu1 }
0x1653   :  { %v6105_v10 = vadd.f32 %v6058_v42, %v14562_v11  ;;  %v6107_v22 = vadd.f32 %v6099_v47, %v14563_v13  ;;  %v6060_v20 = vpop.f32.mrb[138].mxu0  ;;  %v6101_v27 = vpop.f32.mrb[134].mxu1 }
0x1654   :  { %v6108_v56 = vmul.f32 0.5, %v6104_v33  ;;  %v6061_v37 = vpop.f32.mrb[139].mxu0  ;;  %v6102_v38 = vpop.f32.mrb[135].mxu1  ;;  %v6110_v4 = vmul.f32 0.5, %v6106_v36 }
0x1655   :  { %v7300_v1 = vpop.eup %7299  ;;  %v6109_v24 = vmul.f32 0.5, %v6105_v10 }
0x1656   :  { %7301 = vtanh.f32 %v6108_v56  ;;  %v6021_v23 = vmul.f32 %v7300_v1, %v6015_v54 }
0x1657   :  { %7303 = vtanh.f32 %v6109_v24 }
0x1658   :  { %v6130_v5 = vpack.c.bf16 %v6021_v23, %v6021_v23  ;;  %7305 = vtanh.f32 %v6107_v22  ;;  %v6446_v22 = vld [vmem:[#allocation2] ss:$0 sm:$0xff] }
0x1659   :  { %7307 = vtanh.f32 %v6110_v4 }
0x165a   :  { %6163 = vmatprep.mubr.bf16.mxu0 %v6130_v5  ;;  %6204 = vmatprep.mubr.bf16.mxu1 %v6130_v5 }
0x1660   :  { %v7302_v63 = vpop.eup %7301 }
0x1661   :  { %v6114_v35 = vmul.f32 0.5, %v7302_v63  ;;  %v7304_v25 = vpop.eup %7303 }
0x1662   :  { %v6115_v41 = vmul.f32 0.5, %v7304_v25  ;;  %v7306_v55 = vpop.eup %7305 }
0x1663   :  { %v6117_v14 = vadd.f32 0.5, %v6114_v35  ;;  %v7308_v19 = vpop.eup %7307 }
0x1664   :  { %v6118_v60 = vadd.f32 0.5, %v6115_v41  ;;  %v6116_v12 = vmul.f32 0.5, %v7308_v19 }
0x1665   :  { %v6125_v58 = vmul.f32 %v7306_v55, %v6117_v14 }
0x1666   :  { %v6124_v62 = vmul.f32 %v6122_v59, %v6118_v60  ;;  %v6119_v57 = vadd.f32 0.5, %v6116_v12 }
0x1668   :  { %v6126_v17 = vadd.f32 %v6125_v58, %v6124_v62 }
0x166a   :  { %7309 = vtanh.f32 %v6126_v17 }
0x1674   :  { %v7310_v6 = vpop.eup %7309 }
0x1675   :  { %v6128_v40 = vmul.f32 %v7310_v6, %v6119_v57 }
0x1677   :  { %v6129_v39 = vpack.c.bf16 %v6128_v40, %v6128_v40 }
0x1679   :  { %6164 = vmatmul.mubr.bf16.vlgmr.msra.gmra.mrb[140].mxu0 %v6129_v39  ;;  %6205 = vmatmul.mubr.bf16.vlgmr.msra.gmra.mrb[136].mxu1 %v6129_v39 }
0x174c   :  { %v6165_v9 = vpop.f32.mrb[140].mxu0  ;;  %v6206_v8 = vpop.f32.mrb[136].mxu1 }
0x174d   :  { %v6166_v53 = vadd.f32 %v6165_v9, %v14555_v30  ;;  %v6167_v46 = vpop.f32.mrb[141].mxu0  ;;  %v6208_v3 = vpop.f32.mrb[137].mxu1  ;;  %v6207_v7 = vadd.f32 %v6206_v8, %v14558_v51  ;;  %v6445_v51 = vld [vmem:[%s13343_s15] ss:$0 sm:$0xff] }
0x174e   :  { %v6168_v52 = vadd.f32 %v6167_v46, %v14556_v44  ;;  %v6169_v49 = vpop.f32.mrb[142].mxu0  ;;  %v6210_v26 = vpop.f32.mrb[138].mxu1  ;;  %v6209_v61 = vadd.f32 %v6208_v3, %v14557_v15 }
0x174f   :  { %v6213_v28 = vmul.f32 0.5, %v6166_v53  ;;  %v6170_v50 = vpop.f32.mrb[143].mxu0  ;;  %v6211_v21 = vpop.f32.mrb[139].mxu1  ;;  %v6215_v0 = vmul.f32 0.5, %v6207_v7 }
0x1750   :  { %v6214_v16 = vmul.f32 0.5, %v6168_v52 }
0x1751   :  { %7311 = vtanh.f32 %v6213_v28 }
0x1752   :  { %7313 = vtanh.f32 %v6214_v16 }
0x1753   :  { %7315 = vtanh.f32 %v6209_v61 }
0x1754   :  { %7317 = vtanh.f32 %v6215_v0 }
0x175b   :  { %v7312_v45 = vpop.eup %7311 }
0x175c   :  { %v6219_v30 = vmul.f32 0.5, %v7312_v45  ;;  %v7314_v34 = vpop.eup %7313 }
0x175d   :  { %v6220_v44 = vmul.f32 0.5, %v7314_v34  ;;  %v7316_v32 = vpop.eup %7315 }
0x175e   :  { %v6222_v29 = vadd.f32 0.5, %v6219_v30  ;;  %v7318_v36 = vpop.eup %7317 }
0x175f   :  { %v6223_v18 = vadd.f32 0.5, %v6220_v44  ;;  %v6221_v15 = vmul.f32 0.5, %v7318_v36 }
0x1760   :  { %v6227_v43 = vmul.f32 %v7316_v32, %v6222_v29 }
0x1761   :  { %v6226_v33 = vmul.f32 %v6223_v18, %v13304_v2  ;;  %v6224_v42 = vadd.f32 0.5, %v6221_v15 }
0x1763   :  { %v6228_v48 = vadd.f32 %v6227_v43, %v6226_v33 }
0x1765   :  { %7319 = vtanh.f32 %v6228_v48 }
0x176f   :  { %v7320_v47 = vpop.eup %7319 }
0x1770   :  { %v6230_v11 = vmul.f32 %v7320_v47, %v6224_v42 }
0x1772   :  { %v6238_v10 = vmul.f32 %v6445_v51, %v6230_v11 }
0x1774   :  { %v6239_v13 = vsel %vm2611_vm4, %v6238_v10, 0.0 }
0x1775   :  { %6240 = vadd.xlane.f32.xlu1 %v6239_v13 }
0x1802   :  { %v6241_v20 = vpop.xlane.xlu1 %6240 }
0x1803   :  { %v6249_v27 = vadd.f32 %v6446_v22, %v6241_v20 }
0x1805   :  { %6251 = vst.msk [vmem:[%s13344_s17] sm:$0x3] %vm6250_vm6, %v6249_v27 }

</bundles_post_ra>
